<compile_context>
chip_gen: v6e
topology: v6e:2x2x1
jax: 0.10.0
libtpu: 0.0.40
codegen_flags: <defaults>
</compile_context>

<pallas_src>
import jax
import jax.numpy as jnp
from jax import lax
from jax.experimental import pallas as pl
from jax.experimental.pallas import tpu as pltpu


# Exact f32 matmuls everywhere (MXU multi-pass in-kernel, f32 passes in XLA)
# so the kernel and the pure-JAX reference agree tightly.
_PREC = lax.Precision.HIGHEST


def _bcell_recurrence_kernel(u_ref, nrt_ref, nrtT_ref, h0_ref, Wh_ref, bh_ref,
                             out_ref, h_scr):
    """Serial BCell recurrence over one block of Tb timesteps."""
    g = pl.program_id(0)

    # Seed the recurrent carry on the first block; it lives in VMEM scratch
    # across all grid steps afterwards.
    @pl.when(g == 0)
    def _():
        h_scr[...] = h0_ref[...]

    Wh_t = Wh_ref[...]            # (h, h)  resident across the whole sequence
    b_h = bh_ref[...]             # (1, h)
    tb = out_ref.shape[0]

    def rec(h):
        # tanh(h @ W_h^T + b_h) with W_h pre-transposed in the wrapper.
        return jnp.tanh(
            jnp.dot(h, Wh_t, precision=_PREC,
                    preferred_element_type=jnp.float32) + b_h)

    def project_out(src, srcT_scaled, h):
        # h - src @ ((src^T @ h) / ||src||^2); the 1/||src||^2 factor was
        # folded into srcT_scaled in the wrapper, so this is two plain
        # matmuls: no transpose, no reduction, no divide on the serial chain.
        tth = jnp.dot(srcT_scaled, h, precision=_PREC,
                      preferred_element_type=jnp.float32)        # (i, h)
        return h - jnp.dot(src, tth, precision=_PREC,
                           preferred_element_type=jnp.float32)   # (B, h)

    def step(lt, h_prev):
        u_h = u_ref[lt, 0]        # tanh(n_h @ W_nh^T + b_nh), precomputed
        u_r = u_ref[lt, 1]
        u_t = u_ref[lt, 2]
        n_r = nrt_ref[lt, 0]      # (B, i)
        n_t = nrt_ref[lt, 1]
        n_r_T = nrtT_ref[lt, 0]   # (i, B), pre-scaled by 1/||n_r||_F^2
        n_t_T = nrtT_ref[lt, 1]

        h_i = u_h + rec(h_prev)
        h_i_p = project_out(n_r, n_r_T, h_i)
        h_i_1 = u_r + rec(h_i_p)
        h_i_p = project_out(n_t, n_t_T, h_i_1)
        h_next = u_t + rec(h_i_p)

        out_ref[lt] = h_next
        return h_next

    # Unrolled so the LLO scheduler sees across timesteps within the block.
    h_last = lax.fori_loop(0, tb, step, h_scr[...], unroll=True)
    h_scr[...] = h_last


def _pick_time_block(T, max_block):
    tb = min(T, max_block)
    while T % tb:
        tb -= 1
    return tb


def bcell_forward_seq(h0, n_h_seq, n_r_seq, n_t_seq, params, *, time_block=64):
    """Run BCell over a sequence.

    n_*_seq: (T, B, i_dim). Returns (h_seq, b_seq): (T,B,h_dim), (T,B,b_dim).
    """
    T, B, i_dim = n_h_seq.shape
    h_dim = params["W_h"].shape[0]
    b_dim = params["W_bt"].shape[0]
    f32 = jnp.float32

    # -------- hoisted, time-independent work (whole sequence at once) --------
    # Input projections: batched matmuls with M = T*B per stream.
    ns = jnp.stack([n_h_seq, n_r_seq, n_t_seq], axis=1).astype(f32)   # (T,3,B,i)
    Wn_t = jnp.stack(
        [params["W_nh"].T, params["W_nr"].T, params["W_nt"].T], 0)    # (3,i,h)
    bn = jnp.stack([params["b_nh"], params["b_nr"], params["b_nt"]], 0)  # (3,h)
    u = jnp.tanh(jnp.einsum("tsbi,sih->tsbh", ns, Wn_t, precision=_PREC)
                 + bn[None, :, None, :])                              # (T,3,B,h)

    # Projection operands: raw (B,i) copies plus transposed copies pre-scaled
    # by 1/||n||_F^2.  NOTE: like the PyTorch reference, an all-zero n_r/n_t
    # timestep divides by zero.
    nrt = jnp.stack([n_r_seq, n_t_seq], axis=1).astype(f32)           # (T,2,B,i)
    norm_sq = jnp.sum(nrt * nrt, axis=(2, 3), keepdims=True)          # (T,2,1,1)
    nrtT = jnp.swapaxes(nrt, 2, 3) / norm_sq                          # (T,2,i,B)

    Wh_t = params["W_h"].T.astype(f32)                                # (h,h)
    b_h = params["b_h"].reshape(1, h_dim).astype(f32)                 # (1,h)

    tb = _pick_time_block(T, time_block)
    grid = (T // tb,)
    seq_map = lambda g: (g, 0, 0, 0)
    const2 = lambda g: (0, 0)

    # TODO(synk): for production sizes, cast resident weights/activations to
    # bf16 (f32 accumulate), set an explicit vmem_limit_bytes sized for v7x's
    # 64 MiB VMEM, and add a leading "parallel" grid axis over independent
    # sequences (or a batch split) so v7x's second TensorCore is used; with
    # h_dim < 128 the (tb,B,h) output stores are lane-masked — moot once
    # h_dim >= 128.
    h_seq = pl.pallas_call(
        _bcell_recurrence_kernel,
        out_shape=jax.ShapeDtypeStruct((T, B, h_dim), f32),
        grid_spec=pltpu.PrefetchScalarGridSpec(
            num_scalar_prefetch=0,
            grid=grid,
            in_specs=[
                pl.BlockSpec((tb, 3, B, h_dim), seq_map),   # u_h/u_r/u_t
                pl.BlockSpec((tb, 2, B, i_dim), seq_map),   # n_r/n_t
                pl.BlockSpec((tb, 2, i_dim, B), seq_map),   # scaled transposes
                pl.BlockSpec((B, h_dim), const2),           # h0       (resident)
                pl.BlockSpec((h_dim, h_dim), const2),       # W_h^T    (resident)
                pl.BlockSpec((1, h_dim), const2),           # b_h      (resident)
            ],
            out_specs=pl.BlockSpec((tb, B, h_dim), lambda g: (g, 0, 0)),
            scratch_shapes=[pltpu.VMEM((B, h_dim), f32)],
        ),
        compiler_params=pltpu.CompilerParams(
            # Hidden state carries across time blocks -> sequential grid axis.
            dimension_semantics=("arbitrary",)),
    )(u, nrt, nrtT, h0.astype(f32), Wh_t, b_h)

    # Output head, hoisted: one (T*B, h) @ (h, b_dim) matmul + tanh.
    b_seq = jnp.tanh(
        jnp.einsum("tbh,hd->tbd", h_seq, params["W_bt"].T.astype(f32),
                   precision=_PREC) + params["b_bt"][None, None, :])
    return h_seq, b_seq


def bcell_forward(h_prev, n_h, n_r, n_t, params):
    """Single-step forward matching the PyTorch BCell.forward signature."""
    h_seq, b_seq = bcell_forward_seq(
        h_prev, n_h[None], n_r[None], n_t[None], params)
    return h_seq[0], b_seq[0]


# ----------------------------- pure-JAX reference -----------------------------

def _step_ref(h_prev, n_h, n_r, n_t, p):
    def lin(x, W, b):
        return jnp.dot(x, W.T, precision=_PREC) + b

    def proj(src, h):
        t = src / jnp.sqrt(jnp.sum(src * src))
        return h - jnp.dot(t, jnp.dot(t.T, h, precision=_PREC), precision=_PREC)

    h_i = jnp.tanh(lin(n_h, p["W_nh"], p["b_nh"])) + jnp.tanh(lin(h_prev, p["W_h"], p["b_h"]))
    h_i_p = proj(n_r, h_i)
    h_i_1 = jnp.tanh(lin(n_r, p["W_nr"], p["b_nr"])) + jnp.tanh(lin(h_i_p, p["W_h"], p["b_h"]))
    h_i_p = proj(n_t, h_i_1)
    h_next = jnp.tanh(lin(n_t, p["W_nt"], p["b_nt"])) + jnp.tanh(lin(h_i_p, p["W_h"], p["b_h"]))
    b = jnp.tanh(lin(h_next, p["W_bt"], p["b_bt"]))
    return h_next, b


def _seq_ref(h0, n_h_seq, n_r_seq, n_t_seq, p):
    def body(h, xs):
        n_h, n_r, n_t = xs
        h_next, b = _step_ref(h, n_h, n_r, n_t, p)
        return h_next, (h_next, b)

    _, (h_seq, b_seq) = lax.scan(body, h0, (n_h_seq, n_r_seq, n_t_seq))
    return h_seq, b_seq


def _xavier_uniform(key, shape):
    fan_out, fan_in = shape
    limit = jnp.sqrt(6.0 / (fan_in + fan_out))
    return jax.random.uniform(key, shape, jnp.float32, -limit, limit)


if __name__ == "__main__":
    T, B, i_dim, h_dim, b_dim = 8, 8, 32, 32, 16

    key = jax.random.PRNGKey(0)
    keys = jax.random.split(key, 16)

    params = {
        "W_nh": _xavier_uniform(keys[0], (h_dim, i_dim)),
        "b_nh": 0.1 * jax.random.normal(keys[1], (h_dim,), jnp.float32),
        "W_nr": _xavier_uniform(keys[2], (h_dim, i_dim)),
        "b_nr": 0.1 * jax.random.normal(keys[3], (h_dim,), jnp.float32),
        "W_nt": _xavier_uniform(keys[4], (h_dim, i_dim)),
        "b_nt": 0.1 * jax.random.normal(keys[5], (h_dim,), jnp.float32),
        "W_bt": _xavier_uniform(keys[6], (b_dim, h_dim)),
        "b_bt": 0.1 * jax.random.normal(keys[7], (b_dim,), jnp.float32),
        "W_h":  _xavier_uniform(keys[8], (h_dim, h_dim)),
        "b_h":  0.1 * jax.random.normal(keys[9], (h_dim,), jnp.float32),
    }

    h0 = jax.random.normal(keys[10], (B, h_dim), jnp.float32)
    n_h_seq = jax.random.normal(keys[11], (T, B, i_dim), jnp.float32)
    n_r_seq = jax.random.normal(keys[12], (T, B, i_dim), jnp.float32)
    n_t_seq = jax.random.normal(keys[13], (T, B, i_dim), jnp.float32)

    # Whole sequence: recurrence in a single pallas_call (grid=(1,) at T=8),
    # input projections / output head hoisted to XLA.
    h_seq, b_seq = bcell_forward_seq(h0, n_h_seq, n_r_seq, n_t_seq, params)
    jax.block_until_ready((h_seq, b_seq))

    h_seq_ref, b_seq_ref = _seq_ref(h0, n_h_seq, n_r_seq, n_t_seq, params)
    # Tolerance covers MXU-vs-XLA f32 accumulation-order differences; with
    # Precision.HIGHEST on both sides the observed gap is far smaller.
    assert jnp.allclose(h_seq, h_seq_ref, atol=1e-3, rtol=1e-3)
    assert jnp.allclose(b_seq, b_seq_ref, atol=1e-3, rtol=1e-3)

    # Single-step path matches the original module's forward.
    h1, b1 = bcell_forward(h0, n_h_seq[0], n_r_seq[0], n_t_seq[0], params)
    jax.block_until_ready((h1, b1))
    h1_ref, b1_ref = _step_ref(h0, n_h_seq[0], n_r_seq[0], n_t_seq[0], params)
    assert jnp.allclose(h1, h1_ref, atol=1e-3, rtol=1e-3)
    assert jnp.allclose(b1, b1_ref, atol=1e-3, rtol=1e-3)

    print("KERNEL_OK")
</pallas_src>

<mosaic_0001>
module attributes {stable_mosaic.version = 11 : i64} {
  func.func @_bcell_recurrence_kernel(%arg0: i32, %arg1: memref<8x3x8x32xf32, #tpu.memory_space<vmem>>, %arg2: memref<8x2x8x32xf32, #tpu.memory_space<vmem>>, %arg3: memref<8x2x32x8xf32, #tpu.memory_space<vmem>>, %arg4: memref<8x32xf32, #tpu.memory_space<vmem>>, %arg5: memref<32x32xf32, #tpu.memory_space<vmem>>, %arg6: memref<1x32xf32, #tpu.memory_space<vmem>>, %arg7: memref<8x8x32xf32, #tpu.memory_space<vmem>>, %arg8: memref<8x32xf32, #tpu.memory_space<vmem>>) attributes {dimension_semantics = [#tpu.dimension_semantics<arbitrary>], iteration_bounds = array<i64: 1>, scalar_prefetch = 0 : i64, scratch_operands = 1 : i64, tpu.core_type = #tpu.core_type<tc>, window_params = [{transform_indices = @transform_0, window_bounds = array<i64: 8, 3, 8, 32>}, {transform_indices = @transform_1, window_bounds = array<i64: 8, 2, 8, 32>}, {transform_indices = @transform_2, window_bounds = array<i64: 8, 2, 32, 8>}, {pipeline_mode = #tpu.pipeline_mode<synchronous>, transform_indices = @transform_3, window_bounds = array<i64: 8, 32>}, {pipeline_mode = #tpu.pipeline_mode<synchronous>, transform_indices = @transform_4, window_bounds = array<i64: 32, 32>}, {pipeline_mode = #tpu.pipeline_mode<synchronous>, transform_indices = @transform_5, window_bounds = array<i64: 1, 32>}, {transform_indices = @transform_6, window_bounds = array<i64: 8, 8, 32>}]} {
    %c0_i32 = arith.constant 0 : i32
    %0 = arith.cmpi eq, %arg0, %c0_i32 : i32
    %1 = arith.extui %0 : i1 to i32
    %c0_i32_0 = arith.constant 0 : i32
    %2 = arith.cmpi ne, %1, %c0_i32_0 : i32
    scf.if %2 {
      %c0_246 = arith.constant 0 : index
      %c0_247 = arith.constant 0 : index
      %375 = vector.load %arg4[%c0_246, %c0_247] : memref<8x32xf32, #tpu.memory_space<vmem>>, vector<8x32xf32>
      %c0_248 = arith.constant 0 : index
      %c0_249 = arith.constant 0 : index
      %376 = vector.load %arg8[%c0_248, %c0_249] : memref<8x32xf32, #tpu.memory_space<vmem>>, vector<8x32xf32>
      tpu.vector_store %arg8[%c0_248, %c0_249], %375 {strides = array<i32>} : memref<8x32xf32, #tpu.memory_space<vmem>>, vector<8x32xf32>,
    } else {
    }
    %c0 = arith.constant 0 : index
    %c0_1 = arith.constant 0 : index
    %3 = vector.load %arg5[%c0, %c0_1] : memref<32x32xf32, #tpu.memory_space<vmem>>, vector<32x32xf32>
    %c0_2 = arith.constant 0 : index
    %c0_3 = arith.constant 0 : index
    %4 = vector.load %arg6[%c0_2, %c0_3] : memref<1x32xf32, #tpu.memory_space<vmem>>, vector<1x32xf32>
    %c0_4 = arith.constant 0 : index
    %c0_5 = arith.constant 0 : index
    %5 = vector.load %arg8[%c0_4, %c0_5] : memref<8x32xf32, #tpu.memory_space<vmem>>, vector<8x32xf32>
    %c0_i32_6 = arith.constant 0 : i32
    %6 = arith.index_cast %c0_i32_6 : i32 to index
    %c0_7 = arith.constant 0 : index
    %c0_8 = arith.constant 0 : index
    %c0_9 = arith.constant 0 : index
    %7 = vector.load %arg1[%6, %c0_7, %c0_8, %c0_9] : memref<8x3x8x32xf32, #tpu.memory_space<vmem>>, vector<1x1x8x32xf32>
    %8 = vector.shape_cast %7 : vector<1x1x8x32xf32> to vector<8x32xf32>
    %9 = arith.index_cast %c0_i32_6 : i32 to index
    %c1 = arith.constant 1 : index
    %c0_10 = arith.constant 0 : index
    %c0_11 = arith.constant 0 : index
    %10 = vector.load %arg1[%9, %c1, %c0_10, %c0_11] : memref<8x3x8x32xf32, #tpu.memory_space<vmem>>, vector<1x1x8x32xf32>
    %11 = vector.shape_cast %10 : vector<1x1x8x32xf32> to vector<8x32xf32>
    %12 = arith.index_cast %c0_i32_6 : i32 to index
    %c2 = arith.constant 2 : index
    %c0_12 = arith.constant 0 : index
    %c0_13 = arith.constant 0 : index
    %13 = vector.load %arg1[%12, %c2, %c0_12, %c0_13] : memref<8x3x8x32xf32, #tpu.memory_space<vmem>>, vector<1x1x8x32xf32>
    %14 = vector.shape_cast %13 : vector<1x1x8x32xf32> to vector<8x32xf32>
    %15 = arith.index_cast %c0_i32_6 : i32 to index
    %c0_14 = arith.constant 0 : index
    %c0_15 = arith.constant 0 : index
    %c0_16 = arith.constant 0 : index
    %16 = vector.load %arg2[%15, %c0_14, %c0_15, %c0_16] : memref<8x2x8x32xf32, #tpu.memory_space<vmem>>, vector<1x1x8x32xf32>
    %17 = vector.shape_cast %16 : vector<1x1x8x32xf32> to vector<8x32xf32>
    %18 = arith.index_cast %c0_i32_6 : i32 to index
    %c1_17 = arith.constant 1 : index
    %c0_18 = arith.constant 0 : index
    %c0_19 = arith.constant 0 : index
    %19 = vector.load %arg2[%18, %c1_17, %c0_18, %c0_19] : memref<8x2x8x32xf32, #tpu.memory_space<vmem>>, vector<1x1x8x32xf32>
    %20 = vector.shape_cast %19 : vector<1x1x8x32xf32> to vector<8x32xf32>
    %21 = arith.index_cast %c0_i32_6 : i32 to index
    %c0_20 = arith.constant 0 : index
    %c0_21 = arith.constant 0 : index
    %c0_22 = arith.constant 0 : index
    %22 = vector.load %arg3[%21, %c0_20, %c0_21, %c0_22] : memref<8x2x32x8xf32, #tpu.memory_space<vmem>>, vector<1x1x32x8xf32>
    %23 = vector.shape_cast %22 : vector<1x1x32x8xf32> to vector<32x8xf32>
    %24 = arith.index_cast %c0_i32_6 : i32 to index
    %c1_23 = arith.constant 1 : index
    %c0_24 = arith.constant 0 : index
    %c0_25 = arith.constant 0 : index
    %25 = vector.load %arg3[%24, %c1_23, %c0_24, %c0_25] : memref<8x2x32x8xf32, #tpu.memory_space<vmem>>, vector<1x1x32x8xf32>
    %26 = vector.shape_cast %25 : vector<1x1x32x8xf32> to vector<32x8xf32>
    %cst = arith.constant dense<0.000000e+00> : vector<8x32xf32>
    %27 = tpu.matmul %5, %3, %cst {dimension_numbers = #tpu.dot_dimension_numbers<[1], [0], [0], [1], [0, 0, 1, 1], [], []>, precision = #tpu.contract_precision<fp32>} : vector<8x32xf32>, vector<32x32xf32>, vector<8x32xf32> -> vector<8x32xf32>
    %28 = vector.broadcast %4 : vector<1x32xf32> to vector<8x32xf32>
    %29 = arith.addf %27, %28 : vector<8x32xf32>
    %30 = math.tanh %29 : vector<8x32xf32>
    %31 = arith.addf %8, %30 : vector<8x32xf32>
    %cst_26 = arith.constant dense<0.000000e+00> : vector<32x32xf32>
    %32 = tpu.matmul %23, %31, %cst_26 {dimension_numbers = #tpu.dot_dimension_numbers<[1], [0], [0], [1], [0, 0, 1, 1], [], []>, precision = #tpu.contract_precision<fp32>} : vector<32x8xf32>, vector<8x32xf32>, vector<32x32xf32> -> vector<32x32xf32>
    %cst_27 = arith.constant dense<0.000000e+00> : vector<8x32xf32>
    %33 = tpu.matmul %17, %32, %cst_27 {dimension_numbers = #tpu.dot_dimension_numbers<[1], [0], [0], [1], [0, 0, 1, 1], [], []>, precision = #tpu.contract_precision<fp32>} : vector<8x32xf32>, vector<32x32xf32>, vector<8x32xf32> -> vector<8x32xf32>
    %34 = arith.subf %31, %33 : vector<8x32xf32>
    %cst_28 = arith.constant dense<0.000000e+00> : vector<8x32xf32>
    %35 = tpu.matmul %34, %3, %cst_28 {dimension_numbers = #tpu.dot_dimension_numbers<[1], [0], [0], [1], [0, 0, 1, 1], [], []>, precision = #tpu.contract_precision<fp32>} : vector<8x32xf32>, vector<32x32xf32>, vector<8x32xf32> -> vector<8x32xf32>
    %36 = vector.broadcast %4 : vector<1x32xf32> to vector<8x32xf32>
    %37 = arith.addf %35, %36 : vector<8x32xf32>
    %38 = math.tanh %37 : vector<8x32xf32>
    %39 = arith.addf %11, %38 : vector<8x32xf32>
    %cst_29 = arith.constant dense<0.000000e+00> : vector<32x32xf32>
    %40 = tpu.matmul %26, %39, %cst_29 {dimension_numbers = #tpu.dot_dimension_numbers<[1], [0], [0], [1], [0, 0, 1, 1], [], []>, precision = #tpu.contract_precision<fp32>} : vector<32x8xf32>, vector<8x32xf32>, vector<32x32xf32> -> vector<32x32xf32>
    %cst_30 = arith.constant dense<0.000000e+00> : vector<8x32xf32>
    %41 = tpu.matmul %20, %40, %cst_30 {dimension_numbers = #tpu.dot_dimension_numbers<[1], [0], [0], [1], [0, 0, 1, 1], [], []>, precision = #tpu.contract_precision<fp32>} : vector<8x32xf32>, vector<32x32xf32>, vector<8x32xf32> -> vector<8x32xf32>
    %42 = arith.subf %39, %41 : vector<8x32xf32>
    %cst_31 = arith.constant dense<0.000000e+00> : vector<8x32xf32>
    %43 = tpu.matmul %42, %3, %cst_31 {dimension_numbers = #tpu.dot_dimension_numbers<[1], [0], [0], [1], [0, 0, 1, 1], [], []>, precision = #tpu.contract_precision<fp32>} : vector<8x32xf32>, vector<32x32xf32>, vector<8x32xf32> -> vector<8x32xf32>
    %44 = vector.broadcast %4 : vector<1x32xf32> to vector<8x32xf32>
    %45 = arith.addf %43, %44 : vector<8x32xf32>
    %46 = math.tanh %45 : vector<8x32xf32>
    %47 = arith.addf %14, %46 : vector<8x32xf32>
    %48 = arith.index_cast %c0_i32_6 : i32 to index
    %c0_32 = arith.constant 0 : index
    %c0_33 = arith.constant 0 : index
    %49 = vector.load %arg7[%48, %c0_32, %c0_33] : memref<8x8x32xf32, #tpu.memory_space<vmem>>, vector<1x8x32xf32>
    %50 = vector.shape_cast %49 : vector<1x8x32xf32> to vector<8x32xf32>
    %51 = vector.shape_cast %47 : vector<8x32xf32> to vector<1x8x32xf32>
    tpu.vector_store %arg7[%48, %c0_32, %c0_33], %51 {strides = array<i32>} : memref<8x8x32xf32, #tpu.memory_space<vmem>>, vector<1x8x32xf32>,
    %c1_i32 = arith.constant 1 : i32
    %52 = arith.index_cast %c1_i32 : i32 to index
    %c0_34 = arith.constant 0 : index
    %c0_35 = arith.constant 0 : index
    %c0_36 = arith.constant 0 : index
    %53 = vector.load %arg1[%52, %c0_34, %c0_35, %c0_36] : memref<8x3x8x32xf32, #tpu.memory_space<vmem>>, vector<1x1x8x32xf32>
    %54 = vector.shape_cast %53 : vector<1x1x8x32xf32> to vector<8x32xf32>
    %55 = arith.index_cast %c1_i32 : i32 to index
    %c1_37 = arith.constant 1 : index
    %c0_38 = arith.constant 0 : index
    %c0_39 = arith.constant 0 : index
    %56 = vector.load %arg1[%55, %c1_37, %c0_38, %c0_39] : memref<8x3x8x32xf32, #tpu.memory_space<vmem>>, vector<1x1x8x32xf32>
    %57 = vector.shape_cast %56 : vector<1x1x8x32xf32> to vector<8x32xf32>
    %58 = arith.index_cast %c1_i32 : i32 to index
    %c2_40 = arith.constant 2 : index
    %c0_41 = arith.constant 0 : index
    %c0_42 = arith.constant 0 : index
    %59 = vector.load %arg1[%58, %c2_40, %c0_41, %c0_42] : memref<8x3x8x32xf32, #tpu.memory_space<vmem>>, vector<1x1x8x32xf32>
    %60 = vector.shape_cast %59 : vector<1x1x8x32xf32> to vector<8x32xf32>
    %61 = arith.index_cast %c1_i32 : i32 to index
    %c0_43 = arith.constant 0 : index
    %c0_44 = arith.constant 0 : index
    %c0_45 = arith.constant 0 : index
    %62 = vector.load %arg2[%61, %c0_43, %c0_44, %c0_45] : memref<8x2x8x32xf32, #tpu.memory_space<vmem>>, vector<1x1x8x32xf32>
    %63 = vector.shape_cast %62 : vector<1x1x8x32xf32> to vector<8x32xf32>
    %64 = arith.index_cast %c1_i32 : i32 to index
    %c1_46 = arith.constant 1 : index
    %c0_47 = arith.constant 0 : index
    %c0_48 = arith.constant 0 : index
    %65 = vector.load %arg2[%64, %c1_46, %c0_47, %c0_48] : memref<8x2x8x32xf32, #tpu.memory_space<vmem>>, vector<1x1x8x32xf32>
    %66 = vector.shape_cast %65 : vector<1x1x8x32xf32> to vector<8x32xf32>
    %67 = arith.index_cast %c1_i32 : i32 to index
    %c0_49 = arith.constant 0 : index
    %c0_50 = arith.constant 0 : index
    %c0_51 = arith.constant 0 : index
    %68 = vector.load %arg3[%67, %c0_49, %c0_50, %c0_51] : memref<8x2x32x8xf32, #tpu.memory_space<vmem>>, vector<1x1x32x8xf32>
    %69 = vector.shape_cast %68 : vector<1x1x32x8xf32> to vector<32x8xf32>
    %70 = arith.index_cast %c1_i32 : i32 to index
    %c1_52 = arith.constant 1 : index
    %c0_53 = arith.constant 0 : index
    %c0_54 = arith.constant 0 : index
    %71 = vector.load %arg3[%70, %c1_52, %c0_53, %c0_54] : memref<8x2x32x8xf32, #tpu.memory_space<vmem>>, vector<1x1x32x8xf32>
    %72 = vector.shape_cast %71 : vector<1x1x32x8xf32> to vector<32x8xf32>
    %cst_55 = arith.constant dense<0.000000e+00> : vector<8x32xf32>
    %73 = tpu.matmul %47, %3, %cst_55 {dimension_numbers = #tpu.dot_dimension_numbers<[1], [0], [0], [1], [0, 0, 1, 1], [], []>, precision = #tpu.contract_precision<fp32>} : vector<8x32xf32>, vector<32x32xf32>, vector<8x32xf32> -> vector<8x32xf32>
    %74 = vector.broadcast %4 : vector<1x32xf32> to vector<8x32xf32>
    %75 = arith.addf %73, %74 : vector<8x32xf32>
    %76 = math.tanh %75 : vector<8x32xf32>
    %77 = arith.addf %54, %76 : vector<8x32xf32>
    %cst_56 = arith.constant dense<0.000000e+00> : vector<32x32xf32>
    %78 = tpu.matmul %69, %77, %cst_56 {dimension_numbers = #tpu.dot_dimension_numbers<[1], [0], [0], [1], [0, 0, 1, 1], [], []>, precision = #tpu.contract_precision<fp32>} : vector<32x8xf32>, vector<8x32xf32>, vector<32x32xf32> -> vector<32x32xf32>
    %cst_57 = arith.constant dense<0.000000e+00> : vector<8x32xf32>
    %79 = tpu.matmul %63, %78, %cst_57 {dimension_numbers = #tpu.dot_dimension_numbers<[1], [0], [0], [1], [0, 0, 1, 1], [], []>, precision = #tpu.contract_precision<fp32>} : vector<8x32xf32>, vector<32x32xf32>, vector<8x32xf32> -> vector<8x32xf32>
    %80 = arith.subf %77, %79 : vector<8x32xf32>
    %cst_58 = arith.constant dense<0.000000e+00> : vector<8x32xf32>
    %81 = tpu.matmul %80, %3, %cst_58 {dimension_numbers = #tpu.dot_dimension_numbers<[1], [0], [0], [1], [0, 0, 1, 1], [], []>, precision = #tpu.contract_precision<fp32>} : vector<8x32xf32>, vector<32x32xf32>, vector<8x32xf32> -> vector<8x32xf32>
    %82 = vector.broadcast %4 : vector<1x32xf32> to vector<8x32xf32>
    %83 = arith.addf %81, %82 : vector<8x32xf32>
    %84 = math.tanh %83 : vector<8x32xf32>
    %85 = arith.addf %57, %84 : vector<8x32xf32>
    %cst_59 = arith.constant dense<0.000000e+00> : vector<32x32xf32>
    %86 = tpu.matmul %72, %85, %cst_59 {dimension_numbers = #tpu.dot_dimension_numbers<[1], [0], [0], [1], [0, 0, 1, 1], [], []>, precision = #tpu.contract_precision<fp32>} : vector<32x8xf32>, vector<8x32xf32>, vector<32x32xf32> -> vector<32x32xf32>
    %cst_60 = arith.constant dense<0.000000e+00> : vector<8x32xf32>
    %87 = tpu.matmul %66, %86, %cst_60 {dimension_numbers = #tpu.dot_dimension_numbers<[1], [0], [0], [1], [0, 0, 1, 1], [], []>, precision = #tpu.contract_precision<fp32>} : vector<8x32xf32>, vector<32x32xf32>, vector<8x32xf32> -> vector<8x32xf32>
    %88 = arith.subf %85, %87 : vector<8x32xf32>
    %cst_61 = arith.constant dense<0.000000e+00> : vector<8x32xf32>
    %89 = tpu.matmul %88, %3, %cst_61 {dimension_numbers = #tpu.dot_dimension_numbers<[1], [0], [0], [1], [0, 0, 1, 1], [], []>, precision = #tpu.contract_precision<fp32>} : vector<8x32xf32>, vector<32x32xf32>, vector<8x32xf32> -> vector<8x32xf32>
    %90 = vector.broadcast %4 : vector<1x32xf32> to vector<8x32xf32>
    %91 = arith.addf %89, %90 : vector<8x32xf32>
    %92 = math.tanh %91 : vector<8x32xf32>
    %93 = arith.addf %60, %92 : vector<8x32xf32>
    %94 = arith.index_cast %c1_i32 : i32 to index
    %c0_62 = arith.constant 0 : index
    %c0_63 = arith.constant 0 : index
    %95 = vector.load %arg7[%94, %c0_62, %c0_63] : memref<8x8x32xf32, #tpu.memory_space<vmem>>, vector<1x8x32xf32>
    %96 = vector.shape_cast %95 : vector<1x8x32xf32> to vector<8x32xf32>
    %97 = vector.shape_cast %93 : vector<8x32xf32> to vector<1x8x32xf32>
    tpu.vector_store %arg7[%94, %c0_62, %c0_63], %97 {strides = array<i32>} : memref<8x8x32xf32, #tpu.memory_space<vmem>>, vector<1x8x32xf32>,
    %c2_i32 = arith.constant 2 : i32
    %98 = arith.index_cast %c2_i32 : i32 to index
    %c0_64 = arith.constant 0 : index
    %c0_65 = arith.constant 0 : index
    %c0_66 = arith.constant 0 : index
    %99 = vector.load %arg1[%98, %c0_64, %c0_65, %c0_66] : memref<8x3x8x32xf32, #tpu.memory_space<vmem>>, vector<1x1x8x32xf32>
    %100 = vector.shape_cast %99 : vector<1x1x8x32xf32> to vector<8x32xf32>
    %101 = arith.index_cast %c2_i32 : i32 to index
    %c1_67 = arith.constant 1 : index
    %c0_68 = arith.constant 0 : index
    %c0_69 = arith.constant 0 : index
    %102 = vector.load %arg1[%101, %c1_67, %c0_68, %c0_69] : memref<8x3x8x32xf32, #tpu.memory_space<vmem>>, vector<1x1x8x32xf32>
    %103 = vector.shape_cast %102 : vector<1x1x8x32xf32> to vector<8x32xf32>
    %104 = arith.index_cast %c2_i32 : i32 to index
    %c2_70 = arith.constant 2 : index
    %c0_71 = arith.constant 0 : index
    %c0_72 = arith.constant 0 : index
    %105 = vector.load %arg1[%104, %c2_70, %c0_71, %c0_72] : memref<8x3x8x32xf32, #tpu.memory_space<vmem>>, vector<1x1x8x32xf32>
    %106 = vector.shape_cast %105 : vector<1x1x8x32xf32> to vector<8x32xf32>
    %107 = arith.index_cast %c2_i32 : i32 to index
    %c0_73 = arith.constant 0 : index
    %c0_74 = arith.constant 0 : index
    %c0_75 = arith.constant 0 : index
    %108 = vector.load %arg2[%107, %c0_73, %c0_74, %c0_75] : memref<8x2x8x32xf32, #tpu.memory_space<vmem>>, vector<1x1x8x32xf32>
    %109 = vector.shape_cast %108 : vector<1x1x8x32xf32> to vector<8x32xf32>
    %110 = arith.index_cast %c2_i32 : i32 to index
    %c1_76 = arith.constant 1 : index
    %c0_77 = arith.constant 0 : index
    %c0_78 = arith.constant 0 : index
    %111 = vector.load %arg2[%110, %c1_76, %c0_77, %c0_78] : memref<8x2x8x32xf32, #tpu.memory_space<vmem>>, vector<1x1x8x32xf32>
    %112 = vector.shape_cast %111 : vector<1x1x8x32xf32> to vector<8x32xf32>
    %113 = arith.index_cast %c2_i32 : i32 to index
    %c0_79 = arith.constant 0 : index
    %c0_80 = arith.constant 0 : index
    %c0_81 = arith.constant 0 : index
    %114 = vector.load %arg3[%113, %c0_79, %c0_80, %c0_81] : memref<8x2x32x8xf32, #tpu.memory_space<vmem>>, vector<1x1x32x8xf32>
    %115 = vector.shape_cast %114 : vector<1x1x32x8xf32> to vector<32x8xf32>
    %116 = arith.index_cast %c2_i32 : i32 to index
    %c1_82 = arith.constant 1 : index
    %c0_83 = arith.constant 0 : index
    %c0_84 = arith.constant 0 : index
    %117 = vector.load %arg3[%116, %c1_82, %c0_83, %c0_84] : memref<8x2x32x8xf32, #tpu.memory_space<vmem>>, vector<1x1x32x8xf32>
    %118 = vector.shape_cast %117 : vector<1x1x32x8xf32> to vector<32x8xf32>
    %cst_85 = arith.constant dense<0.000000e+00> : vector<8x32xf32>
    %119 = tpu.matmul %93, %3, %cst_85 {dimension_numbers = #tpu.dot_dimension_numbers<[1], [0], [0], [1], [0, 0, 1, 1], [], []>, precision = #tpu.contract_precision<fp32>} : vector<8x32xf32>, vector<32x32xf32>, vector<8x32xf32> -> vector<8x32xf32>
    %120 = vector.broadcast %4 : vector<1x32xf32> to vector<8x32xf32>
    %121 = arith.addf %119, %120 : vector<8x32xf32>
    %122 = math.tanh %121 : vector<8x32xf32>
    %123 = arith.addf %100, %122 : vector<8x32xf32>
    %cst_86 = arith.constant dense<0.000000e+00> : vector<32x32xf32>
    %124 = tpu.matmul %115, %123, %cst_86 {dimension_numbers = #tpu.dot_dimension_numbers<[1], [0], [0], [1], [0, 0, 1, 1], [], []>, precision = #tpu.contract_precision<fp32>} : vector<32x8xf32>, vector<8x32xf32>, vector<32x32xf32> -> vector<32x32xf32>
    %cst_87 = arith.constant dense<0.000000e+00> : vector<8x32xf32>
    %125 = tpu.matmul %109, %124, %cst_87 {dimension_numbers = #tpu.dot_dimension_numbers<[1], [0], [0], [1], [0, 0, 1, 1], [], []>, precision = #tpu.contract_precision<fp32>} : vector<8x32xf32>, vector<32x32xf32>, vector<8x32xf32> -> vector<8x32xf32>
    %126 = arith.subf %123, %125 : vector<8x32xf32>
    %cst_88 = arith.constant dense<0.000000e+00> : vector<8x32xf32>
    %127 = tpu.matmul %126, %3, %cst_88 {dimension_numbers = #tpu.dot_dimension_numbers<[1], [0], [0], [1], [0, 0, 1, 1], [], []>, precision = #tpu.contract_precision<fp32>} : vector<8x32xf32>, vector<32x32xf32>, vector<8x32xf32> -> vector<8x32xf32>
    %128 = vector.broadcast %4 : vector<1x32xf32> to vector<8x32xf32>
    %129 = arith.addf %127, %128 : vector<8x32xf32>
    %130 = math.tanh %129 : vector<8x32xf32>
    %131 = arith.addf %103, %130 : vector<8x32xf32>
    %cst_89 = arith.constant dense<0.000000e+00> : vector<32x32xf32>
    %132 = tpu.matmul %118, %131, %cst_89 {dimension_numbers = #tpu.dot_dimension_numbers<[1], [0], [0], [1], [0, 0, 1, 1], [], []>, precision = #tpu.contract_precision<fp32>} : vector<32x8xf32>, vector<8x32xf32>, vector<32x32xf32> -> vector<32x32xf32>
    %cst_90 = arith.constant dense<0.000000e+00> : vector<8x32xf32>
    %133 = tpu.matmul %112, %132, %cst_90 {dimension_numbers = #tpu.dot_dimension_numbers<[1], [0], [0], [1], [0, 0, 1, 1], [], []>, precision = #tpu.contract_precision<fp32>} : vector<8x32xf32>, vector<32x32xf32>, vector<8x32xf32> -> vector<8x32xf32>
    %134 = arith.subf %131, %133 : vector<8x32xf32>
    %cst_91 = arith.constant dense<0.000000e+00> : vector<8x32xf32>
    %135 = tpu.matmul %134, %3, %cst_91 {dimension_numbers = #tpu.dot_dimension_numbers<[1], [0], [0], [1], [0, 0, 1, 1], [], []>, precision = #tpu.contract_precision<fp32>} : vector<8x32xf32>, vector<32x32xf32>, vector<8x32xf32> -> vector<8x32xf32>
    %136 = vector.broadcast %4 : vector<1x32xf32> to vector<8x32xf32>
    %137 = arith.addf %135, %136 : vector<8x32xf32>
    %138 = math.tanh %137 : vector<8x32xf32>
    %139 = arith.addf %106, %138 : vector<8x32xf32>
    %140 = arith.index_cast %c2_i32 : i32 to index
    %c0_92 = arith.constant 0 : index
    %c0_93 = arith.constant 0 : index
    %141 = vector.load %arg7[%140, %c0_92, %c0_93] : memref<8x8x32xf32, #tpu.memory_space<vmem>>, vector<1x8x32xf32>
    %142 = vector.shape_cast %141 : vector<1x8x32xf32> to vector<8x32xf32>
    %143 = vector.shape_cast %139 : vector<8x32xf32> to vector<1x8x32xf32>
    tpu.vector_store %arg7[%140, %c0_92, %c0_93], %143 {strides = array<i32>} : memref<8x8x32xf32, #tpu.memory_space<vmem>>, vector<1x8x32xf32>,
    %c3_i32 = arith.constant 3 : i32
    %144 = arith.index_cast %c3_i32 : i32 to index
    %c0_94 = arith.constant 0 : index
    %c0_95 = arith.constant 0 : index
    %c0_96 = arith.constant 0 : index
    %145 = vector.load %arg1[%144, %c0_94, %c0_95, %c0_96] : memref<8x3x8x32xf32, #tpu.memory_space<vmem>>, vector<1x1x8x32xf32>
    %146 = vector.shape_cast %145 : vector<1x1x8x32xf32> to vector<8x32xf32>
    %147 = arith.index_cast %c3_i32 : i32 to index
    %c1_97 = arith.constant 1 : index
    %c0_98 = arith.constant 0 : index
    %c0_99 = arith.constant 0 : index
    %148 = vector.load %arg1[%147, %c1_97, %c0_98, %c0_99] : memref<8x3x8x32xf32, #tpu.memory_space<vmem>>, vector<1x1x8x32xf32>
    %149 = vector.shape_cast %148 : vector<1x1x8x32xf32> to vector<8x32xf32>
    %150 = arith.index_cast %c3_i32 : i32 to index
    %c2_100 = arith.constant 2 : index
    %c0_101 = arith.constant 0 : index
    %c0_102 = arith.constant 0 : index
    %151 = vector.load %arg1[%150, %c2_100, %c0_101, %c0_102] : memref<8x3x8x32xf32, #tpu.memory_space<vmem>>, vector<1x1x8x32xf32>
    %152 = vector.shape_cast %151 : vector<1x1x8x32xf32> to vector<8x32xf32>
    %153 = arith.index_cast %c3_i32 : i32 to index
    %c0_103 = arith.constant 0 : index
    %c0_104 = arith.constant 0 : index
    %c0_105 = arith.constant 0 : index
    %154 = vector.load %arg2[%153, %c0_103, %c0_104, %c0_105] : memref<8x2x8x32xf32, #tpu.memory_space<vmem>>, vector<1x1x8x32xf32>
    %155 = vector.shape_cast %154 : vector<1x1x8x32xf32> to vector<8x32xf32>
    %156 = arith.index_cast %c3_i32 : i32 to index
    %c1_106 = arith.constant 1 : index
    %c0_107 = arith.constant 0 : index
    %c0_108 = arith.constant 0 : index
    %157 = vector.load %arg2[%156, %c1_106, %c0_107, %c0_108] : memref<8x2x8x32xf32, #tpu.memory_space<vmem>>, vector<1x1x8x32xf32>
    %158 = vector.shape_cast %157 : vector<1x1x8x32xf32> to vector<8x32xf32>
    %159 = arith.index_cast %c3_i32 : i32 to index
    %c0_109 = arith.constant 0 : index
    %c0_110 = arith.constant 0 : index
    %c0_111 = arith.constant 0 : index
    %160 = vector.load %arg3[%159, %c0_109, %c0_110, %c0_111] : memref<8x2x32x8xf32, #tpu.memory_space<vmem>>, vector<1x1x32x8xf32>
    %161 = vector.shape_cast %160 : vector<1x1x32x8xf32> to vector<32x8xf32>
    %162 = arith.index_cast %c3_i32 : i32 to index
    %c1_112 = arith.constant 1 : index
    %c0_113 = arith.constant 0 : index
    %c0_114 = arith.constant 0 : index
    %163 = vector.load %arg3[%162, %c1_112, %c0_113, %c0_114] : memref<8x2x32x8xf32, #tpu.memory_space<vmem>>, vector<1x1x32x8xf32>
    %164 = vector.shape_cast %163 : vector<1x1x32x8xf32> to vector<32x8xf32>
    %cst_115 = arith.constant dense<0.000000e+00> : vector<8x32xf32>
    %165 = tpu.matmul %139, %3, %cst_115 {dimension_numbers = #tpu.dot_dimension_numbers<[1], [0], [0], [1], [0, 0, 1, 1], [], []>, precision = #tpu.contract_precision<fp32>} : vector<8x32xf32>, vector<32x32xf32>, vector<8x32xf32> -> vector<8x32xf32>
    %166 = vector.broadcast %4 : vector<1x32xf32> to vector<8x32xf32>
    %167 = arith.addf %165, %166 : vector<8x32xf32>
    %168 = math.tanh %167 : vector<8x32xf32>
    %169 = arith.addf %146, %168 : vector<8x32xf32>
    %cst_116 = arith.constant dense<0.000000e+00> : vector<32x32xf32>
    %170 = tpu.matmul %161, %169, %cst_116 {dimension_numbers = #tpu.dot_dimension_numbers<[1], [0], [0], [1], [0, 0, 1, 1], [], []>, precision = #tpu.contract_precision<fp32>} : vector<32x8xf32>, vector<8x32xf32>, vector<32x32xf32> -> vector<32x32xf32>
    %cst_117 = arith.constant dense<0.000000e+00> : vector<8x32xf32>
    %171 = tpu.matmul %155, %170, %cst_117 {dimension_numbers = #tpu.dot_dimension_numbers<[1], [0], [0], [1], [0, 0, 1, 1], [], []>, precision = #tpu.contract_precision<fp32>} : vector<8x32xf32>, vector<32x32xf32>, vector<8x32xf32> -> vector<8x32xf32>
    %172 = arith.subf %169, %171 : vector<8x32xf32>
    %cst_118 = arith.constant dense<0.000000e+00> : vector<8x32xf32>
    %173 = tpu.matmul %172, %3, %cst_118 {dimension_numbers = #tpu.dot_dimension_numbers<[1], [0], [0], [1], [0, 0, 1, 1], [], []>, precision = #tpu.contract_precision<fp32>} : vector<8x32xf32>, vector<32x32xf32>, vector<8x32xf32> -> vector<8x32xf32>
    %174 = vector.broadcast %4 : vector<1x32xf32> to vector<8x32xf32>
    %175 = arith.addf %173, %174 : vector<8x32xf32>
    %176 = math.tanh %175 : vector<8x32xf32>
    %177 = arith.addf %149, %176 : vector<8x32xf32>
    %cst_119 = arith.constant dense<0.000000e+00> : vector<32x32xf32>
    %178 = tpu.matmul %164, %177, %cst_119 {dimension_numbers = #tpu.dot_dimension_numbers<[1], [0], [0], [1], [0, 0, 1, 1], [], []>, precision = #tpu.contract_precision<fp32>} : vector<32x8xf32>, vector<8x32xf32>, vector<32x32xf32> -> vector<32x32xf32>
    %cst_120 = arith.constant dense<0.000000e+00> : vector<8x32xf32>
    %179 = tpu.matmul %158, %178, %cst_120 {dimension_numbers = #tpu.dot_dimension_numbers<[1], [0], [0], [1], [0, 0, 1, 1], [], []>, precision = #tpu.contract_precision<fp32>} : vector<8x32xf32>, vector<32x32xf32>, vector<8x32xf32> -> vector<8x32xf32>
    %180 = arith.subf %177, %179 : vector<8x32xf32>
    %cst_121 = arith.constant dense<0.000000e+00> : vector<8x32xf32>
    %181 = tpu.matmul %180, %3, %cst_121 {dimension_numbers = #tpu.dot_dimension_numbers<[1], [0], [0], [1], [0, 0, 1, 1], [], []>, precision = #tpu.contract_precision<fp32>} : vector<8x32xf32>, vector<32x32xf32>, vector<8x32xf32> -> vector<8x32xf32>
    %182 = vector.broadcast %4 : vector<1x32xf32> to vector<8x32xf32>
    %183 = arith.addf %181, %182 : vector<8x32xf32>
    %184 = math.tanh %183 : vector<8x32xf32>
    %185 = arith.addf %152, %184 : vector<8x32xf32>
    %186 = arith.index_cast %c3_i32 : i32 to index
    %c0_122 = arith.constant 0 : index
    %c0_123 = arith.constant 0 : index
    %187 = vector.load %arg7[%186, %c0_122, %c0_123] : memref<8x8x32xf32, #tpu.memory_space<vmem>>, vector<1x8x32xf32>
    %188 = vector.shape_cast %187 : vector<1x8x32xf32> to vector<8x32xf32>
    %189 = vector.shape_cast %185 : vector<8x32xf32> to vector<1x8x32xf32>
    tpu.vector_store %arg7[%186, %c0_122, %c0_123], %189 {strides = array<i32>} : memref<8x8x32xf32, #tpu.memory_space<vmem>>, vector<1x8x32xf32>,
    %c4_i32 = arith.constant 4 : i32
    %190 = arith.index_cast %c4_i32 : i32 to index
    %c0_124 = arith.constant 0 : index
    %c0_125 = arith.constant 0 : index
    %c0_126 = arith.constant 0 : index
    %191 = vector.load %arg1[%190, %c0_124, %c0_125, %c0_126] : memref<8x3x8x32xf32, #tpu.memory_space<vmem>>, vector<1x1x8x32xf32>
    %192 = vector.shape_cast %191 : vector<1x1x8x32xf32> to vector<8x32xf32>
    %193 = arith.index_cast %c4_i32 : i32 to index
    %c1_127 = arith.constant 1 : index
    %c0_128 = arith.constant 0 : index
    %c0_129 = arith.constant 0 : index
    %194 = vector.load %arg1[%193, %c1_127, %c0_128, %c0_129] : memref<8x3x8x32xf32, #tpu.memory_space<vmem>>, vector<1x1x8x32xf32>
    %195 = vector.shape_cast %194 : vector<1x1x8x32xf32> to vector<8x32xf32>
    %196 = arith.index_cast %c4_i32 : i32 to index
    %c2_130 = arith.constant 2 : index
    %c0_131 = arith.constant 0 : index
    %c0_132 = arith.constant 0 : index
    %197 = vector.load %arg1[%196, %c2_130, %c0_131, %c0_132] : memref<8x3x8x32xf32, #tpu.memory_space<vmem>>, vector<1x1x8x32xf32>
    %198 = vector.shape_cast %197 : vector<1x1x8x32xf32> to vector<8x32xf32>
    %199 = arith.index_cast %c4_i32 : i32 to index
    %c0_133 = arith.constant 0 : index
    %c0_134 = arith.constant 0 : index
    %c0_135 = arith.constant 0 : index
    %200 = vector.load %arg2[%199, %c0_133, %c0_134, %c0_135] : memref<8x2x8x32xf32, #tpu.memory_space<vmem>>, vector<1x1x8x32xf32>
    %201 = vector.shape_cast %200 : vector<1x1x8x32xf32> to vector<8x32xf32>
    %202 = arith.index_cast %c4_i32 : i32 to index
    %c1_136 = arith.constant 1 : index
    %c0_137 = arith.constant 0 : index
    %c0_138 = arith.constant 0 : index
    %203 = vector.load %arg2[%202, %c1_136, %c0_137, %c0_138] : memref<8x2x8x32xf32, #tpu.memory_space<vmem>>, vector<1x1x8x32xf32>
    %204 = vector.shape_cast %203 : vector<1x1x8x32xf32> to vector<8x32xf32>
    %205 = arith.index_cast %c4_i32 : i32 to index
    %c0_139 = arith.constant 0 : index
    %c0_140 = arith.constant 0 : index
    %c0_141 = arith.constant 0 : index
    %206 = vector.load %arg3[%205, %c0_139, %c0_140, %c0_141] : memref<8x2x32x8xf32, #tpu.memory_space<vmem>>, vector<1x1x32x8xf32>
    %207 = vector.shape_cast %206 : vector<1x1x32x8xf32> to vector<32x8xf32>
    %208 = arith.index_cast %c4_i32 : i32 to index
    %c1_142 = arith.constant 1 : index
    %c0_143 = arith.constant 0 : index
    %c0_144 = arith.constant 0 : index
    %209 = vector.load %arg3[%208, %c1_142, %c0_143, %c0_144] : memref<8x2x32x8xf32, #tpu.memory_space<vmem>>, vector<1x1x32x8xf32>
    %210 = vector.shape_cast %209 : vector<1x1x32x8xf32> to vector<32x8xf32>
    %cst_145 = arith.constant dense<0.000000e+00> : vector<8x32xf32>
    %211 = tpu.matmul %185, %3, %cst_145 {dimension_numbers = #tpu.dot_dimension_numbers<[1], [0], [0], [1], [0, 0, 1, 1], [], []>, precision = #tpu.contract_precision<fp32>} : vector<8x32xf32>, vector<32x32xf32>, vector<8x32xf32> -> vector<8x32xf32>
    %212 = vector.broadcast %4 : vector<1x32xf32> to vector<8x32xf32>
    %213 = arith.addf %211, %212 : vector<8x32xf32>
    %214 = math.tanh %213 : vector<8x32xf32>
    %215 = arith.addf %192, %214 : vector<8x32xf32>
    %cst_146 = arith.constant dense<0.000000e+00> : vector<32x32xf32>
    %216 = tpu.matmul %207, %215, %cst_146 {dimension_numbers = #tpu.dot_dimension_numbers<[1], [0], [0], [1], [0, 0, 1, 1], [], []>, precision = #tpu.contract_precision<fp32>} : vector<32x8xf32>, vector<8x32xf32>, vector<32x32xf32> -> vector<32x32xf32>
    %cst_147 = arith.constant dense<0.000000e+00> : vector<8x32xf32>
    %217 = tpu.matmul %201, %216, %cst_147 {dimension_numbers = #tpu.dot_dimension_numbers<[1], [0], [0], [1], [0, 0, 1, 1], [], []>, precision = #tpu.contract_precision<fp32>} : vector<8x32xf32>, vector<32x32xf32>, vector<8x32xf32> -> vector<8x32xf32>
    %218 = arith.subf %215, %217 : vector<8x32xf32>
    %cst_148 = arith.constant dense<0.000000e+00> : vector<8x32xf32>
    %219 = tpu.matmul %218, %3, %cst_148 {dimension_numbers = #tpu.dot_dimension_numbers<[1], [0], [0], [1], [0, 0, 1, 1], [], []>, precision = #tpu.contract_precision<fp32>} : vector<8x32xf32>, vector<32x32xf32>, vector<8x32xf32> -> vector<8x32xf32>
    %220 = vector.broadcast %4 : vector<1x32xf32> to vector<8x32xf32>
    %221 = arith.addf %219, %220 : vector<8x32xf32>
    %222 = math.tanh %221 : vector<8x32xf32>
    %223 = arith.addf %195, %222 : vector<8x32xf32>
    %cst_149 = arith.constant dense<0.000000e+00> : vector<32x32xf32>
    %224 = tpu.matmul %210, %223, %cst_149 {dimension_numbers = #tpu.dot_dimension_numbers<[1], [0], [0], [1], [0, 0, 1, 1], [], []>, precision = #tpu.contract_precision<fp32>} : vector<32x8xf32>, vector<8x32xf32>, vector<32x32xf32> -> vector<32x32xf32>
    %cst_150 = arith.constant dense<0.000000e+00> : vector<8x32xf32>
    %225 = tpu.matmul %204, %224, %cst_150 {dimension_numbers = #tpu.dot_dimension_numbers<[1], [0], [0], [1], [0, 0, 1, 1], [], []>, precision = #tpu.contract_precision<fp32>} : vector<8x32xf32>, vector<32x32xf32>, vector<8x32xf32> -> vector<8x32xf32>
    %226 = arith.subf %223, %225 : vector<8x32xf32>
    %cst_151 = arith.constant dense<0.000000e+00> : vector<8x32xf32>
    %227 = tpu.matmul %226, %3, %cst_151 {dimension_numbers = #tpu.dot_dimension_numbers<[1], [0], [0], [1], [0, 0, 1, 1], [], []>, precision = #tpu.contract_precision<fp32>} : vector<8x32xf32>, vector<32x32xf32>, vector<8x32xf32> -> vector<8x32xf32>
    %228 = vector.broadcast %4 : vector<1x32xf32> to vector<8x32xf32>
    %229 = arith.addf %227, %228 : vector<8x32xf32>
    %230 = math.tanh %229 : vector<8x32xf32>
    %231 = arith.addf %198, %230 : vector<8x32xf32>
    %232 = arith.index_cast %c4_i32 : i32 to index
    %c0_152 = arith.constant 0 : index
    %c0_153 = arith.constant 0 : index
    %233 = vector.load %arg7[%232, %c0_152, %c0_153] : memref<8x8x32xf32, #tpu.memory_space<vmem>>, vector<1x8x32xf32>
    %234 = vector.shape_cast %233 : vector<1x8x32xf32> to vector<8x32xf32>
    %235 = vector.shape_cast %231 : vector<8x32xf32> to vector<1x8x32xf32>
    tpu.vector_store %arg7[%232, %c0_152, %c0_153], %235 {strides = array<i32>} : memref<8x8x32xf32, #tpu.memory_space<vmem>>, vector<1x8x32xf32>,
    %c5_i32 = arith.constant 5 : i32
    %236 = arith.index_cast %c5_i32 : i32 to index
    %c0_154 = arith.constant 0 : index
    %c0_155 = arith.constant 0 : index
    %c0_156 = arith.constant 0 : index
    %237 = vector.load %arg1[%236, %c0_154, %c0_155, %c0_156] : memref<8x3x8x32xf32, #tpu.memory_space<vmem>>, vector<1x1x8x32xf32>
    %238 = vector.shape_cast %237 : vector<1x1x8x32xf32> to vector<8x32xf32>
    %239 = arith.index_cast %c5_i32 : i32 to index
    %c1_157 = arith.constant 1 : index
    %c0_158 = arith.constant 0 : index
    %c0_159 = arith.constant 0 : index
    %240 = vector.load %arg1[%239, %c1_157, %c0_158, %c0_159] : memref<8x3x8x32xf32, #tpu.memory_space<vmem>>, vector<1x1x8x32xf32>
    %241 = vector.shape_cast %240 : vector<1x1x8x32xf32> to vector<8x32xf32>
    %242 = arith.index_cast %c5_i32 : i32 to index
    %c2_160 = arith.constant 2 : index
    %c0_161 = arith.constant 0 : index
    %c0_162 = arith.constant 0 : index
    %243 = vector.load %arg1[%242, %c2_160, %c0_161, %c0_162] : memref<8x3x8x32xf32, #tpu.memory_space<vmem>>, vector<1x1x8x32xf32>
    %244 = vector.shape_cast %243 : vector<1x1x8x32xf32> to vector<8x32xf32>
    %245 = arith.index_cast %c5_i32 : i32 to index
    %c0_163 = arith.constant 0 : index
    %c0_164 = arith.constant 0 : index
    %c0_165 = arith.constant 0 : index
    %246 = vector.load %arg2[%245, %c0_163, %c0_164, %c0_165] : memref<8x2x8x32xf32, #tpu.memory_space<vmem>>, vector<1x1x8x32xf32>
    %247 = vector.shape_cast %246 : vector<1x1x8x32xf32> to vector<8x32xf32>
    %248 = arith.index_cast %c5_i32 : i32 to index
    %c1_166 = arith.constant 1 : index
    %c0_167 = arith.constant 0 : index
    %c0_168 = arith.constant 0 : index
    %249 = vector.load %arg2[%248, %c1_166, %c0_167, %c0_168] : memref<8x2x8x32xf32, #tpu.memory_space<vmem>>, vector<1x1x8x32xf32>
    %250 = vector.shape_cast %249 : vector<1x1x8x32xf32> to vector<8x32xf32>
    %251 = arith.index_cast %c5_i32 : i32 to index
    %c0_169 = arith.constant 0 : index
    %c0_170 = arith.constant 0 : index
    %c0_171 = arith.constant 0 : index
    %252 = vector.load %arg3[%251, %c0_169, %c0_170, %c0_171] : memref<8x2x32x8xf32, #tpu.memory_space<vmem>>, vector<1x1x32x8xf32>
    %253 = vector.shape_cast %252 : vector<1x1x32x8xf32> to vector<32x8xf32>
    %254 = arith.index_cast %c5_i32 : i32 to index
    %c1_172 = arith.constant 1 : index
    %c0_173 = arith.constant 0 : index
    %c0_174 = arith.constant 0 : index
    %255 = vector.load %arg3[%254, %c1_172, %c0_173, %c0_174] : memref<8x2x32x8xf32, #tpu.memory_space<vmem>>, vector<1x1x32x8xf32>
    %256 = vector.shape_cast %255 : vector<1x1x32x8xf32> to vector<32x8xf32>
    %cst_175 = arith.constant dense<0.000000e+00> : vector<8x32xf32>
    %257 = tpu.matmul %231, %3, %cst_175 {dimension_numbers = #tpu.dot_dimension_numbers<[1], [0], [0], [1], [0, 0, 1, 1], [], []>, precision = #tpu.contract_precision<fp32>} : vector<8x32xf32>, vector<32x32xf32>, vector<8x32xf32> -> vector<8x32xf32>
    %258 = vector.broadcast %4 : vector<1x32xf32> to vector<8x32xf32>
    %259 = arith.addf %257, %258 : vector<8x32xf32>
    %260 = math.tanh %259 : vector<8x32xf32>
    %261 = arith.addf %238, %260 : vector<8x32xf32>
    %cst_176 = arith.constant dense<0.000000e+00> : vector<32x32xf32>
    %262 = tpu.matmul %253, %261, %cst_176 {dimension_numbers = #tpu.dot_dimension_numbers<[1], [0], [0], [1], [0, 0, 1, 1], [], []>, precision = #tpu.contract_precision<fp32>} : vector<32x8xf32>, vector<8x32xf32>, vector<32x32xf32> -> vector<32x32xf32>
    %cst_177 = arith.constant dense<0.000000e+00> : vector<8x32xf32>
    %263 = tpu.matmul %247, %262, %cst_177 {dimension_numbers = #tpu.dot_dimension_numbers<[1], [0], [0], [1], [0, 0, 1, 1], [], []>, precision = #tpu.contract_precision<fp32>} : vector<8x32xf32>, vector<32x32xf32>, vector<8x32xf32> -> vector<8x32xf32>
    %264 = arith.subf %261, %263 : vector<8x32xf32>
    %cst_178 = arith.constant dense<0.000000e+00> : vector<8x32xf32>
    %265 = tpu.matmul %264, %3, %cst_178 {dimension_numbers = #tpu.dot_dimension_numbers<[1], [0], [0], [1], [0, 0, 1, 1], [], []>, precision = #tpu.contract_precision<fp32>} : vector<8x32xf32>, vector<32x32xf32>, vector<8x32xf32> -> vector<8x32xf32>
    %266 = vector.broadcast %4 : vector<1x32xf32> to vector<8x32xf32>
    %267 = arith.addf %265, %266 : vector<8x32xf32>
    %268 = math.tanh %267 : vector<8x32xf32>
    %269 = arith.addf %241, %268 : vector<8x32xf32>
    %cst_179 = arith.constant dense<0.000000e+00> : vector<32x32xf32>
    %270 = tpu.matmul %256, %269, %cst_179 {dimension_numbers = #tpu.dot_dimension_numbers<[1], [0], [0], [1], [0, 0, 1, 1], [], []>, precision = #tpu.contract_precision<fp32>} : vector<32x8xf32>, vector<8x32xf32>, vector<32x32xf32> -> vector<32x32xf32>
    %cst_180 = arith.constant dense<0.000000e+00> : vector<8x32xf32>
    %271 = tpu.matmul %250, %270, %cst_180 {dimension_numbers = #tpu.dot_dimension_numbers<[1], [0], [0], [1], [0, 0, 1, 1], [], []>, precision = #tpu.contract_precision<fp32>} : vector<8x32xf32>, vector<32x32xf32>, vector<8x32xf32> -> vector<8x32xf32>
    %272 = arith.subf %269, %271 : vector<8x32xf32>
    %cst_181 = arith.constant dense<0.000000e+00> : vector<8x32xf32>
    %273 = tpu.matmul %272, %3, %cst_181 {dimension_numbers = #tpu.dot_dimension_numbers<[1], [0], [0], [1], [0, 0, 1, 1], [], []>, precision = #tpu.contract_precision<fp32>} : vector<8x32xf32>, vector<32x32xf32>, vector<8x32xf32> -> vector<8x32xf32>
    %274 = vector.broadcast %4 : vector<1x32xf32> to vector<8x32xf32>
    %275 = arith.addf %273, %274 : vector<8x32xf32>
    %276 = math.tanh %275 : vector<8x32xf32>
    %277 = arith.addf %244, %276 : vector<8x32xf32>
    %278 = arith.index_cast %c5_i32 : i32 to index
    %c0_182 = arith.constant 0 : index
    %c0_183 = arith.constant 0 : index
    %279 = vector.load %arg7[%278, %c0_182, %c0_183] : memref<8x8x32xf32, #tpu.memory_space<vmem>>, vector<1x8x32xf32>
    %280 = vector.shape_cast %279 : vector<1x8x32xf32> to vector<8x32xf32>
    %281 = vector.shape_cast %277 : vector<8x32xf32> to vector<1x8x32xf32>
    tpu.vector_store %arg7[%278, %c0_182, %c0_183], %281 {strides = array<i32>} : memref<8x8x32xf32, #tpu.memory_space<vmem>>, vector<1x8x32xf32>,
    %c6_i32 = arith.constant 6 : i32
    %282 = arith.index_cast %c6_i32 : i32 to index
    %c0_184 = arith.constant 0 : index
    %c0_185 = arith.constant 0 : index
    %c0_186 = arith.constant 0 : index
    %283 = vector.load %arg1[%282, %c0_184, %c0_185, %c0_186] : memref<8x3x8x32xf32, #tpu.memory_space<vmem>>, vector<1x1x8x32xf32>
    %284 = vector.shape_cast %283 : vector<1x1x8x32xf32> to vector<8x32xf32>
    %285 = arith.index_cast %c6_i32 : i32 to index
    %c1_187 = arith.constant 1 : index
    %c0_188 = arith.constant 0 : index
    %c0_189 = arith.constant 0 : index
    %286 = vector.load %arg1[%285, %c1_187, %c0_188, %c0_189] : memref<8x3x8x32xf32, #tpu.memory_space<vmem>>, vector<1x1x8x32xf32>
    %287 = vector.shape_cast %286 : vector<1x1x8x32xf32> to vector<8x32xf32>
    %288 = arith.index_cast %c6_i32 : i32 to index
    %c2_190 = arith.constant 2 : index
    %c0_191 = arith.constant 0 : index
    %c0_192 = arith.constant 0 : index
    %289 = vector.load %arg1[%288, %c2_190, %c0_191, %c0_192] : memref<8x3x8x32xf32, #tpu.memory_space<vmem>>, vector<1x1x8x32xf32>
    %290 = vector.shape_cast %289 : vector<1x1x8x32xf32> to vector<8x32xf32>
    %291 = arith.index_cast %c6_i32 : i32 to index
    %c0_193 = arith.constant 0 : index
    %c0_194 = arith.constant 0 : index
    %c0_195 = arith.constant 0 : index
    %292 = vector.load %arg2[%291, %c0_193, %c0_194, %c0_195] : memref<8x2x8x32xf32, #tpu.memory_space<vmem>>, vector<1x1x8x32xf32>
    %293 = vector.shape_cast %292 : vector<1x1x8x32xf32> to vector<8x32xf32>
    %294 = arith.index_cast %c6_i32 : i32 to index
    %c1_196 = arith.constant 1 : index
    %c0_197 = arith.constant 0 : index
    %c0_198 = arith.constant 0 : index
    %295 = vector.load %arg2[%294, %c1_196, %c0_197, %c0_198] : memref<8x2x8x32xf32, #tpu.memory_space<vmem>>, vector<1x1x8x32xf32>
    %296 = vector.shape_cast %295 : vector<1x1x8x32xf32> to vector<8x32xf32>
    %297 = arith.index_cast %c6_i32 : i32 to index
    %c0_199 = arith.constant 0 : index
    %c0_200 = arith.constant 0 : index
    %c0_201 = arith.constant 0 : index
    %298 = vector.load %arg3[%297, %c0_199, %c0_200, %c0_201] : memref<8x2x32x8xf32, #tpu.memory_space<vmem>>, vector<1x1x32x8xf32>
    %299 = vector.shape_cast %298 : vector<1x1x32x8xf32> to vector<32x8xf32>
    %300 = arith.index_cast %c6_i32 : i32 to index
    %c1_202 = arith.constant 1 : index
    %c0_203 = arith.constant 0 : index
    %c0_204 = arith.constant 0 : index
    %301 = vector.load %arg3[%300, %c1_202, %c0_203, %c0_204] : memref<8x2x32x8xf32, #tpu.memory_space<vmem>>, vector<1x1x32x8xf32>
    %302 = vector.shape_cast %301 : vector<1x1x32x8xf32> to vector<32x8xf32>
    %cst_205 = arith.constant dense<0.000000e+00> : vector<8x32xf32>
    %303 = tpu.matmul %277, %3, %cst_205 {dimension_numbers = #tpu.dot_dimension_numbers<[1], [0], [0], [1], [0, 0, 1, 1], [], []>, precision = #tpu.contract_precision<fp32>} : vector<8x32xf32>, vector<32x32xf32>, vector<8x32xf32> -> vector<8x32xf32>
    %304 = vector.broadcast %4 : vector<1x32xf32> to vector<8x32xf32>
    %305 = arith.addf %303, %304 : vector<8x32xf32>
    %306 = math.tanh %305 : vector<8x32xf32>
    %307 = arith.addf %284, %306 : vector<8x32xf32>
    %cst_206 = arith.constant dense<0.000000e+00> : vector<32x32xf32>
    %308 = tpu.matmul %299, %307, %cst_206 {dimension_numbers = #tpu.dot_dimension_numbers<[1], [0], [0], [1], [0, 0, 1, 1], [], []>, precision = #tpu.contract_precision<fp32>} : vector<32x8xf32>, vector<8x32xf32>, vector<32x32xf32> -> vector<32x32xf32>
    %cst_207 = arith.constant dense<0.000000e+00> : vector<8x32xf32>
    %309 = tpu.matmul %293, %308, %cst_207 {dimension_numbers = #tpu.dot_dimension_numbers<[1], [0], [0], [1], [0, 0, 1, 1], [], []>, precision = #tpu.contract_precision<fp32>} : vector<8x32xf32>, vector<32x32xf32>, vector<8x32xf32> -> vector<8x32xf32>
    %310 = arith.subf %307, %309 : vector<8x32xf32>
    %cst_208 = arith.constant dense<0.000000e+00> : vector<8x32xf32>
    %311 = tpu.matmul %310, %3, %cst_208 {dimension_numbers = #tpu.dot_dimension_numbers<[1], [0], [0], [1], [0, 0, 1, 1], [], []>, precision = #tpu.contract_precision<fp32>} : vector<8x32xf32>, vector<32x32xf32>, vector<8x32xf32> -> vector<8x32xf32>
    %312 = vector.broadcast %4 : vector<1x32xf32> to vector<8x32xf32>
    %313 = arith.addf %311, %312 : vector<8x32xf32>
    %314 = math.tanh %313 : vector<8x32xf32>
    %315 = arith.addf %287, %314 : vector<8x32xf32>
    %cst_209 = arith.constant dense<0.000000e+00> : vector<32x32xf32>
    %316 = tpu.matmul %302, %315, %cst_209 {dimension_numbers = #tpu.dot_dimension_numbers<[1], [0], [0], [1], [0, 0, 1, 1], [], []>, precision = #tpu.contract_precision<fp32>} : vector<32x8xf32>, vector<8x32xf32>, vector<32x32xf32> -> vector<32x32xf32>
    %cst_210 = arith.constant dense<0.000000e+00> : vector<8x32xf32>
    %317 = tpu.matmul %296, %316, %cst_210 {dimension_numbers = #tpu.dot_dimension_numbers<[1], [0], [0], [1], [0, 0, 1, 1], [], []>, precision = #tpu.contract_precision<fp32>} : vector<8x32xf32>, vector<32x32xf32>, vector<8x32xf32> -> vector<8x32xf32>
    %318 = arith.subf %315, %317 : vector<8x32xf32>
    %cst_211 = arith.constant dense<0.000000e+00> : vector<8x32xf32>
    %319 = tpu.matmul %318, %3, %cst_211 {dimension_numbers = #tpu.dot_dimension_numbers<[1], [0], [0], [1], [0, 0, 1, 1], [], []>, precision = #tpu.contract_precision<fp32>} : vector<8x32xf32>, vector<32x32xf32>, vector<8x32xf32> -> vector<8x32xf32>
    %320 = vector.broadcast %4 : vector<1x32xf32> to vector<8x32xf32>
    %321 = arith.addf %319, %320 : vector<8x32xf32>
    %322 = math.tanh %321 : vector<8x32xf32>
    %323 = arith.addf %290, %322 : vector<8x32xf32>
    %324 = arith.index_cast %c6_i32 : i32 to index
    %c0_212 = arith.constant 0 : index
    %c0_213 = arith.constant 0 : index
    %325 = vector.load %arg7[%324, %c0_212, %c0_213] : memref<8x8x32xf32, #tpu.memory_space<vmem>>, vector<1x8x32xf32>
    %326 = vector.shape_cast %325 : vector<1x8x32xf32> to vector<8x32xf32>
    %327 = vector.shape_cast %323 : vector<8x32xf32> to vector<1x8x32xf32>
    tpu.vector_store %arg7[%324, %c0_212, %c0_213], %327 {strides = array<i32>} : memref<8x8x32xf32, #tpu.memory_space<vmem>>, vector<1x8x32xf32>,
    %c7_i32 = arith.constant 7 : i32
    %328 = arith.index_cast %c7_i32 : i32 to index
    %c0_214 = arith.constant 0 : index
    %c0_215 = arith.constant 0 : index
    %c0_216 = arith.constant 0 : index
    %329 = vector.load %arg1[%328, %c0_214, %c0_215, %c0_216] : memref<8x3x8x32xf32, #tpu.memory_space<vmem>>, vector<1x1x8x32xf32>
    %330 = vector.shape_cast %329 : vector<1x1x8x32xf32> to vector<8x32xf32>
    %331 = arith.index_cast %c7_i32 : i32 to index
    %c1_217 = arith.constant 1 : index
    %c0_218 = arith.constant 0 : index
    %c0_219 = arith.constant 0 : index
    %332 = vector.load %arg1[%331, %c1_217, %c0_218, %c0_219] : memref<8x3x8x32xf32, #tpu.memory_space<vmem>>, vector<1x1x8x32xf32>
    %333 = vector.shape_cast %332 : vector<1x1x8x32xf32> to vector<8x32xf32>
    %334 = arith.index_cast %c7_i32 : i32 to index
    %c2_220 = arith.constant 2 : index
    %c0_221 = arith.constant 0 : index
    %c0_222 = arith.constant 0 : index
    %335 = vector.load %arg1[%334, %c2_220, %c0_221, %c0_222] : memref<8x3x8x32xf32, #tpu.memory_space<vmem>>, vector<1x1x8x32xf32>
    %336 = vector.shape_cast %335 : vector<1x1x8x32xf32> to vector<8x32xf32>
    %337 = arith.index_cast %c7_i32 : i32 to index
    %c0_223 = arith.constant 0 : index
    %c0_224 = arith.constant 0 : index
    %c0_225 = arith.constant 0 : index
    %338 = vector.load %arg2[%337, %c0_223, %c0_224, %c0_225] : memref<8x2x8x32xf32, #tpu.memory_space<vmem>>, vector<1x1x8x32xf32>
    %339 = vector.shape_cast %338 : vector<1x1x8x32xf32> to vector<8x32xf32>
    %340 = arith.index_cast %c7_i32 : i32 to index
    %c1_226 = arith.constant 1 : index
    %c0_227 = arith.constant 0 : index
    %c0_228 = arith.constant 0 : index
    %341 = vector.load %arg2[%340, %c1_226, %c0_227, %c0_228] : memref<8x2x8x32xf32, #tpu.memory_space<vmem>>, vector<1x1x8x32xf32>
    %342 = vector.shape_cast %341 : vector<1x1x8x32xf32> to vector<8x32xf32>
    %343 = arith.index_cast %c7_i32 : i32 to index
    %c0_229 = arith.constant 0 : index
    %c0_230 = arith.constant 0 : index
    %c0_231 = arith.constant 0 : index
    %344 = vector.load %arg3[%343, %c0_229, %c0_230, %c0_231] : memref<8x2x32x8xf32, #tpu.memory_space<vmem>>, vector<1x1x32x8xf32>
    %345 = vector.shape_cast %344 : vector<1x1x32x8xf32> to vector<32x8xf32>
    %346 = arith.index_cast %c7_i32 : i32 to index
    %c1_232 = arith.constant 1 : index
    %c0_233 = arith.constant 0 : index
    %c0_234 = arith.constant 0 : index
    %347 = vector.load %arg3[%346, %c1_232, %c0_233, %c0_234] : memref<8x2x32x8xf32, #tpu.memory_space<vmem>>, vector<1x1x32x8xf32>
    %348 = vector.shape_cast %347 : vector<1x1x32x8xf32> to vector<32x8xf32>
    %cst_235 = arith.constant dense<0.000000e+00> : vector<8x32xf32>
    %349 = tpu.matmul %323, %3, %cst_235 {dimension_numbers = #tpu.dot_dimension_numbers<[1], [0], [0], [1], [0, 0, 1, 1], [], []>, precision = #tpu.contract_precision<fp32>} : vector<8x32xf32>, vector<32x32xf32>, vector<8x32xf32> -> vector<8x32xf32>
    %350 = vector.broadcast %4 : vector<1x32xf32> to vector<8x32xf32>
    %351 = arith.addf %349, %350 : vector<8x32xf32>
    %352 = math.tanh %351 : vector<8x32xf32>
    %353 = arith.addf %330, %352 : vector<8x32xf32>
    %cst_236 = arith.constant dense<0.000000e+00> : vector<32x32xf32>
    %354 = tpu.matmul %345, %353, %cst_236 {dimension_numbers = #tpu.dot_dimension_numbers<[1], [0], [0], [1], [0, 0, 1, 1], [], []>, precision = #tpu.contract_precision<fp32>} : vector<32x8xf32>, vector<8x32xf32>, vector<32x32xf32> -> vector<32x32xf32>
    %cst_237 = arith.constant dense<0.000000e+00> : vector<8x32xf32>
    %355 = tpu.matmul %339, %354, %cst_237 {dimension_numbers = #tpu.dot_dimension_numbers<[1], [0], [0], [1], [0, 0, 1, 1], [], []>, precision = #tpu.contract_precision<fp32>} : vector<8x32xf32>, vector<32x32xf32>, vector<8x32xf32> -> vector<8x32xf32>
    %356 = arith.subf %353, %355 : vector<8x32xf32>
    %cst_238 = arith.constant dense<0.000000e+00> : vector<8x32xf32>
    %357 = tpu.matmul %356, %3, %cst_238 {dimension_numbers = #tpu.dot_dimension_numbers<[1], [0], [0], [1], [0, 0, 1, 1], [], []>, precision = #tpu.contract_precision<fp32>} : vector<8x32xf32>, vector<32x32xf32>, vector<8x32xf32> -> vector<8x32xf32>
    %358 = vector.broadcast %4 : vector<1x32xf32> to vector<8x32xf32>
    %359 = arith.addf %357, %358 : vector<8x32xf32>
    %360 = math.tanh %359 : vector<8x32xf32>
    %361 = arith.addf %333, %360 : vector<8x32xf32>
    %cst_239 = arith.constant dense<0.000000e+00> : vector<32x32xf32>
    %362 = tpu.matmul %348, %361, %cst_239 {dimension_numbers = #tpu.dot_dimension_numbers<[1], [0], [0], [1], [0, 0, 1, 1], [], []>, precision = #tpu.contract_precision<fp32>} : vector<32x8xf32>, vector<8x32xf32>, vector<32x32xf32> -> vector<32x32xf32>
    %cst_240 = arith.constant dense<0.000000e+00> : vector<8x32xf32>
    %363 = tpu.matmul %342, %362, %cst_240 {dimension_numbers = #tpu.dot_dimension_numbers<[1], [0], [0], [1], [0, 0, 1, 1], [], []>, precision = #tpu.contract_precision<fp32>} : vector<8x32xf32>, vector<32x32xf32>, vector<8x32xf32> -> vector<8x32xf32>
    %364 = arith.subf %361, %363 : vector<8x32xf32>
    %cst_241 = arith.constant dense<0.000000e+00> : vector<8x32xf32>
    %365 = tpu.matmul %364, %3, %cst_241 {dimension_numbers = #tpu.dot_dimension_numbers<[1], [0], [0], [1], [0, 0, 1, 1], [], []>, precision = #tpu.contract_precision<fp32>} : vector<8x32xf32>, vector<32x32xf32>, vector<8x32xf32> -> vector<8x32xf32>
    %366 = vector.broadcast %4 : vector<1x32xf32> to vector<8x32xf32>
    %367 = arith.addf %365, %366 : vector<8x32xf32>
    %368 = math.tanh %367 : vector<8x32xf32>
    %369 = arith.addf %336, %368 : vector<8x32xf32>
    %370 = arith.index_cast %c7_i32 : i32 to index
    %c0_242 = arith.constant 0 : index
    %c0_243 = arith.constant 0 : index
    %371 = vector.load %arg7[%370, %c0_242, %c0_243] : memref<8x8x32xf32, #tpu.memory_space<vmem>>, vector<1x8x32xf32>
    %372 = vector.shape_cast %371 : vector<1x8x32xf32> to vector<8x32xf32>
    %373 = vector.shape_cast %369 : vector<8x32xf32> to vector<1x8x32xf32>
    tpu.vector_store %arg7[%370, %c0_242, %c0_243], %373 {strides = array<i32>} : memref<8x8x32xf32, #tpu.memory_space<vmem>>, vector<1x8x32xf32>,
    %c8_i32 = arith.constant 8 : i32
    %c0_244 = arith.constant 0 : index
    %c0_245 = arith.constant 0 : index
    %374 = vector.load %arg8[%c0_244, %c0_245] : memref<8x32xf32, #tpu.memory_space<vmem>>, vector<8x32xf32>
    tpu.vector_store %arg8[%c0_244, %c0_245], %369 {strides = array<i32>} : memref<8x32xf32, #tpu.memory_space<vmem>>, vector<8x32xf32>,
    return
  }
  func.func @transform_0(%arg0: i32) -> (i32, i32, i32, i32) {
    %c0_i32 = arith.constant 0 : i32
    %c0_i32_0 = arith.constant 0 : i32
    %c0_i32_1 = arith.constant 0 : i32
    %c0_i32_2 = arith.constant 0 : i32
    return %arg0, %c0_i32, %c0_i32_0, %c0_i32_1 : i32, i32, i32, i32
  }
  func.func @transform_1(%arg0: i32) -> (i32, i32, i32, i32) {
    %c0_i32 = arith.constant 0 : i32
    %c0_i32_0 = arith.constant 0 : i32
    %c0_i32_1 = arith.constant 0 : i32
    %c0_i32_2 = arith.constant 0 : i32
    return %arg0, %c0_i32, %c0_i32_0, %c0_i32_1 : i32, i32, i32, i32
  }
  func.func @transform_2(%arg0: i32) -> (i32, i32, i32, i32) {
    %c0_i32 = arith.constant 0 : i32
    %c0_i32_0 = arith.constant 0 : i32
    %c0_i32_1 = arith.constant 0 : i32
    %c0_i32_2 = arith.constant 0 : i32
    return %arg0, %c0_i32, %c0_i32_0, %c0_i32_1 : i32, i32, i32, i32
  }
  func.func @transform_3(%arg0: i32) -> (i32, i32) {
    %c0_i32 = arith.constant 0 : i32
    %c0_i32_0 = arith.constant 0 : i32
    %c0_i32_1 = arith.constant 0 : i32
    return %c0_i32, %c0_i32_0 : i32, i32
  }
  func.func @transform_4(%arg0: i32) -> (i32, i32) {
    %c0_i32 = arith.constant 0 : i32
    %c0_i32_0 = arith.constant 0 : i32
    %c0_i32_1 = arith.constant 0 : i32
    return %c0_i32, %c0_i32_0 : i32, i32
  }
  func.func @transform_5(%arg0: i32) -> (i32, i32) {
    %c0_i32 = arith.constant 0 : i32
    %c0_i32_0 = arith.constant 0 : i32
    %c0_i32_1 = arith.constant 0 : i32
    return %c0_i32, %c0_i32_0 : i32, i32
  }
  func.func @transform_6(%arg0: i32) -> (i32, i32, i32) {
    %c0_i32 = arith.constant 0 : i32
    %c0_i32_0 = arith.constant 0 : i32
    %c0_i32_1 = arith.constant 0 : i32
    return %arg0, %c0_i32, %c0_i32_0 : i32, i32, i32
  }
}

</mosaic_0001>

<bundles_post_ra>
// kernel: tpu_custom_call.1
= control target key start
LH: loop header
LB: loop body
LE: loop exit
PB: predicated region body
PF: predicated region fallthrough
CT: control target
= control target key end

     0   :  { %vm29_vm0 = vcmask 261120   ;;  %v34480_v3 = vmov 0.0   ;;  %vm34481_vm1 = vmmov 0   ;;  %s38038_s0 = inlined_call_operand.vmem [shape: f32[8,3,8,32], index: 0, kind: input, shape index: {}]   ;;  %s38039_s1 = inlined_call_operand.vmem [shape: f32[8,2,8,32], index: 1, kind: input, shape index: {}]   ;;  %s38040_s2 = inlined_call_operand.vmem [shape: f32[8,2,32,8], index: 2, kind: input, shape index: {}]   ;;  %s38041_s3 = inlined_call_operand.vmem [shape: f32[8,32], index: 3, kind: input, shape index: {}]   ;;  %s38042_s4 = inlined_call_operand.vmem [shape: f32[32,32], index: 4, kind: input, shape index: {}]   ;;  %s38043_s5 = inlined_call_operand.vmem [shape: f32[1,32], index: 5, kind: input, shape index: {}]   ;;  %s38044_s6 = inlined_call_operand.hbm [shape: f32[8,8,32], index: 6, kind: output, shape index: {}]  }
   0x1   :  { %v34_v0 = vld [vmem:[%s38042_s4 + $0x18] sm:$0xff]  ;;  %v33_v1 = vld [vmem:[%s38042_s4 + $0x10] sm:$0xff]  ;;  %v32_v2 = vld [vmem:[%s38042_s4 + $0x8] sm:$0xff]  ;;  %30989 = vmatprep.subr.mxu0 %v34480_v3  ;;  %31000 = vmatprep.subr.mxu1 %v34480_v3 }
   0x2   :  { %v34531_v4 = vand.u32 4294901760, %v34_v0  ;;  %v34533_v5 = vand.u32 4294901760, %v33_v1  ;;  %v34535_v6 = vand.u32 4294901760, %v32_v2  ;;  %v31_v7 = vld [vmem:[%s38042_s4] sm:$0xff]  ;;  %30997 = vmatprep.mubr.msk.f32.mxu0 %vm34481_vm1, %v34480_v3  ;;  %31008 = vmatprep.mubr.msk.f32.mxu1 %vm34481_vm1, %v34480_v3 }
   0x3   :  { %v28_v8 = vld [vmem:[%s38041_s3] sm:$0xff]  ;;  %v34543_v9 = vand.u32 4294901760, %v31_v7 }
   0x4   :  { %30 = vst.msk [vmem:[#allocation2] sm:$0xff] %vm29_vm0, %v28_v8 }
   0x5   :  { %11 = vsyncpa [#allocation4], 0  ;;  %30990 = vmatpush3.msra.mxu0 %v34531_v4  ;;  %v34552_v10 = vsub.f32 %v34_v0, %v34531_v4  ;;  %v34555_v11 = vsub.f32 %v33_v1, %v34533_v5  ;;  %v34558_v12 = vsub.f32 %v32_v2, %v34535_v6  ;;  %v34562_v13 = vsub.f32 %v31_v7, %v34543_v9  ;;  %v45_v33 = vld [vmem:[%s38040_s2] sm:$0xff]  ;;  %v46_v53 = vld [vmem:[%s38040_s2 + $0x8] sm:$0xff]  ;;  %s34482_s19 = smov [#allocation3]  }
   0x6   :  { %30991 = vmatprep.subr.mxu0 %v34480_v3  ;;  %vm551_vm2 = vcmask 64512   ;;  %v34662_v44 = vld [vmem:[%s38043_s5] ss:$0 sm:$0xff]  ;;  %v47_v56 = vld [vmem:[%s38040_s2 + $0x10] sm:$0xff]  ;;  %v48_v63 = vld [vmem:[%s38040_s2 + $0x18] sm:$0xff]  ;;  %s29199_s20 = sshll.u32 %s34482_s19, 4  ;;  %s29200_s20 = int_to_ptr.vmem [resolvable:$true] %s29199_s20 }
   0x7   :  { %v34565_v14 = vand.u32 4294901760, %v34552_v10  ;;  %30992 = vmatpush3.msra.mxu0 %v34533_v5  ;;  %v34569_v15 = vand.u32 4294901760, %v34555_v11  ;;  %v34572_v16 = vand.u32 4294901760, %v34558_v12  ;;  %v34576_v17 = vand.u32 4294901760, %v34562_v13  ;;  %p34463_p1 = scmp.lt.s32.totalorder %s29200_s20, %s29200_s20 }
   0x8   :  { %30993 = vmatprep.subr.mxu0 %v34480_v3  ;;  %v553_v34 = vsel %vm551_vm2, %v45_v33, 0  ;;  %v556_v60 = vsel %vm551_vm2, %v46_v53, 0  ;;  %v559_v62 = vsel %vm551_vm2, %v47_v56, 0  ;;  %v562_v2 = vsel %vm551_vm2, %v48_v63, 0 }
   0x9   :  { %v171_v18 = vsub.f32 %v34552_v10, %v34565_v14  ;;  %v178_v19 = vsub.f32 %v34555_v11, %v34569_v15  ;;  %30994 = vmatpush3.msra.mxu0 %v34535_v6  ;;  %v185_v20 = vsub.f32 %v34558_v12, %v34572_v16  ;;  %v192_v23 = vsub.f32 %v34562_v13, %v34576_v17 }
   0xa   :  { %30995 = vmatprep.subr.mxu0 %v34480_v3  ;;  %v34649_v35 = vand.u32 4294901760, %v553_v34  ;;  %v640_v0 = vand.u32 4294901760, %v556_v60  ;;  %v650_v1 = vand.u32 4294901760, %v559_v62  ;;  %v660_v8 = vand.u32 4294901760, %v562_v2 }
   0xb   :  { %v34586_v21 = vand.u32 4294901760, %v171_v18  ;;  %v34588_v22 = vand.u32 4294901760, %v178_v19  ;;  %30996 = vmatpush3.msra.mxu0 %v34543_v9  ;;  %v36_v24 = vld [vmem:[#allocation2] sm:$0xff]  ;;  %v34596_v26 = vand.u32 4294901760, %v185_v20  ;;  %v34600_v28 = vand.u32 4294901760, %v192_v23 }
   0xc   :  { %31011 = vmatprep.subr.mxu0 %v34480_v3  ;;  %v62_v25 = vsel %vm29_vm0, %v36_v24, 0  ;;  %v34652_v36 = vsub.f32 %v553_v34, %v34649_v35  ;;  %v641_v7 = vsub.f32 %v556_v60, %v640_v0  ;;  %v651_v18 = vsub.f32 %v559_v62, %v650_v1  ;;  %v37_v24 = vld [vmem:[%s38038_s0] sm:$0xff] }
   0xd   :  { %31001 = vmatpush3.msra.mxu1 %v34586_v21  ;;  %v133_v27 = vand.u32 4294901760, %v62_v25  ;;  %v661_v20 = vsub.f32 %v562_v2, %v660_v8 }
   0xe   :  { %31002 = vmatprep.subr.mxu1 %v34480_v3  ;;  %v632_v37 = vand.u32 4294901760, %v34652_v36  ;;  %v642_v19 = vand.u32 4294901760, %v641_v7  ;;  %v652_v23 = vand.u32 4294901760, %v651_v18 }
   0xf   :  { %31003 = vmatpush3.msra.mxu1 %v34588_v22  ;;  %v134_v29 = vsub.f32 %v62_v25, %v133_v27 }
  0x10   :  { %31004 = vmatprep.subr.mxu1 %v34480_v3  ;;  %v633_v38 = vsub.f32 %v34652_v36, %v632_v37  ;;  %v643_v25 = vsub.f32 %v641_v7, %v642_v19 }
  0x11   :  { %31005 = vmatpush3.msra.mxu1 %v34596_v26  ;;  %v135_v30 = vand.u32 4294901760, %v134_v29 }
  0x12   :  { %31006 = vmatprep.subr.mxu1 %v34480_v3  ;;  %v634_v39 = vand.u32 4294901760, %v633_v38  ;;  %v644_v33 = vand.u32 4294901760, %v643_v25 }
  0x13   :  { %31007 = vmatpush3.msra.mxu1 %v34600_v28  ;;  %v136_v31 = vsub.f32 %v134_v29, %v135_v30 }
  0x14   :  { %31022 = vmatprep.subr.mxu1 %v34480_v3  ;;  %31009 = vmatmul.mubr.f32.vlgmr.msra.gmra.mxu1 %v133_v27 }
  0x15   :  { %v137_v32 = vand.u32 4294901760, %v136_v31  ;;  %31023 = vmatpush3.msra.mxu1 %v34531_v4  ;;  %31030 = vmatprep.mubr.msk.f32.mxu1 %vm34481_vm1, %v34480_v3 }
  0x16   :  { %31024 = vmatprep.subr.mxu1 %v34480_v3 }
  0x17   :  { %30998 = vmatmul.mubr.f32.vlgmr.msra.gmra.mxu0 %v137_v32  ;;  %31025 = vmatpush3.msra.mxu1 %v34533_v5 }
  0x18   :  { %31012 = vmatpush3.msra.mxu0 %v34552_v10  ;;  %31026 = vmatprep.subr.mxu1 %v34480_v3 }
  0x19   :  { %31013 = vmatprep.subr.mxu0 %v34480_v3  ;;  %31027 = vmatpush3.msra.mxu1 %v34535_v6 }
  0x1a   :  { %31014 = vmatpush3.msra.mxu0 %v34555_v11  ;;  %31028 = vmatprep.subr.mxu1 %v34480_v3 }
  0x1b   :  { %31015 = vmatprep.subr.mxu0 %v34480_v3  ;;  %31019 = vmatprep.mubr.msk.f32.mxu0 %vm34481_vm1, %v34480_v3 }
  0x1c   :  { %31016 = vmatpush3.msra.mxu0 %v34558_v12  ;;  %31029 = vmatpush3.msra.mxu1 %v34543_v9 }
  0x1d   :  { %31017 = vmatprep.subr.mxu0 %v34480_v3  ;;  %31044 = vmatprep.subr.mxu1 %v34480_v3 }
  0x1e   :  { %31018 = vmatpush3.msra.mxu0 %v34562_v13  ;;  %31031 = vmatmul.mubr.f32.vlgmr.msra.gmra.mxu1 %v135_v30  ;;  %v653_v30 = vsub.f32 %v651_v18, %v652_v23 }
  0x1f   :  { %31020 = vmatmul.mubr.f32.vlgmr.msra.gmra.mxu0 %v134_v29  ;;  %31033 = vmatprep.subr.mxu0 %v34480_v3 }
  0x20   :  { %31034 = vmatpush3.msra.mxu0 %v34565_v14  ;;  %31045 = vmatpush3.msra.mxu1 %v34531_v4  ;;  %v654_v38 = vand.u32 4294901760, %v653_v30 }
  0x21   :  { %31035 = vmatprep.subr.mxu0 %v34480_v3  ;;  %31046 = vmatprep.subr.mxu1 %v34480_v3 }
  0x22   :  { %31036 = vmatpush3.msra.mxu0 %v34569_v15  ;;  %31047 = vmatpush3.msra.mxu1 %v34533_v5 }
  0x23   :  { %31037 = vmatprep.subr.mxu0 %v34480_v3  ;;  %31048 = vmatprep.subr.mxu1 %v34480_v3 }
  0x24   :  { %31038 = vmatpush3.msra.mxu0 %v34572_v16  ;;  %31049 = vmatpush3.msra.mxu1 %v34535_v6 }
  0x25   :  { %31039 = vmatprep.subr.mxu0 %v34480_v3  ;;  %31050 = vmatprep.subr.mxu1 %v34480_v3 }
  0x26   :  { %31040 = vmatpush3.msra.mxu0 %v34576_v17  ;;  %31041 = vmatprep.mubr.msk.f32.mxu0 %vm34481_vm1, %v34480_v3 }
  0x27   :  { %31051 = vmatpush3.msra.mxu1 %v34543_v9  ;;  %31052 = vmatprep.mubr.msk.f32.mxu1 %vm34481_vm1, %v34480_v3 }
  0x28   :  { %31042 = vmatmul.mubr.f32.vlgmr.msra.gmra.mxu0 %v133_v27  ;;  %31053 = vmatmul.mubr.f32.vlgmr.msra.gmra.mxu1 %v133_v27  ;;  %v662_v27 = vand.u32 4294901760, %v661_v20 }
  0x29   :  { %31065 = vmatprep.mubr.f32.mxu1 %v34649_v35  ;;  %31057 = vmatprep.mubr.f32.mxu0 %v634_v39 }
  0x2a   :  { %v663_v34 = vsub.f32 %v661_v20, %v662_v27 }
  0xd4   :  { %v230_v40 = vpop.f32.mrf.mxu1 }
  0xd6   :  { %v31010_v41 = vpop.f32.mrf.mxu1 }
  0xd7   :  { %v139_v42 = vpop.f32.mrf.mxu0  ;;  %v664_v41 = vand.u32 4294901760, %v663_v34 }
  0xd8   :  { %v140_v45 = vadd.f32 %v34662_v44, %v139_v42 }
  0xd9   :  { %v30999_v43 = vpop.f32.mrf.mxu0 }
  0xda   :  { %v231_v49 = vadd.f32 %v230_v40, %v140_v45 }
  0xde   :  { %v387_v46 = vpop.f32.mrf.mxu1 }
  0xdf   :  { %v310_v47 = vpop.f32.mrf.mxu0 }
  0xe0   :  { %v31032_v48 = vpop.f32.mrf.mxu1  ;;  %v311_v51 = vadd.f32 %v310_v47, %v231_v49 }
  0xe1   :  { %v31021_v50 = vpop.f32.mrf.mxu0 }
  0xe2   :  { %v388_v52 = vadd.f32 %v387_v46, %v311_v51 }
  0xe8   :  { %v470_v54 = vpop.f32.mrf.mxu0  ;;  %v545_v55 = vpop.f32.mrf.mxu1 }
  0xe9   :  { %v471_v57 = vadd.f32 %v470_v54, %v388_v52 }
  0xea   :  { %v31043_v58 = vpop.f32.mrf.mxu0  ;;  %v31054_v59 = vpop.f32.mrf.mxu1 }
  0xeb   :  { %v546_v61 = vadd.f32 %v545_v55, %v471_v57  ;;  %v42_v55 = vld [vmem:[%s38039_s1] sm:$0xff] }
  0xed   :  { %34402 = vtanh.f32 %v546_v61  ;;  %v1140_v61 = vsel %vm29_vm0, %v42_v55, 0 }
  0xfa   :  { %v34403_v29 = vpop.eup %34402 }
  0xfb   :  { %v34680_v31 = vadd.f32 %v34403_v29, %v37_v24 }
  0xfd   :  { %v595_v32 = vand.u32 4294901760, %v34680_v31 }
  0xff   :  { %31055 = vmatprep.subr.mxu0 %v595_v32  ;;  %v702_v39 = vsub.f32 %v34680_v31, %v595_v32 }
 0x100   :  { %31056 = vmatpush3.msra.mxu0 %v595_v32 }
 0x101   :  { %31058 = vmatmul.mubr.f32.vlgmr.msra.gmra.mxu0 %v644_v33  ;;  %31071 = vmatprep.subr.mxu0 %v702_v39  ;;  %v703_v40 = vand.u32 4294901760, %v702_v39 }
 0x102   :  { %31072 = vmatpush3.msra.mxu0 %v702_v39  ;;  %31060 = vmatprep.mubr.f32.mxu0 %v654_v38 }
 0x103   :  { %31087 = vmatprep.subr.mxu0 %v703_v40  ;;  %v704_v42 = vsub.f32 %v702_v39, %v703_v40 }
 0x105   :  { %31061 = vmatmul.mubr.f32.gmra.mxu0 %v664_v41  ;;  %v705_v43 = vand.u32 4294901760, %v704_v42 }
 0x106   :  { %31073 = vmatprep.mubr.f32.mxu0 %v34652_v36 }
 0x107   :  { %31063 = vmatprep.subr.mxu1 %v705_v43 }
 0x108   :  { %31064 = vmatpush3.msra.mxu1 %v705_v43 }
 0x109   :  { %31066 = vmatmul.mubr.f32.vlgmr.msra.gmra.mxu1 %v640_v0  ;;  %31074 = vmatmul.mubr.f32.vlgmr.msra.gmra.mxu0 %v641_v7 }
 0x10a   :  { %31079 = vmatprep.subr.mxu1 %v595_v32  ;;  %31088 = vmatpush3.msra.mxu0 %v703_v40 }
 0x10b   :  { %31080 = vmatpush3.msra.mxu1 %v595_v32  ;;  %31068 = vmatprep.mubr.f32.mxu1 %v650_v1 }
 0x10c   :  { %31095 = vmatprep.subr.mxu1 %v595_v32  ;;  %31076 = vmatprep.mubr.f32.mxu0 %v651_v18 }
 0x10d   :  { %31069 = vmatmul.mubr.f32.gmra.mxu1 %v660_v8  ;;  %31077 = vmatmul.mubr.f32.gmra.mxu0 %v661_v20 }
 0x10e   :  { %31081 = vmatprep.mubr.f32.mxu1 %v632_v37  ;;  %31089 = vmatprep.mubr.f32.mxu0 %v34649_v35 }
 0x10f   :  { %31103 = vmatprep.subr.mxu0 %v34480_v3 }
 0x111   :  { %31082 = vmatmul.mubr.f32.vlgmr.msra.gmra.mxu1 %v642_v19  ;;  %31090 = vmatmul.mubr.f32.vlgmr.msra.gmra.mxu0 %v640_v0 }
 0x112   :  { %31096 = vmatpush3.msra.mxu1 %v595_v32  ;;  %31084 = vmatprep.mubr.f32.mxu1 %v652_v23 }
 0x113   :  { %31092 = vmatprep.mubr.f32.mxu0 %v650_v1  ;;  %31114 = vmatprep.subr.mxu1 %v34480_v3 }
 0x115   :  { %31085 = vmatmul.mubr.f32.gmra.mxu1 %v662_v27  ;;  %31093 = vmatmul.mubr.f32.gmra.mxu0 %v660_v8 }
 0x116   :  { %31097 = vmatprep.mubr.f32.mxu1 %v34649_v35  ;;  %31111 = vmatprep.mubr.msk.f32.mxu0 %vm34481_vm1, %v34480_v3 }
 0x119   :  { %31098 = vmatmul.mubr.f32.vlgmr.msra.gmra.mxu1 %v640_v0 }
 0x11a   :  { %31100 = vmatprep.mubr.f32.mxu1 %v650_v1 }
 0x11d   :  { %31101 = vmatmul.mubr.f32.gmra.mxu1 %v660_v8  ;;  %v34699_v8 = vand.u32 4294901760, %v1140_v61 }
 0x11e   :  { %31122 = vmatprep.mubr.msk.f32.mxu1 %vm34481_vm1, %v34480_v3 }
 0x11f   :  { %v34702_v30 = vsub.f32 %v1140_v61, %v34699_v8 }
 0x1c1   :  { %v31059_v36 = vpop.f32.mrf.mxu0 }
 0x1c3   :  { %v636_v37 = vpop.f32.mrf.mxu0 }
 0x1c5   :  { %v31062_v45 = vpop.f32.mrf.mxu0 }
 0x1c7   :  { %v656_v46 = vpop.f32.mrf.mxu0 }
 0x1c9   :  { %v31067_v47 = vpop.f32.mrf.mxu1  ;;  %v31075_v48 = vpop.f32.mrf.mxu0 }
 0x1ca   :  { %v749_v35 = vadd.f32 %v31067_v47, %v31059_v36  ;;  %v1213_v36 = vand.u32 4294901760, %v34702_v30 }
 0x1cb   :  { %v742_v49 = vpop.f32.mrf.mxu1  ;;  %v834_v50 = vpop.f32.mrf.mxu0 }
 0x1cc   :  { %v743_v56 = vadd.f32 %v742_v49, %v636_v37  ;;  %v842_v59 = vadd.f32 %v31075_v48, %v749_v35 }
 0x1cd   :  { %v31070_v51 = vpop.f32.mrf.mxu1  ;;  %v31078_v52 = vpop.f32.mrf.mxu0 }
 0x1ce   :  { %v761_v60 = vadd.f32 %v31070_v51, %v31062_v45  ;;  %v835_v0 = vadd.f32 %v834_v50, %v743_v56  ;;  %v1214_v51 = vsub.f32 %v34702_v30, %v1213_v36 }
 0x1cf   :  { %v754_v53 = vpop.f32.mrf.mxu1  ;;  %v848_v54 = vpop.f32.mrf.mxu0 }
 0x1d0   :  { %v755_v1 = vadd.f32 %v754_v53, %v656_v46  ;;  %v856_v18 = vadd.f32 %v31078_v52, %v761_v60 }
 0x1d1   :  { %v31083_v57 = vpop.f32.mrf.mxu1  ;;  %v31091_v58 = vpop.f32.mrf.mxu0 }
 0x1d2   :  { %v938_v2 = vadd.f32 %v31083_v57, %v842_v59  ;;  %v849_v24 = vadd.f32 %v848_v54, %v755_v1  ;;  %v1215_v57 = vand.u32 4294901760, %v1214_v51 }
 0x1d3   :  { %v929_v62 = vpop.f32.mrf.mxu1  ;;  %v1027_v63 = vpop.f32.mrf.mxu0 }
 0x1d4   :  { %v930_v19 = vadd.f32 %v929_v62, %v835_v0  ;;  %v1034_v25 = vadd.f32 %v31091_v58, %v938_v2 }
 0x1d5   :  { %v31086_v7 = vpop.f32.mrf.mxu1  ;;  %v31094_v23 = vpop.f32.mrf.mxu0 }
 0x1d6   :  { %v954_v27 = vadd.f32 %v31086_v7, %v856_v18  ;;  %v1028_v32 = vadd.f32 %v1027_v63, %v930_v19 }
 0x1d7   :  { %v945_v20 = vpop.f32.mrf.mxu1  ;;  %v1039_v38 = vpop.f32.mrf.mxu0 }
 0x1d8   :  { %v946_v33 = vadd.f32 %v945_v20, %v849_v24  ;;  %v1046_v40 = vadd.f32 %v31094_v23, %v954_v27 }
 0x1d9   :  { %v31099_v29 = vpop.f32.mrf.mxu1 }
 0x1da   :  { %v1124_v34 = vadd.f32 %v31099_v29, %v1034_v25  ;;  %v1040_v37 = vadd.f32 %v1039_v38, %v946_v33 }
 0x1db   :  { %v1117_v39 = vpop.f32.mrf.mxu1 }
 0x1dc   :  { %v34704_v41 = vand.u32 4294901760, %v1124_v34  ;;  %v1118_v42 = vadd.f32 %v1117_v39, %v1028_v32 }
 0x1dd   :  { %v31102_v43 = vpop.f32.mrf.mxu1 }
 0x1de   :  { %v34707_v45 = vand.u32 4294901760, %v1118_v42  ;;  %v1136_v46 = vadd.f32 %v31102_v43, %v1046_v40  ;;  %v1261_v48 = vsub.f32 %v1124_v34, %v34704_v41 }
 0x1df   :  { %v1129_v47 = vpop.f32.mrf.mxu1 }
 0x1e0   :  { %v34710_v49 = vand.u32 4294901760, %v1136_v46  ;;  %v1130_v50 = vadd.f32 %v1129_v47, %v1040_v37  ;;  %v1268_v52 = vsub.f32 %v1118_v42, %v34707_v45  ;;  %v1262_v54 = vand.u32 4294901760, %v1261_v48  ;;  %v29213_v47 = vld [vmem:[%s38040_s2 + $0x20] sm:$0xff] }
 0x1e2   :  { %v1247_v35 = vsub.f32 %v1136_v46, %v34710_v49  ;;  %v34717_v53 = vand.u32 4294901760, %v1130_v50  ;;  %31104 = vmatpush3.msra.mxu0 %v34710_v49  ;;  %v1269_v58 = vand.u32 4294901760, %v1268_v52  ;;  %v1263_v61 = vsub.f32 %v1261_v48, %v1262_v54 }
 0x1e3   :  { %31105 = vmatprep.subr.mxu0 %v34480_v3 }
 0x1e4   :  { %v1248_v55 = vand.u32 4294901760, %v1247_v35  ;;  %v1254_v56 = vsub.f32 %v1130_v50, %v34717_v53  ;;  %31106 = vmatpush3.msra.mxu0 %v34717_v53  ;;  %v1270_v1 = vsub.f32 %v1268_v52, %v1269_v58  ;;  %v1264_v2 = vand.u32 4294901760, %v1263_v61 }
 0x1e5   :  { %31107 = vmatprep.subr.mxu0 %v34480_v3 }
 0x1e6   :  { %v1249_v59 = vsub.f32 %v1247_v35, %v1248_v55  ;;  %v1255_v60 = vand.u32 4294901760, %v1254_v56  ;;  %31108 = vmatpush3.msra.mxu0 %v34704_v41  ;;  %v1271_v7 = vand.u32 4294901760, %v1270_v1 }
 0x1e7   :  { %31109 = vmatprep.subr.mxu0 %v34480_v3 }
 0x1e8   :  { %31110 = vmatpush3.msra.mxu0 %v34707_v45  ;;  %v1250_v62 = vand.u32 4294901760, %v1249_v59  ;;  %v1256_v63 = vsub.f32 %v1254_v56, %v1255_v60 }
 0x1e9   :  { %31125 = vmatprep.subr.mxu0 %v34480_v3  ;;  %31112 = vmatmul.mubr.f32.vlgmr.msra.gmra.mxu0 %v1215_v57 }
 0x1ea   :  { %31115 = vmatpush3.msra.mxu1 %v1250_v62  ;;  %31126 = vmatpush3.msra.mxu0 %v1247_v35  ;;  %v1257_v0 = vand.u32 4294901760, %v1256_v63 }
 0x1eb   :  { %31116 = vmatprep.subr.mxu1 %v34480_v3  ;;  %31127 = vmatprep.subr.mxu0 %v34480_v3 }
 0x1ec   :  { %31117 = vmatpush3.msra.mxu1 %v1257_v0  ;;  %31128 = vmatpush3.msra.mxu0 %v1254_v56 }
 0x1ed   :  { %31118 = vmatprep.subr.mxu1 %v34480_v3  ;;  %31129 = vmatprep.subr.mxu0 %v34480_v3 }
 0x1ee   :  { %31119 = vmatpush3.msra.mxu1 %v1264_v2  ;;  %31130 = vmatpush3.msra.mxu0 %v1261_v48  ;;  %v2119_v48 = vsel %vm551_vm2, %v29213_v47, 0 }
 0x1ef   :  { %31120 = vmatprep.subr.mxu1 %v34480_v3  ;;  %31131 = vmatprep.subr.mxu0 %v34480_v3 }
 0x1f0   :  { %31121 = vmatpush3.msra.mxu1 %v1271_v7  ;;  %31132 = vmatpush3.msra.mxu0 %v1268_v52  ;;  %v29214_v7 = vld [vmem:[%s38040_s2 + $0x28] sm:$0xff] }
 0x1f1   :  { %31123 = vmatmul.mubr.f32.vlgmr.msra.gmra.mxu1 %v34699_v8  ;;  %31133 = vmatprep.mubr.msk.f32.mxu0 %vm34481_vm1, %v34480_v3 }
 0x1f2   :  { %31136 = vmatprep.subr.mxu1 %v34480_v3  ;;  %31147 = vmatprep.subr.mxu0 %v34480_v3 }
 0x1f3   :  { %31134 = vmatmul.mubr.f32.vlgmr.msra.gmra.mxu0 %v34702_v30  ;;  %31137 = vmatpush3.msra.mxu1 %v34710_v49 }
 0x1f4   :  { %31148 = vmatpush3.msra.mxu0 %v1248_v55  ;;  %31138 = vmatprep.subr.mxu1 %v34480_v3 }
 0x1f5   :  { %31149 = vmatprep.subr.mxu0 %v34480_v3  ;;  %31139 = vmatpush3.msra.mxu1 %v34717_v53 }
 0x1f6   :  { %31150 = vmatpush3.msra.mxu0 %v1255_v60  ;;  %31140 = vmatprep.subr.mxu1 %v34480_v3 }
 0x1f7   :  { %31151 = vmatprep.subr.mxu0 %v34480_v3  ;;  %31141 = vmatpush3.msra.mxu1 %v34704_v41 }
 0x1f8   :  { %31152 = vmatpush3.msra.mxu0 %v1262_v54  ;;  %31142 = vmatprep.subr.mxu1 %v34480_v3 }
 0x1f9   :  { %31153 = vmatprep.subr.mxu0 %v34480_v3  ;;  %31143 = vmatpush3.msra.mxu1 %v34707_v45 }
 0x1fa   :  { %31144 = vmatprep.mubr.msk.f32.mxu1 %vm34481_vm1, %v34480_v3  ;;  %31154 = vmatpush3.msra.mxu0 %v1269_v58 }
 0x1fb   :  { %31145 = vmatmul.mubr.f32.vlgmr.msra.gmra.mxu1 %v1213_v36  ;;  %31158 = vmatprep.subr.mxu1 %v34480_v3 }
 0x1fc   :  { %31155 = vmatprep.mubr.msk.f32.mxu0 %vm34481_vm1, %v34480_v3  ;;  %31159 = vmatpush3.msra.mxu1 %v34710_v49  ;;  %v34834_v49 = vand.u32 4294901760, %v2119_v48 }
 0x1fd   :  { %31156 = vmatmul.mubr.f32.vlgmr.msra.gmra.mxu0 %v34699_v8  ;;  %31160 = vmatprep.subr.mxu1 %v34480_v3 }
 0x1fe   :  { %31161 = vmatpush3.msra.mxu1 %v34717_v53  ;;  %31166 = vmatprep.mubr.msk.f32.mxu1 %vm34481_vm1, %v34480_v3  ;;  %v34837_v50 = vsub.f32 %v2119_v48, %v34834_v49 }
 0x1ff   :  { %31162 = vmatprep.subr.mxu1 %v34480_v3  ;;  %31169 = vmatprep.subr.mxu0 %v34480_v3 }
 0x200   :  { %31163 = vmatpush3.msra.mxu1 %v34704_v41  ;;  %31170 = vmatpush3.msra.mxu0 %v34531_v4  ;;  %v2198_v51 = vand.u32 4294901760, %v34837_v50 }
 0x201   :  { %31164 = vmatprep.subr.mxu1 %v34480_v3  ;;  %31171 = vmatprep.subr.mxu0 %v34480_v3 }
 0x202   :  { %31165 = vmatpush3.msra.mxu1 %v34707_v45  ;;  %31172 = vmatpush3.msra.mxu0 %v34533_v5  ;;  %v2199_v52 = vsub.f32 %v34837_v50, %v2198_v51 }
 0x203   :  { %31167 = vmatmul.mubr.f32.vlgmr.msra.gmra.mxu1 %v34699_v8  ;;  %31180 = vmatprep.subr.mxu1 %v34480_v3 }
 0x204   :  { %31181 = vmatpush3.msra.mxu1 %v34586_v21  ;;  %31188 = vmatprep.mubr.msk.f32.mxu1 %vm34481_vm1, %v34480_v3  ;;  %v2200_v35 = vand.u32 4294901760, %v2199_v52 }
 0x205   :  { %31182 = vmatprep.subr.mxu1 %v34480_v3  ;;  %31173 = vmatprep.subr.mxu0 %v34480_v3 }
 0x206   :  { %31183 = vmatpush3.msra.mxu1 %v34588_v22  ;;  %31174 = vmatpush3.msra.mxu0 %v34535_v6 }
 0x207   :  { %31184 = vmatprep.subr.mxu1 %v34480_v3  ;;  %31175 = vmatprep.subr.mxu0 %v34480_v3 }
 0x208   :  { %31185 = vmatpush3.msra.mxu1 %v34596_v26  ;;  %31176 = vmatpush3.msra.mxu0 %v34543_v9 }
 0x209   :  { %31186 = vmatprep.subr.mxu1 %v34480_v3  ;;  %31177 = vmatprep.mubr.msk.f32.mxu0 %vm34481_vm1, %v34480_v3 }
 0x20a   :  { %31187 = vmatpush3.msra.mxu1 %v34600_v28  ;;  %31191 = vmatprep.subr.mxu0 %v34480_v3 }
 0x20b   :  { %31202 = vmatprep.subr.mxu1 %v34480_v3 }
 0x2a9   :  { %v1217_v8 = vpop.f32.mrf.mxu0 }
 0x2ab   :  { %v31113_v18 = vpop.f32.mrf.mxu0 }
 0x2ac   :  { %v29215_v18 = vld [vmem:[%s38040_s2 + $0x30] sm:$0xff] }
 0x2b1   :  { %v1308_v19 = vpop.f32.mrf.mxu1 }
 0x2b2   :  { %v1309_v25 = vadd.f32 %v1308_v19, %v1217_v8 }
 0x2b3   :  { %v31124_v20 = vpop.f32.mrf.mxu1  ;;  %v1388_v23 = vpop.f32.mrf.mxu0 }
 0x2b4   :  { %v1389_v29 = vadd.f32 %v1388_v23, %v1309_v25  ;;  %v29216_v25 = vld [vmem:[%s38040_s2 + $0x38] sm:$0xff] }
 0x2b5   :  { %v31135_v24 = vpop.f32.mrf.mxu0 }
 0x2b6   :  { %v2125_v24 = vsel %vm551_vm2, %v29215_v18, 0 }
 0x2bb   :  { %v1465_v27 = vpop.f32.mrf.mxu1 }
 0x2bc   :  { %v1466_v33 = vadd.f32 %v1465_v27, %v1389_v29  ;;  %v2216_v29 = vand.u32 4294901760, %v2125_v24 }
 0x2bd   :  { %v31146_v30 = vpop.f32.mrf.mxu1  ;;  %v1548_v32 = vpop.f32.mrf.mxu0 }
 0x2be   :  { %v1549_v38 = vadd.f32 %v1548_v32, %v1466_v33  ;;  %v2128_v30 = vsel %vm551_vm2, %v29216_v25, 0 }
 0x2bf   :  { %v31157_v34 = vpop.f32.mrf.mxu0  ;;  %v2226_v33 = vand.u32 4294901760, %v2128_v30 }
 0x2c0   :  { %v2217_v34 = vsub.f32 %v2125_v24, %v2216_v29 }
 0x2c3   :  { %v1623_v39 = vpop.f32.mrf.mxu1 }
 0x2c4   :  { %v1624_v40 = vadd.f32 %v1623_v39, %v1549_v38  ;;  %v2227_v39 = vsub.f32 %v2128_v30, %v2226_v33 }
 0x2c5   :  { %v31168_v41 = vpop.f32.mrf.mxu1 }
 0x2c6   :  { %v1627_v42 = vsub.f32 %v34680_v31, %v1624_v40  ;;  %v2218_v40 = vand.u32 4294901760, %v2217_v34  ;;  %v29210_v41 = vld [vmem:[%s38038_s0 + $0x8] sm:$0xff] }
 0x2c8   :  { %v1629_v43 = vsel %vm29_vm0, %v1627_v42, 0 }
 0x2c9   :  { %v1700_v36 = vand.u32 4294901760, %v1629_v43 }
 0x2cb   :  { %v1701_v37 = vsub.f32 %v1629_v43, %v1700_v36  ;;  %31189 = vmatmul.mubr.f32.vlgmr.msra.gmra.mxu1 %v1700_v36  ;;  %v2228_v43 = vand.u32 4294901760, %v2227_v39 }
 0x2cc   :  { %31203 = vmatpush3.msra.mxu1 %v34531_v4  ;;  %31210 = vmatprep.mubr.msk.f32.mxu1 %vm34481_vm1, %v34480_v3 }
 0x2cd   :  { %31204 = vmatprep.subr.mxu1 %v34480_v3  ;;  %v1702_v45 = vand.u32 4294901760, %v1701_v37  ;;  %v2229_v47 = vsub.f32 %v2227_v39, %v2228_v43 }
 0x2ce   :  { %31205 = vmatpush3.msra.mxu1 %v34533_v5 }
 0x2cf   :  { %31206 = vmatprep.subr.mxu1 %v34480_v3  ;;  %v1703_v46 = vsub.f32 %v1701_v37, %v1702_v45 }
 0x2d0   :  { %31207 = vmatpush3.msra.mxu1 %v34535_v6 }
 0x2d1   :  { %31208 = vmatprep.subr.mxu1 %v34480_v3  ;;  %v1704_v31 = vand.u32 4294901760, %v1703_v46 }
 0x2d2   :  { %31209 = vmatpush3.msra.mxu1 %v34543_v9 }
 0x2d3   :  { %31211 = vmatmul.mubr.f32.vlgmr.msra.gmra.mxu1 %v1702_v45  ;;  %31224 = vmatprep.subr.mxu1 %v34480_v3 }
 0x2d4   :  { %31178 = vmatmul.mubr.f32.vlgmr.msra.gmra.mxu0 %v1704_v31  ;;  %31225 = vmatpush3.msra.mxu1 %v34531_v4 }
 0x2d5   :  { %31192 = vmatpush3.msra.mxu0 %v34552_v10  ;;  %31226 = vmatprep.subr.mxu1 %v34480_v3 }
 0x2d6   :  { %31193 = vmatprep.subr.mxu0 %v34480_v3  ;;  %31227 = vmatpush3.msra.mxu1 %v34533_v5 }
 0x2d7   :  { %31194 = vmatpush3.msra.mxu0 %v34555_v11  ;;  %31228 = vmatprep.subr.mxu1 %v34480_v3 }
 0x2d8   :  { %31195 = vmatprep.subr.mxu0 %v34480_v3  ;;  %31229 = vmatpush3.msra.mxu1 %v34535_v6 }
 0x2d9   :  { %31196 = vmatpush3.msra.mxu0 %v34558_v12  ;;  %31230 = vmatprep.subr.mxu1 %v34480_v3 }
 0x2da   :  { %31197 = vmatprep.subr.mxu0 %v34480_v3  ;;  %31199 = vmatprep.mubr.msk.f32.mxu0 %vm34481_vm1, %v34480_v3 }
 0x2db   :  { %31198 = vmatpush3.msra.mxu0 %v34562_v13  ;;  %31231 = vmatpush3.msra.mxu1 %v34543_v9 }
 0x2dc   :  { %31232 = vmatprep.mubr.msk.f32.mxu1 %vm34481_vm1, %v34480_v3  ;;  %31200 = vmatmul.mubr.f32.vlgmr.msra.gmra.mxu0 %v1701_v37  ;;  %v2219_v37 = vsub.f32 %v2217_v34, %v2218_v40 }
 0x2dd   :  { %31213 = vmatprep.subr.mxu0 %v34480_v3  ;;  %31233 = vmatmul.mubr.f32.vlgmr.msra.gmra.mxu1 %v1700_v36 }
 0x2de   :  { %31214 = vmatpush3.msra.mxu0 %v34565_v14  ;;  %31221 = vmatprep.mubr.msk.f32.mxu0 %vm34481_vm1, %v34480_v3  ;;  %v2220_v48 = vand.u32 4294901760, %v2219_v37 }
 0x2df   :  { %31215 = vmatprep.subr.mxu0 %v34480_v3  ;;  %31245 = vmatprep.mubr.f32.mxu1 %v34834_v49 }
 0x2e0   :  { %31216 = vmatpush3.msra.mxu0 %v34569_v15 }
 0x2e1   :  { %31217 = vmatprep.subr.mxu0 %v34480_v3 }
 0x2e2   :  { %31218 = vmatpush3.msra.mxu0 %v34572_v16 }
 0x2e3   :  { %31219 = vmatprep.subr.mxu0 %v34480_v3 }
 0x2e4   :  { %31220 = vmatpush3.msra.mxu0 %v34576_v17 }
 0x2e5   :  { %31222 = vmatmul.mubr.f32.vlgmr.msra.gmra.mxu0 %v1700_v36 }
 0x2e6   :  { %31237 = vmatprep.mubr.f32.mxu0 %v2200_v35 }
 0x38b   :  { %v1797_v53 = vpop.f32.mrf.mxu1 }
 0x38d   :  { %v31190_v54 = vpop.f32.mrf.mxu1 }
 0x393   :  { %v1954_v55 = vpop.f32.mrf.mxu1 }
 0x394   :  { %v1706_v56 = vpop.f32.mrf.mxu0 }
 0x395   :  { %v31212_v57 = vpop.f32.mrf.mxu1  ;;  %v1707_v59 = vadd.f32 %v34662_v44, %v1706_v56  ;;  %v2122_v44 = vsel %vm551_vm2, %v29214_v7, 0 }
 0x396   :  { %v31179_v58 = vpop.f32.mrf.mxu0  ;;  %v2206_v27 = vand.u32 4294901760, %v2122_v44 }
 0x397   :  { %v1798_v62 = vadd.f32 %v1797_v53, %v1707_v59  ;;  %v2230_v53 = vand.u32 4294901760, %v2229_v47 }
 0x398   :  { %v2207_v32 = vsub.f32 %v2122_v44, %v2206_v27 }
 0x39a   :  { %v2208_v38 = vand.u32 4294901760, %v2207_v32 }
 0x39c   :  { %v1877_v60 = vpop.f32.mrf.mxu0  ;;  %v2209_v42 = vsub.f32 %v2207_v32, %v2208_v38 }
 0x39d   :  { %v2112_v61 = vpop.f32.mrf.mxu1  ;;  %v1878_v1 = vadd.f32 %v1877_v60, %v1798_v62 }
 0x39e   :  { %v31201_v63 = vpop.f32.mrf.mxu0  ;;  %v2210_v31 = vand.u32 4294901760, %v2209_v42 }
 0x39f   :  { %v31234_v0 = vpop.f32.mrf.mxu1  ;;  %v1955_v2 = vadd.f32 %v1954_v55, %v1878_v1 }
 0x3a5   :  { %v2037_v8 = vpop.f32.mrf.mxu0 }
 0x3a6   :  { %v2038_v19 = vadd.f32 %v2037_v8, %v1955_v2  ;;  %v29212_v2 = vld [vmem:[%s38039_s1 + $0x8] sm:$0xff] }
 0x3a7   :  { %v31223_v20 = vpop.f32.mrf.mxu0  ;;  %v2706_v44 = vsel %vm29_vm0, %v29212_v2, 0 }
 0x3a8   :  { %v2113_v23 = vadd.f32 %v2112_v61, %v2038_v19 }
 0x3aa   :  { %34404 = vtanh.f32 %v2113_v23 }
 0x3b7   :  { %v34405_v36 = vpop.eup %34404 }
 0x3b8   :  { %v34860_v45 = vadd.f32 %v34405_v36, %v29210_v41 }
 0x3ba   :  { %v2161_v46 = vand.u32 4294901760, %v34860_v45 }
 0x3bc   :  { %31235 = vmatprep.subr.mxu0 %v2161_v46  ;;  %v2268_v52 = vsub.f32 %v34860_v45, %v2161_v46 }
 0x3bd   :  { %31236 = vmatpush3.msra.mxu0 %v2161_v46 }
 0x3be   :  { %31238 = vmatmul.mubr.f32.vlgmr.msra.gmra.mxu0 %v2210_v31  ;;  %31251 = vmatprep.subr.mxu0 %v2268_v52  ;;  %v2269_v35 = vand.u32 4294901760, %v2268_v52 }
 0x3bf   :  { %31252 = vmatpush3.msra.mxu0 %v2268_v52  ;;  %31240 = vmatprep.mubr.f32.mxu0 %v2220_v48 }
 0x3c0   :  { %31267 = vmatprep.subr.mxu0 %v2269_v35  ;;  %v2270_v54 = vsub.f32 %v2268_v52, %v2269_v35 }
 0x3c2   :  { %31241 = vmatmul.mubr.f32.gmra.mxu0 %v2230_v53  ;;  %v2271_v55 = vand.u32 4294901760, %v2270_v54 }
 0x3c3   :  { %31253 = vmatprep.mubr.f32.mxu0 %v34837_v50 }
 0x3c4   :  { %31243 = vmatprep.subr.mxu1 %v2271_v55 }
 0x3c5   :  { %31244 = vmatpush3.msra.mxu1 %v2271_v55 }
 0x3c6   :  { %31246 = vmatmul.mubr.f32.vlgmr.msra.gmra.mxu1 %v2206_v27  ;;  %31254 = vmatmul.mubr.f32.vlgmr.msra.gmra.mxu0 %v2207_v32  ;;  %v34879_v32 = vand.u32 4294901760, %v2706_v44 }
 0x3c7   :  { %31259 = vmatprep.subr.mxu1 %v2161_v46  ;;  %31268 = vmatpush3.msra.mxu0 %v2269_v35 }
 0x3c8   :  { %31260 = vmatpush3.msra.mxu1 %v2161_v46  ;;  %31248 = vmatprep.mubr.f32.mxu1 %v2216_v29  ;;  %v34882_v36 = vsub.f32 %v2706_v44, %v34879_v32 }
 0x3c9   :  { %31275 = vmatprep.subr.mxu1 %v2161_v46  ;;  %31256 = vmatprep.mubr.f32.mxu0 %v2217_v34 }
 0x3ca   :  { %31249 = vmatmul.mubr.f32.gmra.mxu1 %v2226_v33  ;;  %31257 = vmatmul.mubr.f32.gmra.mxu0 %v2227_v39  ;;  %v2779_v55 = vand.u32 4294901760, %v34882_v36 }
 0x3cb   :  { %31261 = vmatprep.mubr.f32.mxu1 %v2198_v51  ;;  %31269 = vmatprep.mubr.f32.mxu0 %v34834_v49 }
 0x3cc   :  { %31283 = vmatprep.subr.mxu0 %v34480_v3 }
 0x3ce   :  { %31262 = vmatmul.mubr.f32.vlgmr.msra.gmra.mxu1 %v2208_v38  ;;  %31270 = vmatmul.mubr.f32.vlgmr.msra.gmra.mxu0 %v2206_v27 }
 0x3cf   :  { %31276 = vmatpush3.msra.mxu1 %v2161_v46  ;;  %31264 = vmatprep.mubr.f32.mxu1 %v2218_v40 }
 0x3d0   :  { %31272 = vmatprep.mubr.f32.mxu0 %v2216_v29  ;;  %31294 = vmatprep.subr.mxu1 %v34480_v3 }
 0x3d2   :  { %31265 = vmatmul.mubr.f32.gmra.mxu1 %v2228_v43  ;;  %31273 = vmatmul.mubr.f32.gmra.mxu0 %v2226_v33 }
 0x3d3   :  { %31277 = vmatprep.mubr.f32.mxu1 %v34834_v49  ;;  %31291 = vmatprep.mubr.msk.f32.mxu0 %vm34481_vm1, %v34480_v3 }
 0x3d6   :  { %31278 = vmatmul.mubr.f32.vlgmr.msra.gmra.mxu1 %v2206_v27 }
 0x3d7   :  { %31280 = vmatprep.mubr.f32.mxu1 %v2216_v29 }
 0x3da   :  { %31281 = vmatmul.mubr.f32.gmra.mxu1 %v2226_v33 }
 0x3db   :  { %31302 = vmatprep.mubr.msk.f32.mxu1 %vm34481_vm1, %v34480_v3 }
 0x47e   :  { %v31239_v50 = vpop.f32.mrf.mxu0 }
 0x480   :  { %v2202_v51 = vpop.f32.mrf.mxu0 }
 0x482   :  { %v31242_v56 = vpop.f32.mrf.mxu0 }
 0x484   :  { %v2222_v57 = vpop.f32.mrf.mxu0 }
 0x486   :  { %v31247_v58 = vpop.f32.mrf.mxu1  ;;  %v31255_v59 = vpop.f32.mrf.mxu0 }
 0x487   :  { %v2315_v49 = vadd.f32 %v31247_v58, %v31239_v50 }
 0x488   :  { %v2308_v60 = vpop.f32.mrf.mxu1  ;;  %v2400_v61 = vpop.f32.mrf.mxu0 }
 0x489   :  { %v2309_v7 = vadd.f32 %v2308_v60, %v2202_v51  ;;  %v2408_v19 = vadd.f32 %v31255_v59, %v2315_v49 }
 0x48a   :  { %v31250_v62 = vpop.f32.mrf.mxu1  ;;  %v31258_v63 = vpop.f32.mrf.mxu0 }
 0x48b   :  { %v2327_v20 = vadd.f32 %v31250_v62, %v31242_v56  ;;  %v2401_v25 = vadd.f32 %v2400_v61, %v2309_v7  ;;  %v2780_v61 = vsub.f32 %v34882_v36, %v2779_v55 }
 0x48c   :  { %v2320_v0 = vpop.f32.mrf.mxu1  ;;  %v2414_v1 = vpop.f32.mrf.mxu0 }
 0x48d   :  { %v2321_v27 = vadd.f32 %v2320_v0, %v2222_v57  ;;  %v2422_v33 = vadd.f32 %v31258_v63, %v2327_v20  ;;  %v2781_v7 = vand.u32 4294901760, %v2780_v61 }
 0x48e   :  { %v31263_v8 = vpop.f32.mrf.mxu1  ;;  %v31271_v18 = vpop.f32.mrf.mxu0 }
 0x48f   :  { %v2504_v29 = vadd.f32 %v31263_v8, %v2408_v19  ;;  %v2415_v40 = vadd.f32 %v2414_v1, %v2321_v27 }
 0x490   :  { %v2495_v23 = vpop.f32.mrf.mxu1  ;;  %v2593_v24 = vpop.f32.mrf.mxu0 }
 0x491   :  { %v2496_v34 = vadd.f32 %v2495_v23, %v2401_v25  ;;  %v2600_v41 = vadd.f32 %v31271_v18, %v2504_v29 }
 0x492   :  { %v31266_v30 = vpop.f32.mrf.mxu1  ;;  %v31274_v39 = vpop.f32.mrf.mxu0 }
 0x493   :  { %v2520_v42 = vadd.f32 %v31266_v30, %v2422_v33  ;;  %v2594_v37 = vadd.f32 %v2593_v24, %v2496_v34 }
 0x494   :  { %v2511_v38 = vpop.f32.mrf.mxu1  ;;  %v2605_v47 = vpop.f32.mrf.mxu0 }
 0x495   :  { %v2512_v46 = vadd.f32 %v2511_v38, %v2415_v40  ;;  %v2612_v52 = vadd.f32 %v31274_v39, %v2520_v42 }
 0x496   :  { %v31279_v43 = vpop.f32.mrf.mxu1 }
 0x497   :  { %v2690_v31 = vadd.f32 %v31279_v43, %v2600_v41  ;;  %v2606_v50 = vadd.f32 %v2605_v47, %v2512_v46 }
 0x498   :  { %v2683_v48 = vpop.f32.mrf.mxu1 }
 0x499   :  { %v34884_v35 = vand.u32 4294901760, %v2690_v31  ;;  %v2684_v53 = vadd.f32 %v2683_v48, %v2594_v37 }
 0x49a   :  { %v31282_v54 = vpop.f32.mrf.mxu1 }
 0x49b   :  { %v34887_v51 = vand.u32 4294901760, %v2684_v53  ;;  %v2702_v56 = vadd.f32 %v31282_v54, %v2612_v52  ;;  %v2827_v58 = vsub.f32 %v2690_v31, %v34884_v35 }
 0x49c   :  { %v2695_v57 = vpop.f32.mrf.mxu1 }
 0x49d   :  { %v34890_v59 = vand.u32 4294901760, %v2702_v56  ;;  %v2696_v60 = vadd.f32 %v2695_v57, %v2606_v50  ;;  %v2834_v62 = vsub.f32 %v2684_v53, %v34887_v51  ;;  %v2828_v0 = vand.u32 4294901760, %v2827_v58 }
 0x49f   :  { %v2813_v63 = vsub.f32 %v2702_v56, %v34890_v59  ;;  %v34897_v49 = vand.u32 4294901760, %v2696_v60  ;;  %31284 = vmatpush3.msra.mxu0 %v34890_v59  ;;  %v2835_v8 = vand.u32 4294901760, %v2834_v62  ;;  %v2829_v20 = vsub.f32 %v2827_v58, %v2828_v0 }
 0x4a0   :  { %31285 = vmatprep.subr.mxu0 %v34480_v3 }
 0x4a1   :  { %v2814_v1 = vand.u32 4294901760, %v2813_v63  ;;  %v2820_v2 = vsub.f32 %v2696_v60, %v34897_v49  ;;  %31286 = vmatpush3.msra.mxu0 %v34897_v49  ;;  %v2836_v25 = vsub.f32 %v2834_v62, %v2835_v8  ;;  %v2830_v27 = vand.u32 4294901760, %v2829_v20 }
 0x4a2   :  { %31287 = vmatprep.subr.mxu0 %v34480_v3 }
 0x4a3   :  { %v2815_v18 = vsub.f32 %v2813_v63, %v2814_v1  ;;  %v2821_v19 = vand.u32 4294901760, %v2820_v2  ;;  %31288 = vmatpush3.msra.mxu0 %v34884_v35  ;;  %v2837_v29 = vand.u32 4294901760, %v2836_v25 }
 0x4a4   :  { %31289 = vmatprep.subr.mxu0 %v34480_v3 }
 0x4a5   :  { %31290 = vmatpush3.msra.mxu0 %v34887_v51  ;;  %v2816_v44 = vand.u32 4294901760, %v2815_v18  ;;  %v2822_v23 = vsub.f32 %v2820_v2, %v2821_v19 }
 0x4a6   :  { %31305 = vmatprep.subr.mxu0 %v34480_v3  ;;  %31292 = vmatmul.mubr.f32.vlgmr.msra.gmra.mxu0 %v2781_v7 }
 0x4a7   :  { %31295 = vmatpush3.msra.mxu1 %v2816_v44  ;;  %31306 = vmatpush3.msra.mxu0 %v2813_v63  ;;  %v2823_v24 = vand.u32 4294901760, %v2822_v23 }
 0x4a8   :  { %31296 = vmatprep.subr.mxu1 %v34480_v3  ;;  %31307 = vmatprep.subr.mxu0 %v34480_v3 }
 0x4a9   :  { %31297 = vmatpush3.msra.mxu1 %v2823_v24  ;;  %31308 = vmatpush3.msra.mxu0 %v2820_v2  ;;  %v29211_v24 = vld [vmem:[%s38038_s0 + $0x10] sm:$0xff] }
 0x4aa   :  { %31298 = vmatprep.subr.mxu1 %v34480_v3  ;;  %31309 = vmatprep.subr.mxu0 %v34480_v3 }
 0x4ab   :  { %31299 = vmatpush3.msra.mxu1 %v2830_v27  ;;  %31310 = vmatpush3.msra.mxu0 %v2827_v58 }
 0x4ac   :  { %31300 = vmatprep.subr.mxu1 %v34480_v3  ;;  %31311 = vmatprep.subr.mxu0 %v34480_v3 }
 0x4ad   :  { %31301 = vmatpush3.msra.mxu1 %v2837_v29  ;;  %31312 = vmatpush3.msra.mxu0 %v2834_v62  ;;  %v35035_v62 = vld [vmem:[%s38043_s5] ss:$0 sm:$0xff] }
 0x4ae   :  { %31303 = vmatmul.mubr.f32.vlgmr.msra.gmra.mxu1 %v34879_v32  ;;  %31313 = vmatprep.mubr.msk.f32.mxu0 %vm34481_vm1, %v34480_v3 }
 0x4af   :  { %31316 = vmatprep.subr.mxu1 %v34480_v3  ;;  %31327 = vmatprep.subr.mxu0 %v34480_v3 }
 0x4b0   :  { %31314 = vmatmul.mubr.f32.vlgmr.msra.gmra.mxu0 %v34882_v36  ;;  %31317 = vmatpush3.msra.mxu1 %v34890_v59 }
 0x4b1   :  { %31328 = vmatpush3.msra.mxu0 %v2814_v1  ;;  %31318 = vmatprep.subr.mxu1 %v34480_v3 }
 0x4b2   :  { %31329 = vmatprep.subr.mxu0 %v34480_v3  ;;  %31319 = vmatpush3.msra.mxu1 %v34897_v49 }
 0x4b3   :  { %31330 = vmatpush3.msra.mxu0 %v2821_v19  ;;  %31320 = vmatprep.subr.mxu1 %v34480_v3 }
 0x4b4   :  { %31331 = vmatprep.subr.mxu0 %v34480_v3  ;;  %31321 = vmatpush3.msra.mxu1 %v34884_v35 }
 0x4b5   :  { %31332 = vmatpush3.msra.mxu0 %v2828_v0  ;;  %31322 = vmatprep.subr.mxu1 %v34480_v3 }
 0x4b6   :  { %31333 = vmatprep.subr.mxu0 %v34480_v3  ;;  %31323 = vmatpush3.msra.mxu1 %v34887_v51 }
 0x4b7   :  { %31324 = vmatprep.mubr.msk.f32.mxu1 %vm34481_vm1, %v34480_v3  ;;  %31334 = vmatpush3.msra.mxu0 %v2835_v8 }
 0x4b8   :  { %31325 = vmatmul.mubr.f32.vlgmr.msra.gmra.mxu1 %v2779_v55  ;;  %31338 = vmatprep.subr.mxu1 %v34480_v3 }
 0x4b9   :  { %31335 = vmatprep.mubr.msk.f32.mxu0 %vm34481_vm1, %v34480_v3  ;;  %31339 = vmatpush3.msra.mxu1 %v34890_v59 }
 0x4ba   :  { %31336 = vmatmul.mubr.f32.vlgmr.msra.gmra.mxu0 %v34879_v32  ;;  %31340 = vmatprep.subr.mxu1 %v34480_v3 }
 0x4bb   :  { %31341 = vmatpush3.msra.mxu1 %v34897_v49  ;;  %31346 = vmatprep.mubr.msk.f32.mxu1 %vm34481_vm1, %v34480_v3 }
 0x4bc   :  { %31342 = vmatprep.subr.mxu1 %v34480_v3  ;;  %31349 = vmatprep.subr.mxu0 %v34480_v3 }
 0x4bd   :  { %31343 = vmatpush3.msra.mxu1 %v34884_v35  ;;  %31350 = vmatpush3.msra.mxu0 %v34531_v4 }
 0x4be   :  { %31344 = vmatprep.subr.mxu1 %v34480_v3  ;;  %31351 = vmatprep.subr.mxu0 %v34480_v3 }
 0x4bf   :  { %31345 = vmatpush3.msra.mxu1 %v34887_v51  ;;  %31352 = vmatpush3.msra.mxu0 %v34533_v5 }
 0x4c0   :  { %31347 = vmatmul.mubr.f32.vlgmr.msra.gmra.mxu1 %v34879_v32  ;;  %31360 = vmatprep.subr.mxu1 %v34480_v3 }
 0x4c1   :  { %31361 = vmatpush3.msra.mxu1 %v34586_v21  ;;  %31368 = vmatprep.mubr.msk.f32.mxu1 %vm34481_vm1, %v34480_v3 }
 0x4c2   :  { %31362 = vmatprep.subr.mxu1 %v34480_v3  ;;  %31353 = vmatprep.subr.mxu0 %v34480_v3 }
 0x4c3   :  { %31363 = vmatpush3.msra.mxu1 %v34588_v22  ;;  %31354 = vmatpush3.msra.mxu0 %v34535_v6 }
 0x4c4   :  { %31364 = vmatprep.subr.mxu1 %v34480_v3  ;;  %31355 = vmatprep.subr.mxu0 %v34480_v3 }
 0x4c5   :  { %31365 = vmatpush3.msra.mxu1 %v34596_v26  ;;  %31356 = vmatpush3.msra.mxu0 %v34543_v9 }
 0x4c6   :  { %31366 = vmatprep.subr.mxu1 %v34480_v3  ;;  %31357 = vmatprep.mubr.msk.f32.mxu0 %vm34481_vm1, %v34480_v3 }
 0x4c7   :  { %31367 = vmatpush3.msra.mxu1 %v34600_v28  ;;  %31371 = vmatprep.subr.mxu0 %v34480_v3 }
 0x4c8   :  { %31382 = vmatprep.subr.mxu1 %v34480_v3 }
 0x566   :  { %v2783_v30 = vpop.f32.mrf.mxu0 }
 0x568   :  { %v31293_v32 = vpop.f32.mrf.mxu0 }
 0x56e   :  { %v2874_v33 = vpop.f32.mrf.mxu1 }
 0x56f   :  { %v2875_v40 = vadd.f32 %v2874_v33, %v2783_v30 }
 0x570   :  { %v31304_v34 = vpop.f32.mrf.mxu1  ;;  %v2954_v38 = vpop.f32.mrf.mxu0 }
 0x571   :  { %v2955_v42 = vadd.f32 %v2954_v38, %v2875_v40 }
 0x572   :  { %v31315_v39 = vpop.f32.mrf.mxu0 }
 0x573   :  { %v29223_v39 = vld [vmem:[%s38040_s2 + $0x40] sm:$0xff] }
 0x574   :  { %v4196_v40 = vsel %vm551_vm2, %v29223_v39, 0 }
 0x578   :  { %v3031_v41 = vpop.f32.mrf.mxu1 }
 0x579   :  { %v3032_v37 = vadd.f32 %v3031_v41, %v2955_v42  ;;  %v35085_v41 = vand.u32 4294901760, %v4196_v40 }
 0x57a   :  { %v31326_v43 = vpop.f32.mrf.mxu1  ;;  %v3114_v36 = vpop.f32.mrf.mxu0 }
 0x57b   :  { %v3115_v31 = vadd.f32 %v3114_v36, %v3032_v37  ;;  %v35088_v42 = vsub.f32 %v4196_v40, %v35085_v41 }
 0x57c   :  { %v31337_v46 = vpop.f32.mrf.mxu0 }
 0x57d   :  { %v4275_v43 = vand.u32 4294901760, %v35088_v42 }
 0x57f   :  { %v4276_v36 = vsub.f32 %v35088_v42, %v4275_v43 }
 0x580   :  { %v3189_v47 = vpop.f32.mrf.mxu1 }
 0x581   :  { %v3190_v48 = vadd.f32 %v3189_v47, %v3115_v31  ;;  %v4277_v37 = vand.u32 4294901760, %v4276_v36 }
 0x582   :  { %v31348_v52 = vpop.f32.mrf.mxu1 }
 0x583   :  { %v3193_v35 = vsub.f32 %v34860_v45, %v3190_v48 }
 0x585   :  { %v3195_v53 = vsel %vm29_vm0, %v3193_v35, 0 }
 0x586   :  { %v3266_v54 = vand.u32 4294901760, %v3195_v53 }
 0x588   :  { %v3267_v55 = vsub.f32 %v3195_v53, %v3266_v54  ;;  %31369 = vmatmul.mubr.f32.vlgmr.msra.gmra.mxu1 %v3266_v54 }
 0x589   :  { %31383 = vmatpush3.msra.mxu1 %v34531_v4  ;;  %31390 = vmatprep.mubr.msk.f32.mxu1 %vm34481_vm1, %v34480_v3 }
 0x58a   :  { %31384 = vmatprep.subr.mxu1 %v34480_v3  ;;  %v3268_v50 = vand.u32 4294901760, %v3267_v55 }
 0x58b   :  { %31385 = vmatpush3.msra.mxu1 %v34533_v5 }
 0x58c   :  { %31386 = vmatprep.subr.mxu1 %v34480_v3  ;;  %v3269_v51 = vsub.f32 %v3267_v55, %v3268_v50 }
 0x58d   :  { %31387 = vmatpush3.msra.mxu1 %v34535_v6 }
 0x58e   :  { %31388 = vmatprep.subr.mxu1 %v34480_v3  ;;  %v3270_v45 = vand.u32 4294901760, %v3269_v51 }
 0x58f   :  { %31389 = vmatpush3.msra.mxu1 %v34543_v9 }
 0x590   :  { %31391 = vmatmul.mubr.f32.vlgmr.msra.gmra.mxu1 %v3268_v50  ;;  %31404 = vmatprep.subr.mxu1 %v34480_v3 }
 0x591   :  { %31358 = vmatmul.mubr.f32.vlgmr.msra.gmra.mxu0 %v3270_v45  ;;  %31405 = vmatpush3.msra.mxu1 %v34531_v4 }
 0x592   :  { %31372 = vmatpush3.msra.mxu0 %v34552_v10  ;;  %31406 = vmatprep.subr.mxu1 %v34480_v3 }
 0x593   :  { %31373 = vmatprep.subr.mxu0 %v34480_v3  ;;  %31407 = vmatpush3.msra.mxu1 %v34533_v5 }
 0x594   :  { %31374 = vmatpush3.msra.mxu0 %v34555_v11  ;;  %31408 = vmatprep.subr.mxu1 %v34480_v3 }
 0x595   :  { %31375 = vmatprep.subr.mxu0 %v34480_v3  ;;  %31409 = vmatpush3.msra.mxu1 %v34535_v6 }
 0x596   :  { %31376 = vmatpush3.msra.mxu0 %v34558_v12  ;;  %31410 = vmatprep.subr.mxu1 %v34480_v3 }
 0x597   :  { %31377 = vmatprep.subr.mxu0 %v34480_v3  ;;  %31379 = vmatprep.mubr.msk.f32.mxu0 %vm34481_vm1, %v34480_v3 }
 0x598   :  { %31378 = vmatpush3.msra.mxu0 %v34562_v13  ;;  %31411 = vmatpush3.msra.mxu1 %v34543_v9 }
 0x599   :  { %31412 = vmatprep.mubr.msk.f32.mxu1 %vm34481_vm1, %v34480_v3  ;;  %31380 = vmatmul.mubr.f32.vlgmr.msra.gmra.mxu0 %v3267_v55 }
 0x59a   :  { %31393 = vmatprep.subr.mxu0 %v34480_v3  ;;  %31413 = vmatmul.mubr.f32.vlgmr.msra.gmra.mxu1 %v3266_v54 }
 0x59b   :  { %31394 = vmatpush3.msra.mxu0 %v34565_v14  ;;  %31401 = vmatprep.mubr.msk.f32.mxu0 %vm34481_vm1, %v34480_v3 }
 0x59c   :  { %31395 = vmatprep.subr.mxu0 %v34480_v3  ;;  %31426 = vmatprep.subr.mxu1 %v34480_v3 }
 0x59d   :  { %31396 = vmatpush3.msra.mxu0 %v34569_v15  ;;  %31427 = vmatpush3.msra.mxu1 %v34586_v21 }
 0x59e   :  { %31397 = vmatprep.subr.mxu0 %v34480_v3  ;;  %31428 = vmatprep.subr.mxu1 %v34480_v3 }
 0x59f   :  { %31398 = vmatpush3.msra.mxu0 %v34572_v16  ;;  %31429 = vmatpush3.msra.mxu1 %v34588_v22 }
 0x5a0   :  { %31399 = vmatprep.subr.mxu0 %v34480_v3  ;;  %31430 = vmatprep.subr.mxu1 %v34480_v3 }
 0x5a1   :  { %31400 = vmatpush3.msra.mxu0 %v34576_v17  ;;  %31431 = vmatpush3.msra.mxu1 %v34596_v26 }
 0x5a2   :  { %31402 = vmatmul.mubr.f32.vlgmr.msra.gmra.mxu0 %v3266_v54  ;;  %31432 = vmatprep.subr.mxu1 %v34480_v3 }
 0x5a3   :  { %31433 = vmatpush3.msra.mxu1 %v34600_v28  ;;  %31415 = vmatprep.subr.mxu0 %v34480_v3 }
 0x5a4   :  { %31434 = vmatprep.mubr.msk.f32.mxu1 %vm34481_vm1, %v34480_v3  ;;  %31448 = vmatprep.subr.mxu1 %v34480_v3 }
 0x5a5   :  { %31416 = vmatpush3.msra.mxu0 %v34531_v4  ;;  %31423 = vmatprep.mubr.msk.f32.mxu0 %vm34481_vm1, %v34480_v3 }
 0x5a6   :  { %31417 = vmatprep.subr.mxu0 %v34480_v3 }
 0x5a7   :  { %31418 = vmatpush3.msra.mxu0 %v34533_v5 }
 0x5a8   :  { %31419 = vmatprep.subr.mxu0 %v34480_v3 }
 0x5a9   :  { %31420 = vmatpush3.msra.mxu0 %v34535_v6 }
 0x5aa   :  { %31421 = vmatprep.subr.mxu0 %v34480_v3 }
 0x5ab   :  { %31422 = vmatpush3.msra.mxu0 %v34543_v9 }
 0x5ac   :  { %31437 = vmatprep.subr.mxu0 %v34480_v3 }
 0x648   :  { %v3363_v56 = vpop.f32.mrf.mxu1 }
 0x64a   :  { %v31370_v57 = vpop.f32.mrf.mxu1 }
 0x650   :  { %v3520_v58 = vpop.f32.mrf.mxu1 }
 0x651   :  { %v3272_v59 = vpop.f32.mrf.mxu0 }
 0x652   :  { %v31392_v60 = vpop.f32.mrf.mxu1  ;;  %v3273_v63 = vadd.f32 %v35035_v62, %v3272_v59 }
 0x653   :  { %v31359_v61 = vpop.f32.mrf.mxu0  ;;  %v29225_v60 = vld [vmem:[%s38040_s2 + $0x50] sm:$0xff] }
 0x654   :  { %v3364_v1 = vadd.f32 %v3363_v56, %v3273_v63 }
 0x659   :  { %v3443_v49 = vpop.f32.mrf.mxu0 }
 0x65a   :  { %v3678_v0 = vpop.f32.mrf.mxu1  ;;  %v3444_v8 = vadd.f32 %v3443_v49, %v3364_v1  ;;  %v4202_v1 = vsel %vm551_vm2, %v29225_v60, 0 }
 0x65b   :  { %v31381_v2 = vpop.f32.mrf.mxu0 }
 0x65c   :  { %v31414_v7 = vpop.f32.mrf.mxu1  ;;  %v3521_v18 = vadd.f32 %v3520_v58, %v3444_v8  ;;  %v29224_v58 = vld [vmem:[%s38040_s2 + $0x48] sm:$0xff]  ;;  %v29226_v2 = vld [vmem:[%s38040_s2 + $0x58] sm:$0xff]  ;;  %v4293_v8 = vand.u32 4294901760, %v4202_v1 }
 0x65d   :  { %v4199_v49 = vsel %vm551_vm2, %v29224_v58, 0  ;;  %v29221_v58 = vld [vmem:[%s38039_s1 + $0x10] sm:$0xff] }
 0x65e   :  { %v4283_v7 = vand.u32 4294901760, %v4199_v49 }
 0x662   :  { %v3603_v19 = vpop.f32.mrf.mxu0 }
 0x663   :  { %v3604_v20 = vadd.f32 %v3603_v19, %v3521_v18  ;;  %v4205_v18 = vsel %vm551_vm2, %v29226_v2, 0  ;;  %v4284_v19 = vsub.f32 %v4199_v49, %v4283_v7 }
 0x664   :  { %v31403_v44 = vpop.f32.mrf.mxu0 }
 0x665   :  { %v3679_v23 = vadd.f32 %v3678_v0, %v3604_v20  ;;  %v4303_v20 = vand.u32 4294901760, %v4205_v18  ;;  %v4294_v44 = vsub.f32 %v4202_v1, %v4293_v8 }
 0x667   :  { %34406 = vtanh.f32 %v3679_v23  ;;  %v4285_v23 = vand.u32 4294901760, %v4284_v19 }
 0x674   :  { %v34407_v25 = vpop.eup %34406 }
 0x675   :  { %v3683_v27 = vadd.f32 %v34407_v25, %v29211_v24  ;;  %v4304_v24 = vsub.f32 %v4205_v18, %v4303_v20  ;;  %v4295_v25 = vand.u32 4294901760, %v4294_v44 }
 0x677   :  { %3684 = vst.msk [vmem:[#allocation3] sm:$0xff] %vm29_vm0, %v3683_v27  ;;  %v3706_v29 = vsel %vm29_vm0, %v3683_v27, 0  ;;  %v29218_v27 = vld [vmem:[%s38038_s0 + $0x18] sm:$0xff] }
 0x678   :  { %v3777_v30 = vand.u32 4294901760, %v3706_v29 }
 0x67a   :  { %v3778_v32 = vsub.f32 %v3706_v29, %v3777_v30  ;;  %31435 = vmatmul.mubr.f32.vlgmr.msra.gmra.mxu1 %v3777_v30  ;;  %v4286_v29 = vsub.f32 %v4284_v19, %v4285_v23 }
 0x67b   :  { %31449 = vmatpush3.msra.mxu1 %v34531_v4  ;;  %31456 = vmatprep.mubr.msk.f32.mxu1 %vm34481_vm1, %v34480_v3 }
 0x67c   :  { %31450 = vmatprep.subr.mxu1 %v34480_v3  ;;  %v3779_v33 = vand.u32 4294901760, %v3778_v32  ;;  %v4287_v39 = vand.u32 4294901760, %v4286_v29 }
 0x67d   :  { %31451 = vmatpush3.msra.mxu1 %v34533_v5 }
 0x67e   :  { %31452 = vmatprep.subr.mxu1 %v34480_v3  ;;  %v3780_v34 = vsub.f32 %v3778_v32, %v3779_v33 }
 0x67f   :  { %31453 = vmatpush3.msra.mxu1 %v34535_v6 }
 0x680   :  { %31454 = vmatprep.subr.mxu1 %v34480_v3  ;;  %v3781_v38 = vand.u32 4294901760, %v3780_v34 }
 0x681   :  { %31455 = vmatpush3.msra.mxu1 %v34543_v9 }
 0x682   :  { %31457 = vmatmul.mubr.f32.vlgmr.msra.gmra.mxu1 %v3779_v33  ;;  %31470 = vmatprep.subr.mxu1 %v34480_v3  ;;  %v4296_v33 = vsub.f32 %v4294_v44, %v4295_v25 }
 0x683   :  { %31424 = vmatmul.mubr.f32.vlgmr.msra.gmra.mxu0 %v3781_v38  ;;  %31471 = vmatpush3.msra.mxu1 %v34531_v4 }
 0x684   :  { %31438 = vmatpush3.msra.mxu0 %v34552_v10  ;;  %31472 = vmatprep.subr.mxu1 %v34480_v3  ;;  %v4297_v36 = vand.u32 4294901760, %v4296_v33 }
 0x685   :  { %31439 = vmatprep.subr.mxu0 %v34480_v3  ;;  %31473 = vmatpush3.msra.mxu1 %v34533_v5 }
 0x686   :  { %31440 = vmatpush3.msra.mxu0 %v34555_v11  ;;  %31474 = vmatprep.subr.mxu1 %v34480_v3 }
 0x687   :  { %31441 = vmatprep.subr.mxu0 %v34480_v3  ;;  %31475 = vmatpush3.msra.mxu1 %v34535_v6 }
 0x688   :  { %31442 = vmatpush3.msra.mxu0 %v34558_v12  ;;  %31476 = vmatprep.subr.mxu1 %v34480_v3 }
 0x689   :  { %31443 = vmatprep.subr.mxu0 %v34480_v3  ;;  %31445 = vmatprep.mubr.msk.f32.mxu0 %vm34481_vm1, %v34480_v3 }
 0x68a   :  { %31444 = vmatpush3.msra.mxu0 %v34562_v13  ;;  %31477 = vmatpush3.msra.mxu1 %v34543_v9 }
 0x68b   :  { %31478 = vmatprep.mubr.msk.f32.mxu1 %vm34481_vm1, %v34480_v3  ;;  %31446 = vmatmul.mubr.f32.vlgmr.msra.gmra.mxu0 %v3778_v32 }
 0x68c   :  { %31459 = vmatprep.subr.mxu0 %v34480_v3  ;;  %31479 = vmatmul.mubr.f32.vlgmr.msra.gmra.mxu1 %v3777_v30 }
 0x68d   :  { %31460 = vmatpush3.msra.mxu0 %v34565_v14  ;;  %31467 = vmatprep.mubr.msk.f32.mxu0 %vm34481_vm1, %v34480_v3 }
 0x68e   :  { %31461 = vmatprep.subr.mxu0 %v34480_v3  ;;  %31491 = vmatprep.mubr.f32.mxu1 %v35085_v41 }
 0x68f   :  { %31462 = vmatpush3.msra.mxu0 %v34569_v15 }
 0x690   :  { %31463 = vmatprep.subr.mxu0 %v34480_v3 }
 0x691   :  { %31464 = vmatpush3.msra.mxu0 %v34572_v16 }
 0x692   :  { %31465 = vmatprep.subr.mxu0 %v34480_v3 }
 0x693   :  { %31466 = vmatpush3.msra.mxu0 %v34576_v17 }
 0x694   :  { %31468 = vmatmul.mubr.f32.vlgmr.msra.gmra.mxu0 %v3777_v30  ;;  %v4305_v30 = vand.u32 4294901760, %v4304_v24 }
 0x695   :  { %31483 = vmatprep.mubr.f32.mxu0 %v4277_v37 }
 0x696   :  { %v4306_v40 = vsub.f32 %v4304_v24, %v4305_v30 }
 0x73a   :  { %v3874_v46 = vpop.f32.mrf.mxu1 }
 0x73c   :  { %v31436_v31 = vpop.f32.mrf.mxu1 }
 0x73d   :  { %v4307_v31 = vand.u32 4294901760, %v4306_v40 }
 0x742   :  { %v4031_v47 = vpop.f32.mrf.mxu1 }
 0x743   :  { %v3783_v48 = vpop.f32.mrf.mxu0 }
 0x744   :  { %v31458_v52 = vpop.f32.mrf.mxu1  ;;  %v3784_v53 = vadd.f32 %v35035_v62, %v3783_v48 }
 0x745   :  { %v31425_v35 = vpop.f32.mrf.mxu0 }
 0x746   :  { %v3875_v50 = vadd.f32 %v3874_v46, %v3784_v53 }
 0x74b   :  { %v3954_v54 = vpop.f32.mrf.mxu0 }
 0x74c   :  { %v4189_v55 = vpop.f32.mrf.mxu1  ;;  %v3955_v56 = vadd.f32 %v3954_v54, %v3875_v50 }
 0x74d   :  { %v31447_v51 = vpop.f32.mrf.mxu0 }
 0x74e   :  { %v31480_v45 = vpop.f32.mrf.mxu1  ;;  %v4032_v57 = vadd.f32 %v4031_v47, %v3955_v56 }
 0x754   :  { %v4114_v59 = vpop.f32.mrf.mxu0 }
 0x755   :  { %v4115_v61 = vadd.f32 %v4114_v59, %v4032_v57 }
 0x756   :  { %v31469_v63 = vpop.f32.mrf.mxu0 }
 0x757   :  { %v4190_v0 = vadd.f32 %v4189_v55, %v4115_v61 }
 0x759   :  { %34408 = vtanh.f32 %v4190_v0  ;;  %v4783_v0 = vsel %vm29_vm0, %v29221_v58, 0 }
 0x766   :  { %v34409_v32 = vpop.eup %34408 }
 0x767   :  { %v35111_v34 = vadd.f32 %v34409_v32, %v29218_v27 }
 0x769   :  { %v4238_v38 = vand.u32 4294901760, %v35111_v34 }
 0x76b   :  { %31481 = vmatprep.subr.mxu0 %v4238_v38  ;;  %v4345_v37 = vsub.f32 %v35111_v34, %v4238_v38 }
 0x76c   :  { %31482 = vmatpush3.msra.mxu0 %v4238_v38 }
 0x76d   :  { %31484 = vmatmul.mubr.f32.vlgmr.msra.gmra.mxu0 %v4287_v39  ;;  %31497 = vmatprep.subr.mxu0 %v4345_v37  ;;  %v4346_v46 = vand.u32 4294901760, %v4345_v37 }
 0x76e   :  { %31498 = vmatpush3.msra.mxu0 %v4345_v37  ;;  %31486 = vmatprep.mubr.f32.mxu0 %v4297_v36 }
 0x76f   :  { %31513 = vmatprep.subr.mxu0 %v4346_v46  ;;  %v4347_v47 = vsub.f32 %v4345_v37, %v4346_v46 }
 0x771   :  { %31487 = vmatmul.mubr.f32.gmra.mxu0 %v4307_v31  ;;  %v4348_v48 = vand.u32 4294901760, %v4347_v47 }
 0x772   :  { %31499 = vmatprep.mubr.f32.mxu0 %v35088_v42 }
 0x773   :  { %31489 = vmatprep.subr.mxu1 %v4348_v48 }
 0x774   :  { %31490 = vmatpush3.msra.mxu1 %v4348_v48 }
 0x775   :  { %31492 = vmatmul.mubr.f32.vlgmr.msra.gmra.mxu1 %v4283_v7  ;;  %31500 = vmatmul.mubr.f32.vlgmr.msra.gmra.mxu0 %v4284_v19 }
 0x776   :  { %31505 = vmatprep.subr.mxu1 %v4238_v38  ;;  %31514 = vmatpush3.msra.mxu0 %v4346_v46 }
 0x777   :  { %31506 = vmatpush3.msra.mxu1 %v4238_v38  ;;  %31494 = vmatprep.mubr.f32.mxu1 %v4293_v8 }
 0x778   :  { %31521 = vmatprep.subr.mxu1 %v4238_v38  ;;  %31502 = vmatprep.mubr.f32.mxu0 %v4294_v44 }
 0x779   :  { %31495 = vmatmul.mubr.f32.gmra.mxu1 %v4303_v20  ;;  %31503 = vmatmul.mubr.f32.gmra.mxu0 %v4304_v24 }
 0x77a   :  { %31507 = vmatprep.mubr.f32.mxu1 %v4275_v43  ;;  %31515 = vmatprep.mubr.f32.mxu0 %v35085_v41 }
 0x77b   :  { %31529 = vmatprep.subr.mxu0 %v34480_v3 }
 0x77d   :  { %31508 = vmatmul.mubr.f32.vlgmr.msra.gmra.mxu1 %v4285_v23  ;;  %31516 = vmatmul.mubr.f32.vlgmr.msra.gmra.mxu0 %v4283_v7 }
 0x77e   :  { %31522 = vmatpush3.msra.mxu1 %v4238_v38  ;;  %31510 = vmatprep.mubr.f32.mxu1 %v4295_v25 }
 0x77f   :  { %31518 = vmatprep.mubr.f32.mxu0 %v4293_v8  ;;  %31540 = vmatprep.subr.mxu1 %v34480_v3 }
 0x781   :  { %31511 = vmatmul.mubr.f32.gmra.mxu1 %v4305_v30  ;;  %31519 = vmatmul.mubr.f32.gmra.mxu0 %v4303_v20 }
 0x782   :  { %31523 = vmatprep.mubr.f32.mxu1 %v35085_v41  ;;  %31537 = vmatprep.mubr.msk.f32.mxu0 %vm34481_vm1, %v34480_v3 }
 0x785   :  { %31524 = vmatmul.mubr.f32.vlgmr.msra.gmra.mxu1 %v4283_v7 }
 0x786   :  { %31526 = vmatprep.mubr.f32.mxu1 %v4293_v8 }
 0x789   :  { %31527 = vmatmul.mubr.f32.gmra.mxu1 %v4303_v20  ;;  %v35130_v20 = vand.u32 4294901760, %v4783_v0 }
 0x78a   :  { %31548 = vmatprep.mubr.msk.f32.mxu1 %vm34481_vm1, %v34480_v3 }
 0x78b   :  { %v35133_v33 = vsub.f32 %v4783_v0, %v35130_v20 }
 0x82d   :  { %v31485_v42 = vpop.f32.mrf.mxu0 }
 0x82f   :  { %v4279_v43 = vpop.f32.mrf.mxu0 }
 0x831   :  { %v31488_v52 = vpop.f32.mrf.mxu0 }
 0x833   :  { %v4299_v35 = vpop.f32.mrf.mxu0 }
 0x835   :  { %v31493_v53 = vpop.f32.mrf.mxu1  ;;  %v31501_v54 = vpop.f32.mrf.mxu0 }
 0x836   :  { %v4392_v41 = vadd.f32 %v31493_v53, %v31485_v42  ;;  %v4856_v42 = vand.u32 4294901760, %v35133_v33 }
 0x837   :  { %v4385_v55 = vpop.f32.mrf.mxu1  ;;  %v4477_v50 = vpop.f32.mrf.mxu0 }
 0x838   :  { %v4386_v59 = vadd.f32 %v4385_v55, %v4279_v43  ;;  %v4485_v63 = vadd.f32 %v31501_v54, %v4392_v41 }
 0x839   :  { %v31496_v51 = vpop.f32.mrf.mxu1  ;;  %v31504_v45 = vpop.f32.mrf.mxu0 }
 0x83a   :  { %v4404_v49 = vadd.f32 %v31496_v51, %v31488_v52  ;;  %v4478_v7 = vadd.f32 %v4477_v50, %v4386_v59  ;;  %v4857_v51 = vsub.f32 %v35133_v33, %v4856_v42 }
 0x83b   :  { %v4397_v56 = vpop.f32.mrf.mxu1  ;;  %v4491_v57 = vpop.f32.mrf.mxu0 }
 0x83c   :  { %v4398_v8 = vadd.f32 %v4397_v56, %v4299_v35  ;;  %v4499_v44 = vadd.f32 %v31504_v45, %v4404_v49 }
 0x83d   :  { %v31509_v60 = vpop.f32.mrf.mxu1  ;;  %v31517_v61 = vpop.f32.mrf.mxu0 }
 0x83e   :  { %v4581_v18 = vadd.f32 %v31509_v60, %v4485_v63  ;;  %v4492_v27 = vadd.f32 %v4491_v57, %v4398_v8  ;;  %v4858_v60 = vand.u32 4294901760, %v4857_v51 }
 0x83f   :  { %v4572_v1 = vpop.f32.mrf.mxu1  ;;  %v4670_v2 = vpop.f32.mrf.mxu0 }
 0x840   :  { %v4573_v23 = vadd.f32 %v4572_v1, %v4478_v7  ;;  %v4677_v29 = vadd.f32 %v31517_v61, %v4581_v18 }
 0x841   :  { %v31512_v19 = vpop.f32.mrf.mxu1  ;;  %v31520_v25 = vpop.f32.mrf.mxu0 }
 0x842   :  { %v4597_v30 = vadd.f32 %v31512_v19, %v4499_v44  ;;  %v4671_v38 = vadd.f32 %v4670_v2, %v4573_v23 }
 0x843   :  { %v4588_v24 = vpop.f32.mrf.mxu1  ;;  %v4682_v36 = vpop.f32.mrf.mxu0 }
 0x844   :  { %v4589_v39 = vadd.f32 %v4588_v24, %v4492_v27  ;;  %v4689_v46 = vadd.f32 %v31520_v25, %v4597_v30 }
 0x845   :  { %v31525_v32 = vpop.f32.mrf.mxu1 }
 0x846   :  { %v4767_v40 = vadd.f32 %v31525_v32, %v4677_v29  ;;  %v4683_v43 = vadd.f32 %v4682_v36, %v4589_v39 }
 0x847   :  { %v4760_v37 = vpop.f32.mrf.mxu1 }
 0x848   :  { %v35135_v31 = vand.u32 4294901760, %v4767_v40  ;;  %v4761_v47 = vadd.f32 %v4760_v37, %v4671_v38 }
 0x849   :  { %v31528_v48 = vpop.f32.mrf.mxu1 }
 0x84a   :  { %v35138_v52 = vand.u32 4294901760, %v4761_v47  ;;  %v4779_v35 = vadd.f32 %v31528_v48, %v4689_v46  ;;  %v4904_v54 = vsub.f32 %v4767_v40, %v35135_v31 }
 0x84b   :  { %v4772_v53 = vpop.f32.mrf.mxu1 }
 0x84c   :  { %v35141_v55 = vand.u32 4294901760, %v4779_v35  ;;  %v4773_v50 = vadd.f32 %v4772_v53, %v4683_v43  ;;  %v4911_v45 = vsub.f32 %v4761_v47, %v35138_v52  ;;  %v4905_v57 = vand.u32 4294901760, %v4904_v54  ;;  %v29227_v53 = vld [vmem:[%s38040_s2 + $0x60] sm:$0xff] }
 0x84e   :  { %v4890_v41 = vsub.f32 %v4779_v35, %v35141_v55  ;;  %v35148_v56 = vand.u32 4294901760, %v4773_v50  ;;  %31530 = vmatpush3.msra.mxu0 %v35141_v55  ;;  %v4912_v61 = vand.u32 4294901760, %v4911_v45  ;;  %v4906_v0 = vsub.f32 %v4904_v54, %v4905_v57 }
 0x84f   :  { %31531 = vmatprep.subr.mxu0 %v34480_v3 }
 0x850   :  { %v4891_v58 = vand.u32 4294901760, %v4890_v41  ;;  %v4897_v59 = vsub.f32 %v4773_v50, %v35148_v56  ;;  %31532 = vmatpush3.msra.mxu0 %v35148_v56  ;;  %v4913_v8 = vsub.f32 %v4911_v45, %v4912_v61  ;;  %v4907_v18 = vand.u32 4294901760, %v4906_v0 }
 0x851   :  { %31533 = vmatprep.subr.mxu0 %v34480_v3 }
 0x852   :  { %v4892_v63 = vsub.f32 %v4890_v41, %v4891_v58  ;;  %v4898_v49 = vand.u32 4294901760, %v4897_v59  ;;  %31534 = vmatpush3.msra.mxu0 %v35135_v31  ;;  %v4914_v19 = vand.u32 4294901760, %v4913_v8 }
 0x853   :  { %31535 = vmatprep.subr.mxu0 %v34480_v3 }
 0x854   :  { %31536 = vmatpush3.msra.mxu0 %v35138_v52  ;;  %v4893_v1 = vand.u32 4294901760, %v4892_v63  ;;  %v4899_v2 = vsub.f32 %v4897_v59, %v4898_v49 }
 0x855   :  { %31551 = vmatprep.subr.mxu0 %v34480_v3  ;;  %31538 = vmatmul.mubr.f32.vlgmr.msra.gmra.mxu0 %v4858_v60 }
 0x856   :  { %31541 = vmatpush3.msra.mxu1 %v4893_v1  ;;  %31552 = vmatpush3.msra.mxu0 %v4890_v41  ;;  %v4900_v7 = vand.u32 4294901760, %v4899_v2 }
 0x857   :  { %31542 = vmatprep.subr.mxu1 %v34480_v3  ;;  %31553 = vmatprep.subr.mxu0 %v34480_v3 }
 0x858   :  { %31543 = vmatpush3.msra.mxu1 %v4900_v7  ;;  %31554 = vmatpush3.msra.mxu0 %v4897_v59 }
 0x859   :  { %31544 = vmatprep.subr.mxu1 %v34480_v3  ;;  %31555 = vmatprep.subr.mxu0 %v34480_v3 }
 0x85a   :  { %31545 = vmatpush3.msra.mxu1 %v4907_v18  ;;  %31556 = vmatpush3.msra.mxu0 %v4904_v54  ;;  %v5762_v54 = vsel %vm551_vm2, %v29227_v53, 0 }
 0x85b   :  { %31546 = vmatprep.subr.mxu1 %v34480_v3  ;;  %31557 = vmatprep.subr.mxu0 %v34480_v3 }
 0x85c   :  { %31547 = vmatpush3.msra.mxu1 %v4914_v19  ;;  %31558 = vmatpush3.msra.mxu0 %v4911_v45  ;;  %v29228_v19 = vld [vmem:[%s38040_s2 + $0x68] sm:$0xff] }
 0x85d   :  { %31549 = vmatmul.mubr.f32.vlgmr.msra.gmra.mxu1 %v35130_v20  ;;  %31559 = vmatprep.mubr.msk.f32.mxu0 %vm34481_vm1, %v34480_v3 }
 0x85e   :  { %31562 = vmatprep.subr.mxu1 %v34480_v3  ;;  %31573 = vmatprep.subr.mxu0 %v34480_v3 }
 0x85f   :  { %31560 = vmatmul.mubr.f32.vlgmr.msra.gmra.mxu0 %v35133_v33  ;;  %31563 = vmatpush3.msra.mxu1 %v35141_v55 }
 0x860   :  { %31574 = vmatpush3.msra.mxu0 %v4891_v58  ;;  %31564 = vmatprep.subr.mxu1 %v34480_v3 }
 0x861   :  { %31575 = vmatprep.subr.mxu0 %v34480_v3  ;;  %31565 = vmatpush3.msra.mxu1 %v35148_v56 }
 0x862   :  { %31576 = vmatpush3.msra.mxu0 %v4898_v49  ;;  %31566 = vmatprep.subr.mxu1 %v34480_v3 }
 0x863   :  { %31577 = vmatprep.subr.mxu0 %v34480_v3  ;;  %31567 = vmatpush3.msra.mxu1 %v35135_v31 }
 0x864   :  { %31578 = vmatpush3.msra.mxu0 %v4905_v57  ;;  %31568 = vmatprep.subr.mxu1 %v34480_v3 }
 0x865   :  { %31579 = vmatprep.subr.mxu0 %v34480_v3  ;;  %31569 = vmatpush3.msra.mxu1 %v35138_v52 }
 0x866   :  { %31570 = vmatprep.mubr.msk.f32.mxu1 %vm34481_vm1, %v34480_v3  ;;  %31580 = vmatpush3.msra.mxu0 %v4912_v61 }
 0x867   :  { %31571 = vmatmul.mubr.f32.vlgmr.msra.gmra.mxu1 %v4856_v42  ;;  %31584 = vmatprep.subr.mxu1 %v34480_v3 }
 0x868   :  { %31581 = vmatprep.mubr.msk.f32.mxu0 %vm34481_vm1, %v34480_v3  ;;  %31585 = vmatpush3.msra.mxu1 %v35141_v55  ;;  %v35265_v55 = vand.u32 4294901760, %v5762_v54 }
 0x869   :  { %31582 = vmatmul.mubr.f32.vlgmr.msra.gmra.mxu0 %v35130_v20  ;;  %31586 = vmatprep.subr.mxu1 %v34480_v3 }
 0x86a   :  { %31587 = vmatpush3.msra.mxu1 %v35148_v56  ;;  %31592 = vmatprep.mubr.msk.f32.mxu1 %vm34481_vm1, %v34480_v3  ;;  %v35268_v50 = vsub.f32 %v5762_v54, %v35265_v55 }
 0x86b   :  { %31588 = vmatprep.subr.mxu1 %v34480_v3  ;;  %31595 = vmatprep.subr.mxu0 %v34480_v3 }
 0x86c   :  { %31589 = vmatpush3.msra.mxu1 %v35135_v31  ;;  %31596 = vmatpush3.msra.mxu0 %v34531_v4  ;;  %v5841_v51 = vand.u32 4294901760, %v35268_v50 }
 0x86d   :  { %31590 = vmatprep.subr.mxu1 %v34480_v3  ;;  %31597 = vmatprep.subr.mxu0 %v34480_v3 }
 0x86e   :  { %31591 = vmatpush3.msra.mxu1 %v35138_v52  ;;  %31598 = vmatpush3.msra.mxu0 %v34533_v5  ;;  %v5842_v45 = vsub.f32 %v35268_v50, %v5841_v51 }
 0x86f   :  { %31593 = vmatmul.mubr.f32.vlgmr.msra.gmra.mxu1 %v35130_v20  ;;  %31606 = vmatprep.subr.mxu1 %v34480_v3 }
 0x870   :  { %31607 = vmatpush3.msra.mxu1 %v34586_v21  ;;  %31614 = vmatprep.mubr.msk.f32.mxu1 %vm34481_vm1, %v34480_v3  ;;  %v5843_v41 = vand.u32 4294901760, %v5842_v45 }
 0x871   :  { %31608 = vmatprep.subr.mxu1 %v34480_v3  ;;  %31599 = vmatprep.subr.mxu0 %v34480_v3 }
 0x872   :  { %31609 = vmatpush3.msra.mxu1 %v34588_v22  ;;  %31600 = vmatpush3.msra.mxu0 %v34535_v6 }
 0x873   :  { %31610 = vmatprep.subr.mxu1 %v34480_v3  ;;  %31601 = vmatprep.subr.mxu0 %v34480_v3 }
 0x874   :  { %31611 = vmatpush3.msra.mxu1 %v34596_v26  ;;  %31602 = vmatpush3.msra.mxu0 %v34543_v9 }
 0x875   :  { %31612 = vmatprep.subr.mxu1 %v34480_v3  ;;  %31603 = vmatprep.mubr.msk.f32.mxu0 %vm34481_vm1, %v34480_v3 }
 0x876   :  { %31613 = vmatpush3.msra.mxu1 %v34600_v28  ;;  %31617 = vmatprep.subr.mxu0 %v34480_v3 }
 0x877   :  { %31628 = vmatprep.subr.mxu1 %v34480_v3 }
 0x915   :  { %v4860_v20 = vpop.f32.mrf.mxu0 }
 0x917   :  { %v31539_v44 = vpop.f32.mrf.mxu0 }
 0x918   :  { %v29229_v44 = vld [vmem:[%s38040_s2 + $0x70] sm:$0xff] }
 0x91d   :  { %v4951_v23 = vpop.f32.mrf.mxu1 }
 0x91e   :  { %v4952_v29 = vadd.f32 %v4951_v23, %v4860_v20 }
 0x91f   :  { %v31550_v24 = vpop.f32.mrf.mxu1  ;;  %v5031_v25 = vpop.f32.mrf.mxu0 }
 0x920   :  { %v5032_v32 = vadd.f32 %v5031_v25, %v4952_v29  ;;  %v29230_v29 = vld [vmem:[%s38040_s2 + $0x78] sm:$0xff] }
 0x921   :  { %v31561_v27 = vpop.f32.mrf.mxu0 }
 0x922   :  { %v5768_v27 = vsel %vm551_vm2, %v29229_v44, 0 }
 0x927   :  { %v5108_v30 = vpop.f32.mrf.mxu1 }
 0x928   :  { %v5109_v39 = vadd.f32 %v5108_v30, %v5032_v32  ;;  %v5859_v32 = vand.u32 4294901760, %v5768_v27 }
 0x929   :  { %v31572_v33 = vpop.f32.mrf.mxu1  ;;  %v5191_v38 = vpop.f32.mrf.mxu0 }
 0x92a   :  { %v5192_v36 = vadd.f32 %v5191_v38, %v5109_v39  ;;  %v5771_v33 = vsel %vm551_vm2, %v29230_v29, 0 }
 0x92b   :  { %v31583_v40 = vpop.f32.mrf.mxu0  ;;  %v5869_v39 = vand.u32 4294901760, %v5771_v33 }
 0x92c   :  { %v5860_v40 = vsub.f32 %v5768_v27, %v5859_v32 }
 0x92f   :  { %v5266_v37 = vpop.f32.mrf.mxu1 }
 0x930   :  { %v5267_v46 = vadd.f32 %v5266_v37, %v5192_v36  ;;  %v5870_v37 = vsub.f32 %v5771_v33, %v5869_v39 }
 0x931   :  { %v31594_v31 = vpop.f32.mrf.mxu1 }
 0x932   :  { %v5270_v47 = vsub.f32 %v35111_v34, %v5267_v46  ;;  %v5861_v46 = vand.u32 4294901760, %v5860_v40  ;;  %v29219_v31 = vld [vmem:[%s38038_s0 + $0x20] sm:$0xff] }
 0x934   :  { %v5272_v48 = vsel %vm29_vm0, %v5270_v47, 0 }
 0x935   :  { %v5343_v42 = vand.u32 4294901760, %v5272_v48 }
 0x937   :  { %v5344_v43 = vsub.f32 %v5272_v48, %v5343_v42  ;;  %31615 = vmatmul.mubr.f32.vlgmr.msra.gmra.mxu1 %v5343_v42  ;;  %v5871_v48 = vand.u32 4294901760, %v5870_v37 }
 0x938   :  { %31629 = vmatpush3.msra.mxu1 %v34531_v4  ;;  %31636 = vmatprep.mubr.msk.f32.mxu1 %vm34481_vm1, %v34480_v3 }
 0x939   :  { %31630 = vmatprep.subr.mxu1 %v34480_v3  ;;  %v5345_v52 = vand.u32 4294901760, %v5344_v43  ;;  %v5872_v53 = vsub.f32 %v5870_v37, %v5871_v48 }
 0x93a   :  { %31631 = vmatpush3.msra.mxu1 %v34533_v5 }
 0x93b   :  { %31632 = vmatprep.subr.mxu1 %v34480_v3  ;;  %v5346_v35 = vsub.f32 %v5344_v43, %v5345_v52 }
 0x93c   :  { %31633 = vmatpush3.msra.mxu1 %v34535_v6 }
 0x93d   :  { %31634 = vmatprep.subr.mxu1 %v34480_v3  ;;  %v5347_v34 = vand.u32 4294901760, %v5346_v35 }
 0x93e   :  { %31635 = vmatpush3.msra.mxu1 %v34543_v9 }
 0x93f   :  { %31637 = vmatmul.mubr.f32.vlgmr.msra.gmra.mxu1 %v5345_v52  ;;  %31650 = vmatprep.subr.mxu1 %v34480_v3 }
 0x940   :  { %31604 = vmatmul.mubr.f32.vlgmr.msra.gmra.mxu0 %v5347_v34  ;;  %31651 = vmatpush3.msra.mxu1 %v34531_v4 }
 0x941   :  { %31618 = vmatpush3.msra.mxu0 %v34552_v10  ;;  %31652 = vmatprep.subr.mxu1 %v34480_v3 }
 0x942   :  { %31619 = vmatprep.subr.mxu0 %v34480_v3  ;;  %31653 = vmatpush3.msra.mxu1 %v34533_v5 }
 0x943   :  { %31620 = vmatpush3.msra.mxu0 %v34555_v11  ;;  %31654 = vmatprep.subr.mxu1 %v34480_v3 }
 0x944   :  { %31621 = vmatprep.subr.mxu0 %v34480_v3  ;;  %31655 = vmatpush3.msra.mxu1 %v34535_v6 }
 0x945   :  { %31622 = vmatpush3.msra.mxu0 %v34558_v12  ;;  %31656 = vmatprep.subr.mxu1 %v34480_v3 }
 0x946   :  { %31623 = vmatprep.subr.mxu0 %v34480_v3  ;;  %31625 = vmatprep.mubr.msk.f32.mxu0 %vm34481_vm1, %v34480_v3 }
 0x947   :  { %31624 = vmatpush3.msra.mxu0 %v34562_v13  ;;  %31657 = vmatpush3.msra.mxu1 %v34543_v9 }
 0x948   :  { %31658 = vmatprep.mubr.msk.f32.mxu1 %vm34481_vm1, %v34480_v3  ;;  %31626 = vmatmul.mubr.f32.vlgmr.msra.gmra.mxu0 %v5344_v43  ;;  %v5862_v43 = vsub.f32 %v5860_v40, %v5861_v46 }
 0x949   :  { %31639 = vmatprep.subr.mxu0 %v34480_v3  ;;  %31659 = vmatmul.mubr.f32.vlgmr.msra.gmra.mxu1 %v5343_v42 }
 0x94a   :  { %31640 = vmatpush3.msra.mxu0 %v34565_v14  ;;  %31647 = vmatprep.mubr.msk.f32.mxu0 %vm34481_vm1, %v34480_v3  ;;  %v5863_v54 = vand.u32 4294901760, %v5862_v43 }
 0x94b   :  { %31641 = vmatprep.subr.mxu0 %v34480_v3  ;;  %31671 = vmatprep.mubr.f32.mxu1 %v35265_v55 }
 0x94c   :  { %31642 = vmatpush3.msra.mxu0 %v34569_v15 }
 0x94d   :  { %31643 = vmatprep.subr.mxu0 %v34480_v3 }
 0x94e   :  { %31644 = vmatpush3.msra.mxu0 %v34572_v16 }
 0x94f   :  { %31645 = vmatprep.subr.mxu0 %v34480_v3 }
 0x950   :  { %31646 = vmatpush3.msra.mxu0 %v34576_v17 }
 0x951   :  { %31648 = vmatmul.mubr.f32.vlgmr.msra.gmra.mxu0 %v5343_v42 }
 0x952   :  { %31663 = vmatprep.mubr.f32.mxu0 %v5843_v41 }
 0x9f7   :  { %v5440_v56 = vpop.f32.mrf.mxu1 }
 0x9f9   :  { %v31616_v57 = vpop.f32.mrf.mxu1 }
 0x9ff   :  { %v5597_v58 = vpop.f32.mrf.mxu1 }
 0xa00   :  { %v5349_v59 = vpop.f32.mrf.mxu0 }
 0xa01   :  { %v31638_v60 = vpop.f32.mrf.mxu1  ;;  %v5350_v63 = vadd.f32 %v35035_v62, %v5349_v59  ;;  %v5765_v62 = vsel %vm551_vm2, %v29228_v19, 0 }
 0xa02   :  { %v31605_v61 = vpop.f32.mrf.mxu0  ;;  %v5849_v30 = vand.u32 4294901760, %v5765_v62 }
 0xa03   :  { %v5441_v1 = vadd.f32 %v5440_v56, %v5350_v63  ;;  %v5873_v56 = vand.u32 4294901760, %v5872_v53 }
 0xa04   :  { %v5850_v38 = vsub.f32 %v5765_v62, %v5849_v30 }
 0xa06   :  { %v5851_v36 = vand.u32 4294901760, %v5850_v38 }
 0xa08   :  { %v5520_v49 = vpop.f32.mrf.mxu0  ;;  %v5852_v47 = vsub.f32 %v5850_v38, %v5851_v36 }
 0xa09   :  { %v5755_v0 = vpop.f32.mrf.mxu1  ;;  %v5521_v8 = vadd.f32 %v5520_v49, %v5441_v1 }
 0xa0a   :  { %v31627_v2 = vpop.f32.mrf.mxu0  ;;  %v5853_v34 = vand.u32 4294901760, %v5852_v47 }
 0xa0b   :  { %v31660_v7 = vpop.f32.mrf.mxu1  ;;  %v5598_v18 = vadd.f32 %v5597_v58, %v5521_v8 }
 0xa11   :  { %v5680_v20 = vpop.f32.mrf.mxu0 }
 0xa12   :  { %v5681_v23 = vadd.f32 %v5680_v20, %v5598_v18  ;;  %v29222_v18 = vld [vmem:[%s38039_s1 + $0x18] sm:$0xff] }
 0xa13   :  { %v31649_v24 = vpop.f32.mrf.mxu0  ;;  %v6349_v62 = vsel %vm29_vm0, %v29222_v18, 0 }
 0xa14   :  { %v5756_v25 = vadd.f32 %v5755_v0, %v5681_v23 }
 0xa16   :  { %34410 = vtanh.f32 %v5756_v25 }
 0xa23   :  { %v34411_v42 = vpop.eup %34410 }
 0xa24   :  { %v35291_v52 = vadd.f32 %v34411_v42, %v29219_v31 }
 0xa26   :  { %v5804_v35 = vand.u32 4294901760, %v35291_v52 }
 0xa28   :  { %31661 = vmatprep.subr.mxu0 %v5804_v35  ;;  %v5911_v45 = vsub.f32 %v35291_v52, %v5804_v35 }
 0xa29   :  { %31662 = vmatpush3.msra.mxu0 %v5804_v35 }
 0xa2a   :  { %31664 = vmatmul.mubr.f32.vlgmr.msra.gmra.mxu0 %v5853_v34  ;;  %31677 = vmatprep.subr.mxu0 %v5911_v45  ;;  %v5912_v41 = vand.u32 4294901760, %v5911_v45 }
 0xa2b   :  { %31678 = vmatpush3.msra.mxu0 %v5911_v45  ;;  %31666 = vmatprep.mubr.f32.mxu0 %v5863_v54 }
 0xa2c   :  { %31693 = vmatprep.subr.mxu0 %v5912_v41  ;;  %v5913_v57 = vsub.f32 %v5911_v45, %v5912_v41 }
 0xa2e   :  { %31667 = vmatmul.mubr.f32.gmra.mxu0 %v5873_v56  ;;  %v5914_v58 = vand.u32 4294901760, %v5913_v57 }
 0xa2f   :  { %31679 = vmatprep.mubr.f32.mxu0 %v35268_v50 }
 0xa30   :  { %31669 = vmatprep.subr.mxu1 %v5914_v58 }
 0xa31   :  { %31670 = vmatpush3.msra.mxu1 %v5914_v58 }
 0xa32   :  { %31672 = vmatmul.mubr.f32.vlgmr.msra.gmra.mxu1 %v5849_v30  ;;  %31680 = vmatmul.mubr.f32.vlgmr.msra.gmra.mxu0 %v5850_v38  ;;  %v35310_v38 = vand.u32 4294901760, %v6349_v62 }
 0xa33   :  { %31685 = vmatprep.subr.mxu1 %v5804_v35  ;;  %31694 = vmatpush3.msra.mxu0 %v5912_v41 }
 0xa34   :  { %31686 = vmatpush3.msra.mxu1 %v5804_v35  ;;  %31674 = vmatprep.mubr.f32.mxu1 %v5859_v32  ;;  %v35313_v42 = vsub.f32 %v6349_v62, %v35310_v38 }
 0xa35   :  { %31701 = vmatprep.subr.mxu1 %v5804_v35  ;;  %31682 = vmatprep.mubr.f32.mxu0 %v5860_v40 }
 0xa36   :  { %31675 = vmatmul.mubr.f32.gmra.mxu1 %v5869_v39  ;;  %31683 = vmatmul.mubr.f32.gmra.mxu0 %v5870_v37  ;;  %v6422_v58 = vand.u32 4294901760, %v35313_v42 }
 0xa37   :  { %31687 = vmatprep.mubr.f32.mxu1 %v5841_v51  ;;  %31695 = vmatprep.mubr.f32.mxu0 %v35265_v55 }
 0xa38   :  { %31709 = vmatprep.subr.mxu0 %v34480_v3 }
 0xa3a   :  { %31688 = vmatmul.mubr.f32.vlgmr.msra.gmra.mxu1 %v5851_v36  ;;  %31696 = vmatmul.mubr.f32.vlgmr.msra.gmra.mxu0 %v5849_v30 }
 0xa3b   :  { %31702 = vmatpush3.msra.mxu1 %v5804_v35  ;;  %31690 = vmatprep.mubr.f32.mxu1 %v5861_v46 }
 0xa3c   :  { %31698 = vmatprep.mubr.f32.mxu0 %v5859_v32  ;;  %31720 = vmatprep.subr.mxu1 %v34480_v3 }
 0xa3e   :  { %31691 = vmatmul.mubr.f32.gmra.mxu1 %v5871_v48  ;;  %31699 = vmatmul.mubr.f32.gmra.mxu0 %v5869_v39 }
 0xa3f   :  { %31703 = vmatprep.mubr.f32.mxu1 %v35265_v55  ;;  %31717 = vmatprep.mubr.msk.f32.mxu0 %vm34481_vm1, %v34480_v3 }
 0xa42   :  { %31704 = vmatmul.mubr.f32.vlgmr.msra.gmra.mxu1 %v5849_v30 }
 0xa43   :  { %31706 = vmatprep.mubr.f32.mxu1 %v5859_v32 }
 0xa46   :  { %31707 = vmatmul.mubr.f32.gmra.mxu1 %v5869_v39 }
 0xa47   :  { %31728 = vmatprep.mubr.msk.f32.mxu1 %vm34481_vm1, %v34480_v3 }
 0xaea   :  { %v31665_v50 = vpop.f32.mrf.mxu0 }
 0xaec   :  { %v5845_v51 = vpop.f32.mrf.mxu0 }
 0xaee   :  { %v31668_v59 = vpop.f32.mrf.mxu0 }
 0xaf0   :  { %v5865_v60 = vpop.f32.mrf.mxu0 }
 0xaf2   :  { %v31673_v61 = vpop.f32.mrf.mxu1  ;;  %v31681_v63 = vpop.f32.mrf.mxu0 }
 0xaf3   :  { %v5958_v55 = vadd.f32 %v31673_v61, %v31665_v50 }
 0xaf4   :  { %v5951_v49 = vpop.f32.mrf.mxu1  ;;  %v6043_v0 = vpop.f32.mrf.mxu0 }
 0xaf5   :  { %v5952_v19 = vadd.f32 %v5951_v49, %v5845_v51  ;;  %v6051_v23 = vadd.f32 %v31681_v63, %v5958_v55 }
 0xaf6   :  { %v31676_v1 = vpop.f32.mrf.mxu1  ;;  %v31684_v2 = vpop.f32.mrf.mxu0 }
 0xaf7   :  { %v5970_v24 = vadd.f32 %v31676_v1, %v31668_v59  ;;  %v6044_v29 = vadd.f32 %v6043_v0, %v5952_v19  ;;  %v6423_v0 = vsub.f32 %v35313_v42, %v6422_v58 }
 0xaf8   :  { %v5963_v7 = vpop.f32.mrf.mxu1  ;;  %v6057_v8 = vpop.f32.mrf.mxu0 }
 0xaf9   :  { %v5964_v30 = vadd.f32 %v5963_v7, %v5865_v60  ;;  %v6065_v39 = vadd.f32 %v31684_v2, %v5970_v24  ;;  %v6424_v19 = vand.u32 4294901760, %v6423_v0 }
 0xafa   :  { %v31689_v20 = vpop.f32.mrf.mxu1  ;;  %v31697_v44 = vpop.f32.mrf.mxu0 }
 0xafb   :  { %v6147_v32 = vadd.f32 %v31689_v20, %v6051_v23  ;;  %v6058_v46 = vadd.f32 %v6057_v8, %v5964_v30 }
 0xafc   :  { %v6138_v25 = vpop.f32.mrf.mxu1  ;;  %v6236_v27 = vpop.f32.mrf.mxu0 }
 0xafd   :  { %v6139_v40 = vadd.f32 %v6138_v25, %v6044_v29  ;;  %v6243_v31 = vadd.f32 %v31697_v44, %v6147_v32 }
 0xafe   :  { %v31692_v33 = vpop.f32.mrf.mxu1  ;;  %v31700_v37 = vpop.f32.mrf.mxu0 }
 0xaff   :  { %v6163_v47 = vadd.f32 %v31692_v33, %v6065_v39  ;;  %v6237_v43 = vadd.f32 %v6236_v27, %v6139_v40 }
 0xb00   :  { %v6154_v36 = vpop.f32.mrf.mxu1  ;;  %v6248_v53 = vpop.f32.mrf.mxu0 }
 0xb01   :  { %v6155_v35 = vadd.f32 %v6154_v36, %v6058_v46  ;;  %v6255_v45 = vadd.f32 %v31700_v37, %v6163_v47 }
 0xb02   :  { %v31705_v48 = vpop.f32.mrf.mxu1 }
 0xb03   :  { %v6333_v34 = vadd.f32 %v31705_v48, %v6243_v31  ;;  %v6249_v50 = vadd.f32 %v6248_v53, %v6155_v35 }
 0xb04   :  { %v6326_v54 = vpop.f32.mrf.mxu1 }
 0xb05   :  { %v35315_v41 = vand.u32 4294901760, %v6333_v34  ;;  %v6327_v56 = vadd.f32 %v6326_v54, %v6237_v43 }
 0xb06   :  { %v31708_v57 = vpop.f32.mrf.mxu1 }
 0xb07   :  { %v35318_v51 = vand.u32 4294901760, %v6327_v56  ;;  %v6345_v59 = vadd.f32 %v31708_v57, %v6255_v45  ;;  %v6470_v61 = vsub.f32 %v6333_v34, %v35315_v41 }
 0xb08   :  { %v6338_v60 = vpop.f32.mrf.mxu1 }
 0xb09   :  { %v35321_v63 = vand.u32 4294901760, %v6345_v59  ;;  %v6339_v49 = vadd.f32 %v6338_v60, %v6249_v50  ;;  %v6477_v1 = vsub.f32 %v6327_v56, %v35318_v51  ;;  %v6471_v7 = vand.u32 4294901760, %v6470_v61 }
 0xb0b   :  { %v6456_v2 = vsub.f32 %v6345_v59, %v35321_v63  ;;  %v35328_v55 = vand.u32 4294901760, %v6339_v49  ;;  %31710 = vmatpush3.msra.mxu0 %v35321_v63  ;;  %v6478_v20 = vand.u32 4294901760, %v6477_v1  ;;  %v6472_v24 = vsub.f32 %v6470_v61, %v6471_v7 }
 0xb0c   :  { %31711 = vmatprep.subr.mxu0 %v34480_v3 }
 0xb0d   :  { %v6457_v8 = vand.u32 4294901760, %v6456_v2  ;;  %v6463_v18 = vsub.f32 %v6339_v49, %v35328_v55  ;;  %31712 = vmatpush3.msra.mxu0 %v35328_v55  ;;  %v6479_v29 = vsub.f32 %v6477_v1, %v6478_v20  ;;  %v6473_v30 = vand.u32 4294901760, %v6472_v24 }
 0xb0e   :  { %31713 = vmatprep.subr.mxu0 %v34480_v3 }
 0xb0f   :  { %v6458_v44 = vsub.f32 %v6456_v2, %v6457_v8  ;;  %v6464_v23 = vand.u32 4294901760, %v6463_v18  ;;  %31714 = vmatpush3.msra.mxu0 %v35315_v41  ;;  %v6480_v32 = vand.u32 4294901760, %v6479_v29 }
 0xb10   :  { %31715 = vmatprep.subr.mxu0 %v34480_v3 }
 0xb11   :  { %31716 = vmatpush3.msra.mxu0 %v35318_v51  ;;  %v6459_v62 = vand.u32 4294901760, %v6458_v44  ;;  %v6465_v25 = vsub.f32 %v6463_v18, %v6464_v23 }
 0xb12   :  { %31731 = vmatprep.subr.mxu0 %v34480_v3  ;;  %31718 = vmatmul.mubr.f32.vlgmr.msra.gmra.mxu0 %v6424_v19 }
 0xb13   :  { %31721 = vmatpush3.msra.mxu1 %v6459_v62  ;;  %31732 = vmatpush3.msra.mxu0 %v6456_v2  ;;  %v6466_v27 = vand.u32 4294901760, %v6465_v25 }
 0xb14   :  { %31722 = vmatprep.subr.mxu1 %v34480_v3  ;;  %31733 = vmatprep.subr.mxu0 %v34480_v3 }
 0xb15   :  { %31723 = vmatpush3.msra.mxu1 %v6466_v27  ;;  %31734 = vmatpush3.msra.mxu0 %v6463_v18  ;;  %v29220_v27 = vld [vmem:[%s38038_s0 + $0x28] sm:$0xff] }
 0xb16   :  { %31724 = vmatprep.subr.mxu1 %v34480_v3  ;;  %31735 = vmatprep.subr.mxu0 %v34480_v3 }
 0xb17   :  { %31725 = vmatpush3.msra.mxu1 %v6473_v30  ;;  %31736 = vmatpush3.msra.mxu0 %v6470_v61 }
 0xb18   :  { %31726 = vmatprep.subr.mxu1 %v34480_v3  ;;  %31737 = vmatprep.subr.mxu0 %v34480_v3 }
 0xb19   :  { %31727 = vmatpush3.msra.mxu1 %v6480_v32  ;;  %31738 = vmatpush3.msra.mxu0 %v6477_v1  ;;  %v35466_v1 = vld [vmem:[%s38043_s5] ss:$0 sm:$0xff] }
 0xb1a   :  { %31729 = vmatmul.mubr.f32.vlgmr.msra.gmra.mxu1 %v35310_v38  ;;  %31739 = vmatprep.mubr.msk.f32.mxu0 %vm34481_vm1, %v34480_v3 }
 0xb1b   :  { %31742 = vmatprep.subr.mxu1 %v34480_v3  ;;  %31753 = vmatprep.subr.mxu0 %v34480_v3 }
 0xb1c   :  { %31740 = vmatmul.mubr.f32.vlgmr.msra.gmra.mxu0 %v35313_v42  ;;  %31743 = vmatpush3.msra.mxu1 %v35321_v63 }
 0xb1d   :  { %31754 = vmatpush3.msra.mxu0 %v6457_v8  ;;  %31744 = vmatprep.subr.mxu1 %v34480_v3 }
 0xb1e   :  { %31755 = vmatprep.subr.mxu0 %v34480_v3  ;;  %31745 = vmatpush3.msra.mxu1 %v35328_v55 }
 0xb1f   :  { %31756 = vmatpush3.msra.mxu0 %v6464_v23  ;;  %31746 = vmatprep.subr.mxu1 %v34480_v3 }
 0xb20   :  { %31757 = vmatprep.subr.mxu0 %v34480_v3  ;;  %31747 = vmatpush3.msra.mxu1 %v35315_v41 }
 0xb21   :  { %31758 = vmatpush3.msra.mxu0 %v6471_v7  ;;  %31748 = vmatprep.subr.mxu1 %v34480_v3 }
 0xb22   :  { %31759 = vmatprep.subr.mxu0 %v34480_v3  ;;  %31749 = vmatpush3.msra.mxu1 %v35318_v51 }
 0xb23   :  { %31750 = vmatprep.mubr.msk.f32.mxu1 %vm34481_vm1, %v34480_v3  ;;  %31760 = vmatpush3.msra.mxu0 %v6478_v20 }
 0xb24   :  { %31751 = vmatmul.mubr.f32.vlgmr.msra.gmra.mxu1 %v6422_v58  ;;  %31764 = vmatprep.subr.mxu1 %v34480_v3 }
 0xb25   :  { %31761 = vmatprep.mubr.msk.f32.mxu0 %vm34481_vm1, %v34480_v3  ;;  %31765 = vmatpush3.msra.mxu1 %v35321_v63 }
 0xb26   :  { %31762 = vmatmul.mubr.f32.vlgmr.msra.gmra.mxu0 %v35310_v38  ;;  %31766 = vmatprep.subr.mxu1 %v34480_v3 }
 0xb27   :  { %31767 = vmatpush3.msra.mxu1 %v35328_v55  ;;  %31772 = vmatprep.mubr.msk.f32.mxu1 %vm34481_vm1, %v34480_v3 }
 0xb28   :  { %31768 = vmatprep.subr.mxu1 %v34480_v3  ;;  %31775 = vmatprep.subr.mxu0 %v34480_v3 }
 0xb29   :  { %31769 = vmatpush3.msra.mxu1 %v35315_v41  ;;  %31776 = vmatpush3.msra.mxu0 %v34531_v4 }
 0xb2a   :  { %31770 = vmatprep.subr.mxu1 %v34480_v3  ;;  %31777 = vmatprep.subr.mxu0 %v34480_v3 }
 0xb2b   :  { %31771 = vmatpush3.msra.mxu1 %v35318_v51  ;;  %31778 = vmatpush3.msra.mxu0 %v34533_v5 }
 0xb2c   :  { %31773 = vmatmul.mubr.f32.vlgmr.msra.gmra.mxu1 %v35310_v38  ;;  %31786 = vmatprep.subr.mxu1 %v34480_v3 }
 0xb2d   :  { %31787 = vmatpush3.msra.mxu1 %v34586_v21  ;;  %31794 = vmatprep.mubr.msk.f32.mxu1 %vm34481_vm1, %v34480_v3 }
 0xb2e   :  { %31788 = vmatprep.subr.mxu1 %v34480_v3  ;;  %31779 = vmatprep.subr.mxu0 %v34480_v3 }
 0xb2f   :  { %31789 = vmatpush3.msra.mxu1 %v34588_v22  ;;  %31780 = vmatpush3.msra.mxu0 %v34535_v6 }
 0xb30   :  { %31790 = vmatprep.subr.mxu1 %v34480_v3  ;;  %31781 = vmatprep.subr.mxu0 %v34480_v3 }
 0xb31   :  { %31791 = vmatpush3.msra.mxu1 %v34596_v26  ;;  %31782 = vmatpush3.msra.mxu0 %v34543_v9 }
 0xb32   :  { %31792 = vmatprep.subr.mxu1 %v34480_v3  ;;  %31783 = vmatprep.mubr.msk.f32.mxu0 %vm34481_vm1, %v34480_v3 }
 0xb33   :  { %31793 = vmatpush3.msra.mxu1 %v34600_v28  ;;  %31797 = vmatprep.subr.mxu0 %v34480_v3 }
 0xb34   :  { %31808 = vmatprep.subr.mxu1 %v34480_v3 }
 0xbd2   :  { %v6426_v33 = vpop.f32.mrf.mxu0 }
 0xbd4   :  { %v31719_v38 = vpop.f32.mrf.mxu0 }
 0xbda   :  { %v6517_v39 = vpop.f32.mrf.mxu1 }
 0xbdb   :  { %v6518_v46 = vadd.f32 %v6517_v39, %v6426_v33 }
 0xbdc   :  { %v31730_v40 = vpop.f32.mrf.mxu1  ;;  %v6597_v36 = vpop.f32.mrf.mxu0 }
 0xbdd   :  { %v6598_v47 = vadd.f32 %v6597_v36, %v6518_v46 }
 0xbde   :  { %v31741_v37 = vpop.f32.mrf.mxu0 }
 0xbdf   :  { %v29236_v37 = vld [vmem:[%s38040_s2 + $0x80] sm:$0xff] }
 0xbe0   :  { %v7840_v46 = vsel %vm551_vm2, %v29236_v37, 0 }
 0xbe4   :  { %v6674_v31 = vpop.f32.mrf.mxu1 }
 0xbe5   :  { %v6675_v43 = vadd.f32 %v6674_v31, %v6598_v47  ;;  %v35516_v31 = vand.u32 4294901760, %v7840_v46 }
 0xbe6   :  { %v31752_v48 = vpop.f32.mrf.mxu1  ;;  %v6757_v42 = vpop.f32.mrf.mxu0 }
 0xbe7   :  { %v6758_v34 = vadd.f32 %v6757_v42, %v6675_v43  ;;  %v35519_v47 = vsub.f32 %v7840_v46, %v35516_v31 }
 0xbe8   :  { %v31763_v35 = vpop.f32.mrf.mxu0 }
 0xbe9   :  { %v7919_v48 = vand.u32 4294901760, %v35519_v47 }
 0xbeb   :  { %v7920_v42 = vsub.f32 %v35519_v47, %v7919_v48 }
 0xbec   :  { %v6832_v53 = vpop.f32.mrf.mxu1 }
 0xbed   :  { %v6833_v54 = vadd.f32 %v6832_v53, %v6758_v34  ;;  %v7921_v43 = vand.u32 4294901760, %v7920_v42 }
 0xbee   :  { %v31774_v45 = vpop.f32.mrf.mxu1 }
 0xbef   :  { %v6836_v41 = vsub.f32 %v35291_v52, %v6833_v54 }
 0xbf1   :  { %v6838_v56 = vsel %vm29_vm0, %v6836_v41, 0 }
 0xbf2   :  { %v6909_v57 = vand.u32 4294901760, %v6838_v56 }
 0xbf4   :  { %v6910_v58 = vsub.f32 %v6838_v56, %v6909_v57  ;;  %31795 = vmatmul.mubr.f32.vlgmr.msra.gmra.mxu1 %v6909_v57 }
 0xbf5   :  { %31809 = vmatpush3.msra.mxu1 %v34531_v4  ;;  %31816 = vmatprep.mubr.msk.f32.mxu1 %vm34481_vm1, %v34480_v3 }
 0xbf6   :  { %31810 = vmatprep.subr.mxu1 %v34480_v3  ;;  %v6911_v50 = vand.u32 4294901760, %v6910_v58 }
 0xbf7   :  { %31811 = vmatpush3.msra.mxu1 %v34533_v5 }
 0xbf8   :  { %31812 = vmatprep.subr.mxu1 %v34480_v3  ;;  %v6912_v51 = vsub.f32 %v6910_v58, %v6911_v50 }
 0xbf9   :  { %31813 = vmatpush3.msra.mxu1 %v34535_v6 }
 0xbfa   :  { %31814 = vmatprep.subr.mxu1 %v34480_v3  ;;  %v6913_v52 = vand.u32 4294901760, %v6912_v51 }
 0xbfb   :  { %31815 = vmatpush3.msra.mxu1 %v34543_v9 }
 0xbfc   :  { %31817 = vmatmul.mubr.f32.vlgmr.msra.gmra.mxu1 %v6911_v50  ;;  %31830 = vmatprep.subr.mxu1 %v34480_v3 }
 0xbfd   :  { %31784 = vmatmul.mubr.f32.vlgmr.msra.gmra.mxu0 %v6913_v52  ;;  %31831 = vmatpush3.msra.mxu1 %v34531_v4 }
 0xbfe   :  { %31798 = vmatpush3.msra.mxu0 %v34552_v10  ;;  %31832 = vmatprep.subr.mxu1 %v34480_v3 }
 0xbff   :  { %31799 = vmatprep.subr.mxu0 %v34480_v3  ;;  %31833 = vmatpush3.msra.mxu1 %v34533_v5 }
 0xc00   :  { %31800 = vmatpush3.msra.mxu0 %v34555_v11  ;;  %31834 = vmatprep.subr.mxu1 %v34480_v3 }
 0xc01   :  { %31801 = vmatprep.subr.mxu0 %v34480_v3  ;;  %31835 = vmatpush3.msra.mxu1 %v34535_v6 }
 0xc02   :  { %31802 = vmatpush3.msra.mxu0 %v34558_v12  ;;  %31836 = vmatprep.subr.mxu1 %v34480_v3 }
 0xc03   :  { %31803 = vmatprep.subr.mxu0 %v34480_v3  ;;  %31805 = vmatprep.mubr.msk.f32.mxu0 %vm34481_vm1, %v34480_v3 }
 0xc04   :  { %31804 = vmatpush3.msra.mxu0 %v34562_v13  ;;  %31837 = vmatpush3.msra.mxu1 %v34543_v9 }
 0xc05   :  { %31838 = vmatprep.mubr.msk.f32.mxu1 %vm34481_vm1, %v34480_v3  ;;  %31806 = vmatmul.mubr.f32.vlgmr.msra.gmra.mxu0 %v6910_v58 }
 0xc06   :  { %31819 = vmatprep.subr.mxu0 %v34480_v3  ;;  %31839 = vmatmul.mubr.f32.vlgmr.msra.gmra.mxu1 %v6909_v57 }
 0xc07   :  { %31820 = vmatpush3.msra.mxu0 %v34565_v14  ;;  %31827 = vmatprep.mubr.msk.f32.mxu0 %vm34481_vm1, %v34480_v3 }
 0xc08   :  { %31821 = vmatprep.subr.mxu0 %v34480_v3  ;;  %31852 = vmatprep.subr.mxu1 %v34480_v3 }
 0xc09   :  { %31822 = vmatpush3.msra.mxu0 %v34569_v15  ;;  %31853 = vmatpush3.msra.mxu1 %v34586_v21 }
 0xc0a   :  { %31823 = vmatprep.subr.mxu0 %v34480_v3  ;;  %31854 = vmatprep.subr.mxu1 %v34480_v3 }
 0xc0b   :  { %31824 = vmatpush3.msra.mxu0 %v34572_v16  ;;  %31855 = vmatpush3.msra.mxu1 %v34588_v22 }
 0xc0c   :  { %31825 = vmatprep.subr.mxu0 %v34480_v3  ;;  %31856 = vmatprep.subr.mxu1 %v34480_v3 }
 0xc0d   :  { %31826 = vmatpush3.msra.mxu0 %v34576_v17  ;;  %31857 = vmatpush3.msra.mxu1 %v34596_v26 }
 0xc0e   :  { %31828 = vmatmul.mubr.f32.vlgmr.msra.gmra.mxu0 %v6909_v57  ;;  %31858 = vmatprep.subr.mxu1 %v34480_v3 }
 0xc0f   :  { %31859 = vmatpush3.msra.mxu1 %v34600_v28  ;;  %31841 = vmatprep.subr.mxu0 %v34480_v3 }
 0xc10   :  { %31860 = vmatprep.mubr.msk.f32.mxu1 %vm34481_vm1, %v34480_v3  ;;  %31874 = vmatprep.subr.mxu1 %v34480_v3 }
 0xc11   :  { %31842 = vmatpush3.msra.mxu0 %v34531_v4  ;;  %31849 = vmatprep.mubr.msk.f32.mxu0 %vm34481_vm1, %v34480_v3 }
 0xc12   :  { %31843 = vmatprep.subr.mxu0 %v34480_v3 }
 0xc13   :  { %31844 = vmatpush3.msra.mxu0 %v34533_v5 }
 0xc14   :  { %31845 = vmatprep.subr.mxu0 %v34480_v3 }
 0xc15   :  { %31846 = vmatpush3.msra.mxu0 %v34535_v6 }
 0xc16   :  { %31847 = vmatprep.subr.mxu0 %v34480_v3 }
 0xc17   :  { %31848 = vmatpush3.msra.mxu0 %v34543_v9 }
 0xc18   :  { %31863 = vmatprep.subr.mxu0 %v34480_v3 }
 0xcb4   :  { %v7006_v59 = vpop.f32.mrf.mxu1 }
 0xcb6   :  { %v31796_v60 = vpop.f32.mrf.mxu1 }
 0xcbc   :  { %v7163_v61 = vpop.f32.mrf.mxu1 }
 0xcbd   :  { %v6915_v63 = vpop.f32.mrf.mxu0 }
 0xcbe   :  { %v31818_v49 = vpop.f32.mrf.mxu1  ;;  %v6916_v2 = vadd.f32 %v35466_v1, %v6915_v63 }
 0xcbf   :  { %v31785_v0 = vpop.f32.mrf.mxu0  ;;  %v29238_v49 = vld [vmem:[%s38040_s2 + $0x90] sm:$0xff] }
 0xcc0   :  { %v7007_v8 = vadd.f32 %v7006_v59, %v6916_v2 }
 0xcc5   :  { %v7086_v55 = vpop.f32.mrf.mxu0 }
 0xcc6   :  { %v7321_v7 = vpop.f32.mrf.mxu1  ;;  %v7087_v20 = vadd.f32 %v7086_v55, %v7007_v8  ;;  %v7846_v8 = vsel %vm551_vm2, %v29238_v49, 0 }
 0xcc7   :  { %v31807_v18 = vpop.f32.mrf.mxu0 }
 0xcc8   :  { %v31840_v19 = vpop.f32.mrf.mxu1  ;;  %v7164_v44 = vadd.f32 %v7163_v61, %v7087_v20  ;;  %v29237_v61 = vld [vmem:[%s38040_s2 + $0x88] sm:$0xff]  ;;  %v29239_v18 = vld [vmem:[%s38040_s2 + $0x98] sm:$0xff]  ;;  %v7937_v20 = vand.u32 4294901760, %v7846_v8 }
 0xcc9   :  { %v7843_v55 = vsel %vm551_vm2, %v29237_v61, 0  ;;  %v29234_v61 = vld [vmem:[%s38039_s1 + $0x20] sm:$0xff] }
 0xcca   :  { %v7927_v19 = vand.u32 4294901760, %v7843_v55 }
 0xcce   :  { %v7246_v23 = vpop.f32.mrf.mxu0 }
 0xccf   :  { %v7247_v24 = vadd.f32 %v7246_v23, %v7164_v44  ;;  %v7849_v44 = vsel %vm551_vm2, %v29239_v18, 0  ;;  %v7928_v23 = vsub.f32 %v7843_v55, %v7927_v19 }
 0xcd0   :  { %v31829_v62 = vpop.f32.mrf.mxu0 }
 0xcd1   :  { %v7322_v25 = vadd.f32 %v7321_v7, %v7247_v24  ;;  %v7947_v24 = vand.u32 4294901760, %v7849_v44  ;;  %v7938_v62 = vsub.f32 %v7846_v8, %v7937_v20 }
 0xcd3   :  { %34412 = vtanh.f32 %v7322_v25  ;;  %v7929_v25 = vand.u32 4294901760, %v7928_v23 }
 0xce0   :  { %v34413_v29 = vpop.eup %34412 }
 0xce1   :  { %v7326_v30 = vadd.f32 %v34413_v29, %v29220_v27  ;;  %v7948_v27 = vsub.f32 %v7849_v44, %v7947_v24  ;;  %v7939_v29 = vand.u32 4294901760, %v7938_v62 }
 0xce3   :  { %7328 = vst.msk [vmem:[#allocation3 + $0x8] sm:$0xff] %vm29_vm0, %v7326_v30  ;;  %v7350_v32 = vsel %vm29_vm0, %v7326_v30, 0  ;;  %v29231_v30 = vld [vmem:[%s38038_s0 + $0x30] sm:$0xff] }
 0xce4   :  { %v7421_v33 = vand.u32 4294901760, %v7350_v32 }
 0xce6   :  { %v7422_v38 = vsub.f32 %v7350_v32, %v7421_v33  ;;  %31861 = vmatmul.mubr.f32.vlgmr.msra.gmra.mxu1 %v7421_v33  ;;  %v7930_v32 = vsub.f32 %v7928_v23, %v7929_v25 }
 0xce7   :  { %31875 = vmatpush3.msra.mxu1 %v34531_v4  ;;  %31882 = vmatprep.mubr.msk.f32.mxu1 %vm34481_vm1, %v34480_v3 }
 0xce8   :  { %31876 = vmatprep.subr.mxu1 %v34480_v3  ;;  %v7423_v39 = vand.u32 4294901760, %v7422_v38  ;;  %v7931_v37 = vand.u32 4294901760, %v7930_v32 }
 0xce9   :  { %31877 = vmatpush3.msra.mxu1 %v34533_v5 }
 0xcea   :  { %31878 = vmatprep.subr.mxu1 %v34480_v3  ;;  %v7424_v40 = vsub.f32 %v7422_v38, %v7423_v39 }
 0xceb   :  { %31879 = vmatpush3.msra.mxu1 %v34535_v6 }
 0xcec   :  { %31880 = vmatprep.subr.mxu1 %v34480_v3  ;;  %v7425_v36 = vand.u32 4294901760, %v7424_v40 }
 0xced   :  { %31881 = vmatpush3.msra.mxu1 %v34543_v9 }
 0xcee   :  { %31883 = vmatmul.mubr.f32.vlgmr.msra.gmra.mxu1 %v7423_v39  ;;  %31896 = vmatprep.subr.mxu1 %v34480_v3  ;;  %v7940_v39 = vsub.f32 %v7938_v62, %v7939_v29 }
 0xcef   :  { %31850 = vmatmul.mubr.f32.vlgmr.msra.gmra.mxu0 %v7425_v36  ;;  %31897 = vmatpush3.msra.mxu1 %v34531_v4 }
 0xcf0   :  { %31864 = vmatpush3.msra.mxu0 %v34552_v10  ;;  %31898 = vmatprep.subr.mxu1 %v34480_v3  ;;  %v7941_v42 = vand.u32 4294901760, %v7940_v39 }
 0xcf1   :  { %31865 = vmatprep.subr.mxu0 %v34480_v3  ;;  %31899 = vmatpush3.msra.mxu1 %v34533_v5 }
 0xcf2   :  { %31866 = vmatpush3.msra.mxu0 %v34555_v11  ;;  %31900 = vmatprep.subr.mxu1 %v34480_v3 }
 0xcf3   :  { %31867 = vmatprep.subr.mxu0 %v34480_v3  ;;  %31901 = vmatpush3.msra.mxu1 %v34535_v6 }
 0xcf4   :  { %31868 = vmatpush3.msra.mxu0 %v34558_v12  ;;  %31902 = vmatprep.subr.mxu1 %v34480_v3 }
 0xcf5   :  { %31869 = vmatprep.subr.mxu0 %v34480_v3  ;;  %31871 = vmatprep.mubr.msk.f32.mxu0 %vm34481_vm1, %v34480_v3 }
 0xcf6   :  { %31870 = vmatpush3.msra.mxu0 %v34562_v13  ;;  %31903 = vmatpush3.msra.mxu1 %v34543_v9 }
 0xcf7   :  { %31904 = vmatprep.mubr.msk.f32.mxu1 %vm34481_vm1, %v34480_v3  ;;  %31872 = vmatmul.mubr.f32.vlgmr.msra.gmra.mxu0 %v7422_v38 }
 0xcf8   :  { %31885 = vmatprep.subr.mxu0 %v34480_v3  ;;  %31905 = vmatmul.mubr.f32.vlgmr.msra.gmra.mxu1 %v7421_v33 }
 0xcf9   :  { %31886 = vmatpush3.msra.mxu0 %v34565_v14  ;;  %31893 = vmatprep.mubr.msk.f32.mxu0 %vm34481_vm1, %v34480_v3 }
 0xcfa   :  { %31887 = vmatprep.subr.mxu0 %v34480_v3  ;;  %31917 = vmatprep.mubr.f32.mxu1 %v35516_v31 }
 0xcfb   :  { %31888 = vmatpush3.msra.mxu0 %v34569_v15 }
 0xcfc   :  { %31889 = vmatprep.subr.mxu0 %v34480_v3 }
 0xcfd   :  { %31890 = vmatpush3.msra.mxu0 %v34572_v16 }
 0xcfe   :  { %31891 = vmatprep.subr.mxu0 %v34480_v3 }
 0xcff   :  { %31892 = vmatpush3.msra.mxu0 %v34576_v17 }
 0xd00   :  { %31894 = vmatmul.mubr.f32.vlgmr.msra.gmra.mxu0 %v7421_v33  ;;  %v7949_v33 = vand.u32 4294901760, %v7948_v27 }
 0xd01   :  { %31909 = vmatprep.mubr.f32.mxu0 %v7921_v43 }
 0xd02   :  { %v7950_v46 = vsub.f32 %v7948_v27, %v7949_v33 }
 0xda6   :  { %v7518_v35 = vpop.f32.mrf.mxu1 }
 0xda8   :  { %v31862_v34 = vpop.f32.mrf.mxu1 }
 0xda9   :  { %v7951_v34 = vand.u32 4294901760, %v7950_v46 }
 0xdae   :  { %v7675_v53 = vpop.f32.mrf.mxu1 }
 0xdaf   :  { %v7427_v54 = vpop.f32.mrf.mxu0 }
 0xdb0   :  { %v31884_v45 = vpop.f32.mrf.mxu1  ;;  %v7428_v56 = vadd.f32 %v35466_v1, %v7427_v54 }
 0xdb1   :  { %v31851_v41 = vpop.f32.mrf.mxu0 }
 0xdb2   :  { %v7519_v50 = vadd.f32 %v7518_v35, %v7428_v56 }
 0xdb7   :  { %v7598_v57 = vpop.f32.mrf.mxu0 }
 0xdb8   :  { %v7833_v58 = vpop.f32.mrf.mxu1  ;;  %v7599_v59 = vadd.f32 %v7598_v57, %v7519_v50 }
 0xdb9   :  { %v31873_v51 = vpop.f32.mrf.mxu0 }
 0xdba   :  { %v31906_v52 = vpop.f32.mrf.mxu1  ;;  %v7676_v60 = vadd.f32 %v7675_v53, %v7599_v59 }
 0xdc0   :  { %v7758_v63 = vpop.f32.mrf.mxu0 }
 0xdc1   :  { %v7759_v0 = vadd.f32 %v7758_v63, %v7676_v60 }
 0xdc2   :  { %v31895_v2 = vpop.f32.mrf.mxu0 }
 0xdc3   :  { %v7834_v7 = vadd.f32 %v7833_v58, %v7759_v0 }
 0xdc5   :  { %34414 = vtanh.f32 %v7834_v7  ;;  %v8427_v7 = vsel %vm29_vm0, %v29234_v61, 0 }
 0xdd2   :  { %v34415_v38 = vpop.eup %34414 }
 0xdd3   :  { %v35542_v40 = vadd.f32 %v34415_v38, %v29231_v30 }
 0xdd5   :  { %v7882_v36 = vand.u32 4294901760, %v35542_v40 }
 0xdd7   :  { %31907 = vmatprep.subr.mxu0 %v7882_v36  ;;  %v7989_v43 = vsub.f32 %v35542_v40, %v7882_v36 }
 0xdd8   :  { %31908 = vmatpush3.msra.mxu0 %v7882_v36 }
 0xdd9   :  { %31910 = vmatmul.mubr.f32.vlgmr.msra.gmra.mxu0 %v7931_v37  ;;  %31923 = vmatprep.subr.mxu0 %v7989_v43  ;;  %v7990_v35 = vand.u32 4294901760, %v7989_v43 }
 0xdda   :  { %31924 = vmatpush3.msra.mxu0 %v7989_v43  ;;  %31912 = vmatprep.mubr.f32.mxu0 %v7941_v42 }
 0xddb   :  { %31939 = vmatprep.subr.mxu0 %v7990_v35  ;;  %v7991_v53 = vsub.f32 %v7989_v43, %v7990_v35 }
 0xddd   :  { %31913 = vmatmul.mubr.f32.gmra.mxu0 %v7951_v34  ;;  %v7992_v54 = vand.u32 4294901760, %v7991_v53 }
 0xdde   :  { %31925 = vmatprep.mubr.f32.mxu0 %v35519_v47 }
 0xddf   :  { %31915 = vmatprep.subr.mxu1 %v7992_v54 }
 0xde0   :  { %31916 = vmatpush3.msra.mxu1 %v7992_v54 }
 0xde1   :  { %31918 = vmatmul.mubr.f32.vlgmr.msra.gmra.mxu1 %v7927_v19  ;;  %31926 = vmatmul.mubr.f32.vlgmr.msra.gmra.mxu0 %v7928_v23 }
 0xde2   :  { %31931 = vmatprep.subr.mxu1 %v7882_v36  ;;  %31940 = vmatpush3.msra.mxu0 %v7990_v35 }
 0xde3   :  { %31932 = vmatpush3.msra.mxu1 %v7882_v36  ;;  %31920 = vmatprep.mubr.f32.mxu1 %v7937_v20 }
 0xde4   :  { %31947 = vmatprep.subr.mxu1 %v7882_v36  ;;  %31928 = vmatprep.mubr.f32.mxu0 %v7938_v62 }
 0xde5   :  { %31921 = vmatmul.mubr.f32.gmra.mxu1 %v7947_v24  ;;  %31929 = vmatmul.mubr.f32.gmra.mxu0 %v7948_v27 }
 0xde6   :  { %31933 = vmatprep.mubr.f32.mxu1 %v7919_v48  ;;  %31941 = vmatprep.mubr.f32.mxu0 %v35516_v31 }
 0xde7   :  { %31955 = vmatprep.subr.mxu0 %v34480_v3 }
 0xde9   :  { %31934 = vmatmul.mubr.f32.vlgmr.msra.gmra.mxu1 %v7929_v25  ;;  %31942 = vmatmul.mubr.f32.vlgmr.msra.gmra.mxu0 %v7927_v19 }
 0xdea   :  { %31948 = vmatpush3.msra.mxu1 %v7882_v36  ;;  %31936 = vmatprep.mubr.f32.mxu1 %v7939_v29 }
 0xdeb   :  { %31944 = vmatprep.mubr.f32.mxu0 %v7937_v20  ;;  %31966 = vmatprep.subr.mxu1 %v34480_v3 }
 0xded   :  { %31937 = vmatmul.mubr.f32.gmra.mxu1 %v7949_v33  ;;  %31945 = vmatmul.mubr.f32.gmra.mxu0 %v7947_v24 }
 0xdee   :  { %31949 = vmatprep.mubr.f32.mxu1 %v35516_v31  ;;  %31963 = vmatprep.mubr.msk.f32.mxu0 %vm34481_vm1, %v34480_v3 }
 0xdf1   :  { %31950 = vmatmul.mubr.f32.vlgmr.msra.gmra.mxu1 %v7927_v19 }
 0xdf2   :  { %31952 = vmatprep.mubr.f32.mxu1 %v7937_v20 }
 0xdf5   :  { %31953 = vmatmul.mubr.f32.gmra.mxu1 %v7947_v24  ;;  %v35561_v24 = vand.u32 4294901760, %v8427_v7 }
 0xdf6   :  { %31974 = vmatprep.mubr.msk.f32.mxu1 %vm34481_vm1, %v34480_v3 }
 0xdf7   :  { %v35564_v39 = vsub.f32 %v8427_v7, %v35561_v24 }
 0xe99   :  { %v31911_v47 = vpop.f32.mrf.mxu0 }
 0xe9b   :  { %v7923_v48 = vpop.f32.mrf.mxu0 }
 0xe9d   :  { %v31914_v45 = vpop.f32.mrf.mxu0 }
 0xe9f   :  { %v7943_v41 = vpop.f32.mrf.mxu0 }
 0xea1   :  { %v31919_v56 = vpop.f32.mrf.mxu1  ;;  %v31927_v57 = vpop.f32.mrf.mxu0 }
 0xea2   :  { %v8036_v31 = vadd.f32 %v31919_v56, %v31911_v47  ;;  %v8500_v47 = vand.u32 4294901760, %v35564_v39 }
 0xea3   :  { %v8029_v58 = vpop.f32.mrf.mxu1  ;;  %v8121_v50 = vpop.f32.mrf.mxu0 }
 0xea4   :  { %v8030_v63 = vadd.f32 %v8029_v58, %v7923_v48  ;;  %v8129_v2 = vadd.f32 %v31927_v57, %v8036_v31 }
 0xea5   :  { %v31922_v51 = vpop.f32.mrf.mxu1  ;;  %v31930_v52 = vpop.f32.mrf.mxu0 }
 0xea6   :  { %v8048_v55 = vadd.f32 %v31922_v51, %v31914_v45  ;;  %v8122_v19 = vadd.f32 %v8121_v50, %v8030_v63  ;;  %v8501_v51 = vsub.f32 %v35564_v39, %v8500_v47 }
 0xea7   :  { %v8041_v59 = vpop.f32.mrf.mxu1  ;;  %v8135_v60 = vpop.f32.mrf.mxu0 }
 0xea8   :  { %v8042_v20 = vadd.f32 %v8041_v59, %v7943_v41  ;;  %v8143_v62 = vadd.f32 %v31930_v52, %v8048_v55 }
 0xea9   :  { %v31935_v49 = vpop.f32.mrf.mxu1  ;;  %v31943_v0 = vpop.f32.mrf.mxu0 }
 0xeaa   :  { %v8225_v44 = vadd.f32 %v31935_v49, %v8129_v2  ;;  %v8136_v30 = vadd.f32 %v8135_v60, %v8042_v20  ;;  %v8502_v49 = vand.u32 4294901760, %v8501_v51 }
 0xeab   :  { %v8216_v8 = vpop.f32.mrf.mxu1  ;;  %v8314_v18 = vpop.f32.mrf.mxu0 }
 0xeac   :  { %v8217_v25 = vadd.f32 %v8216_v8, %v8122_v19  ;;  %v8321_v32 = vadd.f32 %v31943_v0, %v8225_v44 }
 0xead   :  { %v31938_v23 = vpop.f32.mrf.mxu1  ;;  %v31946_v29 = vpop.f32.mrf.mxu0 }
 0xeae   :  { %v8241_v33 = vadd.f32 %v31938_v23, %v8143_v62  ;;  %v8315_v36 = vadd.f32 %v8314_v18, %v8217_v25 }
 0xeaf   :  { %v8232_v27 = vpop.f32.mrf.mxu1  ;;  %v8326_v42 = vpop.f32.mrf.mxu0 }
 0xeb0   :  { %v8233_v37 = vadd.f32 %v8232_v27, %v8136_v30  ;;  %v8333_v35 = vadd.f32 %v31946_v29, %v8241_v33 }
 0xeb1   :  { %v31951_v38 = vpop.f32.mrf.mxu1 }
 0xeb2   :  { %v8411_v46 = vadd.f32 %v31951_v38, %v8321_v32  ;;  %v8327_v48 = vadd.f32 %v8326_v42, %v8233_v37 }
 0xeb3   :  { %v8404_v43 = vpop.f32.mrf.mxu1 }
 0xeb4   :  { %v35566_v34 = vand.u32 4294901760, %v8411_v46  ;;  %v8405_v53 = vadd.f32 %v8404_v43, %v8315_v36 }
 0xeb5   :  { %v31954_v54 = vpop.f32.mrf.mxu1 }
 0xeb6   :  { %v35569_v45 = vand.u32 4294901760, %v8405_v53  ;;  %v8423_v41 = vadd.f32 %v31954_v54, %v8333_v35  ;;  %v8548_v57 = vsub.f32 %v8411_v46, %v35566_v34 }
 0xeb7   :  { %v8416_v56 = vpop.f32.mrf.mxu1 }
 0xeb8   :  { %v35572_v58 = vand.u32 4294901760, %v8423_v41  ;;  %v8417_v50 = vadd.f32 %v8416_v56, %v8327_v48  ;;  %v8555_v52 = vsub.f32 %v8405_v53, %v35569_v45  ;;  %v8549_v60 = vand.u32 4294901760, %v8548_v57  ;;  %v29240_v56 = vld [vmem:[%s38040_s2 + $0xa0] sm:$0xff] }
 0xeba   :  { %v8534_v31 = vsub.f32 %v8423_v41, %v35572_v58  ;;  %v35579_v59 = vand.u32 4294901760, %v8417_v50  ;;  %31956 = vmatpush3.msra.mxu0 %v35572_v58  ;;  %v8556_v0 = vand.u32 4294901760, %v8555_v52  ;;  %v8550_v7 = vsub.f32 %v8548_v57, %v8549_v60 }
 0xebb   :  { %31957 = vmatprep.subr.mxu0 %v34480_v3 }
 0xebc   :  { %v8535_v61 = vand.u32 4294901760, %v8534_v31  ;;  %v8541_v63 = vsub.f32 %v8417_v50, %v35579_v59  ;;  %31958 = vmatpush3.msra.mxu0 %v35579_v59  ;;  %v8557_v20 = vsub.f32 %v8555_v52, %v8556_v0  ;;  %v8551_v44 = vand.u32 4294901760, %v8550_v7 }
 0xebd   :  { %31959 = vmatprep.subr.mxu0 %v34480_v3 }
 0xebe   :  { %v8536_v2 = vsub.f32 %v8534_v31, %v8535_v61  ;;  %v8542_v55 = vand.u32 4294901760, %v8541_v63  ;;  %31960 = vmatpush3.msra.mxu0 %v35566_v34  ;;  %v8558_v23 = vand.u32 4294901760, %v8557_v20 }
 0xebf   :  { %31961 = vmatprep.subr.mxu0 %v34480_v3 }
 0xec0   :  { %31962 = vmatpush3.msra.mxu0 %v35569_v45  ;;  %v8537_v8 = vand.u32 4294901760, %v8536_v2  ;;  %v8543_v18 = vsub.f32 %v8541_v63, %v8542_v55 }
 0xec1   :  { %31977 = vmatprep.subr.mxu0 %v34480_v3  ;;  %31964 = vmatmul.mubr.f32.vlgmr.msra.gmra.mxu0 %v8502_v49 }
 0xec2   :  { %31967 = vmatpush3.msra.mxu1 %v8537_v8  ;;  %31978 = vmatpush3.msra.mxu0 %v8534_v31  ;;  %v8544_v19 = vand.u32 4294901760, %v8543_v18 }
 0xec3   :  { %31968 = vmatprep.subr.mxu1 %v34480_v3  ;;  %31979 = vmatprep.subr.mxu0 %v34480_v3 }
 0xec4   :  { %31969 = vmatpush3.msra.mxu1 %v8544_v19  ;;  %31980 = vmatpush3.msra.mxu0 %v8541_v63 }
 0xec5   :  { %31970 = vmatprep.subr.mxu1 %v34480_v3  ;;  %31981 = vmatprep.subr.mxu0 %v34480_v3 }
 0xec6   :  { %31971 = vmatpush3.msra.mxu1 %v8551_v44  ;;  %31982 = vmatpush3.msra.mxu0 %v8548_v57  ;;  %v9406_v57 = vsel %vm551_vm2, %v29240_v56, 0 }
 0xec7   :  { %31972 = vmatprep.subr.mxu1 %v34480_v3  ;;  %31983 = vmatprep.subr.mxu0 %v34480_v3 }
 0xec8   :  { %31973 = vmatpush3.msra.mxu1 %v8558_v23  ;;  %31984 = vmatpush3.msra.mxu0 %v8555_v52  ;;  %v29241_v23 = vld [vmem:[%s38040_s2 + $0xa8] sm:$0xff] }
 0xec9   :  { %31975 = vmatmul.mubr.f32.vlgmr.msra.gmra.mxu1 %v35561_v24  ;;  %31985 = vmatprep.mubr.msk.f32.mxu0 %vm34481_vm1, %v34480_v3 }
 0xeca   :  { %31988 = vmatprep.subr.mxu1 %v34480_v3  ;;  %31999 = vmatprep.subr.mxu0 %v34480_v3 }
 0xecb   :  { %31986 = vmatmul.mubr.f32.vlgmr.msra.gmra.mxu0 %v35564_v39  ;;  %31989 = vmatpush3.msra.mxu1 %v35572_v58 }
 0xecc   :  { %32000 = vmatpush3.msra.mxu0 %v8535_v61  ;;  %31990 = vmatprep.subr.mxu1 %v34480_v3 }
 0xecd   :  { %32001 = vmatprep.subr.mxu0 %v34480_v3  ;;  %31991 = vmatpush3.msra.mxu1 %v35579_v59 }
 0xece   :  { %32002 = vmatpush3.msra.mxu0 %v8542_v55  ;;  %31992 = vmatprep.subr.mxu1 %v34480_v3 }
 0xecf   :  { %32003 = vmatprep.subr.mxu0 %v34480_v3  ;;  %31993 = vmatpush3.msra.mxu1 %v35566_v34 }
 0xed0   :  { %32004 = vmatpush3.msra.mxu0 %v8549_v60  ;;  %31994 = vmatprep.subr.mxu1 %v34480_v3 }
 0xed1   :  { %32005 = vmatprep.subr.mxu0 %v34480_v3  ;;  %31995 = vmatpush3.msra.mxu1 %v35569_v45 }
 0xed2   :  { %31996 = vmatprep.mubr.msk.f32.mxu1 %vm34481_vm1, %v34480_v3  ;;  %32006 = vmatpush3.msra.mxu0 %v8556_v0 }
 0xed3   :  { %31997 = vmatmul.mubr.f32.vlgmr.msra.gmra.mxu1 %v8500_v47  ;;  %32010 = vmatprep.subr.mxu1 %v34480_v3 }
 0xed4   :  { %32007 = vmatprep.mubr.msk.f32.mxu0 %vm34481_vm1, %v34480_v3  ;;  %32011 = vmatpush3.msra.mxu1 %v35572_v58  ;;  %v35696_v58 = vand.u32 4294901760, %v9406_v57 }
 0xed5   :  { %32008 = vmatmul.mubr.f32.vlgmr.msra.gmra.mxu0 %v35561_v24  ;;  %32012 = vmatprep.subr.mxu1 %v34480_v3 }
 0xed6   :  { %32013 = vmatpush3.msra.mxu1 %v35579_v59  ;;  %32018 = vmatprep.mubr.msk.f32.mxu1 %vm34481_vm1, %v34480_v3  ;;  %v35699_v50 = vsub.f32 %v9406_v57, %v35696_v58 }
 0xed7   :  { %32014 = vmatprep.subr.mxu1 %v34480_v3  ;;  %32021 = vmatprep.subr.mxu0 %v34480_v3 }
 0xed8   :  { %32015 = vmatpush3.msra.mxu1 %v35566_v34  ;;  %32022 = vmatpush3.msra.mxu0 %v34531_v4  ;;  %v9485_v51 = vand.u32 4294901760, %v35699_v50 }
 0xed9   :  { %32016 = vmatprep.subr.mxu1 %v34480_v3  ;;  %32023 = vmatprep.subr.mxu0 %v34480_v3 }
 0xeda   :  { %32017 = vmatpush3.msra.mxu1 %v35569_v45  ;;  %32024 = vmatpush3.msra.mxu0 %v34533_v5  ;;  %v9486_v52 = vsub.f32 %v35699_v50, %v9485_v51 }
 0xedb   :  { %32019 = vmatmul.mubr.f32.vlgmr.msra.gmra.mxu1 %v35561_v24  ;;  %32032 = vmatprep.subr.mxu1 %v34480_v3 }
 0xedc   :  { %32033 = vmatpush3.msra.mxu1 %v34586_v21  ;;  %32040 = vmatprep.mubr.msk.f32.mxu1 %vm34481_vm1, %v34480_v3  ;;  %v9487_v31 = vand.u32 4294901760, %v9486_v52 }
 0xedd   :  { %32034 = vmatprep.subr.mxu1 %v34480_v3  ;;  %32025 = vmatprep.subr.mxu0 %v34480_v3 }
 0xede   :  { %32035 = vmatpush3.msra.mxu1 %v34588_v22  ;;  %32026 = vmatpush3.msra.mxu0 %v34535_v6 }
 0xedf   :  { %32036 = vmatprep.subr.mxu1 %v34480_v3  ;;  %32027 = vmatprep.subr.mxu0 %v34480_v3 }
 0xee0   :  { %32037 = vmatpush3.msra.mxu1 %v34596_v26  ;;  %32028 = vmatpush3.msra.mxu0 %v34543_v9 }
 0xee1   :  { %32038 = vmatprep.subr.mxu1 %v34480_v3  ;;  %32029 = vmatprep.mubr.msk.f32.mxu0 %vm34481_vm1, %v34480_v3 }
 0xee2   :  { %32039 = vmatpush3.msra.mxu1 %v34600_v28  ;;  %32043 = vmatprep.subr.mxu0 %v34480_v3 }
 0xee3   :  { %32054 = vmatprep.subr.mxu1 %v34480_v3 }
 0xf81   :  { %v8504_v24 = vpop.f32.mrf.mxu0 }
 0xf83   :  { %v31965_v62 = vpop.f32.mrf.mxu0 }
 0xf84   :  { %v29242_v62 = vld [vmem:[%s38040_s2 + $0xb0] sm:$0xff] }
 0xf89   :  { %v8595_v25 = vpop.f32.mrf.mxu1 }
 0xf8a   :  { %v8596_v32 = vadd.f32 %v8595_v25, %v8504_v24 }
 0xf8b   :  { %v31976_v27 = vpop.f32.mrf.mxu1  ;;  %v8675_v29 = vpop.f32.mrf.mxu0 }
 0xf8c   :  { %v8676_v38 = vadd.f32 %v8675_v29, %v8596_v32  ;;  %v29243_v32 = vld [vmem:[%s38040_s2 + $0xb8] sm:$0xff] }
 0xf8d   :  { %v31987_v30 = vpop.f32.mrf.mxu0 }
 0xf8e   :  { %v9412_v30 = vsel %vm551_vm2, %v29242_v62, 0 }
 0xf93   :  { %v8752_v33 = vpop.f32.mrf.mxu1 }
 0xf94   :  { %v8753_v37 = vadd.f32 %v8752_v33, %v8676_v38  ;;  %v9503_v38 = vand.u32 4294901760, %v9412_v30 }
 0xf95   :  { %v31998_v39 = vpop.f32.mrf.mxu1  ;;  %v8835_v36 = vpop.f32.mrf.mxu0 }
 0xf96   :  { %v8836_v42 = vadd.f32 %v8835_v36, %v8753_v37  ;;  %v9415_v39 = vsel %vm551_vm2, %v29243_v32, 0 }
 0xf97   :  { %v32009_v46 = vpop.f32.mrf.mxu0  ;;  %v9513_v37 = vand.u32 4294901760, %v9415_v39 }
 0xf98   :  { %v9504_v46 = vsub.f32 %v9412_v30, %v9503_v38 }
 0xf9b   :  { %v8910_v43 = vpop.f32.mrf.mxu1 }
 0xf9c   :  { %v8911_v35 = vadd.f32 %v8910_v43, %v8836_v42  ;;  %v9514_v43 = vsub.f32 %v9415_v39, %v9513_v37 }
 0xf9d   :  { %v32020_v34 = vpop.f32.mrf.mxu1 }
 0xf9e   :  { %v8914_v53 = vsub.f32 %v35542_v40, %v8911_v35  ;;  %v9505_v35 = vand.u32 4294901760, %v9504_v46  ;;  %v29232_v34 = vld [vmem:[%s38038_s0 + $0x38] sm:$0xff] }
 0xfa0   :  { %v8916_v54 = vsel %vm29_vm0, %v8914_v53, 0 }
 0xfa1   :  { %v8987_v47 = vand.u32 4294901760, %v8916_v54 }
 0xfa3   :  { %v8988_v48 = vsub.f32 %v8916_v54, %v8987_v47  ;;  %32041 = vmatmul.mubr.f32.vlgmr.msra.gmra.mxu1 %v8987_v47  ;;  %v9515_v54 = vand.u32 4294901760, %v9514_v43 }
 0xfa4   :  { %32055 = vmatpush3.msra.mxu1 %v34531_v4  ;;  %32062 = vmatprep.mubr.msk.f32.mxu1 %vm34481_vm1, %v34480_v3 }
 0xfa5   :  { %v8989_v45 = vand.u32 4294901760, %v8988_v48  ;;  %32056 = vmatprep.subr.mxu1 %v34480_v3  ;;  %v9516_v56 = vsub.f32 %v9514_v43, %v9515_v54 }
 0xfa6   :  { %32057 = vmatpush3.msra.mxu1 %v34533_v5 }
 0xfa7   :  { %v8990_v41 = vsub.f32 %v8988_v48, %v8989_v45  ;;  %32058 = vmatprep.subr.mxu1 %v34480_v3 }
 0xfa8   :  { %32059 = vmatpush3.msra.mxu1 %v34535_v6 }
 0xfa9   :  { %v8991_v40 = vand.u32 4294901760, %v8990_v41  ;;  %32060 = vmatprep.subr.mxu1 %v34480_v3 }
 0xfaa   :  { %32061 = vmatpush3.msra.mxu1 %v34543_v9 }
 0xfab   :  { %32063 = vmatmul.mubr.f32.vlgmr.msra.gmra.mxu1 %v8989_v45  ;;  %32076 = vmatprep.subr.mxu1 %v34480_v3 }
 0xfac   :  { %32030 = vmatmul.mubr.f32.vlgmr.msra.gmra.mxu0 %v8991_v40  ;;  %32077 = vmatpush3.msra.mxu1 %v34531_v4 }
 0xfad   :  { %32044 = vmatpush3.msra.mxu0 %v34552_v10  ;;  %32078 = vmatprep.subr.mxu1 %v34480_v3 }
 0xfae   :  { %32045 = vmatprep.subr.mxu0 %v34480_v3  ;;  %32079 = vmatpush3.msra.mxu1 %v34533_v5 }
 0xfaf   :  { %32046 = vmatpush3.msra.mxu0 %v34555_v11  ;;  %32080 = vmatprep.subr.mxu1 %v34480_v3 }
 0xfb0   :  { %32047 = vmatprep.subr.mxu0 %v34480_v3  ;;  %32081 = vmatpush3.msra.mxu1 %v34535_v6 }
 0xfb1   :  { %32048 = vmatpush3.msra.mxu0 %v34558_v12  ;;  %32082 = vmatprep.subr.mxu1 %v34480_v3 }
 0xfb2   :  { %32049 = vmatprep.subr.mxu0 %v34480_v3  ;;  %32051 = vmatprep.mubr.msk.f32.mxu0 %vm34481_vm1, %v34480_v3 }
 0xfb3   :  { %32050 = vmatpush3.msra.mxu0 %v34562_v13  ;;  %32083 = vmatpush3.msra.mxu1 %v34543_v9 }
 0xfb4   :  { %32084 = vmatprep.mubr.msk.f32.mxu1 %vm34481_vm1, %v34480_v3  ;;  %32052 = vmatmul.mubr.f32.vlgmr.msra.gmra.mxu0 %v8988_v48  ;;  %v9506_v48 = vsub.f32 %v9504_v46, %v9505_v35 }
 0xfb5   :  { %32065 = vmatprep.subr.mxu0 %v34480_v3  ;;  %32085 = vmatmul.mubr.f32.vlgmr.msra.gmra.mxu1 %v8987_v47 }
 0xfb6   :  { %32066 = vmatpush3.msra.mxu0 %v34565_v14  ;;  %32073 = vmatprep.mubr.msk.f32.mxu0 %vm34481_vm1, %v34480_v3  ;;  %v9507_v57 = vand.u32 4294901760, %v9506_v48 }
 0xfb7   :  { %32067 = vmatprep.subr.mxu0 %v34480_v3  ;;  %32097 = vmatprep.mubr.f32.mxu1 %v35696_v58 }
 0xfb8   :  { %32068 = vmatpush3.msra.mxu0 %v34569_v15 }
 0xfb9   :  { %32069 = vmatprep.subr.mxu0 %v34480_v3 }
 0xfba   :  { %32070 = vmatpush3.msra.mxu0 %v34572_v16 }
 0xfbb   :  { %32071 = vmatprep.subr.mxu0 %v34480_v3 }
 0xfbc   :  { %32072 = vmatpush3.msra.mxu0 %v34576_v17 }
 0xfbd   :  { %32074 = vmatmul.mubr.f32.vlgmr.msra.gmra.mxu0 %v8987_v47 }
 0xfbe   :  { %32089 = vmatprep.mubr.f32.mxu0 %v9487_v31 }
0x1063   :  { %v9084_v59 = vpop.f32.mrf.mxu1 }
0x1065   :  { %v32042_v60 = vpop.f32.mrf.mxu1 }
0x106b   :  { %v9241_v61 = vpop.f32.mrf.mxu1 }
0x106c   :  { %v8993_v63 = vpop.f32.mrf.mxu0 }
0x106d   :  { %v32064_v49 = vpop.f32.mrf.mxu1  ;;  %v8994_v2 = vadd.f32 %v35466_v1, %v8993_v63  ;;  %v9409_v1 = vsel %vm551_vm2, %v29241_v23, 0 }
0x106e   :  { %v32031_v0 = vpop.f32.mrf.mxu0  ;;  %v9493_v33 = vand.u32 4294901760, %v9409_v1 }
0x106f   :  { %v9085_v8 = vadd.f32 %v9084_v59, %v8994_v2  ;;  %v9517_v59 = vand.u32 4294901760, %v9516_v56 }
0x1070   :  { %v9494_v36 = vsub.f32 %v9409_v1, %v9493_v33 }
0x1072   :  { %v9495_v42 = vand.u32 4294901760, %v9494_v36 }
0x1074   :  { %v9164_v55 = vpop.f32.mrf.mxu0  ;;  %v9496_v53 = vsub.f32 %v9494_v36, %v9495_v42 }
0x1075   :  { %v9399_v7 = vpop.f32.mrf.mxu1  ;;  %v9165_v20 = vadd.f32 %v9164_v55, %v9085_v8 }
0x1076   :  { %v32053_v18 = vpop.f32.mrf.mxu0  ;;  %v9497_v40 = vand.u32 4294901760, %v9496_v53 }
0x1077   :  { %v32086_v19 = vpop.f32.mrf.mxu1  ;;  %v9242_v44 = vadd.f32 %v9241_v61, %v9165_v20 }
0x107d   :  { %v9324_v24 = vpop.f32.mrf.mxu0 }
0x107e   :  { %v9325_v25 = vadd.f32 %v9324_v24, %v9242_v44  ;;  %v29235_v44 = vld [vmem:[%s38039_s1 + $0x28] sm:$0xff] }
0x107f   :  { %v32075_v27 = vpop.f32.mrf.mxu0  ;;  %v9993_v1 = vsel %vm29_vm0, %v29235_v44, 0 }
0x1080   :  { %v9400_v29 = vadd.f32 %v9399_v7, %v9325_v25 }
0x1082   :  { %34416 = vtanh.f32 %v9400_v29 }
0x108f   :  { %v34417_v47 = vpop.eup %34416 }
0x1090   :  { %v35722_v45 = vadd.f32 %v34417_v47, %v29232_v34 }
0x1092   :  { %v9448_v41 = vand.u32 4294901760, %v35722_v45 }
0x1094   :  { %32087 = vmatprep.subr.mxu0 %v9448_v41  ;;  %v9555_v52 = vsub.f32 %v35722_v45, %v9448_v41 }
0x1095   :  { %32088 = vmatpush3.msra.mxu0 %v9448_v41 }
0x1096   :  { %32090 = vmatmul.mubr.f32.vlgmr.msra.gmra.mxu0 %v9497_v40  ;;  %32103 = vmatprep.subr.mxu0 %v9555_v52  ;;  %v9556_v31 = vand.u32 4294901760, %v9555_v52 }
0x1097   :  { %32104 = vmatpush3.msra.mxu0 %v9555_v52  ;;  %32092 = vmatprep.mubr.f32.mxu0 %v9507_v57 }
0x1098   :  { %32119 = vmatprep.subr.mxu0 %v9556_v31  ;;  %v9557_v60 = vsub.f32 %v9555_v52, %v9556_v31 }
0x109a   :  { %32093 = vmatmul.mubr.f32.gmra.mxu0 %v9517_v59  ;;  %v9558_v61 = vand.u32 4294901760, %v9557_v60 }
0x109b   :  { %32105 = vmatprep.mubr.f32.mxu0 %v35699_v50 }
0x109c   :  { %32095 = vmatprep.subr.mxu1 %v9558_v61 }
0x109d   :  { %32096 = vmatpush3.msra.mxu1 %v9558_v61 }
0x109e   :  { %32098 = vmatmul.mubr.f32.vlgmr.msra.gmra.mxu1 %v9493_v33  ;;  %32106 = vmatmul.mubr.f32.vlgmr.msra.gmra.mxu0 %v9494_v36  ;;  %v35741_v36 = vand.u32 4294901760, %v9993_v1 }
0x109f   :  { %32111 = vmatprep.subr.mxu1 %v9448_v41  ;;  %32120 = vmatpush3.msra.mxu0 %v9556_v31 }
0x10a0   :  { %32112 = vmatpush3.msra.mxu1 %v9448_v41  ;;  %32100 = vmatprep.mubr.f32.mxu1 %v9503_v38  ;;  %v35744_v47 = vsub.f32 %v9993_v1, %v35741_v36 }
0x10a1   :  { %32127 = vmatprep.subr.mxu1 %v9448_v41  ;;  %32108 = vmatprep.mubr.f32.mxu0 %v9504_v46 }
0x10a2   :  { %32101 = vmatmul.mubr.f32.gmra.mxu1 %v9513_v37  ;;  %32109 = vmatmul.mubr.f32.gmra.mxu0 %v9514_v43  ;;  %v10066_v61 = vand.u32 4294901760, %v35744_v47 }
0x10a3   :  { %32113 = vmatprep.mubr.f32.mxu1 %v9485_v51  ;;  %32121 = vmatprep.mubr.f32.mxu0 %v35696_v58 }
0x10a4   :  { %32135 = vmatprep.subr.mxu0 %v34480_v3 }
0x10a6   :  { %32114 = vmatmul.mubr.f32.vlgmr.msra.gmra.mxu1 %v9495_v42  ;;  %32122 = vmatmul.mubr.f32.vlgmr.msra.gmra.mxu0 %v9493_v33 }
0x10a7   :  { %32128 = vmatpush3.msra.mxu1 %v9448_v41  ;;  %32116 = vmatprep.mubr.f32.mxu1 %v9505_v35 }
0x10a8   :  { %32124 = vmatprep.mubr.f32.mxu0 %v9503_v38  ;;  %32146 = vmatprep.subr.mxu1 %v34480_v3 }
0x10aa   :  { %32117 = vmatmul.mubr.f32.gmra.mxu1 %v9515_v54  ;;  %32125 = vmatmul.mubr.f32.gmra.mxu0 %v9513_v37 }
0x10ab   :  { %32129 = vmatprep.mubr.f32.mxu1 %v35696_v58  ;;  %32143 = vmatprep.mubr.msk.f32.mxu0 %vm34481_vm1, %v34480_v3 }
0x10ae   :  { %32130 = vmatmul.mubr.f32.vlgmr.msra.gmra.mxu1 %v9493_v33 }
0x10af   :  { %32132 = vmatprep.mubr.f32.mxu1 %v9503_v38 }
0x10b2   :  { %32133 = vmatmul.mubr.f32.gmra.mxu1 %v9513_v37 }
0x10b3   :  { %32154 = vmatprep.mubr.msk.f32.mxu1 %vm34481_vm1, %v34480_v3 }
0x1156   :  { %v32091_v50 = vpop.f32.mrf.mxu0 }
0x1158   :  { %v9489_v51 = vpop.f32.mrf.mxu0 }
0x115a   :  { %v32094_v63 = vpop.f32.mrf.mxu0 }
0x115c   :  { %v9509_v49 = vpop.f32.mrf.mxu0 }
0x115e   :  { %v32099_v0 = vpop.f32.mrf.mxu1  ;;  %v32107_v2 = vpop.f32.mrf.mxu0 }
0x115f   :  { %v9602_v58 = vadd.f32 %v32099_v0, %v32091_v50 }
0x1160   :  { %v9595_v55 = vpop.f32.mrf.mxu1  ;;  %v9687_v7 = vpop.f32.mrf.mxu0 }
0x1161   :  { %v9596_v23 = vadd.f32 %v9595_v55, %v9489_v51  ;;  %v9695_v25 = vadd.f32 %v32107_v2, %v9602_v58 }
0x1162   :  { %v32102_v8 = vpop.f32.mrf.mxu1  ;;  %v32110_v18 = vpop.f32.mrf.mxu0 }
0x1163   :  { %v9614_v27 = vadd.f32 %v32102_v8, %v32094_v63  ;;  %v9688_v32 = vadd.f32 %v9687_v7, %v9596_v23  ;;  %v10067_v7 = vsub.f32 %v35744_v47, %v10066_v61 }
0x1164   :  { %v9607_v19 = vpop.f32.mrf.mxu1  ;;  %v9701_v20 = vpop.f32.mrf.mxu0 }
0x1165   :  { %v9608_v33 = vadd.f32 %v9607_v19, %v9509_v49  ;;  %v9709_v37 = vadd.f32 %v32110_v18, %v9614_v27  ;;  %v10068_v23 = vand.u32 4294901760, %v10067_v7 }
0x1166   :  { %v32115_v24 = vpop.f32.mrf.mxu1  ;;  %v32123_v62 = vpop.f32.mrf.mxu0 }
0x1167   :  { %v9791_v38 = vadd.f32 %v32115_v24, %v9695_v25  ;;  %v9702_v35 = vadd.f32 %v9701_v20, %v9608_v33 }
0x1168   :  { %v9782_v29 = vpop.f32.mrf.mxu1  ;;  %v9880_v30 = vpop.f32.mrf.mxu0 }
0x1169   :  { %v9783_v46 = vadd.f32 %v9782_v29, %v9688_v32  ;;  %v9887_v34 = vadd.f32 %v32123_v62, %v9791_v38 }
0x116a   :  { %v32118_v39 = vpop.f32.mrf.mxu1  ;;  %v32126_v43 = vpop.f32.mrf.mxu0 }
0x116b   :  { %v9807_v53 = vadd.f32 %v32118_v39, %v9709_v37  ;;  %v9881_v48 = vadd.f32 %v9880_v30, %v9783_v46 }
0x116c   :  { %v9798_v42 = vpop.f32.mrf.mxu1  ;;  %v9892_v56 = vpop.f32.mrf.mxu0 }
0x116d   :  { %v9799_v41 = vadd.f32 %v9798_v42, %v9702_v35  ;;  %v9899_v52 = vadd.f32 %v32126_v43, %v9807_v53 }
0x116e   :  { %v32131_v54 = vpop.f32.mrf.mxu1 }
0x116f   :  { %v9977_v40 = vadd.f32 %v32131_v54, %v9887_v34  ;;  %v9893_v50 = vadd.f32 %v9892_v56, %v9799_v41 }
0x1170   :  { %v9970_v57 = vpop.f32.mrf.mxu1 }
0x1171   :  { %v35746_v31 = vand.u32 4294901760, %v9977_v40  ;;  %v9971_v59 = vadd.f32 %v9970_v57, %v9881_v48 }
0x1172   :  { %v32134_v60 = vpop.f32.mrf.mxu1 }
0x1173   :  { %v35749_v51 = vand.u32 4294901760, %v9971_v59  ;;  %v9989_v63 = vadd.f32 %v32134_v60, %v9899_v52  ;;  %v10114_v0 = vsub.f32 %v9977_v40, %v35746_v31 }
0x1174   :  { %v9982_v49 = vpop.f32.mrf.mxu1 }
0x1175   :  { %v35752_v2 = vand.u32 4294901760, %v9989_v63  ;;  %v9983_v55 = vadd.f32 %v9982_v49, %v9893_v50  ;;  %v10121_v8 = vsub.f32 %v9971_v59, %v35749_v51  ;;  %v10115_v19 = vand.u32 4294901760, %v10114_v0 }
0x1177   :  { %v10100_v18 = vsub.f32 %v9989_v63, %v35752_v2  ;;  %v35759_v58 = vand.u32 4294901760, %v9983_v55  ;;  %32136 = vmatpush3.msra.mxu0 %v35752_v2  ;;  %v10122_v24 = vand.u32 4294901760, %v10121_v8  ;;  %v10116_v27 = vsub.f32 %v10114_v0, %v10115_v19 }
0x1178   :  { %32137 = vmatprep.subr.mxu0 %v34480_v3 }
0x1179   :  { %v10101_v20 = vand.u32 4294901760, %v10100_v18  ;;  %v10107_v44 = vsub.f32 %v9983_v55, %v35759_v58  ;;  %32138 = vmatpush3.msra.mxu0 %v35759_v58  ;;  %v10123_v32 = vsub.f32 %v10121_v8, %v10122_v24  ;;  %v10117_v33 = vand.u32 4294901760, %v10116_v27 }
0x117a   :  { %32139 = vmatprep.subr.mxu0 %v34480_v3 }
0x117b   :  { %v10102_v62 = vsub.f32 %v10100_v18, %v10101_v20  ;;  %v10108_v25 = vand.u32 4294901760, %v10107_v44  ;;  %32140 = vmatpush3.msra.mxu0 %v35746_v31  ;;  %v10124_v38 = vand.u32 4294901760, %v10123_v32 }
0x117c   :  { %32141 = vmatprep.subr.mxu0 %v34480_v3 }
0x117d   :  { %32142 = vmatpush3.msra.mxu0 %v35749_v51  ;;  %v10103_v1 = vand.u32 4294901760, %v10102_v62  ;;  %v10109_v29 = vsub.f32 %v10107_v44, %v10108_v25 }
0x117e   :  { %32157 = vmatprep.subr.mxu0 %v34480_v3  ;;  %32144 = vmatmul.mubr.f32.vlgmr.msra.gmra.mxu0 %v10068_v23 }
0x117f   :  { %32147 = vmatpush3.msra.mxu1 %v10103_v1  ;;  %32158 = vmatpush3.msra.mxu0 %v10100_v18  ;;  %v10110_v30 = vand.u32 4294901760, %v10109_v29 }
0x1180   :  { %32148 = vmatprep.subr.mxu1 %v34480_v3  ;;  %32159 = vmatprep.subr.mxu0 %v34480_v3 }
0x1181   :  { %32149 = vmatpush3.msra.mxu1 %v10110_v30  ;;  %32160 = vmatpush3.msra.mxu0 %v10107_v44  ;;  %v29233_v30 = vld [vmem:[%s38038_s0 + $0x40] sm:$0xff] }
0x1182   :  { %32150 = vmatprep.subr.mxu1 %v34480_v3  ;;  %32161 = vmatprep.subr.mxu0 %v34480_v3 }
0x1183   :  { %32151 = vmatpush3.msra.mxu1 %v10117_v33  ;;  %32162 = vmatpush3.msra.mxu0 %v10114_v0 }
0x1184   :  { %32152 = vmatprep.subr.mxu1 %v34480_v3  ;;  %32163 = vmatprep.subr.mxu0 %v34480_v3 }
0x1185   :  { %32153 = vmatpush3.msra.mxu1 %v10124_v38  ;;  %32164 = vmatpush3.msra.mxu0 %v10121_v8  ;;  %v35897_v8 = vld [vmem:[%s38043_s5] ss:$0 sm:$0xff] }
0x1186   :  { %32155 = vmatmul.mubr.f32.vlgmr.msra.gmra.mxu1 %v35741_v36  ;;  %32165 = vmatprep.mubr.msk.f32.mxu0 %vm34481_vm1, %v34480_v3 }
0x1187   :  { %32168 = vmatprep.subr.mxu1 %v34480_v3  ;;  %32179 = vmatprep.subr.mxu0 %v34480_v3 }
0x1188   :  { %32166 = vmatmul.mubr.f32.vlgmr.msra.gmra.mxu0 %v35744_v47  ;;  %32169 = vmatpush3.msra.mxu1 %v35752_v2 }
0x1189   :  { %32180 = vmatpush3.msra.mxu0 %v10101_v20  ;;  %32170 = vmatprep.subr.mxu1 %v34480_v3 }
0x118a   :  { %32181 = vmatprep.subr.mxu0 %v34480_v3  ;;  %32171 = vmatpush3.msra.mxu1 %v35759_v58 }
0x118b   :  { %32182 = vmatpush3.msra.mxu0 %v10108_v25  ;;  %32172 = vmatprep.subr.mxu1 %v34480_v3 }
0x118c   :  { %32183 = vmatprep.subr.mxu0 %v34480_v3  ;;  %32173 = vmatpush3.msra.mxu1 %v35746_v31 }
0x118d   :  { %32184 = vmatpush3.msra.mxu0 %v10115_v19  ;;  %32174 = vmatprep.subr.mxu1 %v34480_v3 }
0x118e   :  { %32185 = vmatprep.subr.mxu0 %v34480_v3  ;;  %32175 = vmatpush3.msra.mxu1 %v35749_v51 }
0x118f   :  { %32176 = vmatprep.mubr.msk.f32.mxu1 %vm34481_vm1, %v34480_v3  ;;  %32186 = vmatpush3.msra.mxu0 %v10122_v24 }
0x1190   :  { %32177 = vmatmul.mubr.f32.vlgmr.msra.gmra.mxu1 %v10066_v61  ;;  %32190 = vmatprep.subr.mxu1 %v34480_v3 }
0x1191   :  { %32187 = vmatprep.mubr.msk.f32.mxu0 %vm34481_vm1, %v34480_v3  ;;  %32191 = vmatpush3.msra.mxu1 %v35752_v2 }
0x1192   :  { %32188 = vmatmul.mubr.f32.vlgmr.msra.gmra.mxu0 %v35741_v36  ;;  %32192 = vmatprep.subr.mxu1 %v34480_v3 }
0x1193   :  { %32193 = vmatpush3.msra.mxu1 %v35759_v58  ;;  %32198 = vmatprep.mubr.msk.f32.mxu1 %vm34481_vm1, %v34480_v3 }
0x1194   :  { %32194 = vmatprep.subr.mxu1 %v34480_v3  ;;  %32201 = vmatprep.subr.mxu0 %v34480_v3 }
0x1195   :  { %32195 = vmatpush3.msra.mxu1 %v35746_v31  ;;  %32202 = vmatpush3.msra.mxu0 %v34531_v4 }
0x1196   :  { %32196 = vmatprep.subr.mxu1 %v34480_v3  ;;  %32203 = vmatprep.subr.mxu0 %v34480_v3 }
0x1197   :  { %32197 = vmatpush3.msra.mxu1 %v35749_v51  ;;  %32204 = vmatpush3.msra.mxu0 %v34533_v5 }
0x1198   :  { %32199 = vmatmul.mubr.f32.vlgmr.msra.gmra.mxu1 %v35741_v36  ;;  %32212 = vmatprep.subr.mxu1 %v34480_v3 }
0x1199   :  { %32213 = vmatpush3.msra.mxu1 %v34586_v21  ;;  %32220 = vmatprep.mubr.msk.f32.mxu1 %vm34481_vm1, %v34480_v3 }
0x119a   :  { %32214 = vmatprep.subr.mxu1 %v34480_v3  ;;  %32205 = vmatprep.subr.mxu0 %v34480_v3 }
0x119b   :  { %32215 = vmatpush3.msra.mxu1 %v34588_v22  ;;  %32206 = vmatpush3.msra.mxu0 %v34535_v6 }
0x119c   :  { %32216 = vmatprep.subr.mxu1 %v34480_v3  ;;  %32207 = vmatprep.subr.mxu0 %v34480_v3 }
0x119d   :  { %32217 = vmatpush3.msra.mxu1 %v34596_v26  ;;  %32208 = vmatpush3.msra.mxu0 %v34543_v9 }
0x119e   :  { %32218 = vmatprep.subr.mxu1 %v34480_v3  ;;  %32209 = vmatprep.mubr.msk.f32.mxu0 %vm34481_vm1, %v34480_v3 }
0x119f   :  { %32219 = vmatpush3.msra.mxu1 %v34600_v28  ;;  %32223 = vmatprep.subr.mxu0 %v34480_v3 }
0x11a0   :  { %32234 = vmatprep.subr.mxu1 %v34480_v3 }
0x123e   :  { %v10070_v39 = vpop.f32.mrf.mxu0 }
0x1240   :  { %v32145_v36 = vpop.f32.mrf.mxu0 }
0x1246   :  { %v10161_v37 = vpop.f32.mrf.mxu1 }
0x1247   :  { %v10162_v35 = vadd.f32 %v10161_v37, %v10070_v39 }
0x1248   :  { %v32156_v46 = vpop.f32.mrf.mxu1  ;;  %v10241_v42 = vpop.f32.mrf.mxu0 }
0x1249   :  { %v10242_v53 = vadd.f32 %v10241_v42, %v10162_v35 }
0x124a   :  { %v32167_v43 = vpop.f32.mrf.mxu0 }
0x124b   :  { %v29249_v43 = vld [vmem:[%s38040_s2 + $0xc0] sm:$0xff] }
0x124c   :  { %v11484_v35 = vsel %vm551_vm2, %v29249_v43, 0 }
0x1250   :  { %v10318_v34 = vpop.f32.mrf.mxu1 }
0x1251   :  { %v10319_v48 = vadd.f32 %v10318_v34, %v10242_v53  ;;  %v35947_v34 = vand.u32 4294901760, %v11484_v35 }
0x1252   :  { %v32178_v54 = vpop.f32.mrf.mxu1  ;;  %v10401_v47 = vpop.f32.mrf.mxu0 }
0x1253   :  { %v10402_v40 = vadd.f32 %v10401_v47, %v10319_v48  ;;  %v35950_v53 = vsub.f32 %v11484_v35, %v35947_v34 }
0x1254   :  { %v32189_v41 = vpop.f32.mrf.mxu0 }
0x1255   :  { %v11563_v54 = vand.u32 4294901760, %v35950_v53 }
0x1257   :  { %v11564_v47 = vsub.f32 %v35950_v53, %v11563_v54 }
0x1258   :  { %v10476_v56 = vpop.f32.mrf.mxu1 }
0x1259   :  { %v10477_v57 = vadd.f32 %v10476_v56, %v10402_v40  ;;  %v11565_v48 = vand.u32 4294901760, %v11564_v47 }
0x125a   :  { %v32200_v52 = vpop.f32.mrf.mxu1 }
0x125b   :  { %v10480_v31 = vsub.f32 %v35722_v45, %v10477_v57 }
0x125d   :  { %v10482_v59 = vsel %vm29_vm0, %v10480_v31, 0 }
0x125e   :  { %v10553_v60 = vand.u32 4294901760, %v10482_v59 }
0x1260   :  { %v10554_v61 = vsub.f32 %v10482_v59, %v10553_v60  ;;  %32221 = vmatmul.mubr.f32.vlgmr.msra.gmra.mxu1 %v10553_v60 }
0x1261   :  { %32235 = vmatpush3.msra.mxu1 %v34531_v4  ;;  %32242 = vmatprep.mubr.msk.f32.mxu1 %vm34481_vm1, %v34480_v3 }
0x1262   :  { %v10555_v50 = vand.u32 4294901760, %v10554_v61  ;;  %32236 = vmatprep.subr.mxu1 %v34480_v3 }
0x1263   :  { %32237 = vmatpush3.msra.mxu1 %v34533_v5 }
0x1264   :  { %v10556_v51 = vsub.f32 %v10554_v61, %v10555_v50  ;;  %32238 = vmatprep.subr.mxu1 %v34480_v3 }
0x1265   :  { %32239 = vmatpush3.msra.mxu1 %v34535_v6 }
0x1266   :  { %v10557_v45 = vand.u32 4294901760, %v10556_v51  ;;  %32240 = vmatprep.subr.mxu1 %v34480_v3 }
0x1267   :  { %32241 = vmatpush3.msra.mxu1 %v34543_v9 }
0x1268   :  { %32243 = vmatmul.mubr.f32.vlgmr.msra.gmra.mxu1 %v10555_v50  ;;  %32256 = vmatprep.subr.mxu1 %v34480_v3 }
0x1269   :  { %32210 = vmatmul.mubr.f32.vlgmr.msra.gmra.mxu0 %v10557_v45  ;;  %32257 = vmatpush3.msra.mxu1 %v34531_v4 }
0x126a   :  { %32224 = vmatpush3.msra.mxu0 %v34552_v10  ;;  %32258 = vmatprep.subr.mxu1 %v34480_v3 }
0x126b   :  { %32225 = vmatprep.subr.mxu0 %v34480_v3  ;;  %32259 = vmatpush3.msra.mxu1 %v34533_v5 }
0x126c   :  { %32226 = vmatpush3.msra.mxu0 %v34555_v11  ;;  %32260 = vmatprep.subr.mxu1 %v34480_v3 }
0x126d   :  { %32227 = vmatprep.subr.mxu0 %v34480_v3  ;;  %32261 = vmatpush3.msra.mxu1 %v34535_v6 }
0x126e   :  { %32228 = vmatpush3.msra.mxu0 %v34558_v12  ;;  %32262 = vmatprep.subr.mxu1 %v34480_v3 }
0x126f   :  { %32229 = vmatprep.subr.mxu0 %v34480_v3  ;;  %32231 = vmatprep.mubr.msk.f32.mxu0 %vm34481_vm1, %v34480_v3 }
0x1270   :  { %32230 = vmatpush3.msra.mxu0 %v34562_v13  ;;  %32263 = vmatpush3.msra.mxu1 %v34543_v9 }
0x1271   :  { %32264 = vmatprep.mubr.msk.f32.mxu1 %vm34481_vm1, %v34480_v3  ;;  %32232 = vmatmul.mubr.f32.vlgmr.msra.gmra.mxu0 %v10554_v61 }
0x1272   :  { %32245 = vmatprep.subr.mxu0 %v34480_v3  ;;  %32265 = vmatmul.mubr.f32.vlgmr.msra.gmra.mxu1 %v10553_v60 }
0x1273   :  { %32246 = vmatpush3.msra.mxu0 %v34565_v14  ;;  %32253 = vmatprep.mubr.msk.f32.mxu0 %vm34481_vm1, %v34480_v3 }
0x1274   :  { %32247 = vmatprep.subr.mxu0 %v34480_v3  ;;  %32278 = vmatprep.subr.mxu1 %v34480_v3 }
0x1275   :  { %32248 = vmatpush3.msra.mxu0 %v34569_v15  ;;  %32279 = vmatpush3.msra.mxu1 %v34586_v21 }
0x1276   :  { %32249 = vmatprep.subr.mxu0 %v34480_v3  ;;  %32280 = vmatprep.subr.mxu1 %v34480_v3 }
0x1277   :  { %32250 = vmatpush3.msra.mxu0 %v34572_v16  ;;  %32281 = vmatpush3.msra.mxu1 %v34588_v22 }
0x1278   :  { %32251 = vmatprep.subr.mxu0 %v34480_v3  ;;  %32282 = vmatprep.subr.mxu1 %v34480_v3 }
0x1279   :  { %32252 = vmatpush3.msra.mxu0 %v34576_v17  ;;  %32283 = vmatpush3.msra.mxu1 %v34596_v26 }
0x127a   :  { %32254 = vmatmul.mubr.f32.vlgmr.msra.gmra.mxu0 %v10553_v60  ;;  %32284 = vmatprep.subr.mxu1 %v34480_v3 }
0x127b   :  { %32285 = vmatpush3.msra.mxu1 %v34600_v28  ;;  %32267 = vmatprep.subr.mxu0 %v34480_v3 }
0x127c   :  { %32286 = vmatprep.mubr.msk.f32.mxu1 %vm34481_vm1, %v34480_v3  ;;  %32300 = vmatprep.subr.mxu1 %v34480_v3 }
0x127d   :  { %32268 = vmatpush3.msra.mxu0 %v34531_v4  ;;  %32275 = vmatprep.mubr.msk.f32.mxu0 %vm34481_vm1, %v34480_v3 }
0x127e   :  { %32269 = vmatprep.subr.mxu0 %v34480_v3 }
0x127f   :  { %32270 = vmatpush3.msra.mxu0 %v34533_v5 }
0x1280   :  { %32271 = vmatprep.subr.mxu0 %v34480_v3 }
0x1281   :  { %32272 = vmatpush3.msra.mxu0 %v34535_v6 }
0x1282   :  { %32273 = vmatprep.subr.mxu0 %v34480_v3 }
0x1283   :  { %32274 = vmatpush3.msra.mxu0 %v34543_v9 }
0x1284   :  { %32289 = vmatprep.subr.mxu0 %v34480_v3 }
0x1320   :  { %v10650_v63 = vpop.f32.mrf.mxu1 }
0x1322   :  { %v32222_v49 = vpop.f32.mrf.mxu1 }
0x1328   :  { %v10807_v0 = vpop.f32.mrf.mxu1 }
0x1329   :  { %v10559_v2 = vpop.f32.mrf.mxu0 }
0x132a   :  { %v32244_v55 = vpop.f32.mrf.mxu1  ;;  %v10560_v18 = vadd.f32 %v35897_v8, %v10559_v2 }
0x132b   :  { %v32211_v7 = vpop.f32.mrf.mxu0  ;;  %v29251_v55 = vld [vmem:[%s38040_s2 + $0xd0] sm:$0xff] }
0x132c   :  { %v10651_v20 = vadd.f32 %v10650_v63, %v10560_v18 }
0x1331   :  { %v10730_v58 = vpop.f32.mrf.mxu0 }
0x1332   :  { %v10965_v19 = vpop.f32.mrf.mxu1  ;;  %v10731_v24 = vadd.f32 %v10730_v58, %v10651_v20  ;;  %v11490_v20 = vsel %vm551_vm2, %v29251_v55, 0 }
0x1333   :  { %v32233_v44 = vpop.f32.mrf.mxu0 }
0x1334   :  { %v32266_v23 = vpop.f32.mrf.mxu1  ;;  %v10808_v62 = vadd.f32 %v10807_v0, %v10731_v24  ;;  %v29250_v0 = vld [vmem:[%s38040_s2 + $0xc8] sm:$0xff]  ;;  %v29252_v44 = vld [vmem:[%s38040_s2 + $0xd8] sm:$0xff]  ;;  %v11581_v24 = vand.u32 4294901760, %v11490_v20 }
0x1335   :  { %v11487_v58 = vsel %vm551_vm2, %v29250_v0, 0  ;;  %v29247_v0 = vld [vmem:[%s38039_s1 + $0x30] sm:$0xff] }
0x1336   :  { %v11571_v23 = vand.u32 4294901760, %v11487_v58 }
0x133a   :  { %v10890_v25 = vpop.f32.mrf.mxu0 }
0x133b   :  { %v10891_v27 = vadd.f32 %v10890_v25, %v10808_v62  ;;  %v11493_v62 = vsel %vm551_vm2, %v29252_v44, 0  ;;  %v11572_v25 = vsub.f32 %v11487_v58, %v11571_v23 }
0x133c   :  { %v32255_v1 = vpop.f32.mrf.mxu0 }
0x133d   :  { %v10966_v29 = vadd.f32 %v10965_v19, %v10891_v27  ;;  %v11591_v27 = vand.u32 4294901760, %v11493_v62  ;;  %v11582_v1 = vsub.f32 %v11490_v20, %v11581_v24 }
0x133f   :  { %34418 = vtanh.f32 %v10966_v29  ;;  %v11573_v29 = vand.u32 4294901760, %v11572_v25 }
0x134c   :  { %v34419_v32 = vpop.eup %34418 }
0x134d   :  { %v10970_v33 = vadd.f32 %v34419_v32, %v29233_v30  ;;  %v11592_v30 = vsub.f32 %v11493_v62, %v11591_v27  ;;  %v11583_v32 = vand.u32 4294901760, %v11582_v1 }
0x134f   :  { %10972 = vst.msk [vmem:[#allocation3 + $0x10] sm:$0xff] %vm29_vm0, %v10970_v33  ;;  %v10994_v38 = vsel %vm29_vm0, %v10970_v33, 0  ;;  %v29244_v33 = vld [vmem:[%s38038_s0 + $0x48] sm:$0xff] }
0x1350   :  { %v11065_v39 = vand.u32 4294901760, %v10994_v38 }
0x1352   :  { %v11066_v36 = vsub.f32 %v10994_v38, %v11065_v39  ;;  %32287 = vmatmul.mubr.f32.vlgmr.msra.gmra.mxu1 %v11065_v39  ;;  %v11574_v38 = vsub.f32 %v11572_v25, %v11573_v29 }
0x1353   :  { %32301 = vmatpush3.msra.mxu1 %v34531_v4  ;;  %32308 = vmatprep.mubr.msk.f32.mxu1 %vm34481_vm1, %v34480_v3 }
0x1354   :  { %32302 = vmatprep.subr.mxu1 %v34480_v3  ;;  %v11067_v37 = vand.u32 4294901760, %v11066_v36  ;;  %v11575_v43 = vand.u32 4294901760, %v11574_v38 }
0x1355   :  { %32303 = vmatpush3.msra.mxu1 %v34533_v5 }
0x1356   :  { %32304 = vmatprep.subr.mxu1 %v34480_v3  ;;  %v11068_v46 = vsub.f32 %v11066_v36, %v11067_v37 }
0x1357   :  { %32305 = vmatpush3.msra.mxu1 %v34535_v6 }
0x1358   :  { %32306 = vmatprep.subr.mxu1 %v34480_v3  ;;  %v11069_v42 = vand.u32 4294901760, %v11068_v46 }
0x1359   :  { %32307 = vmatpush3.msra.mxu1 %v34543_v9 }
0x135a   :  { %32309 = vmatmul.mubr.f32.vlgmr.msra.gmra.mxu1 %v11067_v37  ;;  %32322 = vmatprep.subr.mxu1 %v34480_v3  ;;  %v11584_v37 = vsub.f32 %v11582_v1, %v11583_v32 }
0x135b   :  { %32276 = vmatmul.mubr.f32.vlgmr.msra.gmra.mxu0 %v11069_v42  ;;  %32323 = vmatpush3.msra.mxu1 %v34531_v4 }
0x135c   :  { %32290 = vmatpush3.msra.mxu0 %v34552_v10  ;;  %32324 = vmatprep.subr.mxu1 %v34480_v3  ;;  %v11585_v47 = vand.u32 4294901760, %v11584_v37 }
0x135d   :  { %32291 = vmatprep.subr.mxu0 %v34480_v3  ;;  %32325 = vmatpush3.msra.mxu1 %v34533_v5 }
0x135e   :  { %32292 = vmatpush3.msra.mxu0 %v34555_v11  ;;  %32326 = vmatprep.subr.mxu1 %v34480_v3 }
0x135f   :  { %32293 = vmatprep.subr.mxu0 %v34480_v3  ;;  %32327 = vmatpush3.msra.mxu1 %v34535_v6 }
0x1360   :  { %32294 = vmatpush3.msra.mxu0 %v34558_v12  ;;  %32328 = vmatprep.subr.mxu1 %v34480_v3 }
0x1361   :  { %32295 = vmatprep.subr.mxu0 %v34480_v3  ;;  %32297 = vmatprep.mubr.msk.f32.mxu0 %vm34481_vm1, %v34480_v3 }
0x1362   :  { %32296 = vmatpush3.msra.mxu0 %v34562_v13  ;;  %32329 = vmatpush3.msra.mxu1 %v34543_v9 }
0x1363   :  { %32330 = vmatprep.mubr.msk.f32.mxu1 %vm34481_vm1, %v34480_v3  ;;  %32298 = vmatmul.mubr.f32.vlgmr.msra.gmra.mxu0 %v11066_v36 }
0x1364   :  { %32311 = vmatprep.subr.mxu0 %v34480_v3  ;;  %32331 = vmatmul.mubr.f32.vlgmr.msra.gmra.mxu1 %v11065_v39 }
0x1365   :  { %32312 = vmatpush3.msra.mxu0 %v34565_v14  ;;  %32319 = vmatprep.mubr.msk.f32.mxu0 %vm34481_vm1, %v34480_v3 }
0x1366   :  { %32313 = vmatprep.subr.mxu0 %v34480_v3  ;;  %32343 = vmatprep.mubr.f32.mxu1 %v35947_v34 }
0x1367   :  { %32314 = vmatpush3.msra.mxu0 %v34569_v15 }
0x1368   :  { %32315 = vmatprep.subr.mxu0 %v34480_v3 }
0x1369   :  { %32316 = vmatpush3.msra.mxu0 %v34572_v16 }
0x136a   :  { %32317 = vmatprep.subr.mxu0 %v34480_v3 }
0x136b   :  { %32318 = vmatpush3.msra.mxu0 %v34576_v17 }
0x136c   :  { %32320 = vmatmul.mubr.f32.vlgmr.msra.gmra.mxu0 %v11065_v39  ;;  %v11593_v39 = vand.u32 4294901760, %v11592_v30 }
0x136d   :  { %32335 = vmatprep.mubr.f32.mxu0 %v11565_v48 }
0x136e   :  { %v11594_v35 = vsub.f32 %v11592_v30, %v11593_v39 }
0x1412   :  { %v11162_v41 = vpop.f32.mrf.mxu1 }
0x1414   :  { %v32288_v40 = vpop.f32.mrf.mxu1 }
0x1415   :  { %v11595_v40 = vand.u32 4294901760, %v11594_v35 }
0x141a   :  { %v11319_v56 = vpop.f32.mrf.mxu1 }
0x141b   :  { %v11071_v57 = vpop.f32.mrf.mxu0 }
0x141c   :  { %v32310_v52 = vpop.f32.mrf.mxu1  ;;  %v11072_v59 = vadd.f32 %v35897_v8, %v11071_v57 }
0x141d   :  { %v32277_v31 = vpop.f32.mrf.mxu0 }
0x141e   :  { %v11163_v50 = vadd.f32 %v11162_v41, %v11072_v59 }
0x1423   :  { %v11242_v60 = vpop.f32.mrf.mxu0 }
0x1424   :  { %v11477_v61 = vpop.f32.mrf.mxu1  ;;  %v11243_v63 = vadd.f32 %v11242_v60, %v11163_v50 }
0x1425   :  { %v32299_v51 = vpop.f32.mrf.mxu0 }
0x1426   :  { %v32332_v45 = vpop.f32.mrf.mxu1  ;;  %v11320_v49 = vadd.f32 %v11319_v56, %v11243_v63 }
0x142c   :  { %v11402_v2 = vpop.f32.mrf.mxu0 }
0x142d   :  { %v11403_v7 = vadd.f32 %v11402_v2, %v11320_v49 }
0x142e   :  { %v32321_v18 = vpop.f32.mrf.mxu0 }
0x142f   :  { %v11478_v19 = vadd.f32 %v11477_v61, %v11403_v7 }
0x1431   :  { %34420 = vtanh.f32 %v11478_v19  ;;  %v12071_v19 = vsel %vm29_vm0, %v29247_v0, 0 }
0x143e   :  { %v34421_v36 = vpop.eup %34420 }
0x143f   :  { %v35973_v46 = vadd.f32 %v34421_v36, %v29244_v33 }
0x1441   :  { %v11526_v42 = vand.u32 4294901760, %v35973_v46 }
0x1443   :  { %32333 = vmatprep.subr.mxu0 %v11526_v42  ;;  %v11633_v48 = vsub.f32 %v35973_v46, %v11526_v42 }
0x1444   :  { %32334 = vmatpush3.msra.mxu0 %v11526_v42 }
0x1445   :  { %32336 = vmatmul.mubr.f32.vlgmr.msra.gmra.mxu0 %v11575_v43  ;;  %32349 = vmatprep.subr.mxu0 %v11633_v48  ;;  %v11634_v41 = vand.u32 4294901760, %v11633_v48 }
0x1446   :  { %32350 = vmatpush3.msra.mxu0 %v11633_v48  ;;  %32338 = vmatprep.mubr.f32.mxu0 %v11585_v47 }
0x1447   :  { %32365 = vmatprep.subr.mxu0 %v11634_v41  ;;  %v11635_v56 = vsub.f32 %v11633_v48, %v11634_v41 }
0x1449   :  { %32339 = vmatmul.mubr.f32.gmra.mxu0 %v11595_v40  ;;  %v11636_v57 = vand.u32 4294901760, %v11635_v56 }
0x144a   :  { %32351 = vmatprep.mubr.f32.mxu0 %v35950_v53 }
0x144b   :  { %32341 = vmatprep.subr.mxu1 %v11636_v57 }
0x144c   :  { %32342 = vmatpush3.msra.mxu1 %v11636_v57 }
0x144d   :  { %32344 = vmatmul.mubr.f32.vlgmr.msra.gmra.mxu1 %v11571_v23  ;;  %32352 = vmatmul.mubr.f32.vlgmr.msra.gmra.mxu0 %v11572_v25 }
0x144e   :  { %32357 = vmatprep.subr.mxu1 %v11526_v42  ;;  %32366 = vmatpush3.msra.mxu0 %v11634_v41 }
0x144f   :  { %32358 = vmatpush3.msra.mxu1 %v11526_v42  ;;  %32346 = vmatprep.mubr.f32.mxu1 %v11581_v24 }
0x1450   :  { %32373 = vmatprep.subr.mxu1 %v11526_v42  ;;  %32354 = vmatprep.mubr.f32.mxu0 %v11582_v1 }
0x1451   :  { %32347 = vmatmul.mubr.f32.gmra.mxu1 %v11591_v27  ;;  %32355 = vmatmul.mubr.f32.gmra.mxu0 %v11592_v30 }
0x1452   :  { %32359 = vmatprep.mubr.f32.mxu1 %v11563_v54  ;;  %32367 = vmatprep.mubr.f32.mxu0 %v35947_v34 }
0x1453   :  { %32381 = vmatprep.subr.mxu0 %v34480_v3 }
0x1455   :  { %32360 = vmatmul.mubr.f32.vlgmr.msra.gmra.mxu1 %v11573_v29  ;;  %32368 = vmatmul.mubr.f32.vlgmr.msra.gmra.mxu0 %v11571_v23 }
0x1456   :  { %32374 = vmatpush3.msra.mxu1 %v11526_v42  ;;  %32362 = vmatprep.mubr.f32.mxu1 %v11583_v32 }
0x1457   :  { %32370 = vmatprep.mubr.f32.mxu0 %v11581_v24  ;;  %32392 = vmatprep.subr.mxu1 %v34480_v3 }
0x1459   :  { %32363 = vmatmul.mubr.f32.gmra.mxu1 %v11593_v39  ;;  %32371 = vmatmul.mubr.f32.gmra.mxu0 %v11591_v27 }
0x145a   :  { %32375 = vmatprep.mubr.f32.mxu1 %v35947_v34  ;;  %32389 = vmatprep.mubr.msk.f32.mxu0 %vm34481_vm1, %v34480_v3 }
0x145d   :  { %32376 = vmatmul.mubr.f32.vlgmr.msra.gmra.mxu1 %v11571_v23 }
0x145e   :  { %32378 = vmatprep.mubr.f32.mxu1 %v11581_v24 }
0x1461   :  { %32379 = vmatmul.mubr.f32.gmra.mxu1 %v11591_v27  ;;  %v35992_v27 = vand.u32 4294901760, %v12071_v19 }
0x1462   :  { %32400 = vmatprep.mubr.msk.f32.mxu1 %vm34481_vm1, %v34480_v3 }
0x1463   :  { %v35995_v37 = vsub.f32 %v12071_v19, %v35992_v27 }
0x1505   :  { %v32337_v53 = vpop.f32.mrf.mxu0 }
0x1507   :  { %v11567_v54 = vpop.f32.mrf.mxu0 }
0x1509   :  { %v32340_v52 = vpop.f32.mrf.mxu0 }
0x150b   :  { %v11587_v31 = vpop.f32.mrf.mxu0 }
0x150d   :  { %v32345_v59 = vpop.f32.mrf.mxu1  ;;  %v32353_v60 = vpop.f32.mrf.mxu0 }
0x150e   :  { %v11680_v34 = vadd.f32 %v32345_v59, %v32337_v53  ;;  %v12144_v53 = vand.u32 4294901760, %v35995_v37 }
0x150f   :  { %v11673_v61 = vpop.f32.mrf.mxu1  ;;  %v11765_v50 = vpop.f32.mrf.mxu0 }
0x1510   :  { %v11674_v2 = vadd.f32 %v11673_v61, %v11567_v54  ;;  %v11773_v18 = vadd.f32 %v32353_v60, %v11680_v34 }
0x1511   :  { %v32348_v51 = vpop.f32.mrf.mxu1  ;;  %v32356_v45 = vpop.f32.mrf.mxu0 }
0x1512   :  { %v11692_v58 = vadd.f32 %v32348_v51, %v32340_v52  ;;  %v11766_v23 = vadd.f32 %v11765_v50, %v11674_v2  ;;  %v12145_v51 = vsub.f32 %v35995_v37, %v12144_v53 }
0x1513   :  { %v11685_v63 = vpop.f32.mrf.mxu1  ;;  %v11779_v49 = vpop.f32.mrf.mxu0 }
0x1514   :  { %v11686_v24 = vadd.f32 %v11685_v63, %v11587_v31  ;;  %v11787_v1 = vadd.f32 %v32356_v45, %v11692_v58 }
0x1515   :  { %v32361_v55 = vpop.f32.mrf.mxu1  ;;  %v32369_v7 = vpop.f32.mrf.mxu0 }
0x1516   :  { %v11869_v62 = vadd.f32 %v32361_v55, %v11773_v18  ;;  %v11780_v33 = vadd.f32 %v11779_v49, %v11686_v24  ;;  %v12146_v55 = vand.u32 4294901760, %v12145_v51 }
0x1517   :  { %v11860_v20 = vpop.f32.mrf.mxu1  ;;  %v11958_v44 = vpop.f32.mrf.mxu0 }
0x1518   :  { %v11861_v29 = vadd.f32 %v11860_v20, %v11766_v23  ;;  %v11965_v38 = vadd.f32 %v32369_v7, %v11869_v62 }
0x1519   :  { %v32364_v25 = vpop.f32.mrf.mxu1  ;;  %v32372_v32 = vpop.f32.mrf.mxu0 }
0x151a   :  { %v11885_v39 = vadd.f32 %v32364_v25, %v11787_v1  ;;  %v11959_v42 = vadd.f32 %v11958_v44, %v11861_v29 }
0x151b   :  { %v11876_v30 = vpop.f32.mrf.mxu1  ;;  %v11970_v47 = vpop.f32.mrf.mxu0 }
0x151c   :  { %v11877_v43 = vadd.f32 %v11876_v30, %v11780_v33  ;;  %v11977_v41 = vadd.f32 %v32372_v32, %v11885_v39 }
0x151d   :  { %v32377_v36 = vpop.f32.mrf.mxu1 }
0x151e   :  { %v12055_v35 = vadd.f32 %v32377_v36, %v11965_v38  ;;  %v11971_v54 = vadd.f32 %v11970_v47, %v11877_v43 }
0x151f   :  { %v12048_v48 = vpop.f32.mrf.mxu1 }
0x1520   :  { %v35997_v40 = vand.u32 4294901760, %v12055_v35  ;;  %v12049_v56 = vadd.f32 %v12048_v48, %v11959_v42 }
0x1521   :  { %v32380_v57 = vpop.f32.mrf.mxu1 }
0x1522   :  { %v36000_v52 = vand.u32 4294901760, %v12049_v56  ;;  %v12067_v31 = vadd.f32 %v32380_v57, %v11977_v41  ;;  %v12192_v60 = vsub.f32 %v12055_v35, %v35997_v40 }
0x1523   :  { %v12060_v59 = vpop.f32.mrf.mxu1 }
0x1524   :  { %v36003_v61 = vand.u32 4294901760, %v12067_v31  ;;  %v12061_v50 = vadd.f32 %v12060_v59, %v11971_v54  ;;  %v12199_v45 = vsub.f32 %v12049_v56, %v36000_v52  ;;  %v12193_v49 = vand.u32 4294901760, %v12192_v60  ;;  %v29253_v59 = vld [vmem:[%s38040_s2 + $0xe0] sm:$0xff] }
0x1526   :  { %v12178_v34 = vsub.f32 %v12067_v31, %v36003_v61  ;;  %v36010_v63 = vand.u32 4294901760, %v12061_v50  ;;  %32382 = vmatpush3.msra.mxu0 %v36003_v61  ;;  %v12200_v7 = vand.u32 4294901760, %v12199_v45  ;;  %v12194_v19 = vsub.f32 %v12192_v60, %v12193_v49 }
0x1527   :  { %32383 = vmatprep.subr.mxu0 %v34480_v3 }
0x1528   :  { %v12179_v0 = vand.u32 4294901760, %v12178_v34  ;;  %v12185_v2 = vsub.f32 %v12061_v50, %v36010_v63  ;;  %32384 = vmatpush3.msra.mxu0 %v36010_v63  ;;  %v12201_v24 = vsub.f32 %v12199_v45, %v12200_v7  ;;  %v12195_v62 = vand.u32 4294901760, %v12194_v19 }
0x1529   :  { %32385 = vmatprep.subr.mxu0 %v34480_v3 }
0x152a   :  { %v12180_v18 = vsub.f32 %v12178_v34, %v12179_v0  ;;  %v12186_v58 = vand.u32 4294901760, %v12185_v2  ;;  %32386 = vmatpush3.msra.mxu0 %v35997_v40  ;;  %v12202_v25 = vand.u32 4294901760, %v12201_v24 }
0x152b   :  { %32387 = vmatprep.subr.mxu0 %v34480_v3 }
0x152c   :  { %32388 = vmatpush3.msra.mxu0 %v36000_v52  ;;  %v12181_v20 = vand.u32 4294901760, %v12180_v18  ;;  %v12187_v44 = vsub.f32 %v12185_v2, %v12186_v58 }
0x152d   :  { %32403 = vmatprep.subr.mxu0 %v34480_v3  ;;  %32390 = vmatmul.mubr.f32.vlgmr.msra.gmra.mxu0 %v12146_v55 }
0x152e   :  { %32393 = vmatpush3.msra.mxu1 %v12181_v20  ;;  %32404 = vmatpush3.msra.mxu0 %v12178_v34  ;;  %v12188_v23 = vand.u32 4294901760, %v12187_v44 }
0x152f   :  { %32394 = vmatprep.subr.mxu1 %v34480_v3  ;;  %32405 = vmatprep.subr.mxu0 %v34480_v3 }
0x1530   :  { %32395 = vmatpush3.msra.mxu1 %v12188_v23  ;;  %32406 = vmatpush3.msra.mxu0 %v12185_v2 }
0x1531   :  { %32396 = vmatprep.subr.mxu1 %v34480_v3  ;;  %32407 = vmatprep.subr.mxu0 %v34480_v3 }
0x1532   :  { %32397 = vmatpush3.msra.mxu1 %v12195_v62  ;;  %32408 = vmatpush3.msra.mxu0 %v12192_v60  ;;  %v13050_v60 = vsel %vm551_vm2, %v29253_v59, 0 }
0x1533   :  { %32398 = vmatprep.subr.mxu1 %v34480_v3  ;;  %32409 = vmatprep.subr.mxu0 %v34480_v3 }
0x1534   :  { %32399 = vmatpush3.msra.mxu1 %v12202_v25  ;;  %32410 = vmatpush3.msra.mxu0 %v12199_v45  ;;  %v29254_v25 = vld [vmem:[%s38040_s2 + $0xe8] sm:$0xff] }
0x1535   :  { %32401 = vmatmul.mubr.f32.vlgmr.msra.gmra.mxu1 %v35992_v27  ;;  %32411 = vmatprep.mubr.msk.f32.mxu0 %vm34481_vm1, %v34480_v3 }
0x1536   :  { %32414 = vmatprep.subr.mxu1 %v34480_v3  ;;  %32425 = vmatprep.subr.mxu0 %v34480_v3 }
0x1537   :  { %32412 = vmatmul.mubr.f32.vlgmr.msra.gmra.mxu0 %v35995_v37  ;;  %32415 = vmatpush3.msra.mxu1 %v36003_v61 }
0x1538   :  { %32426 = vmatpush3.msra.mxu0 %v12179_v0  ;;  %32416 = vmatprep.subr.mxu1 %v34480_v3 }
0x1539   :  { %32427 = vmatprep.subr.mxu0 %v34480_v3  ;;  %32417 = vmatpush3.msra.mxu1 %v36010_v63 }
0x153a   :  { %32428 = vmatpush3.msra.mxu0 %v12186_v58  ;;  %32418 = vmatprep.subr.mxu1 %v34480_v3 }
0x153b   :  { %32429 = vmatprep.subr.mxu0 %v34480_v3  ;;  %32419 = vmatpush3.msra.mxu1 %v35997_v40 }
0x153c   :  { %32430 = vmatpush3.msra.mxu0 %v12193_v49  ;;  %32420 = vmatprep.subr.mxu1 %v34480_v3 }
0x153d   :  { %32431 = vmatprep.subr.mxu0 %v34480_v3  ;;  %32421 = vmatpush3.msra.mxu1 %v36000_v52 }
0x153e   :  { %32422 = vmatprep.mubr.msk.f32.mxu1 %vm34481_vm1, %v34480_v3  ;;  %32432 = vmatpush3.msra.mxu0 %v12200_v7 }
0x153f   :  { %32423 = vmatmul.mubr.f32.vlgmr.msra.gmra.mxu1 %v12144_v53  ;;  %32436 = vmatprep.subr.mxu1 %v34480_v3 }
0x1540   :  { %32433 = vmatprep.mubr.msk.f32.mxu0 %vm34481_vm1, %v34480_v3  ;;  %32437 = vmatpush3.msra.mxu1 %v36003_v61  ;;  %v36127_v61 = vand.u32 4294901760, %v13050_v60 }
0x1541   :  { %32434 = vmatmul.mubr.f32.vlgmr.msra.gmra.mxu0 %v35992_v27  ;;  %32438 = vmatprep.subr.mxu1 %v34480_v3 }
0x1542   :  { %32439 = vmatpush3.msra.mxu1 %v36010_v63  ;;  %32444 = vmatprep.mubr.msk.f32.mxu1 %vm34481_vm1, %v34480_v3  ;;  %v36130_v50 = vsub.f32 %v13050_v60, %v36127_v61 }
0x1543   :  { %32440 = vmatprep.subr.mxu1 %v34480_v3  ;;  %32447 = vmatprep.subr.mxu0 %v34480_v3 }
0x1544   :  { %32441 = vmatpush3.msra.mxu1 %v35997_v40  ;;  %32448 = vmatpush3.msra.mxu0 %v34531_v4  ;;  %v13129_v51 = vand.u32 4294901760, %v36130_v50 }
0x1545   :  { %32442 = vmatprep.subr.mxu1 %v34480_v3  ;;  %32449 = vmatprep.subr.mxu0 %v34480_v3 }
0x1546   :  { %32443 = vmatpush3.msra.mxu1 %v36000_v52  ;;  %32450 = vmatpush3.msra.mxu0 %v34533_v5  ;;  %v13130_v45 = vsub.f32 %v36130_v50, %v13129_v51 }
0x1547   :  { %32445 = vmatmul.mubr.f32.vlgmr.msra.gmra.mxu1 %v35992_v27  ;;  %32458 = vmatprep.subr.mxu1 %v34480_v3 }
0x1548   :  { %32459 = vmatpush3.msra.mxu1 %v34586_v21  ;;  %32466 = vmatprep.mubr.msk.f32.mxu1 %vm34481_vm1, %v34480_v3  ;;  %v13131_v34 = vand.u32 4294901760, %v13130_v45 }
0x1549   :  { %32460 = vmatprep.subr.mxu1 %v34480_v3  ;;  %32451 = vmatprep.subr.mxu0 %v34480_v3 }
0x154a   :  { %32461 = vmatpush3.msra.mxu1 %v34588_v22  ;;  %32452 = vmatpush3.msra.mxu0 %v34535_v6 }
0x154b   :  { %32462 = vmatprep.subr.mxu1 %v34480_v3  ;;  %32453 = vmatprep.subr.mxu0 %v34480_v3 }
0x154c   :  { %32463 = vmatpush3.msra.mxu1 %v34596_v26  ;;  %32454 = vmatpush3.msra.mxu0 %v34543_v9 }
0x154d   :  { %32464 = vmatprep.subr.mxu1 %v34480_v3  ;;  %32455 = vmatprep.mubr.msk.f32.mxu0 %vm34481_vm1, %v34480_v3 }
0x154e   :  { %32465 = vmatpush3.msra.mxu1 %v34600_v28  ;;  %32469 = vmatprep.subr.mxu0 %v34480_v3 }
0x154f   :  { %32480 = vmatprep.subr.mxu1 %v34480_v3 }
0x15ed   :  { %v12148_v27 = vpop.f32.mrf.mxu0 }
0x15ef   :  { %v32391_v1 = vpop.f32.mrf.mxu0 }
0x15f0   :  { %v29255_v1 = vld [vmem:[%s38040_s2 + $0xf0] sm:$0xff] }
0x15f5   :  { %v12239_v29 = vpop.f32.mrf.mxu1 }
0x15f6   :  { %v12240_v38 = vadd.f32 %v12239_v29, %v12148_v27 }
0x15f7   :  { %v32402_v30 = vpop.f32.mrf.mxu1  ;;  %v12319_v32 = vpop.f32.mrf.mxu0 }
0x15f8   :  { %v12320_v36 = vadd.f32 %v12319_v32, %v12240_v38  ;;  %v29256_v38 = vld [vmem:[%s38040_s2 + $0xf8] sm:$0xff] }
0x15f9   :  { %v32413_v33 = vpop.f32.mrf.mxu0 }
0x15fa   :  { %v13056_v33 = vsel %vm551_vm2, %v29255_v1, 0 }
0x15ff   :  { %v12396_v39 = vpop.f32.mrf.mxu1 }
0x1600   :  { %v12397_v43 = vadd.f32 %v12396_v39, %v12320_v36  ;;  %v13147_v36 = vand.u32 4294901760, %v13056_v33 }
0x1601   :  { %v32424_v37 = vpop.f32.mrf.mxu1  ;;  %v12479_v42 = vpop.f32.mrf.mxu0 }
0x1602   :  { %v12480_v47 = vadd.f32 %v12479_v42, %v12397_v43  ;;  %v13059_v37 = vsel %vm551_vm2, %v29256_v38, 0 }
0x1603   :  { %v32435_v35 = vpop.f32.mrf.mxu0  ;;  %v13157_v43 = vand.u32 4294901760, %v13059_v37 }
0x1604   :  { %v13148_v35 = vsub.f32 %v13056_v33, %v13147_v36 }
0x1607   :  { %v12554_v48 = vpop.f32.mrf.mxu1 }
0x1608   :  { %v12555_v41 = vadd.f32 %v12554_v48, %v12480_v47  ;;  %v13158_v48 = vsub.f32 %v13059_v37, %v13157_v43 }
0x1609   :  { %v32446_v40 = vpop.f32.mrf.mxu1 }
0x160a   :  { %v12558_v56 = vsub.f32 %v35973_v46, %v12555_v41  ;;  %v13149_v41 = vand.u32 4294901760, %v13148_v35  ;;  %v29245_v40 = vld [vmem:[%s38038_s0 + $0x50] sm:$0xff] }
0x160c   :  { %v12560_v57 = vsel %vm29_vm0, %v12558_v56, 0 }
0x160d   :  { %v12631_v53 = vand.u32 4294901760, %v12560_v57 }
0x160f   :  { %v12632_v54 = vsub.f32 %v12560_v57, %v12631_v53  ;;  %32467 = vmatmul.mubr.f32.vlgmr.msra.gmra.mxu1 %v12631_v53  ;;  %v13159_v57 = vand.u32 4294901760, %v13158_v48 }
0x1610   :  { %32481 = vmatpush3.msra.mxu1 %v34531_v4  ;;  %32488 = vmatprep.mubr.msk.f32.mxu1 %vm34481_vm1, %v34480_v3 }
0x1611   :  { %v12633_v52 = vand.u32 4294901760, %v12632_v54  ;;  %32482 = vmatprep.subr.mxu1 %v34480_v3  ;;  %v13160_v59 = vsub.f32 %v13158_v48, %v13159_v57 }
0x1612   :  { %32483 = vmatpush3.msra.mxu1 %v34533_v5 }
0x1613   :  { %v12634_v31 = vsub.f32 %v12632_v54, %v12633_v52  ;;  %32484 = vmatprep.subr.mxu1 %v34480_v3 }
0x1614   :  { %32485 = vmatpush3.msra.mxu1 %v34535_v6 }
0x1615   :  { %v12635_v46 = vand.u32 4294901760, %v12634_v31  ;;  %32486 = vmatprep.subr.mxu1 %v34480_v3 }
0x1616   :  { %32487 = vmatpush3.msra.mxu1 %v34543_v9 }
0x1617   :  { %32489 = vmatmul.mubr.f32.vlgmr.msra.gmra.mxu1 %v12633_v52  ;;  %32502 = vmatprep.subr.mxu1 %v34480_v3 }
0x1618   :  { %32456 = vmatmul.mubr.f32.vlgmr.msra.gmra.mxu0 %v12635_v46  ;;  %32503 = vmatpush3.msra.mxu1 %v34531_v4 }
0x1619   :  { %32470 = vmatpush3.msra.mxu0 %v34552_v10  ;;  %32504 = vmatprep.subr.mxu1 %v34480_v3 }
0x161a   :  { %32471 = vmatprep.subr.mxu0 %v34480_v3  ;;  %32505 = vmatpush3.msra.mxu1 %v34533_v5 }
0x161b   :  { %32472 = vmatpush3.msra.mxu0 %v34555_v11  ;;  %32506 = vmatprep.subr.mxu1 %v34480_v3 }
0x161c   :  { %32473 = vmatprep.subr.mxu0 %v34480_v3  ;;  %32507 = vmatpush3.msra.mxu1 %v34535_v6 }
0x161d   :  { %32474 = vmatpush3.msra.mxu0 %v34558_v12  ;;  %32508 = vmatprep.subr.mxu1 %v34480_v3 }
0x161e   :  { %32475 = vmatprep.subr.mxu0 %v34480_v3  ;;  %32477 = vmatprep.mubr.msk.f32.mxu0 %vm34481_vm1, %v34480_v3 }
0x161f   :  { %32476 = vmatpush3.msra.mxu0 %v34562_v13  ;;  %32509 = vmatpush3.msra.mxu1 %v34543_v9 }
0x1620   :  { %32510 = vmatprep.mubr.msk.f32.mxu1 %vm34481_vm1, %v34480_v3  ;;  %32478 = vmatmul.mubr.f32.vlgmr.msra.gmra.mxu0 %v12632_v54  ;;  %v13150_v54 = vsub.f32 %v13148_v35, %v13149_v41 }
0x1621   :  { %32491 = vmatprep.subr.mxu0 %v34480_v3  ;;  %32511 = vmatmul.mubr.f32.vlgmr.msra.gmra.mxu1 %v12631_v53 }
0x1622   :  { %32492 = vmatpush3.msra.mxu0 %v34565_v14  ;;  %32499 = vmatprep.mubr.msk.f32.mxu0 %vm34481_vm1, %v34480_v3  ;;  %v13151_v60 = vand.u32 4294901760, %v13150_v54 }
0x1623   :  { %32493 = vmatprep.subr.mxu0 %v34480_v3  ;;  %32523 = vmatprep.mubr.f32.mxu1 %v36127_v61 }
0x1624   :  { %32494 = vmatpush3.msra.mxu0 %v34569_v15 }
0x1625   :  { %32495 = vmatprep.subr.mxu0 %v34480_v3 }
0x1626   :  { %32496 = vmatpush3.msra.mxu0 %v34572_v16 }
0x1627   :  { %32497 = vmatprep.subr.mxu0 %v34480_v3 }
0x1628   :  { %32498 = vmatpush3.msra.mxu0 %v34576_v17 }
0x1629   :  { %32500 = vmatmul.mubr.f32.vlgmr.msra.gmra.mxu0 %v12631_v53 }
0x162a   :  { %32515 = vmatprep.mubr.f32.mxu0 %v13131_v34 }
0x16cf   :  { %v12728_v63 = vpop.f32.mrf.mxu1 }
0x16d1   :  { %v32468_v49 = vpop.f32.mrf.mxu1 }
0x16d7   :  { %v12885_v0 = vpop.f32.mrf.mxu1 }
0x16d8   :  { %v12637_v2 = vpop.f32.mrf.mxu0 }
0x16d9   :  { %v32490_v55 = vpop.f32.mrf.mxu1  ;;  %v12638_v18 = vadd.f32 %v35897_v8, %v12637_v2  ;;  %v13053_v8 = vsel %vm551_vm2, %v29254_v25, 0 }
0x16da   :  { %v32457_v7 = vpop.f32.mrf.mxu0  ;;  %v13137_v39 = vand.u32 4294901760, %v13053_v8 }
0x16db   :  { %v12729_v20 = vadd.f32 %v12728_v63, %v12638_v18  ;;  %v13161_v63 = vand.u32 4294901760, %v13160_v59 }
0x16dc   :  { %v13138_v42 = vsub.f32 %v13053_v8, %v13137_v39 }
0x16de   :  { %v13139_v47 = vand.u32 4294901760, %v13138_v42 }
0x16e0   :  { %v12808_v58 = vpop.f32.mrf.mxu0  ;;  %v13140_v56 = vsub.f32 %v13138_v42, %v13139_v47 }
0x16e1   :  { %v13043_v19 = vpop.f32.mrf.mxu1  ;;  %v12809_v24 = vadd.f32 %v12808_v58, %v12729_v20 }
0x16e2   :  { %v32479_v44 = vpop.f32.mrf.mxu0  ;;  %v13141_v46 = vand.u32 4294901760, %v13140_v56 }
0x16e3   :  { %v32512_v23 = vpop.f32.mrf.mxu1  ;;  %v12886_v62 = vadd.f32 %v12885_v0, %v12809_v24 }
0x16e9   :  { %v12968_v27 = vpop.f32.mrf.mxu0 }
0x16ea   :  { %v12969_v29 = vadd.f32 %v12968_v27, %v12886_v62  ;;  %v29248_v62 = vld [vmem:[%s38039_s1 + $0x38] sm:$0xff] }
0x16eb   :  { %v32501_v30 = vpop.f32.mrf.mxu0  ;;  %v13637_v8 = vsel %vm29_vm0, %v29248_v62, 0 }
0x16ec   :  { %v13044_v32 = vadd.f32 %v13043_v19, %v12969_v29 }
0x16ee   :  { %34422 = vtanh.f32 %v13044_v32 }
0x16fb   :  { %v34423_v53 = vpop.eup %34422 }
0x16fc   :  { %v36153_v52 = vadd.f32 %v34423_v53, %v29245_v40 }
0x16fe   :  { %v13092_v31 = vand.u32 4294901760, %v36153_v52 }
0x1700   :  { %32513 = vmatprep.subr.mxu0 %v13092_v31  ;;  %v13199_v45 = vsub.f32 %v36153_v52, %v13092_v31 }
0x1701   :  { %32514 = vmatpush3.msra.mxu0 %v13092_v31 }
0x1702   :  { %32516 = vmatmul.mubr.f32.vlgmr.msra.gmra.mxu0 %v13141_v46  ;;  %32529 = vmatprep.subr.mxu0 %v13199_v45  ;;  %v13200_v34 = vand.u32 4294901760, %v13199_v45 }
0x1703   :  { %32530 = vmatpush3.msra.mxu0 %v13199_v45  ;;  %32518 = vmatprep.mubr.f32.mxu0 %v13151_v60 }
0x1704   :  { %32545 = vmatprep.subr.mxu0 %v13200_v34  ;;  %v13201_v49 = vsub.f32 %v13199_v45, %v13200_v34 }
0x1706   :  { %32519 = vmatmul.mubr.f32.gmra.mxu0 %v13161_v63  ;;  %v13202_v0 = vand.u32 4294901760, %v13201_v49 }
0x1707   :  { %32531 = vmatprep.mubr.f32.mxu0 %v36130_v50 }
0x1708   :  { %32521 = vmatprep.subr.mxu1 %v13202_v0 }
0x1709   :  { %32522 = vmatpush3.msra.mxu1 %v13202_v0 }
0x170a   :  { %32524 = vmatmul.mubr.f32.vlgmr.msra.gmra.mxu1 %v13137_v39  ;;  %32532 = vmatmul.mubr.f32.vlgmr.msra.gmra.mxu0 %v13138_v42  ;;  %v36172_v42 = vand.u32 4294901760, %v13637_v8 }
0x170b   :  { %32537 = vmatprep.subr.mxu1 %v13092_v31  ;;  %32546 = vmatpush3.msra.mxu0 %v13200_v34 }
0x170c   :  { %32538 = vmatpush3.msra.mxu1 %v13092_v31  ;;  %32526 = vmatprep.mubr.f32.mxu1 %v13147_v36  ;;  %v36175_v53 = vsub.f32 %v13637_v8, %v36172_v42 }
0x170d   :  { %32553 = vmatprep.subr.mxu1 %v13092_v31  ;;  %32534 = vmatprep.mubr.f32.mxu0 %v13148_v35 }
0x170e   :  { %32527 = vmatmul.mubr.f32.gmra.mxu1 %v13157_v43  ;;  %32535 = vmatmul.mubr.f32.gmra.mxu0 %v13158_v48  ;;  %v13710_v0 = vand.u32 4294901760, %v36175_v53 }
0x170f   :  { %32539 = vmatprep.mubr.f32.mxu1 %v13129_v51  ;;  %32547 = vmatprep.mubr.f32.mxu0 %v36127_v61 }
0x1710   :  { %32561 = vmatprep.subr.mxu0 %v34480_v3 }
0x1712   :  { %32540 = vmatmul.mubr.f32.vlgmr.msra.gmra.mxu1 %v13139_v47  ;;  %32548 = vmatmul.mubr.f32.vlgmr.msra.gmra.mxu0 %v13137_v39 }
0x1713   :  { %32554 = vmatpush3.msra.mxu1 %v13092_v31  ;;  %32542 = vmatprep.mubr.f32.mxu1 %v13149_v41 }
0x1714   :  { %32550 = vmatprep.mubr.f32.mxu0 %v13147_v36  ;;  %32572 = vmatprep.subr.mxu1 %v34480_v3 }
0x1716   :  { %32543 = vmatmul.mubr.f32.gmra.mxu1 %v13159_v57  ;;  %32551 = vmatmul.mubr.f32.gmra.mxu0 %v13157_v43 }
0x1717   :  { %32555 = vmatprep.mubr.f32.mxu1 %v36127_v61  ;;  %32569 = vmatprep.mubr.msk.f32.mxu0 %vm34481_vm1, %v34480_v3 }
0x171a   :  { %32556 = vmatmul.mubr.f32.vlgmr.msra.gmra.mxu1 %v13137_v39 }
0x171b   :  { %32558 = vmatprep.mubr.f32.mxu1 %v13147_v36 }
0x171e   :  { %32559 = vmatmul.mubr.f32.gmra.mxu1 %v13157_v43 }
0x171f   :  { %32580 = vmatprep.mubr.msk.f32.mxu1 %vm34481_vm1, %v34480_v3 }
0x17c2   :  { %v32517_v50 = vpop.f32.mrf.mxu0 }
0x17c4   :  { %v13133_v51 = vpop.f32.mrf.mxu0 }
0x17c6   :  { %v32520_v2 = vpop.f32.mrf.mxu0 }
0x17c8   :  { %v13153_v55 = vpop.f32.mrf.mxu0 }
0x17ca   :  { %v32525_v7 = vpop.f32.mrf.mxu1  ;;  %v32533_v18 = vpop.f32.mrf.mxu0 }
0x17cb   :  { %v13246_v61 = vadd.f32 %v32525_v7, %v32517_v50 }
0x17cc   :  { %v13239_v58 = vpop.f32.mrf.mxu1  ;;  %v13331_v19 = vpop.f32.mrf.mxu0 }
0x17cd   :  { %v13240_v25 = vadd.f32 %v13239_v58, %v13133_v51  ;;  %v13339_v29 = vadd.f32 %v32533_v18, %v13246_v61 }
0x17ce   :  { %v32528_v20 = vpop.f32.mrf.mxu1  ;;  %v32536_v44 = vpop.f32.mrf.mxu0 }
0x17cf   :  { %v13258_v30 = vadd.f32 %v32528_v20, %v32520_v2  ;;  %v13332_v38 = vadd.f32 %v13331_v19, %v13240_v25  ;;  %v13711_v19 = vsub.f32 %v36175_v53, %v13710_v0 }
0x17d0   :  { %v13251_v23 = vpop.f32.mrf.mxu1  ;;  %v13345_v24 = vpop.f32.mrf.mxu0 }
0x17d1   :  { %v13252_v39 = vadd.f32 %v13251_v23, %v13153_v55  ;;  %v13353_v43 = vadd.f32 %v32536_v44, %v13258_v30  ;;  %v13712_v25 = vand.u32 4294901760, %v13711_v19 }
0x17d2   :  { %v32541_v27 = vpop.f32.mrf.mxu1  ;;  %v32549_v1 = vpop.f32.mrf.mxu0 }
0x17d3   :  { %v13435_v36 = vadd.f32 %v32541_v27, %v13339_v29  ;;  %v13346_v41 = vadd.f32 %v13345_v24, %v13252_v39 }
0x17d4   :  { %v13426_v32 = vpop.f32.mrf.mxu1  ;;  %v13524_v33 = vpop.f32.mrf.mxu0 }
0x17d5   :  { %v13427_v35 = vadd.f32 %v13426_v32, %v13332_v38  ;;  %v13531_v40 = vadd.f32 %v32549_v1, %v13435_v36 }
0x17d6   :  { %v32544_v37 = vpop.f32.mrf.mxu1  ;;  %v32552_v48 = vpop.f32.mrf.mxu0 }
0x17d7   :  { %v13451_v56 = vadd.f32 %v32544_v37, %v13353_v43  ;;  %v13525_v54 = vadd.f32 %v13524_v33, %v13427_v35 }
0x17d8   :  { %v13442_v47 = vpop.f32.mrf.mxu1  ;;  %v13536_v59 = vpop.f32.mrf.mxu0 }
0x17d9   :  { %v13443_v31 = vadd.f32 %v13442_v47, %v13346_v41  ;;  %v13543_v45 = vadd.f32 %v32552_v48, %v13451_v56 }
0x17da   :  { %v32557_v57 = vpop.f32.mrf.mxu1 }
0x17db   :  { %v13621_v46 = vadd.f32 %v32557_v57, %v13531_v40  ;;  %v13537_v50 = vadd.f32 %v13536_v59, %v13443_v31 }
0x17dc   :  { %v13614_v60 = vpop.f32.mrf.mxu1 }
0x17dd   :  { %v36177_v34 = vand.u32 4294901760, %v13621_v46  ;;  %v13615_v63 = vadd.f32 %v13614_v60, %v13525_v54 }
0x17de   :  { %v32560_v49 = vpop.f32.mrf.mxu1 }
0x17df   :  { %v36180_v51 = vand.u32 4294901760, %v13615_v63  ;;  %v13633_v2 = vadd.f32 %v32560_v49, %v13543_v45  ;;  %v13758_v7 = vsub.f32 %v13621_v46, %v36177_v34 }
0x17e0   :  { %v13626_v55 = vpop.f32.mrf.mxu1 }
0x17e1   :  { %v36183_v18 = vand.u32 4294901760, %v13633_v2  ;;  %v13627_v58 = vadd.f32 %v13626_v55, %v13537_v50  ;;  %v13765_v20 = vsub.f32 %v13615_v63, %v36180_v51  ;;  %v13759_v23 = vand.u32 4294901760, %v13758_v7 }
0x17e3   :  { %v13744_v44 = vsub.f32 %v13633_v2, %v36183_v18  ;;  %v36190_v61 = vand.u32 4294901760, %v13627_v58  ;;  %32562 = vmatpush3.msra.mxu0 %v36183_v18  ;;  %v13766_v27 = vand.u32 4294901760, %v13765_v20  ;;  %v13760_v30 = vsub.f32 %v13758_v7, %v13759_v23 }
0x17e4   :  { %32563 = vmatprep.subr.mxu0 %v34480_v3 }
0x17e5   :  { %v13745_v24 = vand.u32 4294901760, %v13744_v44  ;;  %v13751_v62 = vsub.f32 %v13627_v58, %v36190_v61  ;;  %32564 = vmatpush3.msra.mxu0 %v36190_v61  ;;  %v13767_v38 = vsub.f32 %v13765_v20, %v13766_v27  ;;  %v13761_v39 = vand.u32 4294901760, %v13760_v30 }
0x17e6   :  { %32565 = vmatprep.subr.mxu0 %v34480_v3 }
0x17e7   :  { %v13746_v1 = vsub.f32 %v13744_v44, %v13745_v24  ;;  %v13752_v29 = vand.u32 4294901760, %v13751_v62  ;;  %32566 = vmatpush3.msra.mxu0 %v36177_v34  ;;  %v13768_v36 = vand.u32 4294901760, %v13767_v38 }
0x17e8   :  { %32567 = vmatprep.subr.mxu0 %v34480_v3 }
0x17e9   :  { %32568 = vmatpush3.msra.mxu0 %v36180_v51  ;;  %v13747_v8 = vand.u32 4294901760, %v13746_v1  ;;  %v13753_v32 = vsub.f32 %v13751_v62, %v13752_v29 }
0x17ea   :  { %32583 = vmatprep.subr.mxu0 %v34480_v3  ;;  %32570 = vmatmul.mubr.f32.vlgmr.msra.gmra.mxu0 %v13712_v25 }
0x17eb   :  { %32573 = vmatpush3.msra.mxu1 %v13747_v8  ;;  %32584 = vmatpush3.msra.mxu0 %v13744_v44  ;;  %v13754_v33 = vand.u32 4294901760, %v13753_v32 }
0x17ec   :  { %32574 = vmatprep.subr.mxu1 %v34480_v3  ;;  %32585 = vmatprep.subr.mxu0 %v34480_v3 }
0x17ed   :  { %32575 = vmatpush3.msra.mxu1 %v13754_v33  ;;  %32586 = vmatpush3.msra.mxu0 %v13751_v62  ;;  %v29246_v33 = vld [vmem:[%s38038_s0 + $0x58] sm:$0xff] }
0x17ee   :  { %32576 = vmatprep.subr.mxu1 %v34480_v3  ;;  %32587 = vmatprep.subr.mxu0 %v34480_v3 }
0x17ef   :  { %32577 = vmatpush3.msra.mxu1 %v13761_v39  ;;  %32588 = vmatpush3.msra.mxu0 %v13758_v7 }
0x17f0   :  { %32578 = vmatprep.subr.mxu1 %v34480_v3  ;;  %32589 = vmatprep.subr.mxu0 %v34480_v3 }
0x17f1   :  { %32579 = vmatpush3.msra.mxu1 %v13768_v36  ;;  %32590 = vmatpush3.msra.mxu0 %v13765_v20  ;;  %v36328_v20 = vld [vmem:[%s38043_s5] ss:$0 sm:$0xff] }
0x17f2   :  { %32581 = vmatmul.mubr.f32.vlgmr.msra.gmra.mxu1 %v36172_v42  ;;  %32591 = vmatprep.mubr.msk.f32.mxu0 %vm34481_vm1, %v34480_v3 }
0x17f3   :  { %32594 = vmatprep.subr.mxu1 %v34480_v3  ;;  %32605 = vmatprep.subr.mxu0 %v34480_v3 }
0x17f4   :  { %32592 = vmatmul.mubr.f32.vlgmr.msra.gmra.mxu0 %v36175_v53  ;;  %32595 = vmatpush3.msra.mxu1 %v36183_v18 }
0x17f5   :  { %32606 = vmatpush3.msra.mxu0 %v13745_v24  ;;  %32596 = vmatprep.subr.mxu1 %v34480_v3 }
0x17f6   :  { %32607 = vmatprep.subr.mxu0 %v34480_v3  ;;  %32597 = vmatpush3.msra.mxu1 %v36190_v61 }
0x17f7   :  { %32608 = vmatpush3.msra.mxu0 %v13752_v29  ;;  %32598 = vmatprep.subr.mxu1 %v34480_v3 }
0x17f8   :  { %32609 = vmatprep.subr.mxu0 %v34480_v3  ;;  %32599 = vmatpush3.msra.mxu1 %v36177_v34 }
0x17f9   :  { %32610 = vmatpush3.msra.mxu0 %v13759_v23  ;;  %32600 = vmatprep.subr.mxu1 %v34480_v3 }
0x17fa   :  { %32611 = vmatprep.subr.mxu0 %v34480_v3  ;;  %32601 = vmatpush3.msra.mxu1 %v36180_v51 }
0x17fb   :  { %32602 = vmatprep.mubr.msk.f32.mxu1 %vm34481_vm1, %v34480_v3  ;;  %32612 = vmatpush3.msra.mxu0 %v13766_v27 }
0x17fc   :  { %32603 = vmatmul.mubr.f32.vlgmr.msra.gmra.mxu1 %v13710_v0  ;;  %32616 = vmatprep.subr.mxu1 %v34480_v3 }
0x17fd   :  { %32613 = vmatprep.mubr.msk.f32.mxu0 %vm34481_vm1, %v34480_v3  ;;  %32617 = vmatpush3.msra.mxu1 %v36183_v18 }
0x17fe   :  { %32614 = vmatmul.mubr.f32.vlgmr.msra.gmra.mxu0 %v36172_v42  ;;  %32618 = vmatprep.subr.mxu1 %v34480_v3 }
0x17ff   :  { %32619 = vmatpush3.msra.mxu1 %v36190_v61  ;;  %32624 = vmatprep.mubr.msk.f32.mxu1 %vm34481_vm1, %v34480_v3 }
0x1800   :  { %32620 = vmatprep.subr.mxu1 %v34480_v3  ;;  %32627 = vmatprep.subr.mxu0 %v34480_v3 }
0x1801   :  { %32621 = vmatpush3.msra.mxu1 %v36177_v34  ;;  %32628 = vmatpush3.msra.mxu0 %v34531_v4 }
0x1802   :  { %32622 = vmatprep.subr.mxu1 %v34480_v3  ;;  %32629 = vmatprep.subr.mxu0 %v34480_v3 }
0x1803   :  { %32623 = vmatpush3.msra.mxu1 %v36180_v51  ;;  %32630 = vmatpush3.msra.mxu0 %v34533_v5 }
0x1804   :  { %32625 = vmatmul.mubr.f32.vlgmr.msra.gmra.mxu1 %v36172_v42  ;;  %32638 = vmatprep.subr.mxu1 %v34480_v3 }
0x1805   :  { %32639 = vmatpush3.msra.mxu1 %v34586_v21  ;;  %32646 = vmatprep.mubr.msk.f32.mxu1 %vm34481_vm1, %v34480_v3 }
0x1806   :  { %32640 = vmatprep.subr.mxu1 %v34480_v3  ;;  %32631 = vmatprep.subr.mxu0 %v34480_v3 }
0x1807   :  { %32641 = vmatpush3.msra.mxu1 %v34588_v22  ;;  %32632 = vmatpush3.msra.mxu0 %v34535_v6 }
0x1808   :  { %32642 = vmatprep.subr.mxu1 %v34480_v3  ;;  %32633 = vmatprep.subr.mxu0 %v34480_v3 }
0x1809   :  { %32643 = vmatpush3.msra.mxu1 %v34596_v26  ;;  %32634 = vmatpush3.msra.mxu0 %v34543_v9 }
0x180a   :  { %32644 = vmatprep.subr.mxu1 %v34480_v3  ;;  %32635 = vmatprep.mubr.msk.f32.mxu0 %vm34481_vm1, %v34480_v3 }
0x180b   :  { %32645 = vmatpush3.msra.mxu1 %v34600_v28  ;;  %32649 = vmatprep.subr.mxu0 %v34480_v3 }
0x180c   :  { %32660 = vmatprep.subr.mxu1 %v34480_v3 }
0x18aa   :  { %v13714_v37 = vpop.f32.mrf.mxu0 }
0x18ac   :  { %v32571_v42 = vpop.f32.mrf.mxu0 }
0x18b2   :  { %v13805_v43 = vpop.f32.mrf.mxu1 }
0x18b3   :  { %v13806_v41 = vadd.f32 %v13805_v43, %v13714_v37 }
0x18b4   :  { %v32582_v35 = vpop.f32.mrf.mxu1  ;;  %v13885_v47 = vpop.f32.mrf.mxu0 }
0x18b5   :  { %v13886_v56 = vadd.f32 %v13885_v47, %v13806_v41 }
0x18b6   :  { %v32593_v48 = vpop.f32.mrf.mxu0 }
0x18b7   :  { %v29262_v48 = vld [vmem:[%s38040_s2 + $0x100] sm:$0xff] }
0x18b8   :  { %v15128_v41 = vsel %vm551_vm2, %v29262_v48, 0 }
0x18bc   :  { %v13962_v40 = vpop.f32.mrf.mxu1 }
0x18bd   :  { %v13963_v54 = vadd.f32 %v13962_v40, %v13886_v56  ;;  %v36378_v40 = vand.u32 4294901760, %v15128_v41 }
0x18be   :  { %v32604_v57 = vpop.f32.mrf.mxu1  ;;  %v14045_v53 = vpop.f32.mrf.mxu0 }
0x18bf   :  { %v14046_v46 = vadd.f32 %v14045_v53, %v13963_v54  ;;  %v36381_v56 = vsub.f32 %v15128_v41, %v36378_v40 }
0x18c0   :  { %v32615_v31 = vpop.f32.mrf.mxu0 }
0x18c1   :  { %v15207_v57 = vand.u32 4294901760, %v36381_v56 }
0x18c3   :  { %v15208_v53 = vsub.f32 %v36381_v56, %v15207_v57 }
0x18c4   :  { %v14120_v59 = vpop.f32.mrf.mxu1 }
0x18c5   :  { %v14121_v60 = vadd.f32 %v14120_v59, %v14046_v46  ;;  %v15209_v54 = vand.u32 4294901760, %v15208_v53 }
0x18c6   :  { %v32626_v45 = vpop.f32.mrf.mxu1 }
0x18c7   :  { %v14124_v34 = vsub.f32 %v36153_v52, %v14121_v60 }
0x18c9   :  { %v14126_v63 = vsel %vm29_vm0, %v14124_v34, 0 }
0x18ca   :  { %v14197_v49 = vand.u32 4294901760, %v14126_v63 }
0x18cc   :  { %v14198_v0 = vsub.f32 %v14126_v63, %v14197_v49  ;;  %32647 = vmatmul.mubr.f32.vlgmr.msra.gmra.mxu1 %v14197_v49 }
0x18cd   :  { %32661 = vmatpush3.msra.mxu1 %v34531_v4  ;;  %32668 = vmatprep.mubr.msk.f32.mxu1 %vm34481_vm1, %v34480_v3 }
0x18ce   :  { %v14199_v50 = vand.u32 4294901760, %v14198_v0  ;;  %32662 = vmatprep.subr.mxu1 %v34480_v3 }
0x18cf   :  { %32663 = vmatpush3.msra.mxu1 %v34533_v5 }
0x18d0   :  { %v14200_v51 = vsub.f32 %v14198_v0, %v14199_v50  ;;  %32664 = vmatprep.subr.mxu1 %v34480_v3 }
0x18d1   :  { %32665 = vmatpush3.msra.mxu1 %v34535_v6 }
0x18d2   :  { %v14201_v52 = vand.u32 4294901760, %v14200_v51  ;;  %32666 = vmatprep.subr.mxu1 %v34480_v3 }
0x18d3   :  { %32667 = vmatpush3.msra.mxu1 %v34543_v9 }
0x18d4   :  { %32669 = vmatmul.mubr.f32.vlgmr.msra.gmra.mxu1 %v14199_v50  ;;  %32682 = vmatprep.subr.mxu1 %v34480_v3 }
0x18d5   :  { %32636 = vmatmul.mubr.f32.vlgmr.msra.gmra.mxu0 %v14201_v52  ;;  %32683 = vmatpush3.msra.mxu1 %v34531_v4 }
0x18d6   :  { %32650 = vmatpush3.msra.mxu0 %v34552_v10  ;;  %32684 = vmatprep.subr.mxu1 %v34480_v3 }
0x18d7   :  { %32651 = vmatprep.subr.mxu0 %v34480_v3  ;;  %32685 = vmatpush3.msra.mxu1 %v34533_v5 }
0x18d8   :  { %32652 = vmatpush3.msra.mxu0 %v34555_v11  ;;  %32686 = vmatprep.subr.mxu1 %v34480_v3 }
0x18d9   :  { %32653 = vmatprep.subr.mxu0 %v34480_v3  ;;  %32687 = vmatpush3.msra.mxu1 %v34535_v6 }
0x18da   :  { %32654 = vmatpush3.msra.mxu0 %v34558_v12  ;;  %32688 = vmatprep.subr.mxu1 %v34480_v3 }
0x18db   :  { %32655 = vmatprep.subr.mxu0 %v34480_v3  ;;  %32657 = vmatprep.mubr.msk.f32.mxu0 %vm34481_vm1, %v34480_v3 }
0x18dc   :  { %32656 = vmatpush3.msra.mxu0 %v34562_v13  ;;  %32689 = vmatpush3.msra.mxu1 %v34543_v9 }
0x18dd   :  { %32690 = vmatprep.mubr.msk.f32.mxu1 %vm34481_vm1, %v34480_v3  ;;  %32658 = vmatmul.mubr.f32.vlgmr.msra.gmra.mxu0 %v14198_v0 }
0x18de   :  { %32671 = vmatprep.subr.mxu0 %v34480_v3  ;;  %32691 = vmatmul.mubr.f32.vlgmr.msra.gmra.mxu1 %v14197_v49 }
0x18df   :  { %32672 = vmatpush3.msra.mxu0 %v34565_v14  ;;  %32679 = vmatprep.mubr.msk.f32.mxu0 %vm34481_vm1, %v34480_v3 }
0x18e0   :  { %32673 = vmatprep.subr.mxu0 %v34480_v3  ;;  %32704 = vmatprep.subr.mxu1 %v34480_v3 }
0x18e1   :  { %32674 = vmatpush3.msra.mxu0 %v34569_v15  ;;  %32705 = vmatpush3.msra.mxu1 %v34586_v21 }
0x18e2   :  { %32675 = vmatprep.subr.mxu0 %v34480_v3  ;;  %32706 = vmatprep.subr.mxu1 %v34480_v3 }
0x18e3   :  { %32676 = vmatpush3.msra.mxu0 %v34572_v16  ;;  %32707 = vmatpush3.msra.mxu1 %v34588_v22 }
0x18e4   :  { %32677 = vmatprep.subr.mxu0 %v34480_v3  ;;  %32708 = vmatprep.subr.mxu1 %v34480_v3 }
0x18e5   :  { %32678 = vmatpush3.msra.mxu0 %v34576_v17  ;;  %32709 = vmatpush3.msra.mxu1 %v34596_v26 }
0x18e6   :  { %32680 = vmatmul.mubr.f32.vlgmr.msra.gmra.mxu0 %v14197_v49  ;;  %32710 = vmatprep.subr.mxu1 %v34480_v3 }
0x18e7   :  { %32711 = vmatpush3.msra.mxu1 %v34600_v28  ;;  %32693 = vmatprep.subr.mxu0 %v34480_v3 }
0x18e8   :  { %32712 = vmatprep.mubr.msk.f32.mxu1 %vm34481_vm1, %v34480_v3  ;;  %32726 = vmatprep.subr.mxu1 %v34480_v3 }
0x18e9   :  { %32694 = vmatpush3.msra.mxu0 %v34531_v4  ;;  %32701 = vmatprep.mubr.msk.f32.mxu0 %vm34481_vm1, %v34480_v3 }
0x18ea   :  { %32695 = vmatprep.subr.mxu0 %v34480_v3 }
0x18eb   :  { %32696 = vmatpush3.msra.mxu0 %v34533_v5 }
0x18ec   :  { %32697 = vmatprep.subr.mxu0 %v34480_v3 }
0x18ed   :  { %32698 = vmatpush3.msra.mxu0 %v34535_v6 }
0x18ee   :  { %32699 = vmatprep.subr.mxu0 %v34480_v3 }
0x18ef   :  { %32700 = vmatpush3.msra.mxu0 %v34543_v9 }
0x18f0   :  { %32715 = vmatprep.subr.mxu0 %v34480_v3 }
0x198c   :  { %v14294_v2 = vpop.f32.mrf.mxu1 }
0x198e   :  { %v32648_v55 = vpop.f32.mrf.mxu1 }
0x1994   :  { %v14451_v7 = vpop.f32.mrf.mxu1 }
0x1995   :  { %v14203_v18 = vpop.f32.mrf.mxu0 }
0x1996   :  { %v32670_v58 = vpop.f32.mrf.mxu1  ;;  %v14204_v44 = vadd.f32 %v36328_v20, %v14203_v18 }
0x1997   :  { %v32637_v19 = vpop.f32.mrf.mxu0  ;;  %v29264_v58 = vld [vmem:[%s38040_s2 + $0x110] sm:$0xff] }
0x1998   :  { %v14295_v24 = vadd.f32 %v14294_v2, %v14204_v44 }
0x199d   :  { %v14374_v61 = vpop.f32.mrf.mxu0 }
0x199e   :  { %v14609_v23 = vpop.f32.mrf.mxu1  ;;  %v14375_v27 = vadd.f32 %v14374_v61, %v14295_v24  ;;  %v15134_v24 = vsel %vm551_vm2, %v29264_v58, 0 }
0x199f   :  { %v32659_v62 = vpop.f32.mrf.mxu0 }
0x19a0   :  { %v32692_v25 = vpop.f32.mrf.mxu1  ;;  %v14452_v1 = vadd.f32 %v14451_v7, %v14375_v27  ;;  %v29263_v7 = vld [vmem:[%s38040_s2 + $0x108] sm:$0xff]  ;;  %v29265_v62 = vld [vmem:[%s38040_s2 + $0x118] sm:$0xff]  ;;  %v15225_v27 = vand.u32 4294901760, %v15134_v24 }
0x19a1   :  { %v15131_v61 = vsel %vm551_vm2, %v29263_v7, 0  ;;  %v29260_v7 = vld [vmem:[%s38039_s1 + $0x40] sm:$0xff] }
0x19a2   :  { %v15215_v25 = vand.u32 4294901760, %v15131_v61 }
0x19a6   :  { %v14534_v29 = vpop.f32.mrf.mxu0 }
0x19a7   :  { %v14535_v30 = vadd.f32 %v14534_v29, %v14452_v1  ;;  %v15137_v1 = vsel %vm551_vm2, %v29265_v62, 0  ;;  %v15216_v29 = vsub.f32 %v15131_v61, %v15215_v25 }
0x19a8   :  { %v32681_v8 = vpop.f32.mrf.mxu0 }
0x19a9   :  { %v14610_v32 = vadd.f32 %v14609_v23, %v14535_v30  ;;  %v15235_v30 = vand.u32 4294901760, %v15137_v1  ;;  %v15226_v8 = vsub.f32 %v15134_v24, %v15225_v27 }
0x19ab   :  { %34424 = vtanh.f32 %v14610_v32  ;;  %v15217_v32 = vand.u32 4294901760, %v15216_v29 }
0x19b8   :  { %v34425_v38 = vpop.eup %34424 }
0x19b9   :  { %v14614_v39 = vadd.f32 %v34425_v38, %v29246_v33  ;;  %v15236_v33 = vsub.f32 %v15137_v1, %v15235_v30  ;;  %v15227_v38 = vand.u32 4294901760, %v15226_v8 }
0x19bb   :  { %14616 = vst.msk [vmem:[#allocation3 + $0x18] sm:$0xff] %vm29_vm0, %v14614_v39  ;;  %v14638_v36 = vsel %vm29_vm0, %v14614_v39, 0  ;;  %v29257_v39 = vld [vmem:[%s38038_s0 + $0x60] sm:$0xff] }
0x19bc   :  { %v14709_v37 = vand.u32 4294901760, %v14638_v36 }
0x19be   :  { %v14710_v42 = vsub.f32 %v14638_v36, %v14709_v37  ;;  %32713 = vmatmul.mubr.f32.vlgmr.msra.gmra.mxu1 %v14709_v37  ;;  %v15218_v36 = vsub.f32 %v15216_v29, %v15217_v32 }
0x19bf   :  { %32727 = vmatpush3.msra.mxu1 %v34531_v4  ;;  %32734 = vmatprep.mubr.msk.f32.mxu1 %vm34481_vm1, %v34480_v3 }
0x19c0   :  { %32728 = vmatprep.subr.mxu1 %v34480_v3  ;;  %v14711_v43 = vand.u32 4294901760, %v14710_v42  ;;  %v15219_v48 = vand.u32 4294901760, %v15218_v36 }
0x19c1   :  { %32729 = vmatpush3.msra.mxu1 %v34533_v5 }
0x19c2   :  { %32730 = vmatprep.subr.mxu1 %v34480_v3  ;;  %v14712_v35 = vsub.f32 %v14710_v42, %v14711_v43 }
0x19c3   :  { %32731 = vmatpush3.msra.mxu1 %v34535_v6 }
0x19c4   :  { %32732 = vmatprep.subr.mxu1 %v34480_v3  ;;  %v14713_v47 = vand.u32 4294901760, %v14712_v35 }
0x19c5   :  { %32733 = vmatpush3.msra.mxu1 %v34543_v9 }
0x19c6   :  { %32735 = vmatmul.mubr.f32.vlgmr.msra.gmra.mxu1 %v14711_v43  ;;  %32748 = vmatprep.subr.mxu1 %v34480_v3  ;;  %v15228_v43 = vsub.f32 %v15226_v8, %v15227_v38 }
0x19c7   :  { %32702 = vmatmul.mubr.f32.vlgmr.msra.gmra.mxu0 %v14713_v47  ;;  %32749 = vmatpush3.msra.mxu1 %v34531_v4 }
0x19c8   :  { %32716 = vmatpush3.msra.mxu0 %v34552_v10  ;;  %32750 = vmatprep.subr.mxu1 %v34480_v3  ;;  %v15229_v53 = vand.u32 4294901760, %v15228_v43 }
0x19c9   :  { %32717 = vmatprep.subr.mxu0 %v34480_v3  ;;  %32751 = vmatpush3.msra.mxu1 %v34533_v5 }
0x19ca   :  { %32718 = vmatpush3.msra.mxu0 %v34555_v11  ;;  %32752 = vmatprep.subr.mxu1 %v34480_v3 }
0x19cb   :  { %32719 = vmatprep.subr.mxu0 %v34480_v3  ;;  %32753 = vmatpush3.msra.mxu1 %v34535_v6 }
0x19cc   :  { %32720 = vmatpush3.msra.mxu0 %v34558_v12  ;;  %32754 = vmatprep.subr.mxu1 %v34480_v3 }
0x19cd   :  { %32721 = vmatprep.subr.mxu0 %v34480_v3  ;;  %32723 = vmatprep.mubr.msk.f32.mxu0 %vm34481_vm1, %v34480_v3 }
0x19ce   :  { %32722 = vmatpush3.msra.mxu0 %v34562_v13  ;;  %32755 = vmatpush3.msra.mxu1 %v34543_v9 }
0x19cf   :  { %32756 = vmatprep.mubr.msk.f32.mxu1 %vm34481_vm1, %v34480_v3  ;;  %32724 = vmatmul.mubr.f32.vlgmr.msra.gmra.mxu0 %v14710_v42 }
0x19d0   :  { %32737 = vmatprep.subr.mxu0 %v34480_v3  ;;  %32757 = vmatmul.mubr.f32.vlgmr.msra.gmra.mxu1 %v14709_v37 }
0x19d1   :  { %32738 = vmatpush3.msra.mxu0 %v34565_v14  ;;  %32745 = vmatprep.mubr.msk.f32.mxu0 %vm34481_vm1, %v34480_v3 }
0x19d2   :  { %32739 = vmatprep.subr.mxu0 %v34480_v3  ;;  %32769 = vmatprep.mubr.f32.mxu1 %v36378_v40 }
0x19d3   :  { %32740 = vmatpush3.msra.mxu0 %v34569_v15 }
0x19d4   :  { %32741 = vmatprep.subr.mxu0 %v34480_v3 }
0x19d5   :  { %32742 = vmatpush3.msra.mxu0 %v34572_v16 }
0x19d6   :  { %32743 = vmatprep.subr.mxu0 %v34480_v3 }
0x19d7   :  { %32744 = vmatpush3.msra.mxu0 %v34576_v17 }
0x19d8   :  { %32746 = vmatmul.mubr.f32.vlgmr.msra.gmra.mxu0 %v14709_v37  ;;  %v15237_v37 = vand.u32 4294901760, %v15236_v33 }
0x19d9   :  { %32761 = vmatprep.mubr.f32.mxu0 %v15209_v54 }
0x19da   :  { %v15238_v41 = vsub.f32 %v15236_v33, %v15237_v37 }
0x1a7e   :  { %v14806_v31 = vpop.f32.mrf.mxu1 }
0x1a80   :  { %v32714_v46 = vpop.f32.mrf.mxu1 }
0x1a81   :  { %v15239_v46 = vand.u32 4294901760, %v15238_v41 }
0x1a86   :  { %v14963_v59 = vpop.f32.mrf.mxu1 }
0x1a87   :  { %v14715_v60 = vpop.f32.mrf.mxu0 }
0x1a88   :  { %v32736_v45 = vpop.f32.mrf.mxu1  ;;  %v14716_v63 = vadd.f32 %v36328_v20, %v14715_v60 }
0x1a89   :  { %v32703_v34 = vpop.f32.mrf.mxu0 }
0x1a8a   :  { %v14807_v50 = vadd.f32 %v14806_v31, %v14716_v63 }
0x1a8f   :  { %v14886_v49 = vpop.f32.mrf.mxu0 }
0x1a90   :  { %v15121_v0 = vpop.f32.mrf.mxu1  ;;  %v14887_v2 = vadd.f32 %v14886_v49, %v14807_v50 }
0x1a91   :  { %v32725_v51 = vpop.f32.mrf.mxu0 }
0x1a92   :  { %v32758_v52 = vpop.f32.mrf.mxu1  ;;  %v14964_v55 = vadd.f32 %v14963_v59, %v14887_v2 }
0x1a98   :  { %v15046_v18 = vpop.f32.mrf.mxu0 }
0x1a99   :  { %v15047_v19 = vadd.f32 %v15046_v18, %v14964_v55 }
0x1a9a   :  { %v32747_v44 = vpop.f32.mrf.mxu0 }
0x1a9b   :  { %v15122_v23 = vadd.f32 %v15121_v0, %v15047_v19 }
0x1a9d   :  { %34426 = vtanh.f32 %v15122_v23  ;;  %v15715_v23 = vsel %vm29_vm0, %v29260_v7, 0 }
0x1aaa   :  { %v34427_v42 = vpop.eup %34426 }
0x1aab   :  { %v36404_v35 = vadd.f32 %v34427_v42, %v29257_v39 }
0x1aad   :  { %v15170_v47 = vand.u32 4294901760, %v36404_v35 }
0x1aaf   :  { %32759 = vmatprep.subr.mxu0 %v15170_v47  ;;  %v15277_v54 = vsub.f32 %v36404_v35, %v15170_v47 }
0x1ab0   :  { %32760 = vmatpush3.msra.mxu0 %v15170_v47 }
0x1ab1   :  { %32762 = vmatmul.mubr.f32.vlgmr.msra.gmra.mxu0 %v15219_v48  ;;  %32775 = vmatprep.subr.mxu0 %v15277_v54  ;;  %v15278_v31 = vand.u32 4294901760, %v15277_v54 }
0x1ab2   :  { %32776 = vmatpush3.msra.mxu0 %v15277_v54  ;;  %32764 = vmatprep.mubr.f32.mxu0 %v15229_v53 }
0x1ab3   :  { %32791 = vmatprep.subr.mxu0 %v15278_v31  ;;  %v15279_v59 = vsub.f32 %v15277_v54, %v15278_v31 }
0x1ab5   :  { %32765 = vmatmul.mubr.f32.gmra.mxu0 %v15239_v46  ;;  %v15280_v60 = vand.u32 4294901760, %v15279_v59 }
0x1ab6   :  { %32777 = vmatprep.mubr.f32.mxu0 %v36381_v56 }
0x1ab7   :  { %32767 = vmatprep.subr.mxu1 %v15280_v60 }
0x1ab8   :  { %32768 = vmatpush3.msra.mxu1 %v15280_v60 }
0x1ab9   :  { %32770 = vmatmul.mubr.f32.vlgmr.msra.gmra.mxu1 %v15215_v25  ;;  %32778 = vmatmul.mubr.f32.vlgmr.msra.gmra.mxu0 %v15216_v29 }
0x1aba   :  { %32783 = vmatprep.subr.mxu1 %v15170_v47  ;;  %32792 = vmatpush3.msra.mxu0 %v15278_v31 }
0x1abb   :  { %32784 = vmatpush3.msra.mxu1 %v15170_v47  ;;  %32772 = vmatprep.mubr.f32.mxu1 %v15225_v27 }
0x1abc   :  { %32799 = vmatprep.subr.mxu1 %v15170_v47  ;;  %32780 = vmatprep.mubr.f32.mxu0 %v15226_v8 }
0x1abd   :  { %32773 = vmatmul.mubr.f32.gmra.mxu1 %v15235_v30  ;;  %32781 = vmatmul.mubr.f32.gmra.mxu0 %v15236_v33 }
0x1abe   :  { %32785 = vmatprep.mubr.f32.mxu1 %v15207_v57  ;;  %32793 = vmatprep.mubr.f32.mxu0 %v36378_v40 }
0x1abf   :  { %32807 = vmatprep.subr.mxu0 %v34480_v3 }
0x1ac1   :  { %32786 = vmatmul.mubr.f32.vlgmr.msra.gmra.mxu1 %v15217_v32  ;;  %32794 = vmatmul.mubr.f32.vlgmr.msra.gmra.mxu0 %v15215_v25 }
0x1ac2   :  { %32800 = vmatpush3.msra.mxu1 %v15170_v47  ;;  %32788 = vmatprep.mubr.f32.mxu1 %v15227_v38 }
0x1ac3   :  { %32796 = vmatprep.mubr.f32.mxu0 %v15225_v27  ;;  %32818 = vmatprep.subr.mxu1 %v34480_v3 }
0x1ac5   :  { %32789 = vmatmul.mubr.f32.gmra.mxu1 %v15237_v37  ;;  %32797 = vmatmul.mubr.f32.gmra.mxu0 %v15235_v30 }
0x1ac6   :  { %32801 = vmatprep.mubr.f32.mxu1 %v36378_v40  ;;  %32815 = vmatprep.mubr.msk.f32.mxu0 %vm34481_vm1, %v34480_v3 }
0x1ac9   :  { %32802 = vmatmul.mubr.f32.vlgmr.msra.gmra.mxu1 %v15215_v25 }
0x1aca   :  { %32804 = vmatprep.mubr.f32.mxu1 %v15225_v27 }
0x1acd   :  { %32805 = vmatmul.mubr.f32.gmra.mxu1 %v15235_v30  ;;  %v36423_v30 = vand.u32 4294901760, %v15715_v23 }
0x1ace   :  { %32826 = vmatprep.mubr.msk.f32.mxu1 %vm34481_vm1, %v34480_v3 }
0x1acf   :  { %v36426_v43 = vsub.f32 %v15715_v23, %v36423_v30 }
0x1b71   :  { %v32763_v56 = vpop.f32.mrf.mxu0 }
0x1b73   :  { %v15211_v57 = vpop.f32.mrf.mxu0 }
0x1b75   :  { %v32766_v45 = vpop.f32.mrf.mxu0 }
0x1b77   :  { %v15231_v34 = vpop.f32.mrf.mxu0 }
0x1b79   :  { %v32771_v63 = vpop.f32.mrf.mxu1  ;;  %v32779_v49 = vpop.f32.mrf.mxu0 }
0x1b7a   :  { %v15324_v40 = vadd.f32 %v32771_v63, %v32763_v56  ;;  %v15788_v56 = vand.u32 4294901760, %v36426_v43 }
0x1b7b   :  { %v15317_v0 = vpop.f32.mrf.mxu1  ;;  %v15409_v50 = vpop.f32.mrf.mxu0 }
0x1b7c   :  { %v15318_v18 = vadd.f32 %v15317_v0, %v15211_v57  ;;  %v15417_v44 = vadd.f32 %v32779_v49, %v15324_v40 }
0x1b7d   :  { %v32774_v51 = vpop.f32.mrf.mxu1  ;;  %v32782_v52 = vpop.f32.mrf.mxu0 }
0x1b7e   :  { %v15336_v61 = vadd.f32 %v32774_v51, %v32766_v45  ;;  %v15410_v25 = vadd.f32 %v15409_v50, %v15318_v18  ;;  %v15789_v51 = vsub.f32 %v36426_v43, %v15788_v56 }
0x1b7f   :  { %v15329_v2 = vpop.f32.mrf.mxu1  ;;  %v15423_v55 = vpop.f32.mrf.mxu0 }
0x1b80   :  { %v15330_v27 = vadd.f32 %v15329_v2, %v15231_v34  ;;  %v15431_v8 = vadd.f32 %v32782_v52, %v15336_v61 }
0x1b81   :  { %v32787_v58 = vpop.f32.mrf.mxu1  ;;  %v32795_v19 = vpop.f32.mrf.mxu0 }
0x1b82   :  { %v15513_v1 = vadd.f32 %v32787_v58, %v15417_v44  ;;  %v15424_v39 = vadd.f32 %v15423_v55, %v15330_v27  ;;  %v15790_v58 = vand.u32 4294901760, %v15789_v51 }
0x1b83   :  { %v15504_v24 = vpop.f32.mrf.mxu1  ;;  %v15602_v62 = vpop.f32.mrf.mxu0 }
0x1b84   :  { %v15505_v32 = vadd.f32 %v15504_v24, %v15410_v25  ;;  %v15609_v36 = vadd.f32 %v32795_v19, %v15513_v1 }
0x1b85   :  { %v32790_v29 = vpop.f32.mrf.mxu1  ;;  %v32798_v38 = vpop.f32.mrf.mxu0 }
0x1b86   :  { %v15529_v37 = vadd.f32 %v32790_v29, %v15431_v8  ;;  %v15603_v47 = vadd.f32 %v15602_v62, %v15505_v32 }
0x1b87   :  { %v15520_v33 = vpop.f32.mrf.mxu1  ;;  %v15614_v53 = vpop.f32.mrf.mxu0 }
0x1b88   :  { %v15521_v48 = vadd.f32 %v15520_v33, %v15424_v39  ;;  %v15621_v31 = vadd.f32 %v32798_v38, %v15529_v37 }
0x1b89   :  { %v32803_v42 = vpop.f32.mrf.mxu1 }
0x1b8a   :  { %v15699_v41 = vadd.f32 %v32803_v42, %v15609_v36  ;;  %v15615_v57 = vadd.f32 %v15614_v53, %v15521_v48 }
0x1b8b   :  { %v15692_v54 = vpop.f32.mrf.mxu1 }
0x1b8c   :  { %v36428_v46 = vand.u32 4294901760, %v15699_v41  ;;  %v15693_v59 = vadd.f32 %v15692_v54, %v15603_v47 }
0x1b8d   :  { %v32806_v60 = vpop.f32.mrf.mxu1 }
0x1b8e   :  { %v36431_v45 = vand.u32 4294901760, %v15693_v59  ;;  %v15711_v34 = vadd.f32 %v32806_v60, %v15621_v31  ;;  %v15836_v49 = vsub.f32 %v15699_v41, %v36428_v46 }
0x1b8f   :  { %v15704_v63 = vpop.f32.mrf.mxu1 }
0x1b90   :  { %v36434_v0 = vand.u32 4294901760, %v15711_v34  ;;  %v15705_v50 = vadd.f32 %v15704_v63, %v15615_v57  ;;  %v15843_v52 = vsub.f32 %v15693_v59, %v36431_v45  ;;  %v15837_v55 = vand.u32 4294901760, %v15836_v49  ;;  %v29266_v63 = vld [vmem:[%s38040_s2 + $0x120] sm:$0xff] }
0x1b92   :  { %v15822_v40 = vsub.f32 %v15711_v34, %v36434_v0  ;;  %v36441_v2 = vand.u32 4294901760, %v15705_v50  ;;  %32808 = vmatpush3.msra.mxu0 %v36434_v0  ;;  %v15844_v19 = vand.u32 4294901760, %v15843_v52  ;;  %v15838_v23 = vsub.f32 %v15836_v49, %v15837_v55 }
0x1b93   :  { %32809 = vmatprep.subr.mxu0 %v34480_v3 }
0x1b94   :  { %v15823_v7 = vand.u32 4294901760, %v15822_v40  ;;  %v15829_v18 = vsub.f32 %v15705_v50, %v36441_v2  ;;  %32810 = vmatpush3.msra.mxu0 %v36441_v2  ;;  %v15845_v27 = vsub.f32 %v15843_v52, %v15844_v19  ;;  %v15839_v1 = vand.u32 4294901760, %v15838_v23 }
0x1b95   :  { %32811 = vmatprep.subr.mxu0 %v34480_v3 }
0x1b96   :  { %v15824_v44 = vsub.f32 %v15822_v40, %v15823_v7  ;;  %v15830_v61 = vand.u32 4294901760, %v15829_v18  ;;  %32812 = vmatpush3.msra.mxu0 %v36428_v46  ;;  %v15846_v29 = vand.u32 4294901760, %v15845_v27 }
0x1b97   :  { %32813 = vmatprep.subr.mxu0 %v34480_v3 }
0x1b98   :  { %32814 = vmatpush3.msra.mxu0 %v36431_v45  ;;  %v15825_v24 = vand.u32 4294901760, %v15824_v44  ;;  %v15831_v62 = vsub.f32 %v15829_v18, %v15830_v61 }
0x1b99   :  { %32829 = vmatprep.subr.mxu0 %v34480_v3  ;;  %32816 = vmatmul.mubr.f32.vlgmr.msra.gmra.mxu0 %v15790_v58 }
0x1b9a   :  { %32819 = vmatpush3.msra.mxu1 %v15825_v24  ;;  %32830 = vmatpush3.msra.mxu0 %v15822_v40  ;;  %v15832_v25 = vand.u32 4294901760, %v15831_v62 }
0x1b9b   :  { %32820 = vmatprep.subr.mxu1 %v34480_v3  ;;  %32831 = vmatprep.subr.mxu0 %v34480_v3 }
0x1b9c   :  { %32821 = vmatpush3.msra.mxu1 %v15832_v25  ;;  %32832 = vmatpush3.msra.mxu0 %v15829_v18 }
0x1b9d   :  { %32822 = vmatprep.subr.mxu1 %v34480_v3  ;;  %32833 = vmatprep.subr.mxu0 %v34480_v3 }
0x1b9e   :  { %32823 = vmatpush3.msra.mxu1 %v15839_v1  ;;  %32834 = vmatpush3.msra.mxu0 %v15836_v49  ;;  %v16694_v49 = vsel %vm551_vm2, %v29266_v63, 0 }
0x1b9f   :  { %32824 = vmatprep.subr.mxu1 %v34480_v3  ;;  %32835 = vmatprep.subr.mxu0 %v34480_v3 }
0x1ba0   :  { %32825 = vmatpush3.msra.mxu1 %v15846_v29  ;;  %32836 = vmatpush3.msra.mxu0 %v15843_v52  ;;  %v29267_v29 = vld [vmem:[%s38040_s2 + $0x128] sm:$0xff] }
0x1ba1   :  { %32827 = vmatmul.mubr.f32.vlgmr.msra.gmra.mxu1 %v36423_v30  ;;  %32837 = vmatprep.mubr.msk.f32.mxu0 %vm34481_vm1, %v34480_v3 }
0x1ba2   :  { %32840 = vmatprep.subr.mxu1 %v34480_v3  ;;  %32851 = vmatprep.subr.mxu0 %v34480_v3 }
0x1ba3   :  { %32838 = vmatmul.mubr.f32.vlgmr.msra.gmra.mxu0 %v36426_v43  ;;  %32841 = vmatpush3.msra.mxu1 %v36434_v0 }
0x1ba4   :  { %32852 = vmatpush3.msra.mxu0 %v15823_v7  ;;  %32842 = vmatprep.subr.mxu1 %v34480_v3 }
0x1ba5   :  { %32853 = vmatprep.subr.mxu0 %v34480_v3  ;;  %32843 = vmatpush3.msra.mxu1 %v36441_v2 }
0x1ba6   :  { %32854 = vmatpush3.msra.mxu0 %v15830_v61  ;;  %32844 = vmatprep.subr.mxu1 %v34480_v3 }
0x1ba7   :  { %32855 = vmatprep.subr.mxu0 %v34480_v3  ;;  %32845 = vmatpush3.msra.mxu1 %v36428_v46 }
0x1ba8   :  { %32856 = vmatpush3.msra.mxu0 %v15837_v55  ;;  %32846 = vmatprep.subr.mxu1 %v34480_v3 }
0x1ba9   :  { %32857 = vmatprep.subr.mxu0 %v34480_v3  ;;  %32847 = vmatpush3.msra.mxu1 %v36431_v45 }
0x1baa   :  { %32848 = vmatprep.mubr.msk.f32.mxu1 %vm34481_vm1, %v34480_v3  ;;  %32858 = vmatpush3.msra.mxu0 %v15844_v19 }
0x1bab   :  { %32849 = vmatmul.mubr.f32.vlgmr.msra.gmra.mxu1 %v15788_v56  ;;  %32862 = vmatprep.subr.mxu1 %v34480_v3 }
0x1bac   :  { %32859 = vmatprep.mubr.msk.f32.mxu0 %vm34481_vm1, %v34480_v3  ;;  %32863 = vmatpush3.msra.mxu1 %v36434_v0  ;;  %v36558_v0 = vand.u32 4294901760, %v16694_v49 }
0x1bad   :  { %32860 = vmatmul.mubr.f32.vlgmr.msra.gmra.mxu0 %v36423_v30  ;;  %32864 = vmatprep.subr.mxu1 %v34480_v3 }
0x1bae   :  { %32865 = vmatpush3.msra.mxu1 %v36441_v2  ;;  %32870 = vmatprep.mubr.msk.f32.mxu1 %vm34481_vm1, %v34480_v3  ;;  %v36561_v50 = vsub.f32 %v16694_v49, %v36558_v0 }
0x1baf   :  { %32866 = vmatprep.subr.mxu1 %v34480_v3  ;;  %32873 = vmatprep.subr.mxu0 %v34480_v3 }
0x1bb0   :  { %32867 = vmatpush3.msra.mxu1 %v36428_v46  ;;  %32874 = vmatpush3.msra.mxu0 %v34531_v4  ;;  %v16773_v51 = vand.u32 4294901760, %v36561_v50 }
0x1bb1   :  { %32868 = vmatprep.subr.mxu1 %v34480_v3  ;;  %32875 = vmatprep.subr.mxu0 %v34480_v3 }
0x1bb2   :  { %32869 = vmatpush3.msra.mxu1 %v36431_v45  ;;  %32876 = vmatpush3.msra.mxu0 %v34533_v5  ;;  %v16774_v52 = vsub.f32 %v36561_v50, %v16773_v51 }
0x1bb3   :  { %32871 = vmatmul.mubr.f32.vlgmr.msra.gmra.mxu1 %v36423_v30  ;;  %32884 = vmatprep.subr.mxu1 %v34480_v3 }
0x1bb4   :  { %32885 = vmatpush3.msra.mxu1 %v34586_v21  ;;  %32892 = vmatprep.mubr.msk.f32.mxu1 %vm34481_vm1, %v34480_v3  ;;  %v16775_v40 = vand.u32 4294901760, %v16774_v52 }
0x1bb5   :  { %32886 = vmatprep.subr.mxu1 %v34480_v3  ;;  %32877 = vmatprep.subr.mxu0 %v34480_v3 }
0x1bb6   :  { %32887 = vmatpush3.msra.mxu1 %v34588_v22  ;;  %32878 = vmatpush3.msra.mxu0 %v34535_v6 }
0x1bb7   :  { %32888 = vmatprep.subr.mxu1 %v34480_v3  ;;  %32879 = vmatprep.subr.mxu0 %v34480_v3 }
0x1bb8   :  { %32889 = vmatpush3.msra.mxu1 %v34596_v26  ;;  %32880 = vmatpush3.msra.mxu0 %v34543_v9 }
0x1bb9   :  { %32890 = vmatprep.subr.mxu1 %v34480_v3  ;;  %32881 = vmatprep.mubr.msk.f32.mxu0 %vm34481_vm1, %v34480_v3 }
0x1bba   :  { %32891 = vmatpush3.msra.mxu1 %v34600_v28  ;;  %32895 = vmatprep.subr.mxu0 %v34480_v3 }
0x1bbb   :  { %32906 = vmatprep.subr.mxu1 %v34480_v3 }
0x1c59   :  { %v15792_v30 = vpop.f32.mrf.mxu0 }
0x1c5b   :  { %v32817_v8 = vpop.f32.mrf.mxu0 }
0x1c5c   :  { %v29268_v8 = vld [vmem:[%s38040_s2 + $0x130] sm:$0xff] }
0x1c61   :  { %v15883_v32 = vpop.f32.mrf.mxu1 }
0x1c62   :  { %v15884_v36 = vadd.f32 %v15883_v32, %v15792_v30 }
0x1c63   :  { %v32828_v33 = vpop.f32.mrf.mxu1  ;;  %v15963_v38 = vpop.f32.mrf.mxu0 }
0x1c64   :  { %v15964_v42 = vadd.f32 %v15963_v38, %v15884_v36  ;;  %v29269_v36 = vld [vmem:[%s38040_s2 + $0x138] sm:$0xff] }
0x1c65   :  { %v32839_v39 = vpop.f32.mrf.mxu0 }
0x1c66   :  { %v16700_v39 = vsel %vm551_vm2, %v29268_v8, 0 }
0x1c6b   :  { %v16040_v37 = vpop.f32.mrf.mxu1 }
0x1c6c   :  { %v16041_v48 = vadd.f32 %v16040_v37, %v15964_v42  ;;  %v16791_v42 = vand.u32 4294901760, %v16700_v39 }
0x1c6d   :  { %v32850_v43 = vpop.f32.mrf.mxu1  ;;  %v16123_v47 = vpop.f32.mrf.mxu0 }
0x1c6e   :  { %v16124_v53 = vadd.f32 %v16123_v47, %v16041_v48  ;;  %v16703_v43 = vsel %vm551_vm2, %v29269_v36, 0 }
0x1c6f   :  { %v32861_v41 = vpop.f32.mrf.mxu0  ;;  %v16801_v48 = vand.u32 4294901760, %v16703_v43 }
0x1c70   :  { %v16792_v41 = vsub.f32 %v16700_v39, %v16791_v42 }
0x1c73   :  { %v16198_v54 = vpop.f32.mrf.mxu1 }
0x1c74   :  { %v16199_v31 = vadd.f32 %v16198_v54, %v16124_v53  ;;  %v16802_v54 = vsub.f32 %v16703_v43, %v16801_v48 }
0x1c75   :  { %v32872_v46 = vpop.f32.mrf.mxu1 }
0x1c76   :  { %v16202_v59 = vsub.f32 %v36404_v35, %v16199_v31  ;;  %v16793_v31 = vand.u32 4294901760, %v16792_v41  ;;  %v29258_v46 = vld [vmem:[%s38038_s0 + $0x68] sm:$0xff] }
0x1c78   :  { %v16204_v60 = vsel %vm29_vm0, %v16202_v59, 0 }
0x1c79   :  { %v16275_v56 = vand.u32 4294901760, %v16204_v60 }
0x1c7b   :  { %v16276_v57 = vsub.f32 %v16204_v60, %v16275_v56  ;;  %32893 = vmatmul.mubr.f32.vlgmr.msra.gmra.mxu1 %v16275_v56  ;;  %v16803_v60 = vand.u32 4294901760, %v16802_v54 }
0x1c7c   :  { %32907 = vmatpush3.msra.mxu1 %v34531_v4  ;;  %32914 = vmatprep.mubr.msk.f32.mxu1 %vm34481_vm1, %v34480_v3 }
0x1c7d   :  { %v16277_v45 = vand.u32 4294901760, %v16276_v57  ;;  %32908 = vmatprep.subr.mxu1 %v34480_v3  ;;  %v16804_v63 = vsub.f32 %v16802_v54, %v16803_v60 }
0x1c7e   :  { %32909 = vmatpush3.msra.mxu1 %v34533_v5 }
0x1c7f   :  { %v16278_v34 = vsub.f32 %v16276_v57, %v16277_v45  ;;  %32910 = vmatprep.subr.mxu1 %v34480_v3 }
0x1c80   :  { %32911 = vmatpush3.msra.mxu1 %v34535_v6 }
0x1c81   :  { %v16279_v35 = vand.u32 4294901760, %v16278_v34  ;;  %32912 = vmatprep.subr.mxu1 %v34480_v3 }
0x1c82   :  { %32913 = vmatpush3.msra.mxu1 %v34543_v9 }
0x1c83   :  { %32915 = vmatmul.mubr.f32.vlgmr.msra.gmra.mxu1 %v16277_v45  ;;  %32928 = vmatprep.subr.mxu1 %v34480_v3 }
0x1c84   :  { %32882 = vmatmul.mubr.f32.vlgmr.msra.gmra.mxu0 %v16279_v35  ;;  %32929 = vmatpush3.msra.mxu1 %v34531_v4 }
0x1c85   :  { %32896 = vmatpush3.msra.mxu0 %v34552_v10  ;;  %32930 = vmatprep.subr.mxu1 %v34480_v3 }
0x1c86   :  { %32897 = vmatprep.subr.mxu0 %v34480_v3  ;;  %32931 = vmatpush3.msra.mxu1 %v34533_v5 }
0x1c87   :  { %32898 = vmatpush3.msra.mxu0 %v34555_v11  ;;  %32932 = vmatprep.subr.mxu1 %v34480_v3 }
0x1c88   :  { %32899 = vmatprep.subr.mxu0 %v34480_v3  ;;  %32933 = vmatpush3.msra.mxu1 %v34535_v6 }
0x1c89   :  { %32900 = vmatpush3.msra.mxu0 %v34558_v12  ;;  %32934 = vmatprep.subr.mxu1 %v34480_v3 }
0x1c8a   :  { %32901 = vmatprep.subr.mxu0 %v34480_v3  ;;  %32903 = vmatprep.mubr.msk.f32.mxu0 %vm34481_vm1, %v34480_v3 }
0x1c8b   :  { %32902 = vmatpush3.msra.mxu0 %v34562_v13  ;;  %32935 = vmatpush3.msra.mxu1 %v34543_v9 }
0x1c8c   :  { %32936 = vmatprep.mubr.msk.f32.mxu1 %vm34481_vm1, %v34480_v3  ;;  %32904 = vmatmul.mubr.f32.vlgmr.msra.gmra.mxu0 %v16276_v57  ;;  %v16794_v57 = vsub.f32 %v16792_v41, %v16793_v31 }
0x1c8d   :  { %32917 = vmatprep.subr.mxu0 %v34480_v3  ;;  %32937 = vmatmul.mubr.f32.vlgmr.msra.gmra.mxu1 %v16275_v56 }
0x1c8e   :  { %32918 = vmatpush3.msra.mxu0 %v34565_v14  ;;  %32925 = vmatprep.mubr.msk.f32.mxu0 %vm34481_vm1, %v34480_v3  ;;  %v16795_v49 = vand.u32 4294901760, %v16794_v57 }
0x1c8f   :  { %32919 = vmatprep.subr.mxu0 %v34480_v3  ;;  %32949 = vmatprep.mubr.f32.mxu1 %v36558_v0 }
0x1c90   :  { %32920 = vmatpush3.msra.mxu0 %v34569_v15 }
0x1c91   :  { %32921 = vmatprep.subr.mxu0 %v34480_v3 }
0x1c92   :  { %32922 = vmatpush3.msra.mxu0 %v34572_v16 }
0x1c93   :  { %32923 = vmatprep.subr.mxu0 %v34480_v3 }
0x1c94   :  { %32924 = vmatpush3.msra.mxu0 %v34576_v17 }
0x1c95   :  { %32926 = vmatmul.mubr.f32.vlgmr.msra.gmra.mxu0 %v16275_v56 }
0x1c96   :  { %32941 = vmatprep.mubr.f32.mxu0 %v16775_v40 }
0x1d3b   :  { %v16372_v2 = vpop.f32.mrf.mxu1 }
0x1d3d   :  { %v32894_v55 = vpop.f32.mrf.mxu1 }
0x1d43   :  { %v16529_v7 = vpop.f32.mrf.mxu1 }
0x1d44   :  { %v16281_v18 = vpop.f32.mrf.mxu0 }
0x1d45   :  { %v32916_v58 = vpop.f32.mrf.mxu1  ;;  %v16282_v44 = vadd.f32 %v36328_v20, %v16281_v18  ;;  %v16697_v20 = vsel %vm551_vm2, %v29267_v29, 0 }
0x1d46   :  { %v32883_v19 = vpop.f32.mrf.mxu0  ;;  %v16781_v37 = vand.u32 4294901760, %v16697_v20 }
0x1d47   :  { %v16373_v24 = vadd.f32 %v16372_v2, %v16282_v44  ;;  %v16805_v2 = vand.u32 4294901760, %v16804_v63 }
0x1d48   :  { %v16782_v47 = vsub.f32 %v16697_v20, %v16781_v37 }
0x1d4a   :  { %v16783_v53 = vand.u32 4294901760, %v16782_v47 }
0x1d4c   :  { %v16452_v61 = vpop.f32.mrf.mxu0  ;;  %v16784_v59 = vsub.f32 %v16782_v47, %v16783_v53 }
0x1d4d   :  { %v16687_v23 = vpop.f32.mrf.mxu1  ;;  %v16453_v27 = vadd.f32 %v16452_v61, %v16373_v24 }
0x1d4e   :  { %v32905_v62 = vpop.f32.mrf.mxu0  ;;  %v16785_v35 = vand.u32 4294901760, %v16784_v59 }
0x1d4f   :  { %v32938_v25 = vpop.f32.mrf.mxu1  ;;  %v16530_v1 = vadd.f32 %v16529_v7, %v16453_v27 }
0x1d55   :  { %v16612_v30 = vpop.f32.mrf.mxu0 }
0x1d56   :  { %v16613_v32 = vadd.f32 %v16612_v30, %v16530_v1  ;;  %v29261_v1 = vld [vmem:[%s38039_s1 + $0x48] sm:$0xff] }
0x1d57   :  { %v32927_v33 = vpop.f32.mrf.mxu0  ;;  %v17281_v20 = vsel %vm29_vm0, %v29261_v1, 0 }
0x1d58   :  { %v16688_v38 = vadd.f32 %v16687_v23, %v16613_v32 }
0x1d5a   :  { %34428 = vtanh.f32 %v16688_v38 }
0x1d67   :  { %v34429_v56 = vpop.eup %34428 }
0x1d68   :  { %v36584_v45 = vadd.f32 %v34429_v56, %v29258_v46 }
0x1d6a   :  { %v16736_v34 = vand.u32 4294901760, %v36584_v45 }
0x1d6c   :  { %32939 = vmatprep.subr.mxu0 %v16736_v34  ;;  %v16843_v52 = vsub.f32 %v36584_v45, %v16736_v34 }
0x1d6d   :  { %32940 = vmatpush3.msra.mxu0 %v16736_v34 }
0x1d6e   :  { %32942 = vmatmul.mubr.f32.vlgmr.msra.gmra.mxu0 %v16785_v35  ;;  %32955 = vmatprep.subr.mxu0 %v16843_v52  ;;  %v16844_v40 = vand.u32 4294901760, %v16843_v52 }
0x1d6f   :  { %32956 = vmatpush3.msra.mxu0 %v16843_v52  ;;  %32944 = vmatprep.mubr.f32.mxu0 %v16795_v49 }
0x1d70   :  { %32971 = vmatprep.subr.mxu0 %v16844_v40  ;;  %v16845_v55 = vsub.f32 %v16843_v52, %v16844_v40 }
0x1d72   :  { %32945 = vmatmul.mubr.f32.gmra.mxu0 %v16805_v2  ;;  %v16846_v7 = vand.u32 4294901760, %v16845_v55 }
0x1d73   :  { %32957 = vmatprep.mubr.f32.mxu0 %v36561_v50 }
0x1d74   :  { %32947 = vmatprep.subr.mxu1 %v16846_v7 }
0x1d75   :  { %32948 = vmatpush3.msra.mxu1 %v16846_v7 }
0x1d76   :  { %32950 = vmatmul.mubr.f32.vlgmr.msra.gmra.mxu1 %v16781_v37  ;;  %32958 = vmatmul.mubr.f32.vlgmr.msra.gmra.mxu0 %v16782_v47  ;;  %v36603_v47 = vand.u32 4294901760, %v17281_v20 }
0x1d77   :  { %32963 = vmatprep.subr.mxu1 %v16736_v34  ;;  %32972 = vmatpush3.msra.mxu0 %v16844_v40 }
0x1d78   :  { %32964 = vmatpush3.msra.mxu1 %v16736_v34  ;;  %32952 = vmatprep.mubr.f32.mxu1 %v16791_v42  ;;  %v36606_v56 = vsub.f32 %v17281_v20, %v36603_v47 }
0x1d79   :  { %32979 = vmatprep.subr.mxu1 %v16736_v34  ;;  %32960 = vmatprep.mubr.f32.mxu0 %v16792_v41 }
0x1d7a   :  { %32953 = vmatmul.mubr.f32.gmra.mxu1 %v16801_v48  ;;  %32961 = vmatmul.mubr.f32.gmra.mxu0 %v16802_v54  ;;  %v17354_v7 = vand.u32 4294901760, %v36606_v56 }
0x1d7b   :  { %32965 = vmatprep.mubr.f32.mxu1 %v16773_v51  ;;  %32973 = vmatprep.mubr.f32.mxu0 %v36558_v0 }
0x1d7c   :  { %32987 = vmatprep.subr.mxu0 %v34480_v3 }
0x1d7e   :  { %32966 = vmatmul.mubr.f32.vlgmr.msra.gmra.mxu1 %v16783_v53  ;;  %32974 = vmatmul.mubr.f32.vlgmr.msra.gmra.mxu0 %v16781_v37 }
0x1d7f   :  { %32980 = vmatpush3.msra.mxu1 %v16736_v34  ;;  %32968 = vmatprep.mubr.f32.mxu1 %v16793_v31 }
0x1d80   :  { %32976 = vmatprep.mubr.f32.mxu0 %v16791_v42  ;;  %32998 = vmatprep.subr.mxu1 %v34480_v3 }
0x1d82   :  { %32969 = vmatmul.mubr.f32.gmra.mxu1 %v16803_v60  ;;  %32977 = vmatmul.mubr.f32.gmra.mxu0 %v16801_v48 }
0x1d83   :  { %32981 = vmatprep.mubr.f32.mxu1 %v36558_v0  ;;  %32995 = vmatprep.mubr.msk.f32.mxu0 %vm34481_vm1, %v34480_v3 }
0x1d86   :  { %32982 = vmatmul.mubr.f32.vlgmr.msra.gmra.mxu1 %v16781_v37 }
0x1d87   :  { %32984 = vmatprep.mubr.f32.mxu1 %v16791_v42 }
0x1d8a   :  { %32985 = vmatmul.mubr.f32.gmra.mxu1 %v16801_v48 }
0x1d8b   :  { %33006 = vmatprep.mubr.msk.f32.mxu1 %vm34481_vm1, %v34480_v3 }
0x1e2e   :  { %v32943_v50 = vpop.f32.mrf.mxu0 }
0x1e30   :  { %v16777_v51 = vpop.f32.mrf.mxu0 }
0x1e32   :  { %v32946_v18 = vpop.f32.mrf.mxu0 }
0x1e34   :  { %v16797_v58 = vpop.f32.mrf.mxu0 }
0x1e36   :  { %v32951_v19 = vpop.f32.mrf.mxu1  ;;  %v32959_v44 = vpop.f32.mrf.mxu0 }
0x1e37   :  { %v16890_v0 = vadd.f32 %v32951_v19, %v32943_v50 }
0x1e38   :  { %v16883_v61 = vpop.f32.mrf.mxu1  ;;  %v16975_v23 = vpop.f32.mrf.mxu0 }
0x1e39   :  { %v16884_v29 = vadd.f32 %v16883_v61, %v16777_v51  ;;  %v16983_v32 = vadd.f32 %v32959_v44, %v16890_v0 }
0x1e3a   :  { %v32954_v24 = vpop.f32.mrf.mxu1  ;;  %v32962_v62 = vpop.f32.mrf.mxu0 }
0x1e3b   :  { %v16902_v33 = vadd.f32 %v32954_v24, %v32946_v18  ;;  %v16976_v36 = vadd.f32 %v16975_v23, %v16884_v29  ;;  %v17355_v23 = vsub.f32 %v36606_v56, %v17354_v7 }
0x1e3c   :  { %v16895_v25 = vpop.f32.mrf.mxu1  ;;  %v16989_v27 = vpop.f32.mrf.mxu0 }
0x1e3d   :  { %v16896_v37 = vadd.f32 %v16895_v25, %v16797_v58  ;;  %v16997_v48 = vadd.f32 %v32962_v62, %v16902_v33  ;;  %v17356_v29 = vand.u32 4294901760, %v17355_v23 }
0x1e3e   :  { %v32967_v30 = vpop.f32.mrf.mxu1  ;;  %v32975_v8 = vpop.f32.mrf.mxu0 }
0x1e3f   :  { %v17079_v42 = vadd.f32 %v32967_v30, %v16983_v32  ;;  %v16990_v31 = vadd.f32 %v16989_v27, %v16896_v37 }
0x1e40   :  { %v17070_v38 = vpop.f32.mrf.mxu1  ;;  %v17168_v39 = vpop.f32.mrf.mxu0 }
0x1e41   :  { %v17071_v41 = vadd.f32 %v17070_v38, %v16976_v36  ;;  %v17175_v46 = vadd.f32 %v32975_v8, %v17079_v42 }
0x1e42   :  { %v32970_v43 = vpop.f32.mrf.mxu1  ;;  %v32978_v54 = vpop.f32.mrf.mxu0 }
0x1e43   :  { %v17095_v59 = vadd.f32 %v32970_v43, %v16997_v48  ;;  %v17169_v57 = vadd.f32 %v17168_v39, %v17071_v41 }
0x1e44   :  { %v17086_v53 = vpop.f32.mrf.mxu1  ;;  %v17180_v63 = vpop.f32.mrf.mxu0 }
0x1e45   :  { %v17087_v34 = vadd.f32 %v17086_v53, %v16990_v31  ;;  %v17187_v52 = vadd.f32 %v32978_v54, %v17095_v59 }
0x1e46   :  { %v32983_v60 = vpop.f32.mrf.mxu1 }
0x1e47   :  { %v17265_v35 = vadd.f32 %v32983_v60, %v17175_v46  ;;  %v17181_v50 = vadd.f32 %v17180_v63, %v17087_v34 }
0x1e48   :  { %v17258_v49 = vpop.f32.mrf.mxu1 }
0x1e49   :  { %v36608_v40 = vand.u32 4294901760, %v17265_v35  ;;  %v17259_v2 = vadd.f32 %v17258_v49, %v17169_v57 }
0x1e4a   :  { %v32986_v55 = vpop.f32.mrf.mxu1 }
0x1e4b   :  { %v36611_v51 = vand.u32 4294901760, %v17259_v2  ;;  %v17277_v18 = vadd.f32 %v32986_v55, %v17187_v52  ;;  %v17402_v19 = vsub.f32 %v17265_v35, %v36608_v40 }
0x1e4c   :  { %v17270_v58 = vpop.f32.mrf.mxu1 }
0x1e4d   :  { %v36614_v44 = vand.u32 4294901760, %v17277_v18  ;;  %v17271_v61 = vadd.f32 %v17270_v58, %v17181_v50  ;;  %v17409_v24 = vsub.f32 %v17259_v2, %v36611_v51  ;;  %v17403_v25 = vand.u32 4294901760, %v17402_v19 }
0x1e4f   :  { %v17388_v62 = vsub.f32 %v17277_v18, %v36614_v44  ;;  %v36621_v0 = vand.u32 4294901760, %v17271_v61  ;;  %32988 = vmatpush3.msra.mxu0 %v36614_v44  ;;  %v17410_v30 = vand.u32 4294901760, %v17409_v24  ;;  %v17404_v33 = vsub.f32 %v17402_v19, %v17403_v25 }
0x1e50   :  { %32989 = vmatprep.subr.mxu0 %v34480_v3 }
0x1e51   :  { %v17389_v27 = vand.u32 4294901760, %v17388_v62  ;;  %v17395_v1 = vsub.f32 %v17271_v61, %v36621_v0  ;;  %32990 = vmatpush3.msra.mxu0 %v36621_v0  ;;  %v17411_v36 = vsub.f32 %v17409_v24, %v17410_v30  ;;  %v17405_v37 = vand.u32 4294901760, %v17404_v33 }
0x1e52   :  { %32991 = vmatprep.subr.mxu0 %v34480_v3 }
0x1e53   :  { %v17390_v8 = vsub.f32 %v17388_v62, %v17389_v27  ;;  %v17396_v32 = vand.u32 4294901760, %v17395_v1  ;;  %32992 = vmatpush3.msra.mxu0 %v36608_v40  ;;  %v17412_v42 = vand.u32 4294901760, %v17411_v36 }
0x1e54   :  { %32993 = vmatprep.subr.mxu0 %v34480_v3 }
0x1e55   :  { %32994 = vmatpush3.msra.mxu0 %v36611_v51  ;;  %v17391_v20 = vand.u32 4294901760, %v17390_v8  ;;  %v17397_v38 = vsub.f32 %v17395_v1, %v17396_v32 }
0x1e56   :  { %33009 = vmatprep.subr.mxu0 %v34480_v3  ;;  %32996 = vmatmul.mubr.f32.vlgmr.msra.gmra.mxu0 %v17356_v29 }
0x1e57   :  { %32999 = vmatpush3.msra.mxu1 %v17391_v20  ;;  %33010 = vmatpush3.msra.mxu0 %v17388_v62  ;;  %v17398_v39 = vand.u32 4294901760, %v17397_v38 }
0x1e58   :  { %33000 = vmatprep.subr.mxu1 %v34480_v3  ;;  %33011 = vmatprep.subr.mxu0 %v34480_v3 }
0x1e59   :  { %33001 = vmatpush3.msra.mxu1 %v17398_v39  ;;  %33012 = vmatpush3.msra.mxu0 %v17395_v1  ;;  %v29259_v39 = vld [vmem:[%s38038_s0 + $0x70] sm:$0xff] }
0x1e5a   :  { %33002 = vmatprep.subr.mxu1 %v34480_v3  ;;  %33013 = vmatprep.subr.mxu0 %v34480_v3 }
0x1e5b   :  { %33003 = vmatpush3.msra.mxu1 %v17405_v37  ;;  %33014 = vmatpush3.msra.mxu0 %v17402_v19 }
0x1e5c   :  { %33004 = vmatprep.subr.mxu1 %v34480_v3  ;;  %33015 = vmatprep.subr.mxu0 %v34480_v3 }
0x1e5d   :  { %33005 = vmatpush3.msra.mxu1 %v17412_v42  ;;  %33016 = vmatpush3.msra.mxu0 %v17409_v24  ;;  %v36759_v24 = vld [vmem:[%s38043_s5] ss:$0 sm:$0xff] }
0x1e5e   :  { %33007 = vmatmul.mubr.f32.vlgmr.msra.gmra.mxu1 %v36603_v47  ;;  %33017 = vmatprep.mubr.msk.f32.mxu0 %vm34481_vm1, %v34480_v3 }
0x1e5f   :  { %33020 = vmatprep.subr.mxu1 %v34480_v3  ;;  %33031 = vmatprep.subr.mxu0 %v34480_v3 }
0x1e60   :  { %33018 = vmatmul.mubr.f32.vlgmr.msra.gmra.mxu0 %v36606_v56  ;;  %33021 = vmatpush3.msra.mxu1 %v36614_v44 }
0x1e61   :  { %33032 = vmatpush3.msra.mxu0 %v17389_v27  ;;  %33022 = vmatprep.subr.mxu1 %v34480_v3 }
0x1e62   :  { %33033 = vmatprep.subr.mxu0 %v34480_v3  ;;  %33023 = vmatpush3.msra.mxu1 %v36621_v0 }
0x1e63   :  { %33034 = vmatpush3.msra.mxu0 %v17396_v32  ;;  %33024 = vmatprep.subr.mxu1 %v34480_v3 }
0x1e64   :  { %33035 = vmatprep.subr.mxu0 %v34480_v3  ;;  %33025 = vmatpush3.msra.mxu1 %v36608_v40 }
0x1e65   :  { %33036 = vmatpush3.msra.mxu0 %v17403_v25  ;;  %33026 = vmatprep.subr.mxu1 %v34480_v3 }
0x1e66   :  { %33037 = vmatprep.subr.mxu0 %v34480_v3  ;;  %33027 = vmatpush3.msra.mxu1 %v36611_v51 }
0x1e67   :  { %33028 = vmatprep.mubr.msk.f32.mxu1 %vm34481_vm1, %v34480_v3  ;;  %33038 = vmatpush3.msra.mxu0 %v17410_v30 }
0x1e68   :  { %33029 = vmatmul.mubr.f32.vlgmr.msra.gmra.mxu1 %v17354_v7  ;;  %33042 = vmatprep.subr.mxu1 %v34480_v3 }
0x1e69   :  { %33039 = vmatprep.mubr.msk.f32.mxu0 %vm34481_vm1, %v34480_v3  ;;  %33043 = vmatpush3.msra.mxu1 %v36614_v44 }
0x1e6a   :  { %33040 = vmatmul.mubr.f32.vlgmr.msra.gmra.mxu0 %v36603_v47  ;;  %33044 = vmatprep.subr.mxu1 %v34480_v3 }
0x1e6b   :  { %33045 = vmatpush3.msra.mxu1 %v36621_v0  ;;  %33050 = vmatprep.mubr.msk.f32.mxu1 %vm34481_vm1, %v34480_v3 }
0x1e6c   :  { %33046 = vmatprep.subr.mxu1 %v34480_v3  ;;  %33053 = vmatprep.subr.mxu0 %v34480_v3 }
0x1e6d   :  { %33047 = vmatpush3.msra.mxu1 %v36608_v40  ;;  %33054 = vmatpush3.msra.mxu0 %v34531_v4 }
0x1e6e   :  { %33048 = vmatprep.subr.mxu1 %v34480_v3  ;;  %33055 = vmatprep.subr.mxu0 %v34480_v3 }
0x1e6f   :  { %33049 = vmatpush3.msra.mxu1 %v36611_v51  ;;  %33056 = vmatpush3.msra.mxu0 %v34533_v5 }
0x1e70   :  { %33051 = vmatmul.mubr.f32.vlgmr.msra.gmra.mxu1 %v36603_v47  ;;  %33064 = vmatprep.subr.mxu1 %v34480_v3 }
0x1e71   :  { %33065 = vmatpush3.msra.mxu1 %v34586_v21  ;;  %33072 = vmatprep.mubr.msk.f32.mxu1 %vm34481_vm1, %v34480_v3 }
0x1e72   :  { %33066 = vmatprep.subr.mxu1 %v34480_v3  ;;  %33057 = vmatprep.subr.mxu0 %v34480_v3 }
0x1e73   :  { %33067 = vmatpush3.msra.mxu1 %v34588_v22  ;;  %33058 = vmatpush3.msra.mxu0 %v34535_v6 }
0x1e74   :  { %33068 = vmatprep.subr.mxu1 %v34480_v3  ;;  %33059 = vmatprep.subr.mxu0 %v34480_v3 }
0x1e75   :  { %33069 = vmatpush3.msra.mxu1 %v34596_v26  ;;  %33060 = vmatpush3.msra.mxu0 %v34543_v9 }
0x1e76   :  { %33070 = vmatprep.subr.mxu1 %v34480_v3  ;;  %33061 = vmatprep.mubr.msk.f32.mxu0 %vm34481_vm1, %v34480_v3 }
0x1e77   :  { %33071 = vmatpush3.msra.mxu1 %v34600_v28  ;;  %33075 = vmatprep.subr.mxu0 %v34480_v3 }
0x1e78   :  { %33086 = vmatprep.subr.mxu1 %v34480_v3 }
0x1f16   :  { %v17358_v43 = vpop.f32.mrf.mxu0 }
0x1f18   :  { %v32997_v47 = vpop.f32.mrf.mxu0 }
0x1f1e   :  { %v17449_v48 = vpop.f32.mrf.mxu1 }
0x1f1f   :  { %v17450_v31 = vadd.f32 %v17449_v48, %v17358_v43 }
0x1f20   :  { %v33008_v41 = vpop.f32.mrf.mxu1  ;;  %v17529_v53 = vpop.f32.mrf.mxu0 }
0x1f21   :  { %v17530_v59 = vadd.f32 %v17529_v53, %v17450_v31 }
0x1f22   :  { %v33019_v54 = vpop.f32.mrf.mxu0 }
0x1f23   :  { %v29275_v54 = vld [vmem:[%s38040_s2 + $0x140] sm:$0xff] }
0x1f24   :  { %v18772_v31 = vsel %vm551_vm2, %v29275_v54, 0 }
0x1f28   :  { %v17606_v46 = vpop.f32.mrf.mxu1 }
0x1f29   :  { %v17607_v57 = vadd.f32 %v17606_v46, %v17530_v59  ;;  %v36809_v46 = vand.u32 4294901760, %v18772_v31 }
0x1f2a   :  { %v33030_v60 = vpop.f32.mrf.mxu1  ;;  %v17689_v56 = vpop.f32.mrf.mxu0 }
0x1f2b   :  { %v17690_v35 = vadd.f32 %v17689_v56, %v17607_v57  ;;  %v36812_v59 = vsub.f32 %v18772_v31, %v36809_v46 }
0x1f2c   :  { %v33041_v34 = vpop.f32.mrf.mxu0 }
0x1f2d   :  { %v18851_v60 = vand.u32 4294901760, %v36812_v59 }
0x1f2f   :  { %v18852_v56 = vsub.f32 %v36812_v59, %v18851_v60 }
0x1f30   :  { %v17764_v63 = vpop.f32.mrf.mxu1 }
0x1f31   :  { %v17765_v49 = vadd.f32 %v17764_v63, %v17690_v35  ;;  %v18853_v57 = vand.u32 4294901760, %v18852_v56 }
0x1f32   :  { %v33052_v52 = vpop.f32.mrf.mxu1 }
0x1f33   :  { %v17768_v40 = vsub.f32 %v36584_v45, %v17765_v49 }
0x1f35   :  { %v17770_v2 = vsel %vm29_vm0, %v17768_v40, 0 }
0x1f36   :  { %v17841_v55 = vand.u32 4294901760, %v17770_v2 }
0x1f38   :  { %v17842_v7 = vsub.f32 %v17770_v2, %v17841_v55  ;;  %33073 = vmatmul.mubr.f32.vlgmr.msra.gmra.mxu1 %v17841_v55 }
0x1f39   :  { %33087 = vmatpush3.msra.mxu1 %v34531_v4  ;;  %33094 = vmatprep.mubr.msk.f32.mxu1 %vm34481_vm1, %v34480_v3 }
0x1f3a   :  { %v17843_v50 = vand.u32 4294901760, %v17842_v7  ;;  %33088 = vmatprep.subr.mxu1 %v34480_v3 }
0x1f3b   :  { %33089 = vmatpush3.msra.mxu1 %v34533_v5 }
0x1f3c   :  { %v17844_v51 = vsub.f32 %v17842_v7, %v17843_v50  ;;  %33090 = vmatprep.subr.mxu1 %v34480_v3 }
0x1f3d   :  { %33091 = vmatpush3.msra.mxu1 %v34535_v6 }
0x1f3e   :  { %v17845_v45 = vand.u32 4294901760, %v17844_v51  ;;  %33092 = vmatprep.subr.mxu1 %v34480_v3 }
0x1f3f   :  { %33093 = vmatpush3.msra.mxu1 %v34543_v9 }
0x1f40   :  { %33095 = vmatmul.mubr.f32.vlgmr.msra.gmra.mxu1 %v17843_v50  ;;  %33108 = vmatprep.subr.mxu1 %v34480_v3 }
0x1f41   :  { %33062 = vmatmul.mubr.f32.vlgmr.msra.gmra.mxu0 %v17845_v45  ;;  %33109 = vmatpush3.msra.mxu1 %v34531_v4 }
0x1f42   :  { %33076 = vmatpush3.msra.mxu0 %v34552_v10  ;;  %33110 = vmatprep.subr.mxu1 %v34480_v3 }
0x1f43   :  { %33077 = vmatprep.subr.mxu0 %v34480_v3  ;;  %33111 = vmatpush3.msra.mxu1 %v34533_v5 }
0x1f44   :  { %33078 = vmatpush3.msra.mxu0 %v34555_v11  ;;  %33112 = vmatprep.subr.mxu1 %v34480_v3 }
0x1f45   :  { %33079 = vmatprep.subr.mxu0 %v34480_v3  ;;  %33113 = vmatpush3.msra.mxu1 %v34535_v6 }
0x1f46   :  { %33080 = vmatpush3.msra.mxu0 %v34558_v12  ;;  %33114 = vmatprep.subr.mxu1 %v34480_v3 }
0x1f47   :  { %33081 = vmatprep.subr.mxu0 %v34480_v3  ;;  %33083 = vmatprep.mubr.msk.f32.mxu0 %vm34481_vm1, %v34480_v3 }
0x1f48   :  { %33082 = vmatpush3.msra.mxu0 %v34562_v13  ;;  %33115 = vmatpush3.msra.mxu1 %v34543_v9 }
0x1f49   :  { %33116 = vmatprep.mubr.msk.f32.mxu1 %vm34481_vm1, %v34480_v3  ;;  %33084 = vmatmul.mubr.f32.vlgmr.msra.gmra.mxu0 %v17842_v7 }
0x1f4a   :  { %33097 = vmatprep.subr.mxu0 %v34480_v3  ;;  %33117 = vmatmul.mubr.f32.vlgmr.msra.gmra.mxu1 %v17841_v55 }
0x1f4b   :  { %33098 = vmatpush3.msra.mxu0 %v34565_v14  ;;  %33105 = vmatprep.mubr.msk.f32.mxu0 %vm34481_vm1, %v34480_v3 }
0x1f4c   :  { %33099 = vmatprep.subr.mxu0 %v34480_v3  ;;  %33130 = vmatprep.subr.mxu1 %v34480_v3 }
0x1f4d   :  { %33100 = vmatpush3.msra.mxu0 %v34569_v15  ;;  %33131 = vmatpush3.msra.mxu1 %v34586_v21 }
0x1f4e   :  { %33101 = vmatprep.subr.mxu0 %v34480_v3  ;;  %33132 = vmatprep.subr.mxu1 %v34480_v3 }
0x1f4f   :  { %33102 = vmatpush3.msra.mxu0 %v34572_v16  ;;  %33133 = vmatpush3.msra.mxu1 %v34588_v22 }
0x1f50   :  { %33103 = vmatprep.subr.mxu0 %v34480_v3  ;;  %33134 = vmatprep.subr.mxu1 %v34480_v3 }
0x1f51   :  { %33104 = vmatpush3.msra.mxu0 %v34576_v17  ;;  %33135 = vmatpush3.msra.mxu1 %v34596_v26 }
0x1f52   :  { %33106 = vmatmul.mubr.f32.vlgmr.msra.gmra.mxu0 %v17841_v55  ;;  %33136 = vmatprep.subr.mxu1 %v34480_v3 }
0x1f53   :  { %33137 = vmatpush3.msra.mxu1 %v34600_v28  ;;  %33119 = vmatprep.subr.mxu0 %v34480_v3 }
0x1f54   :  { %33138 = vmatprep.mubr.msk.f32.mxu1 %vm34481_vm1, %v34480_v3  ;;  %33152 = vmatprep.subr.mxu1 %v34480_v3 }
0x1f55   :  { %33120 = vmatpush3.msra.mxu0 %v34531_v4  ;;  %33127 = vmatprep.mubr.msk.f32.mxu0 %vm34481_vm1, %v34480_v3 }
0x1f56   :  { %33121 = vmatprep.subr.mxu0 %v34480_v3 }
0x1f57   :  { %33122 = vmatpush3.msra.mxu0 %v34533_v5 }
0x1f58   :  { %33123 = vmatprep.subr.mxu0 %v34480_v3 }
0x1f59   :  { %33124 = vmatpush3.msra.mxu0 %v34535_v6 }
0x1f5a   :  { %33125 = vmatprep.subr.mxu0 %v34480_v3 }
0x1f5b   :  { %33126 = vmatpush3.msra.mxu0 %v34543_v9 }
0x1f5c   :  { %33141 = vmatprep.subr.mxu0 %v34480_v3 }
0x1ff8   :  { %v17938_v18 = vpop.f32.mrf.mxu1 }
0x1ffa   :  { %v33074_v58 = vpop.f32.mrf.mxu1 }
0x2000   :  { %v18095_v19 = vpop.f32.mrf.mxu1 }
0x2001   :  { %v17847_v44 = vpop.f32.mrf.mxu0 }
0x2002   :  { %v33096_v61 = vpop.f32.mrf.mxu1  ;;  %v17848_v62 = vadd.f32 %v36759_v24, %v17847_v44 }
0x2003   :  { %v33063_v23 = vpop.f32.mrf.mxu0  ;;  %v29277_v61 = vld [vmem:[%s38040_s2 + $0x150] sm:$0xff] }
0x2004   :  { %v17939_v27 = vadd.f32 %v17938_v18, %v17848_v62 }
0x2009   :  { %v18018_v0 = vpop.f32.mrf.mxu0 }
0x200a   :  { %v18253_v25 = vpop.f32.mrf.mxu1  ;;  %v18019_v30 = vadd.f32 %v18018_v0, %v17939_v27  ;;  %v18778_v27 = vsel %vm551_vm2, %v29277_v61, 0 }
0x200b   :  { %v33085_v1 = vpop.f32.mrf.mxu0 }
0x200c   :  { %v33118_v29 = vpop.f32.mrf.mxu1  ;;  %v18096_v8 = vadd.f32 %v18095_v19, %v18019_v30  ;;  %v29276_v19 = vld [vmem:[%s38040_s2 + $0x148] sm:$0xff]  ;;  %v29278_v1 = vld [vmem:[%s38040_s2 + $0x158] sm:$0xff]  ;;  %v18869_v30 = vand.u32 4294901760, %v18778_v27 }
0x200d   :  { %v18775_v0 = vsel %vm551_vm2, %v29276_v19, 0  ;;  %v29273_v19 = vld [vmem:[%s38039_s1 + $0x50] sm:$0xff] }
0x200e   :  { %v18859_v29 = vand.u32 4294901760, %v18775_v0 }
0x2012   :  { %v18178_v32 = vpop.f32.mrf.mxu0 }
0x2013   :  { %v18179_v33 = vadd.f32 %v18178_v32, %v18096_v8  ;;  %v18781_v8 = vsel %vm551_vm2, %v29278_v1, 0  ;;  %v18860_v32 = vsub.f32 %v18775_v0, %v18859_v29 }
0x2014   :  { %v33107_v20 = vpop.f32.mrf.mxu0 }
0x2015   :  { %v18254_v38 = vadd.f32 %v18253_v25, %v18179_v33  ;;  %v18879_v33 = vand.u32 4294901760, %v18781_v8  ;;  %v18870_v20 = vsub.f32 %v18778_v27, %v18869_v30 }
0x2017   :  { %34430 = vtanh.f32 %v18254_v38  ;;  %v18861_v38 = vand.u32 4294901760, %v18860_v32 }
0x2024   :  { %v34431_v36 = vpop.eup %34430 }
0x2025   :  { %v18258_v37 = vadd.f32 %v34431_v36, %v29259_v39  ;;  %v18880_v39 = vsub.f32 %v18781_v8, %v18879_v33  ;;  %v18871_v36 = vand.u32 4294901760, %v18870_v20 }
0x2027   :  { %18260 = vst.msk [vmem:[#allocation3 + $0x20] sm:$0xff] %vm29_vm0, %v18258_v37  ;;  %v18282_v42 = vsel %vm29_vm0, %v18258_v37, 0  ;;  %v29270_v37 = vld [vmem:[%s38038_s0 + $0x78] sm:$0xff] }
0x2028   :  { %v18353_v43 = vand.u32 4294901760, %v18282_v42 }
0x202a   :  { %v18354_v47 = vsub.f32 %v18282_v42, %v18353_v43  ;;  %33139 = vmatmul.mubr.f32.vlgmr.msra.gmra.mxu1 %v18353_v43  ;;  %v18862_v42 = vsub.f32 %v18860_v32, %v18861_v38 }
0x202b   :  { %33153 = vmatpush3.msra.mxu1 %v34531_v4  ;;  %33160 = vmatprep.mubr.msk.f32.mxu1 %vm34481_vm1, %v34480_v3 }
0x202c   :  { %33154 = vmatprep.subr.mxu1 %v34480_v3  ;;  %v18355_v48 = vand.u32 4294901760, %v18354_v47  ;;  %v18863_v54 = vand.u32 4294901760, %v18862_v42 }
0x202d   :  { %33155 = vmatpush3.msra.mxu1 %v34533_v5 }
0x202e   :  { %33156 = vmatprep.subr.mxu1 %v34480_v3  ;;  %v18356_v41 = vsub.f32 %v18354_v47, %v18355_v48 }
0x202f   :  { %33157 = vmatpush3.msra.mxu1 %v34535_v6 }
0x2030   :  { %33158 = vmatprep.subr.mxu1 %v34480_v3  ;;  %v18357_v53 = vand.u32 4294901760, %v18356_v41 }
0x2031   :  { %33159 = vmatpush3.msra.mxu1 %v34543_v9 }
0x2032   :  { %33161 = vmatmul.mubr.f32.vlgmr.msra.gmra.mxu1 %v18355_v48  ;;  %33174 = vmatprep.subr.mxu1 %v34480_v3  ;;  %v18872_v48 = vsub.f32 %v18870_v20, %v18871_v36 }
0x2033   :  { %33128 = vmatmul.mubr.f32.vlgmr.msra.gmra.mxu0 %v18357_v53  ;;  %33175 = vmatpush3.msra.mxu1 %v34531_v4 }
0x2034   :  { %33142 = vmatpush3.msra.mxu0 %v34552_v10  ;;  %33176 = vmatprep.subr.mxu1 %v34480_v3  ;;  %v18873_v56 = vand.u32 4294901760, %v18872_v48 }
0x2035   :  { %33143 = vmatprep.subr.mxu0 %v34480_v3  ;;  %33177 = vmatpush3.msra.mxu1 %v34533_v5 }
0x2036   :  { %33144 = vmatpush3.msra.mxu0 %v34555_v11  ;;  %33178 = vmatprep.subr.mxu1 %v34480_v3 }
0x2037   :  { %33145 = vmatprep.subr.mxu0 %v34480_v3  ;;  %33179 = vmatpush3.msra.mxu1 %v34535_v6 }
0x2038   :  { %33146 = vmatpush3.msra.mxu0 %v34558_v12  ;;  %33180 = vmatprep.subr.mxu1 %v34480_v3 }
0x2039   :  { %33147 = vmatprep.subr.mxu0 %v34480_v3  ;;  %33149 = vmatprep.mubr.msk.f32.mxu0 %vm34481_vm1, %v34480_v3 }
0x203a   :  { %33148 = vmatpush3.msra.mxu0 %v34562_v13  ;;  %33181 = vmatpush3.msra.mxu1 %v34543_v9 }
0x203b   :  { %33182 = vmatprep.mubr.msk.f32.mxu1 %vm34481_vm1, %v34480_v3  ;;  %33150 = vmatmul.mubr.f32.vlgmr.msra.gmra.mxu0 %v18354_v47 }
0x203c   :  { %33163 = vmatprep.subr.mxu0 %v34480_v3  ;;  %33183 = vmatmul.mubr.f32.vlgmr.msra.gmra.mxu1 %v18353_v43 }
0x203d   :  { %33164 = vmatpush3.msra.mxu0 %v34565_v14  ;;  %33171 = vmatprep.mubr.msk.f32.mxu0 %vm34481_vm1, %v34480_v3 }
0x203e   :  { %33165 = vmatprep.subr.mxu0 %v34480_v3  ;;  %33195 = vmatprep.mubr.f32.mxu1 %v36809_v46 }
0x203f   :  { %33166 = vmatpush3.msra.mxu0 %v34569_v15 }
0x2040   :  { %33167 = vmatprep.subr.mxu0 %v34480_v3 }
0x2041   :  { %33168 = vmatpush3.msra.mxu0 %v34572_v16 }
0x2042   :  { %33169 = vmatprep.subr.mxu0 %v34480_v3 }
0x2043   :  { %33170 = vmatpush3.msra.mxu0 %v34576_v17 }
0x2044   :  { %33172 = vmatmul.mubr.f32.vlgmr.msra.gmra.mxu0 %v18353_v43  ;;  %v18881_v43 = vand.u32 4294901760, %v18880_v39 }
0x2045   :  { %33187 = vmatprep.mubr.f32.mxu0 %v18853_v57 }
0x2046   :  { %v18882_v31 = vsub.f32 %v18880_v39, %v18881_v43 }
0x20ea   :  { %v18450_v34 = vpop.f32.mrf.mxu1 }
0x20ec   :  { %v33140_v35 = vpop.f32.mrf.mxu1 }
0x20ed   :  { %v18883_v35 = vand.u32 4294901760, %v18882_v31 }
0x20f2   :  { %v18607_v63 = vpop.f32.mrf.mxu1 }
0x20f3   :  { %v18359_v49 = vpop.f32.mrf.mxu0 }
0x20f4   :  { %v33162_v52 = vpop.f32.mrf.mxu1  ;;  %v18360_v2 = vadd.f32 %v36759_v24, %v18359_v49 }
0x20f5   :  { %v33129_v40 = vpop.f32.mrf.mxu0 }
0x20f6   :  { %v18451_v50 = vadd.f32 %v18450_v34, %v18360_v2 }
0x20fb   :  { %v18530_v55 = vpop.f32.mrf.mxu0 }
0x20fc   :  { %v18765_v7 = vpop.f32.mrf.mxu1  ;;  %v18531_v18 = vadd.f32 %v18530_v55, %v18451_v50 }
0x20fd   :  { %v33151_v51 = vpop.f32.mrf.mxu0 }
0x20fe   :  { %v33184_v45 = vpop.f32.mrf.mxu1  ;;  %v18608_v58 = vadd.f32 %v18607_v63, %v18531_v18 }
0x2104   :  { %v18690_v44 = vpop.f32.mrf.mxu0 }
0x2105   :  { %v18691_v23 = vadd.f32 %v18690_v44, %v18608_v58 }
0x2106   :  { %v33173_v62 = vpop.f32.mrf.mxu0 }
0x2107   :  { %v18766_v25 = vadd.f32 %v18765_v7, %v18691_v23 }
0x2109   :  { %34432 = vtanh.f32 %v18766_v25  ;;  %v19359_v25 = vsel %vm29_vm0, %v29273_v19, 0 }
0x2116   :  { %v34433_v47 = vpop.eup %34432 }
0x2117   :  { %v36835_v41 = vadd.f32 %v34433_v47, %v29270_v37 }
0x2119   :  { %v18814_v53 = vand.u32 4294901760, %v36835_v41 }
0x211b   :  { %33185 = vmatprep.subr.mxu0 %v18814_v53  ;;  %v18921_v57 = vsub.f32 %v36835_v41, %v18814_v53 }
0x211c   :  { %33186 = vmatpush3.msra.mxu0 %v18814_v53 }
0x211d   :  { %33188 = vmatmul.mubr.f32.vlgmr.msra.gmra.mxu0 %v18863_v54  ;;  %33201 = vmatprep.subr.mxu0 %v18921_v57  ;;  %v18922_v34 = vand.u32 4294901760, %v18921_v57 }
0x211e   :  { %33202 = vmatpush3.msra.mxu0 %v18921_v57  ;;  %33190 = vmatprep.mubr.f32.mxu0 %v18873_v56 }
0x211f   :  { %33217 = vmatprep.subr.mxu0 %v18922_v34  ;;  %v18923_v63 = vsub.f32 %v18921_v57, %v18922_v34 }
0x2121   :  { %33191 = vmatmul.mubr.f32.gmra.mxu0 %v18883_v35  ;;  %v18924_v49 = vand.u32 4294901760, %v18923_v63 }
0x2122   :  { %33203 = vmatprep.mubr.f32.mxu0 %v36812_v59 }
0x2123   :  { %33193 = vmatprep.subr.mxu1 %v18924_v49 }
0x2124   :  { %33194 = vmatpush3.msra.mxu1 %v18924_v49 }
0x2125   :  { %33196 = vmatmul.mubr.f32.vlgmr.msra.gmra.mxu1 %v18859_v29  ;;  %33204 = vmatmul.mubr.f32.vlgmr.msra.gmra.mxu0 %v18860_v32 }
0x2126   :  { %33209 = vmatprep.subr.mxu1 %v18814_v53  ;;  %33218 = vmatpush3.msra.mxu0 %v18922_v34 }
0x2127   :  { %33210 = vmatpush3.msra.mxu1 %v18814_v53  ;;  %33198 = vmatprep.mubr.f32.mxu1 %v18869_v30 }
0x2128   :  { %33225 = vmatprep.subr.mxu1 %v18814_v53  ;;  %33206 = vmatprep.mubr.f32.mxu0 %v18870_v20 }
0x2129   :  { %33199 = vmatmul.mubr.f32.gmra.mxu1 %v18879_v33  ;;  %33207 = vmatmul.mubr.f32.gmra.mxu0 %v18880_v39 }
0x212a   :  { %33211 = vmatprep.mubr.f32.mxu1 %v18851_v60  ;;  %33219 = vmatprep.mubr.f32.mxu0 %v36809_v46 }
0x212b   :  { %33233 = vmatprep.subr.mxu0 %v34480_v3 }
0x212d   :  { %33212 = vmatmul.mubr.f32.vlgmr.msra.gmra.mxu1 %v18861_v38  ;;  %33220 = vmatmul.mubr.f32.vlgmr.msra.gmra.mxu0 %v18859_v29 }
0x212e   :  { %33226 = vmatpush3.msra.mxu1 %v18814_v53  ;;  %33214 = vmatprep.mubr.f32.mxu1 %v18871_v36 }
0x212f   :  { %33222 = vmatprep.mubr.f32.mxu0 %v18869_v30  ;;  %33244 = vmatprep.subr.mxu1 %v34480_v3 }
0x2131   :  { %33215 = vmatmul.mubr.f32.gmra.mxu1 %v18881_v43  ;;  %33223 = vmatmul.mubr.f32.gmra.mxu0 %v18879_v33 }
0x2132   :  { %33227 = vmatprep.mubr.f32.mxu1 %v36809_v46  ;;  %33241 = vmatprep.mubr.msk.f32.mxu0 %vm34481_vm1, %v34480_v3 }
0x2135   :  { %33228 = vmatmul.mubr.f32.vlgmr.msra.gmra.mxu1 %v18859_v29 }
0x2136   :  { %33230 = vmatprep.mubr.f32.mxu1 %v18869_v30 }
0x2139   :  { %33231 = vmatmul.mubr.f32.gmra.mxu1 %v18879_v33  ;;  %v36854_v33 = vand.u32 4294901760, %v19359_v25 }
0x213a   :  { %33252 = vmatprep.mubr.msk.f32.mxu1 %vm34481_vm1, %v34480_v3 }
0x213b   :  { %v36857_v48 = vsub.f32 %v19359_v25, %v36854_v33 }
0x21dd   :  { %v33189_v59 = vpop.f32.mrf.mxu0 }
0x21df   :  { %v18855_v60 = vpop.f32.mrf.mxu0 }
0x21e1   :  { %v33192_v52 = vpop.f32.mrf.mxu0 }
0x21e3   :  { %v18875_v40 = vpop.f32.mrf.mxu0 }
0x21e5   :  { %v33197_v2 = vpop.f32.mrf.mxu1  ;;  %v33205_v55 = vpop.f32.mrf.mxu0 }
0x21e6   :  { %v18968_v46 = vadd.f32 %v33197_v2, %v33189_v59  ;;  %v19432_v59 = vand.u32 4294901760, %v36857_v48 }
0x21e7   :  { %v18961_v7 = vpop.f32.mrf.mxu1  ;;  %v19053_v50 = vpop.f32.mrf.mxu0 }
0x21e8   :  { %v18962_v44 = vadd.f32 %v18961_v7, %v18855_v60  ;;  %v19061_v62 = vadd.f32 %v33205_v55, %v18968_v46 }
0x21e9   :  { %v33200_v51 = vpop.f32.mrf.mxu1  ;;  %v33208_v45 = vpop.f32.mrf.mxu0 }
0x21ea   :  { %v18980_v0 = vadd.f32 %v33200_v51, %v33192_v52  ;;  %v19054_v29 = vadd.f32 %v19053_v50, %v18962_v44  ;;  %v19433_v51 = vsub.f32 %v36857_v48, %v19432_v59 }
0x21eb   :  { %v18973_v18 = vpop.f32.mrf.mxu1  ;;  %v19067_v58 = vpop.f32.mrf.mxu0 }
0x21ec   :  { %v18974_v30 = vadd.f32 %v18973_v18, %v18875_v40  ;;  %v19075_v20 = vadd.f32 %v33208_v45, %v18980_v0 }
0x21ed   :  { %v33213_v61 = vpop.f32.mrf.mxu1  ;;  %v33221_v23 = vpop.f32.mrf.mxu0 }
0x21ee   :  { %v19157_v8 = vadd.f32 %v33213_v61, %v19061_v62  ;;  %v19068_v37 = vadd.f32 %v19067_v58, %v18974_v30  ;;  %v19434_v61 = vand.u32 4294901760, %v19433_v51 }
0x21ef   :  { %v19148_v27 = vpop.f32.mrf.mxu1  ;;  %v19246_v1 = vpop.f32.mrf.mxu0 }
0x21f0   :  { %v19149_v38 = vadd.f32 %v19148_v27, %v19054_v29  ;;  %v19253_v42 = vadd.f32 %v33221_v23, %v19157_v8 }
0x21f1   :  { %v33216_v32 = vpop.f32.mrf.mxu1  ;;  %v33224_v36 = vpop.f32.mrf.mxu0 }
0x21f2   :  { %v19173_v43 = vadd.f32 %v33216_v32, %v19075_v20  ;;  %v19247_v53 = vadd.f32 %v19246_v1, %v19149_v38 }
0x21f3   :  { %v19164_v39 = vpop.f32.mrf.mxu1  ;;  %v19258_v56 = vpop.f32.mrf.mxu0 }
0x21f4   :  { %v19165_v54 = vadd.f32 %v19164_v39, %v19068_v37  ;;  %v19265_v34 = vadd.f32 %v33224_v36, %v19173_v43 }
0x21f5   :  { %v33229_v47 = vpop.f32.mrf.mxu1 }
0x21f6   :  { %v19343_v31 = vadd.f32 %v33229_v47, %v19253_v42  ;;  %v19259_v60 = vadd.f32 %v19258_v56, %v19165_v54 }
0x21f7   :  { %v19336_v57 = vpop.f32.mrf.mxu1 }
0x21f8   :  { %v36859_v35 = vand.u32 4294901760, %v19343_v31  ;;  %v19337_v63 = vadd.f32 %v19336_v57, %v19247_v53 }
0x21f9   :  { %v33232_v49 = vpop.f32.mrf.mxu1 }
0x21fa   :  { %v36862_v52 = vand.u32 4294901760, %v19337_v63  ;;  %v19355_v40 = vadd.f32 %v33232_v49, %v19265_v34  ;;  %v19480_v55 = vsub.f32 %v19343_v31, %v36859_v35 }
0x21fb   :  { %v19348_v2 = vpop.f32.mrf.mxu1 }
0x21fc   :  { %v36865_v7 = vand.u32 4294901760, %v19355_v40  ;;  %v19349_v50 = vadd.f32 %v19348_v2, %v19259_v60  ;;  %v19487_v45 = vsub.f32 %v19337_v63, %v36862_v52  ;;  %v19481_v58 = vand.u32 4294901760, %v19480_v55  ;;  %v29279_v2 = vld [vmem:[%s38040_s2 + $0x160] sm:$0xff] }
0x21fe   :  { %v19466_v46 = vsub.f32 %v19355_v40, %v36865_v7  ;;  %v36872_v18 = vand.u32 4294901760, %v19349_v50  ;;  %33234 = vmatpush3.msra.mxu0 %v36865_v7  ;;  %v19488_v23 = vand.u32 4294901760, %v19487_v45  ;;  %v19482_v25 = vsub.f32 %v19480_v55, %v19481_v58 }
0x21ff   :  { %33235 = vmatprep.subr.mxu0 %v34480_v3 }
0x2200   :  { %v19467_v19 = vand.u32 4294901760, %v19466_v46  ;;  %v19473_v44 = vsub.f32 %v19349_v50, %v36872_v18  ;;  %33236 = vmatpush3.msra.mxu0 %v36872_v18  ;;  %v19489_v30 = vsub.f32 %v19487_v45, %v19488_v23  ;;  %v19483_v8 = vand.u32 4294901760, %v19482_v25 }
0x2201   :  { %33237 = vmatprep.subr.mxu0 %v34480_v3 }
0x2202   :  { %v19468_v62 = vsub.f32 %v19466_v46, %v19467_v19  ;;  %v19474_v0 = vand.u32 4294901760, %v19473_v44  ;;  %33238 = vmatpush3.msra.mxu0 %v36859_v35  ;;  %v19490_v32 = vand.u32 4294901760, %v19489_v30 }
0x2203   :  { %33239 = vmatprep.subr.mxu0 %v34480_v3 }
0x2204   :  { %33240 = vmatpush3.msra.mxu0 %v36862_v52  ;;  %v19469_v27 = vand.u32 4294901760, %v19468_v62  ;;  %v19475_v1 = vsub.f32 %v19473_v44, %v19474_v0 }
0x2205   :  { %33255 = vmatprep.subr.mxu0 %v34480_v3  ;;  %33242 = vmatmul.mubr.f32.vlgmr.msra.gmra.mxu0 %v19434_v61 }
0x2206   :  { %33245 = vmatpush3.msra.mxu1 %v19469_v27  ;;  %33256 = vmatpush3.msra.mxu0 %v19466_v46  ;;  %v19476_v29 = vand.u32 4294901760, %v19475_v1 }
0x2207   :  { %33246 = vmatprep.subr.mxu1 %v34480_v3  ;;  %33257 = vmatprep.subr.mxu0 %v34480_v3 }
0x2208   :  { %33247 = vmatpush3.msra.mxu1 %v19476_v29  ;;  %33258 = vmatpush3.msra.mxu0 %v19473_v44 }
0x2209   :  { %33248 = vmatprep.subr.mxu1 %v34480_v3  ;;  %33259 = vmatprep.subr.mxu0 %v34480_v3 }
0x220a   :  { %33249 = vmatpush3.msra.mxu1 %v19483_v8  ;;  %33260 = vmatpush3.msra.mxu0 %v19480_v55  ;;  %v20338_v55 = vsel %vm551_vm2, %v29279_v2, 0 }
0x220b   :  { %33250 = vmatprep.subr.mxu1 %v34480_v3  ;;  %33261 = vmatprep.subr.mxu0 %v34480_v3 }
0x220c   :  { %33251 = vmatpush3.msra.mxu1 %v19490_v32  ;;  %33262 = vmatpush3.msra.mxu0 %v19487_v45  ;;  %v29280_v32 = vld [vmem:[%s38040_s2 + $0x168] sm:$0xff] }
0x220d   :  { %33253 = vmatmul.mubr.f32.vlgmr.msra.gmra.mxu1 %v36854_v33  ;;  %33263 = vmatprep.mubr.msk.f32.mxu0 %vm34481_vm1, %v34480_v3 }
0x220e   :  { %33266 = vmatprep.subr.mxu1 %v34480_v3  ;;  %33277 = vmatprep.subr.mxu0 %v34480_v3 }
0x220f   :  { %33264 = vmatmul.mubr.f32.vlgmr.msra.gmra.mxu0 %v36857_v48  ;;  %33267 = vmatpush3.msra.mxu1 %v36865_v7 }
0x2210   :  { %33278 = vmatpush3.msra.mxu0 %v19467_v19  ;;  %33268 = vmatprep.subr.mxu1 %v34480_v3 }
0x2211   :  { %33279 = vmatprep.subr.mxu0 %v34480_v3  ;;  %33269 = vmatpush3.msra.mxu1 %v36872_v18 }
0x2212   :  { %33280 = vmatpush3.msra.mxu0 %v19474_v0  ;;  %33270 = vmatprep.subr.mxu1 %v34480_v3 }
0x2213   :  { %33281 = vmatprep.subr.mxu0 %v34480_v3  ;;  %33271 = vmatpush3.msra.mxu1 %v36859_v35 }
0x2214   :  { %33282 = vmatpush3.msra.mxu0 %v19481_v58  ;;  %33272 = vmatprep.subr.mxu1 %v34480_v3 }
0x2215   :  { %33283 = vmatprep.subr.mxu0 %v34480_v3  ;;  %33273 = vmatpush3.msra.mxu1 %v36862_v52 }
0x2216   :  { %33274 = vmatprep.mubr.msk.f32.mxu1 %vm34481_vm1, %v34480_v3  ;;  %33284 = vmatpush3.msra.mxu0 %v19488_v23 }
0x2217   :  { %33275 = vmatmul.mubr.f32.vlgmr.msra.gmra.mxu1 %v19432_v59  ;;  %33288 = vmatprep.subr.mxu1 %v34480_v3 }
0x2218   :  { %33285 = vmatprep.mubr.msk.f32.mxu0 %vm34481_vm1, %v34480_v3  ;;  %33289 = vmatpush3.msra.mxu1 %v36865_v7  ;;  %v36989_v7 = vand.u32 4294901760, %v20338_v55 }
0x2219   :  { %33286 = vmatmul.mubr.f32.vlgmr.msra.gmra.mxu0 %v36854_v33  ;;  %33290 = vmatprep.subr.mxu1 %v34480_v3 }
0x221a   :  { %33291 = vmatpush3.msra.mxu1 %v36872_v18  ;;  %33296 = vmatprep.mubr.msk.f32.mxu1 %vm34481_vm1, %v34480_v3  ;;  %v36992_v50 = vsub.f32 %v20338_v55, %v36989_v7 }
0x221b   :  { %33292 = vmatprep.subr.mxu1 %v34480_v3  ;;  %33299 = vmatprep.subr.mxu0 %v34480_v3 }
0x221c   :  { %33293 = vmatpush3.msra.mxu1 %v36859_v35  ;;  %33300 = vmatpush3.msra.mxu0 %v34531_v4  ;;  %v20417_v51 = vand.u32 4294901760, %v36992_v50 }
0x221d   :  { %33294 = vmatprep.subr.mxu1 %v34480_v3  ;;  %33301 = vmatprep.subr.mxu0 %v34480_v3 }
0x221e   :  { %33295 = vmatpush3.msra.mxu1 %v36862_v52  ;;  %33302 = vmatpush3.msra.mxu0 %v34533_v5  ;;  %v20418_v45 = vsub.f32 %v36992_v50, %v20417_v51 }
0x221f   :  { %33297 = vmatmul.mubr.f32.vlgmr.msra.gmra.mxu1 %v36854_v33  ;;  %33310 = vmatprep.subr.mxu1 %v34480_v3 }
0x2220   :  { %33311 = vmatpush3.msra.mxu1 %v34586_v21  ;;  %33318 = vmatprep.mubr.msk.f32.mxu1 %vm34481_vm1, %v34480_v3  ;;  %v20419_v46 = vand.u32 4294901760, %v20418_v45 }
0x2221   :  { %33312 = vmatprep.subr.mxu1 %v34480_v3  ;;  %33303 = vmatprep.subr.mxu0 %v34480_v3 }
0x2222   :  { %33313 = vmatpush3.msra.mxu1 %v34588_v22  ;;  %33304 = vmatpush3.msra.mxu0 %v34535_v6 }
0x2223   :  { %33314 = vmatprep.subr.mxu1 %v34480_v3  ;;  %33305 = vmatprep.subr.mxu0 %v34480_v3 }
0x2224   :  { %33315 = vmatpush3.msra.mxu1 %v34596_v26  ;;  %33306 = vmatpush3.msra.mxu0 %v34543_v9 }
0x2225   :  { %33316 = vmatprep.subr.mxu1 %v34480_v3  ;;  %33307 = vmatprep.mubr.msk.f32.mxu0 %vm34481_vm1, %v34480_v3 }
0x2226   :  { %33317 = vmatpush3.msra.mxu1 %v34600_v28  ;;  %33321 = vmatprep.subr.mxu0 %v34480_v3 }
0x2227   :  { %33332 = vmatprep.subr.mxu1 %v34480_v3 }
0x22c5   :  { %v19436_v33 = vpop.f32.mrf.mxu0 }
0x22c7   :  { %v33243_v20 = vpop.f32.mrf.mxu0 }
0x22c8   :  { %v29281_v20 = vld [vmem:[%s38040_s2 + $0x170] sm:$0xff] }
0x22cd   :  { %v19527_v38 = vpop.f32.mrf.mxu1 }
0x22ce   :  { %v19528_v42 = vadd.f32 %v19527_v38, %v19436_v33 }
0x22cf   :  { %v33254_v39 = vpop.f32.mrf.mxu1  ;;  %v19607_v36 = vpop.f32.mrf.mxu0 }
0x22d0   :  { %v19608_v47 = vadd.f32 %v19607_v36, %v19528_v42  ;;  %v29282_v42 = vld [vmem:[%s38040_s2 + $0x178] sm:$0xff] }
0x22d1   :  { %v33265_v37 = vpop.f32.mrf.mxu0 }
0x22d2   :  { %v20344_v37 = vsel %vm551_vm2, %v29281_v20, 0 }
0x22d7   :  { %v19684_v43 = vpop.f32.mrf.mxu1 }
0x22d8   :  { %v19685_v54 = vadd.f32 %v19684_v43, %v19608_v47  ;;  %v20435_v47 = vand.u32 4294901760, %v20344_v37 }
0x22d9   :  { %v33276_v48 = vpop.f32.mrf.mxu1  ;;  %v19767_v53 = vpop.f32.mrf.mxu0 }
0x22da   :  { %v19768_v56 = vadd.f32 %v19767_v53, %v19685_v54  ;;  %v20347_v48 = vsel %vm551_vm2, %v29282_v42, 0 }
0x22db   :  { %v33287_v31 = vpop.f32.mrf.mxu0  ;;  %v20445_v54 = vand.u32 4294901760, %v20347_v48 }
0x22dc   :  { %v20436_v31 = vsub.f32 %v20344_v37, %v20435_v47 }
0x22df   :  { %v19842_v57 = vpop.f32.mrf.mxu1 }
0x22e0   :  { %v19843_v34 = vadd.f32 %v19842_v57, %v19768_v56  ;;  %v20446_v57 = vsub.f32 %v20347_v48, %v20445_v54 }
0x22e1   :  { %v33298_v35 = vpop.f32.mrf.mxu1 }
0x22e2   :  { %v19846_v63 = vsub.f32 %v36835_v41, %v19843_v34  ;;  %v20437_v34 = vand.u32 4294901760, %v20436_v31  ;;  %v29271_v35 = vld [vmem:[%s38038_s0 + $0x80] sm:$0xff] }
0x22e4   :  { %v19848_v49 = vsel %vm29_vm0, %v19846_v63, 0 }
0x22e5   :  { %v19919_v59 = vand.u32 4294901760, %v19848_v49 }
0x22e7   :  { %v19920_v60 = vsub.f32 %v19848_v49, %v19919_v59  ;;  %33319 = vmatmul.mubr.f32.vlgmr.msra.gmra.mxu1 %v19919_v59  ;;  %v20447_v49 = vand.u32 4294901760, %v20446_v57 }
0x22e8   :  { %33333 = vmatpush3.msra.mxu1 %v34531_v4  ;;  %33340 = vmatprep.mubr.msk.f32.mxu1 %vm34481_vm1, %v34480_v3 }
0x22e9   :  { %v19921_v52 = vand.u32 4294901760, %v19920_v60  ;;  %33334 = vmatprep.subr.mxu1 %v34480_v3  ;;  %v20448_v2 = vsub.f32 %v20446_v57, %v20447_v49 }
0x22ea   :  { %33335 = vmatpush3.msra.mxu1 %v34533_v5 }
0x22eb   :  { %v19922_v40 = vsub.f32 %v19920_v60, %v19921_v52  ;;  %33336 = vmatprep.subr.mxu1 %v34480_v3 }
0x22ec   :  { %33337 = vmatpush3.msra.mxu1 %v34535_v6 }
0x22ed   :  { %v19923_v41 = vand.u32 4294901760, %v19922_v40  ;;  %33338 = vmatprep.subr.mxu1 %v34480_v3 }
0x22ee   :  { %33339 = vmatpush3.msra.mxu1 %v34543_v9 }
0x22ef   :  { %33341 = vmatmul.mubr.f32.vlgmr.msra.gmra.mxu1 %v19921_v52  ;;  %33354 = vmatprep.subr.mxu1 %v34480_v3 }
0x22f0   :  { %33308 = vmatmul.mubr.f32.vlgmr.msra.gmra.mxu0 %v19923_v41  ;;  %33355 = vmatpush3.msra.mxu1 %v34531_v4 }
0x22f1   :  { %33322 = vmatpush3.msra.mxu0 %v34552_v10  ;;  %33356 = vmatprep.subr.mxu1 %v34480_v3 }
0x22f2   :  { %33323 = vmatprep.subr.mxu0 %v34480_v3  ;;  %33357 = vmatpush3.msra.mxu1 %v34533_v5 }
0x22f3   :  { %33324 = vmatpush3.msra.mxu0 %v34555_v11  ;;  %33358 = vmatprep.subr.mxu1 %v34480_v3 }
0x22f4   :  { %33325 = vmatprep.subr.mxu0 %v34480_v3  ;;  %33359 = vmatpush3.msra.mxu1 %v34535_v6 }
0x22f5   :  { %33326 = vmatpush3.msra.mxu0 %v34558_v12  ;;  %33360 = vmatprep.subr.mxu1 %v34480_v3 }
0x22f6   :  { %33327 = vmatprep.subr.mxu0 %v34480_v3  ;;  %33329 = vmatprep.mubr.msk.f32.mxu0 %vm34481_vm1, %v34480_v3 }
0x22f7   :  { %33328 = vmatpush3.msra.mxu0 %v34562_v13  ;;  %33361 = vmatpush3.msra.mxu1 %v34543_v9 }
0x22f8   :  { %33362 = vmatprep.mubr.msk.f32.mxu1 %vm34481_vm1, %v34480_v3  ;;  %33330 = vmatmul.mubr.f32.vlgmr.msra.gmra.mxu0 %v19920_v60  ;;  %v20438_v60 = vsub.f32 %v20436_v31, %v20437_v34 }
0x22f9   :  { %33343 = vmatprep.subr.mxu0 %v34480_v3  ;;  %33363 = vmatmul.mubr.f32.vlgmr.msra.gmra.mxu1 %v19919_v59 }
0x22fa   :  { %33344 = vmatpush3.msra.mxu0 %v34565_v14  ;;  %33351 = vmatprep.mubr.msk.f32.mxu0 %vm34481_vm1, %v34480_v3  ;;  %v20439_v55 = vand.u32 4294901760, %v20438_v60 }
0x22fb   :  { %33345 = vmatprep.subr.mxu0 %v34480_v3  ;;  %33375 = vmatprep.mubr.f32.mxu1 %v36989_v7 }
0x22fc   :  { %33346 = vmatpush3.msra.mxu0 %v34569_v15 }
0x22fd   :  { %33347 = vmatprep.subr.mxu0 %v34480_v3 }
0x22fe   :  { %33348 = vmatpush3.msra.mxu0 %v34572_v16 }
0x22ff   :  { %33349 = vmatprep.subr.mxu0 %v34480_v3 }
0x2300   :  { %33350 = vmatpush3.msra.mxu0 %v34576_v17 }
0x2301   :  { %33352 = vmatmul.mubr.f32.vlgmr.msra.gmra.mxu0 %v19919_v59 }
0x2302   :  { %33367 = vmatprep.mubr.f32.mxu0 %v20419_v46 }
0x23a7   :  { %v20016_v18 = vpop.f32.mrf.mxu1 }
0x23a9   :  { %v33320_v58 = vpop.f32.mrf.mxu1 }
0x23af   :  { %v20173_v19 = vpop.f32.mrf.mxu1 }
0x23b0   :  { %v19925_v44 = vpop.f32.mrf.mxu0 }
0x23b1   :  { %v33342_v61 = vpop.f32.mrf.mxu1  ;;  %v19926_v62 = vadd.f32 %v36759_v24, %v19925_v44  ;;  %v20341_v24 = vsel %vm551_vm2, %v29280_v32, 0 }
0x23b2   :  { %v33309_v23 = vpop.f32.mrf.mxu0  ;;  %v20425_v43 = vand.u32 4294901760, %v20341_v24 }
0x23b3   :  { %v20017_v27 = vadd.f32 %v20016_v18, %v19926_v62  ;;  %v20449_v18 = vand.u32 4294901760, %v20448_v2 }
0x23b4   :  { %v20426_v53 = vsub.f32 %v20341_v24, %v20425_v43 }
0x23b6   :  { %v20427_v56 = vand.u32 4294901760, %v20426_v53 }
0x23b8   :  { %v20096_v0 = vpop.f32.mrf.mxu0  ;;  %v20428_v63 = vsub.f32 %v20426_v53, %v20427_v56 }
0x23b9   :  { %v20331_v25 = vpop.f32.mrf.mxu1  ;;  %v20097_v30 = vadd.f32 %v20096_v0, %v20017_v27 }
0x23ba   :  { %v33331_v1 = vpop.f32.mrf.mxu0  ;;  %v20429_v41 = vand.u32 4294901760, %v20428_v63 }
0x23bb   :  { %v33364_v29 = vpop.f32.mrf.mxu1  ;;  %v20174_v8 = vadd.f32 %v20173_v19, %v20097_v30 }
0x23c1   :  { %v20256_v33 = vpop.f32.mrf.mxu0 }
0x23c2   :  { %v20257_v38 = vadd.f32 %v20256_v33, %v20174_v8  ;;  %v29274_v8 = vld [vmem:[%s38039_s1 + $0x58] sm:$0xff] }
0x23c3   :  { %v33353_v39 = vpop.f32.mrf.mxu0  ;;  %v20925_v24 = vsel %vm29_vm0, %v29274_v8, 0 }
0x23c4   :  { %v20332_v36 = vadd.f32 %v20331_v25, %v20257_v38 }
0x23c6   :  { %34434 = vtanh.f32 %v20332_v36 }
0x23d3   :  { %v34435_v59 = vpop.eup %34434 }
0x23d4   :  { %v37015_v52 = vadd.f32 %v34435_v59, %v29271_v35 }
0x23d6   :  { %v20380_v40 = vand.u32 4294901760, %v37015_v52 }
0x23d8   :  { %33365 = vmatprep.subr.mxu0 %v20380_v40  ;;  %v20487_v45 = vsub.f32 %v37015_v52, %v20380_v40 }
0x23d9   :  { %33366 = vmatpush3.msra.mxu0 %v20380_v40 }
0x23da   :  { %33368 = vmatmul.mubr.f32.vlgmr.msra.gmra.mxu0 %v20429_v41  ;;  %33381 = vmatprep.subr.mxu0 %v20487_v45  ;;  %v20488_v46 = vand.u32 4294901760, %v20487_v45 }
0x23db   :  { %33382 = vmatpush3.msra.mxu0 %v20487_v45  ;;  %33370 = vmatprep.mubr.f32.mxu0 %v20439_v55 }
0x23dc   :  { %33397 = vmatprep.subr.mxu0 %v20488_v46  ;;  %v20489_v58 = vsub.f32 %v20487_v45, %v20488_v46 }
0x23de   :  { %33371 = vmatmul.mubr.f32.gmra.mxu0 %v20449_v18  ;;  %v20490_v19 = vand.u32 4294901760, %v20489_v58 }
0x23df   :  { %33383 = vmatprep.mubr.f32.mxu0 %v36992_v50 }
0x23e0   :  { %33373 = vmatprep.subr.mxu1 %v20490_v19 }
0x23e1   :  { %33374 = vmatpush3.msra.mxu1 %v20490_v19 }
0x23e2   :  { %33376 = vmatmul.mubr.f32.vlgmr.msra.gmra.mxu1 %v20425_v43  ;;  %33384 = vmatmul.mubr.f32.vlgmr.msra.gmra.mxu0 %v20426_v53  ;;  %v37034_v53 = vand.u32 4294901760, %v20925_v24 }
0x23e3   :  { %33389 = vmatprep.subr.mxu1 %v20380_v40  ;;  %33398 = vmatpush3.msra.mxu0 %v20488_v46 }
0x23e4   :  { %33390 = vmatpush3.msra.mxu1 %v20380_v40  ;;  %33378 = vmatprep.mubr.f32.mxu1 %v20435_v47  ;;  %v37037_v59 = vsub.f32 %v20925_v24, %v37034_v53 }
0x23e5   :  { %33405 = vmatprep.subr.mxu1 %v20380_v40  ;;  %33386 = vmatprep.mubr.f32.mxu0 %v20436_v31 }
0x23e6   :  { %33379 = vmatmul.mubr.f32.gmra.mxu1 %v20445_v54  ;;  %33387 = vmatmul.mubr.f32.gmra.mxu0 %v20446_v57  ;;  %v20998_v19 = vand.u32 4294901760, %v37037_v59 }
0x23e7   :  { %33391 = vmatprep.mubr.f32.mxu1 %v20417_v51  ;;  %33399 = vmatprep.mubr.f32.mxu0 %v36989_v7 }
0x23e8   :  { %33413 = vmatprep.subr.mxu0 %v34480_v3 }
0x23ea   :  { %33392 = vmatmul.mubr.f32.vlgmr.msra.gmra.mxu1 %v20427_v56  ;;  %33400 = vmatmul.mubr.f32.vlgmr.msra.gmra.mxu0 %v20425_v43 }
0x23eb   :  { %33406 = vmatpush3.msra.mxu1 %v20380_v40  ;;  %33394 = vmatprep.mubr.f32.mxu1 %v20437_v34 }
0x23ec   :  { %33402 = vmatprep.mubr.f32.mxu0 %v20435_v47  ;;  %33424 = vmatprep.subr.mxu1 %v34480_v3 }
0x23ee   :  { %33395 = vmatmul.mubr.f32.gmra.mxu1 %v20447_v49  ;;  %33403 = vmatmul.mubr.f32.gmra.mxu0 %v20445_v54 }
0x23ef   :  { %33407 = vmatprep.mubr.f32.mxu1 %v36989_v7  ;;  %33421 = vmatprep.mubr.msk.f32.mxu0 %vm34481_vm1, %v34480_v3 }
0x23f2   :  { %33408 = vmatmul.mubr.f32.vlgmr.msra.gmra.mxu1 %v20425_v43 }
0x23f3   :  { %33410 = vmatprep.mubr.f32.mxu1 %v20435_v47 }
0x23f6   :  { %33411 = vmatmul.mubr.f32.gmra.mxu1 %v20445_v54 }
0x23f7   :  { %33432 = vmatprep.mubr.msk.f32.mxu1 %vm34481_vm1, %v34480_v3 }
0x249a   :  { %v33369_v50 = vpop.f32.mrf.mxu0 }
0x249c   :  { %v20421_v51 = vpop.f32.mrf.mxu0 }
0x249e   :  { %v33372_v44 = vpop.f32.mrf.mxu0 }
0x24a0   :  { %v20441_v61 = vpop.f32.mrf.mxu0 }
0x24a2   :  { %v33377_v23 = vpop.f32.mrf.mxu1  ;;  %v33385_v62 = vpop.f32.mrf.mxu0 }
0x24a3   :  { %v20534_v7 = vadd.f32 %v33377_v23, %v33369_v50 }
0x24a4   :  { %v20527_v0 = vpop.f32.mrf.mxu1  ;;  %v20619_v25 = vpop.f32.mrf.mxu0 }
0x24a5   :  { %v20528_v32 = vadd.f32 %v20527_v0, %v20421_v51  ;;  %v20627_v38 = vadd.f32 %v33385_v62, %v20534_v7 }
0x24a6   :  { %v33380_v27 = vpop.f32.mrf.mxu1  ;;  %v33388_v1 = vpop.f32.mrf.mxu0 }
0x24a7   :  { %v20546_v39 = vadd.f32 %v33380_v27, %v33372_v44  ;;  %v20620_v42 = vadd.f32 %v20619_v25, %v20528_v32  ;;  %v20999_v25 = vsub.f32 %v37037_v59, %v20998_v19 }
0x24a8   :  { %v20539_v29 = vpop.f32.mrf.mxu1  ;;  %v20633_v30 = vpop.f32.mrf.mxu0 }
0x24a9   :  { %v20540_v43 = vadd.f32 %v20539_v29, %v20441_v61  ;;  %v20641_v54 = vadd.f32 %v33388_v1, %v20546_v39  ;;  %v21000_v32 = vand.u32 4294901760, %v20999_v25 }
0x24aa   :  { %v33393_v33 = vpop.f32.mrf.mxu1  ;;  %v33401_v20 = vpop.f32.mrf.mxu0 }
0x24ab   :  { %v20723_v47 = vadd.f32 %v33393_v33, %v20627_v38  ;;  %v20634_v34 = vadd.f32 %v20633_v30, %v20540_v43 }
0x24ac   :  { %v20714_v36 = vpop.f32.mrf.mxu1  ;;  %v20812_v37 = vpop.f32.mrf.mxu0 }
0x24ad   :  { %v20715_v31 = vadd.f32 %v20714_v36, %v20620_v42  ;;  %v20819_v35 = vadd.f32 %v33401_v20, %v20723_v47 }
0x24ae   :  { %v33396_v48 = vpop.f32.mrf.mxu1  ;;  %v33404_v57 = vpop.f32.mrf.mxu0 }
0x24af   :  { %v20739_v63 = vadd.f32 %v33396_v48, %v20641_v54  ;;  %v20813_v60 = vadd.f32 %v20812_v37, %v20715_v31 }
0x24b0   :  { %v20730_v56 = vpop.f32.mrf.mxu1  ;;  %v20824_v2 = vpop.f32.mrf.mxu0 }
0x24b1   :  { %v20731_v40 = vadd.f32 %v20730_v56, %v20634_v34  ;;  %v20831_v45 = vadd.f32 %v33404_v57, %v20739_v63 }
0x24b2   :  { %v33409_v49 = vpop.f32.mrf.mxu1 }
0x24b3   :  { %v20909_v41 = vadd.f32 %v33409_v49, %v20819_v35  ;;  %v20825_v50 = vadd.f32 %v20824_v2, %v20731_v40 }
0x24b4   :  { %v20902_v55 = vpop.f32.mrf.mxu1 }
0x24b5   :  { %v37039_v46 = vand.u32 4294901760, %v20909_v41  ;;  %v20903_v18 = vadd.f32 %v20902_v55, %v20813_v60 }
0x24b6   :  { %v33412_v58 = vpop.f32.mrf.mxu1 }
0x24b7   :  { %v37042_v51 = vand.u32 4294901760, %v20903_v18  ;;  %v20921_v44 = vadd.f32 %v33412_v58, %v20831_v45  ;;  %v21046_v23 = vsub.f32 %v20909_v41, %v37039_v46 }
0x24b8   :  { %v20914_v61 = vpop.f32.mrf.mxu1 }
0x24b9   :  { %v37045_v62 = vand.u32 4294901760, %v20921_v44  ;;  %v20915_v0 = vadd.f32 %v20914_v61, %v20825_v50  ;;  %v21053_v27 = vsub.f32 %v20903_v18, %v37042_v51  ;;  %v21047_v29 = vand.u32 4294901760, %v21046_v23 }
0x24bb   :  { %v21032_v1 = vsub.f32 %v20921_v44, %v37045_v62  ;;  %v37052_v7 = vand.u32 4294901760, %v20915_v0  ;;  %33414 = vmatpush3.msra.mxu0 %v37045_v62  ;;  %v21054_v33 = vand.u32 4294901760, %v21053_v27  ;;  %v21048_v39 = vsub.f32 %v21046_v23, %v21047_v29 }
0x24bc   :  { %33415 = vmatprep.subr.mxu0 %v34480_v3 }
0x24bd   :  { %v21033_v30 = vand.u32 4294901760, %v21032_v1  ;;  %v21039_v8 = vsub.f32 %v20915_v0, %v37052_v7  ;;  %33416 = vmatpush3.msra.mxu0 %v37052_v7  ;;  %v21055_v42 = vsub.f32 %v21053_v27, %v21054_v33  ;;  %v21049_v43 = vand.u32 4294901760, %v21048_v39 }
0x24be   :  { %33417 = vmatprep.subr.mxu0 %v34480_v3 }
0x24bf   :  { %v21034_v20 = vsub.f32 %v21032_v1, %v21033_v30  ;;  %v21040_v38 = vand.u32 4294901760, %v21039_v8  ;;  %33418 = vmatpush3.msra.mxu0 %v37039_v46  ;;  %v21056_v47 = vand.u32 4294901760, %v21055_v42 }
0x24c0   :  { %33419 = vmatprep.subr.mxu0 %v34480_v3 }
0x24c1   :  { %33420 = vmatpush3.msra.mxu0 %v37042_v51  ;;  %v21035_v24 = vand.u32 4294901760, %v21034_v20  ;;  %v21041_v36 = vsub.f32 %v21039_v8, %v21040_v38 }
0x24c2   :  { %33435 = vmatprep.subr.mxu0 %v34480_v3  ;;  %33422 = vmatmul.mubr.f32.vlgmr.msra.gmra.mxu0 %v21000_v32 }
0x24c3   :  { %33425 = vmatpush3.msra.mxu1 %v21035_v24  ;;  %33436 = vmatpush3.msra.mxu0 %v21032_v1  ;;  %v21042_v37 = vand.u32 4294901760, %v21041_v36 }
0x24c4   :  { %33426 = vmatprep.subr.mxu1 %v34480_v3  ;;  %33437 = vmatprep.subr.mxu0 %v34480_v3 }
0x24c5   :  { %33427 = vmatpush3.msra.mxu1 %v21042_v37  ;;  %33438 = vmatpush3.msra.mxu0 %v21039_v8  ;;  %v29272_v37 = vld [vmem:[%s38038_s0 + $0x88] sm:$0xff] }
0x24c6   :  { %33428 = vmatprep.subr.mxu1 %v34480_v3  ;;  %33439 = vmatprep.subr.mxu0 %v34480_v3 }
0x24c7   :  { %33429 = vmatpush3.msra.mxu1 %v21049_v43  ;;  %33440 = vmatpush3.msra.mxu0 %v21046_v23 }
0x24c8   :  { %33430 = vmatprep.subr.mxu1 %v34480_v3  ;;  %33441 = vmatprep.subr.mxu0 %v34480_v3 }
0x24c9   :  { %33431 = vmatpush3.msra.mxu1 %v21056_v47  ;;  %33442 = vmatpush3.msra.mxu0 %v21053_v27  ;;  %v37190_v27 = vld [vmem:[%s38043_s5] ss:$0 sm:$0xff] }
0x24ca   :  { %33433 = vmatmul.mubr.f32.vlgmr.msra.gmra.mxu1 %v37034_v53  ;;  %33443 = vmatprep.mubr.msk.f32.mxu0 %vm34481_vm1, %v34480_v3 }
0x24cb   :  { %33446 = vmatprep.subr.mxu1 %v34480_v3  ;;  %33457 = vmatprep.subr.mxu0 %v34480_v3 }
0x24cc   :  { %33444 = vmatmul.mubr.f32.vlgmr.msra.gmra.mxu0 %v37037_v59  ;;  %33447 = vmatpush3.msra.mxu1 %v37045_v62 }
0x24cd   :  { %33458 = vmatpush3.msra.mxu0 %v21033_v30  ;;  %33448 = vmatprep.subr.mxu1 %v34480_v3 }
0x24ce   :  { %33459 = vmatprep.subr.mxu0 %v34480_v3  ;;  %33449 = vmatpush3.msra.mxu1 %v37052_v7 }
0x24cf   :  { %33460 = vmatpush3.msra.mxu0 %v21040_v38  ;;  %33450 = vmatprep.subr.mxu1 %v34480_v3 }
0x24d0   :  { %33461 = vmatprep.subr.mxu0 %v34480_v3  ;;  %33451 = vmatpush3.msra.mxu1 %v37039_v46 }
0x24d1   :  { %33462 = vmatpush3.msra.mxu0 %v21047_v29  ;;  %33452 = vmatprep.subr.mxu1 %v34480_v3 }
0x24d2   :  { %33463 = vmatprep.subr.mxu0 %v34480_v3  ;;  %33453 = vmatpush3.msra.mxu1 %v37042_v51 }
0x24d3   :  { %33454 = vmatprep.mubr.msk.f32.mxu1 %vm34481_vm1, %v34480_v3  ;;  %33464 = vmatpush3.msra.mxu0 %v21054_v33 }
0x24d4   :  { %33455 = vmatmul.mubr.f32.vlgmr.msra.gmra.mxu1 %v20998_v19  ;;  %33468 = vmatprep.subr.mxu1 %v34480_v3 }
0x24d5   :  { %33465 = vmatprep.mubr.msk.f32.mxu0 %vm34481_vm1, %v34480_v3  ;;  %33469 = vmatpush3.msra.mxu1 %v37045_v62 }
0x24d6   :  { %33466 = vmatmul.mubr.f32.vlgmr.msra.gmra.mxu0 %v37034_v53  ;;  %33470 = vmatprep.subr.mxu1 %v34480_v3 }
0x24d7   :  { %33471 = vmatpush3.msra.mxu1 %v37052_v7  ;;  %33476 = vmatprep.mubr.msk.f32.mxu1 %vm34481_vm1, %v34480_v3 }
0x24d8   :  { %33472 = vmatprep.subr.mxu1 %v34480_v3  ;;  %33479 = vmatprep.subr.mxu0 %v34480_v3 }
0x24d9   :  { %33473 = vmatpush3.msra.mxu1 %v37039_v46  ;;  %33480 = vmatpush3.msra.mxu0 %v34531_v4 }
0x24da   :  { %33474 = vmatprep.subr.mxu1 %v34480_v3  ;;  %33481 = vmatprep.subr.mxu0 %v34480_v3 }
0x24db   :  { %33475 = vmatpush3.msra.mxu1 %v37042_v51  ;;  %33482 = vmatpush3.msra.mxu0 %v34533_v5 }
0x24dc   :  { %33477 = vmatmul.mubr.f32.vlgmr.msra.gmra.mxu1 %v37034_v53  ;;  %33490 = vmatprep.subr.mxu1 %v34480_v3 }
0x24dd   :  { %33491 = vmatpush3.msra.mxu1 %v34586_v21  ;;  %33498 = vmatprep.mubr.msk.f32.mxu1 %vm34481_vm1, %v34480_v3 }
0x24de   :  { %33492 = vmatprep.subr.mxu1 %v34480_v3  ;;  %33483 = vmatprep.subr.mxu0 %v34480_v3 }
0x24df   :  { %33493 = vmatpush3.msra.mxu1 %v34588_v22  ;;  %33484 = vmatpush3.msra.mxu0 %v34535_v6 }
0x24e0   :  { %33494 = vmatprep.subr.mxu1 %v34480_v3  ;;  %33485 = vmatprep.subr.mxu0 %v34480_v3 }
0x24e1   :  { %33495 = vmatpush3.msra.mxu1 %v34596_v26  ;;  %33486 = vmatpush3.msra.mxu0 %v34543_v9 }
0x24e2   :  { %33496 = vmatprep.subr.mxu1 %v34480_v3  ;;  %33487 = vmatprep.mubr.msk.f32.mxu0 %vm34481_vm1, %v34480_v3 }
0x24e3   :  { %33497 = vmatpush3.msra.mxu1 %v34600_v28  ;;  %33501 = vmatprep.subr.mxu0 %v34480_v3 }
0x24e4   :  { %33512 = vmatprep.subr.mxu1 %v34480_v3 }
0x2582   :  { %v21002_v48 = vpop.f32.mrf.mxu0 }
0x2584   :  { %v33423_v53 = vpop.f32.mrf.mxu0 }
0x258a   :  { %v21093_v54 = vpop.f32.mrf.mxu1 }
0x258b   :  { %v21094_v34 = vadd.f32 %v21093_v54, %v21002_v48 }
0x258c   :  { %v33434_v31 = vpop.f32.mrf.mxu1  ;;  %v21173_v56 = vpop.f32.mrf.mxu0 }
0x258d   :  { %v21174_v63 = vadd.f32 %v21173_v56, %v21094_v34 }
0x258e   :  { %v33445_v57 = vpop.f32.mrf.mxu0 }
0x258f   :  { %v29288_v57 = vld [vmem:[%s38040_s2 + $0x180] sm:$0xff] }
0x2590   :  { %v22416_v34 = vsel %vm551_vm2, %v29288_v57, 0 }
0x2594   :  { %v21250_v35 = vpop.f32.mrf.mxu1 }
0x2595   :  { %v21251_v60 = vadd.f32 %v21250_v35, %v21174_v63  ;;  %v37240_v35 = vand.u32 4294901760, %v22416_v34 }
0x2596   :  { %v33456_v49 = vpop.f32.mrf.mxu1  ;;  %v21333_v59 = vpop.f32.mrf.mxu0 }
0x2597   :  { %v21334_v41 = vadd.f32 %v21333_v59, %v21251_v60  ;;  %v37243_v63 = vsub.f32 %v22416_v34, %v37240_v35 }
0x2598   :  { %v33467_v40 = vpop.f32.mrf.mxu0 }
0x2599   :  { %v22495_v49 = vand.u32 4294901760, %v37243_v63 }
0x259b   :  { %v22496_v59 = vsub.f32 %v37243_v63, %v22495_v49 }
0x259c   :  { %v21408_v2 = vpop.f32.mrf.mxu1 }
0x259d   :  { %v21409_v55 = vadd.f32 %v21408_v2, %v21334_v41  ;;  %v22497_v60 = vand.u32 4294901760, %v22496_v59 }
0x259e   :  { %v33478_v45 = vpop.f32.mrf.mxu1 }
0x259f   :  { %v21412_v46 = vsub.f32 %v37015_v52, %v21409_v55 }
0x25a1   :  { %v21414_v18 = vsel %vm29_vm0, %v21412_v46, 0 }
0x25a2   :  { %v21485_v58 = vand.u32 4294901760, %v21414_v18 }
0x25a4   :  { %v21486_v19 = vsub.f32 %v21414_v18, %v21485_v58  ;;  %33499 = vmatmul.mubr.f32.vlgmr.msra.gmra.mxu1 %v21485_v58 }
0x25a5   :  { %33513 = vmatpush3.msra.mxu1 %v34531_v4  ;;  %33520 = vmatprep.mubr.msk.f32.mxu1 %vm34481_vm1, %v34480_v3 }
0x25a6   :  { %v21487_v50 = vand.u32 4294901760, %v21486_v19  ;;  %33514 = vmatprep.subr.mxu1 %v34480_v3 }
0x25a7   :  { %33515 = vmatpush3.msra.mxu1 %v34533_v5 }
0x25a8   :  { %v21488_v51 = vsub.f32 %v21486_v19, %v21487_v50  ;;  %33516 = vmatprep.subr.mxu1 %v34480_v3 }
0x25a9   :  { %33517 = vmatpush3.msra.mxu1 %v34535_v6 }
0x25aa   :  { %v21489_v52 = vand.u32 4294901760, %v21488_v51  ;;  %33518 = vmatprep.subr.mxu1 %v34480_v3 }
0x25ab   :  { %33519 = vmatpush3.msra.mxu1 %v34543_v9 }
0x25ac   :  { %33521 = vmatmul.mubr.f32.vlgmr.msra.gmra.mxu1 %v21487_v50  ;;  %33534 = vmatprep.subr.mxu1 %v34480_v3 }
0x25ad   :  { %33488 = vmatmul.mubr.f32.vlgmr.msra.gmra.mxu0 %v21489_v52  ;;  %33535 = vmatpush3.msra.mxu1 %v34531_v4 }
0x25ae   :  { %33502 = vmatpush3.msra.mxu0 %v34552_v10  ;;  %33536 = vmatprep.subr.mxu1 %v34480_v3 }
0x25af   :  { %33503 = vmatprep.subr.mxu0 %v34480_v3  ;;  %33537 = vmatpush3.msra.mxu1 %v34533_v5 }
0x25b0   :  { %33504 = vmatpush3.msra.mxu0 %v34555_v11  ;;  %33538 = vmatprep.subr.mxu1 %v34480_v3 }
0x25b1   :  { %33505 = vmatprep.subr.mxu0 %v34480_v3  ;;  %33539 = vmatpush3.msra.mxu1 %v34535_v6 }
0x25b2   :  { %33506 = vmatpush3.msra.mxu0 %v34558_v12  ;;  %33540 = vmatprep.subr.mxu1 %v34480_v3 }
0x25b3   :  { %33507 = vmatprep.subr.mxu0 %v34480_v3  ;;  %33509 = vmatprep.mubr.msk.f32.mxu0 %vm34481_vm1, %v34480_v3 }
0x25b4   :  { %33508 = vmatpush3.msra.mxu0 %v34562_v13  ;;  %33541 = vmatpush3.msra.mxu1 %v34543_v9 }
0x25b5   :  { %33542 = vmatprep.mubr.msk.f32.mxu1 %vm34481_vm1, %v34480_v3  ;;  %33510 = vmatmul.mubr.f32.vlgmr.msra.gmra.mxu0 %v21486_v19 }
0x25b6   :  { %33523 = vmatprep.subr.mxu0 %v34480_v3  ;;  %33543 = vmatmul.mubr.f32.vlgmr.msra.gmra.mxu1 %v21485_v58 }
0x25b7   :  { %33524 = vmatpush3.msra.mxu0 %v34565_v14  ;;  %33531 = vmatprep.mubr.msk.f32.mxu0 %vm34481_vm1, %v34480_v3 }
0x25b8   :  { %33525 = vmatprep.subr.mxu0 %v34480_v3  ;;  %33556 = vmatprep.subr.mxu1 %v34480_v3 }
0x25b9   :  { %33526 = vmatpush3.msra.mxu0 %v34569_v15  ;;  %33557 = vmatpush3.msra.mxu1 %v34586_v21 }
0x25ba   :  { %33527 = vmatprep.subr.mxu0 %v34480_v3  ;;  %33558 = vmatprep.subr.mxu1 %v34480_v3 }
0x25bb   :  { %33528 = vmatpush3.msra.mxu0 %v34572_v16  ;;  %33559 = vmatpush3.msra.mxu1 %v34588_v22 }
0x25bc   :  { %33529 = vmatprep.subr.mxu0 %v34480_v3  ;;  %33560 = vmatprep.subr.mxu1 %v34480_v3 }
0x25bd   :  { %33530 = vmatpush3.msra.mxu0 %v34576_v17  ;;  %33561 = vmatpush3.msra.mxu1 %v34596_v26 }
0x25be   :  { %33532 = vmatmul.mubr.f32.vlgmr.msra.gmra.mxu0 %v21485_v58  ;;  %33562 = vmatprep.subr.mxu1 %v34480_v3 }
0x25bf   :  { %33563 = vmatpush3.msra.mxu1 %v34600_v28  ;;  %33545 = vmatprep.subr.mxu0 %v34480_v3 }
0x25c0   :  { %33564 = vmatprep.mubr.msk.f32.mxu1 %vm34481_vm1, %v34480_v3  ;;  %33578 = vmatprep.subr.mxu1 %v34480_v3 }
0x25c1   :  { %33546 = vmatpush3.msra.mxu0 %v34531_v4  ;;  %33553 = vmatprep.mubr.msk.f32.mxu0 %vm34481_vm1, %v34480_v3 }
0x25c2   :  { %33547 = vmatprep.subr.mxu0 %v34480_v3 }
0x25c3   :  { %33548 = vmatpush3.msra.mxu0 %v34533_v5 }
0x25c4   :  { %33549 = vmatprep.subr.mxu0 %v34480_v3 }
0x25c5   :  { %33550 = vmatpush3.msra.mxu0 %v34535_v6 }
0x25c6   :  { %33551 = vmatprep.subr.mxu0 %v34480_v3 }
0x25c7   :  { %33552 = vmatpush3.msra.mxu0 %v34543_v9 }
0x25c8   :  { %33567 = vmatprep.subr.mxu0 %v34480_v3 }
0x2664   :  { %v21582_v44 = vpop.f32.mrf.mxu1 }
0x2666   :  { %v33500_v61 = vpop.f32.mrf.mxu1 }
0x266c   :  { %v21739_v23 = vpop.f32.mrf.mxu1 }
0x266d   :  { %v21491_v62 = vpop.f32.mrf.mxu0 }
0x266e   :  { %v33522_v0 = vpop.f32.mrf.mxu1  ;;  %v21492_v1 = vadd.f32 %v37190_v27, %v21491_v62 }
0x266f   :  { %v33489_v25 = vpop.f32.mrf.mxu0  ;;  %v29290_v0 = vld [vmem:[%s38040_s2 + $0x190] sm:$0xff] }
0x2670   :  { %v21583_v30 = vadd.f32 %v21582_v44, %v21492_v1 }
0x2675   :  { %v21662_v7 = vpop.f32.mrf.mxu0 }
0x2676   :  { %v21897_v29 = vpop.f32.mrf.mxu1  ;;  %v21663_v33 = vadd.f32 %v21662_v7, %v21583_v30  ;;  %v22422_v30 = vsel %vm551_vm2, %v29290_v0, 0 }
0x2677   :  { %v33511_v8 = vpop.f32.mrf.mxu0 }
0x2678   :  { %v33544_v32 = vpop.f32.mrf.mxu1  ;;  %v21740_v20 = vadd.f32 %v21739_v23, %v21663_v33  ;;  %v29289_v23 = vld [vmem:[%s38040_s2 + $0x188] sm:$0xff]  ;;  %v29291_v8 = vld [vmem:[%s38040_s2 + $0x198] sm:$0xff]  ;;  %v22513_v33 = vand.u32 4294901760, %v22422_v30 }
0x2679   :  { %v22419_v7 = vsel %vm551_vm2, %v29289_v23, 0  ;;  %v29286_v23 = vld [vmem:[%s38039_s1 + $0x60] sm:$0xff] }
0x267a   :  { %v22503_v32 = vand.u32 4294901760, %v22419_v7 }
0x267e   :  { %v21822_v38 = vpop.f32.mrf.mxu0 }
0x267f   :  { %v21823_v39 = vadd.f32 %v21822_v38, %v21740_v20  ;;  %v22425_v20 = vsel %vm551_vm2, %v29291_v8, 0  ;;  %v22504_v38 = vsub.f32 %v22419_v7, %v22503_v32 }
0x2680   :  { %v33533_v24 = vpop.f32.mrf.mxu0 }
0x2681   :  { %v21898_v36 = vadd.f32 %v21897_v29, %v21823_v39  ;;  %v22523_v39 = vand.u32 4294901760, %v22425_v20  ;;  %v22514_v24 = vsub.f32 %v22422_v30, %v22513_v33 }
0x2683   :  { %34436 = vtanh.f32 %v21898_v36  ;;  %v22505_v36 = vand.u32 4294901760, %v22504_v38 }
0x2690   :  { %v34437_v42 = vpop.eup %34436 }
0x2691   :  { %v21902_v43 = vadd.f32 %v34437_v42, %v29272_v37  ;;  %v22524_v37 = vsub.f32 %v22425_v20, %v22523_v39  ;;  %v22515_v42 = vand.u32 4294901760, %v22514_v24 }
0x2693   :  { %21904 = vst.msk [vmem:[#allocation3 + $0x28] sm:$0xff] %vm29_vm0, %v21902_v43  ;;  %v21926_v47 = vsel %vm29_vm0, %v21902_v43, 0  ;;  %v29283_v43 = vld [vmem:[%s38038_s0 + $0x90] sm:$0xff] }
0x2694   :  { %v21997_v48 = vand.u32 4294901760, %v21926_v47 }
0x2696   :  { %v21998_v53 = vsub.f32 %v21926_v47, %v21997_v48  ;;  %33565 = vmatmul.mubr.f32.vlgmr.msra.gmra.mxu1 %v21997_v48  ;;  %v22506_v47 = vsub.f32 %v22504_v38, %v22505_v36 }
0x2697   :  { %33579 = vmatpush3.msra.mxu1 %v34531_v4  ;;  %33586 = vmatprep.mubr.msk.f32.mxu1 %vm34481_vm1, %v34480_v3 }
0x2698   :  { %33580 = vmatprep.subr.mxu1 %v34480_v3  ;;  %v21999_v54 = vand.u32 4294901760, %v21998_v53  ;;  %v22507_v57 = vand.u32 4294901760, %v22506_v47 }
0x2699   :  { %33581 = vmatpush3.msra.mxu1 %v34533_v5 }
0x269a   :  { %33582 = vmatprep.subr.mxu1 %v34480_v3  ;;  %v22000_v31 = vsub.f32 %v21998_v53, %v21999_v54 }
0x269b   :  { %33583 = vmatpush3.msra.mxu1 %v34535_v6 }
0x269c   :  { %33584 = vmatprep.subr.mxu1 %v34480_v3  ;;  %v22001_v56 = vand.u32 4294901760, %v22000_v31 }
0x269d   :  { %33585 = vmatpush3.msra.mxu1 %v34543_v9 }
0x269e   :  { %33587 = vmatmul.mubr.f32.vlgmr.msra.gmra.mxu1 %v21999_v54  ;;  %33600 = vmatprep.subr.mxu1 %v34480_v3  ;;  %v22516_v54 = vsub.f32 %v22514_v24, %v22515_v42 }
0x269f   :  { %33554 = vmatmul.mubr.f32.vlgmr.msra.gmra.mxu0 %v22001_v56  ;;  %33601 = vmatpush3.msra.mxu1 %v34531_v4 }
0x26a0   :  { %33568 = vmatpush3.msra.mxu0 %v34552_v10  ;;  %33602 = vmatprep.subr.mxu1 %v34480_v3  ;;  %v22517_v59 = vand.u32 4294901760, %v22516_v54 }
0x26a1   :  { %33569 = vmatprep.subr.mxu0 %v34480_v3  ;;  %33603 = vmatpush3.msra.mxu1 %v34533_v5 }
0x26a2   :  { %33570 = vmatpush3.msra.mxu0 %v34555_v11  ;;  %33604 = vmatprep.subr.mxu1 %v34480_v3 }
0x26a3   :  { %33571 = vmatprep.subr.mxu0 %v34480_v3  ;;  %33605 = vmatpush3.msra.mxu1 %v34535_v6 }
0x26a4   :  { %33572 = vmatpush3.msra.mxu0 %v34558_v12  ;;  %33606 = vmatprep.subr.mxu1 %v34480_v3 }
0x26a5   :  { %33573 = vmatprep.subr.mxu0 %v34480_v3  ;;  %33575 = vmatprep.mubr.msk.f32.mxu0 %vm34481_vm1, %v34480_v3 }
0x26a6   :  { %33574 = vmatpush3.msra.mxu0 %v34562_v13  ;;  %33607 = vmatpush3.msra.mxu1 %v34543_v9 }
0x26a7   :  { %33608 = vmatprep.mubr.msk.f32.mxu1 %vm34481_vm1, %v34480_v3  ;;  %33576 = vmatmul.mubr.f32.vlgmr.msra.gmra.mxu0 %v21998_v53 }
0x26a8   :  { %33589 = vmatprep.subr.mxu0 %v34480_v3  ;;  %33609 = vmatmul.mubr.f32.vlgmr.msra.gmra.mxu1 %v21997_v48 }
0x26a9   :  { %33590 = vmatpush3.msra.mxu0 %v34565_v14  ;;  %33597 = vmatprep.mubr.msk.f32.mxu0 %vm34481_vm1, %v34480_v3 }
0x26aa   :  { %33591 = vmatprep.subr.mxu0 %v34480_v3  ;;  %33621 = vmatprep.mubr.f32.mxu1 %v37240_v35 }
0x26ab   :  { %33592 = vmatpush3.msra.mxu0 %v34569_v15 }
0x26ac   :  { %33593 = vmatprep.subr.mxu0 %v34480_v3 }
0x26ad   :  { %33594 = vmatpush3.msra.mxu0 %v34572_v16 }
0x26ae   :  { %33595 = vmatprep.subr.mxu0 %v34480_v3 }
0x26af   :  { %33596 = vmatpush3.msra.mxu0 %v34576_v17 }
0x26b0   :  { %33598 = vmatmul.mubr.f32.vlgmr.msra.gmra.mxu0 %v21997_v48  ;;  %v22525_v48 = vand.u32 4294901760, %v22524_v37 }
0x26b1   :  { %33613 = vmatprep.mubr.f32.mxu0 %v22497_v60 }
0x26b2   :  { %v22526_v34 = vsub.f32 %v22524_v37, %v22525_v48 }
0x2756   :  { %v22094_v40 = vpop.f32.mrf.mxu1 }
0x2758   :  { %v33566_v41 = vpop.f32.mrf.mxu1 }
0x2759   :  { %v22527_v41 = vand.u32 4294901760, %v22526_v34 }
0x275e   :  { %v22251_v2 = vpop.f32.mrf.mxu1 }
0x275f   :  { %v22003_v55 = vpop.f32.mrf.mxu0 }
0x2760   :  { %v33588_v45 = vpop.f32.mrf.mxu1  ;;  %v22004_v18 = vadd.f32 %v37190_v27, %v22003_v55 }
0x2761   :  { %v33555_v46 = vpop.f32.mrf.mxu0 }
0x2762   :  { %v22095_v50 = vadd.f32 %v22094_v40, %v22004_v18 }
0x2767   :  { %v22174_v58 = vpop.f32.mrf.mxu0 }
0x2768   :  { %v22409_v19 = vpop.f32.mrf.mxu1  ;;  %v22175_v44 = vadd.f32 %v22174_v58, %v22095_v50 }
0x2769   :  { %v33577_v51 = vpop.f32.mrf.mxu0 }
0x276a   :  { %v33610_v52 = vpop.f32.mrf.mxu1  ;;  %v22252_v61 = vadd.f32 %v22251_v2, %v22175_v44 }
0x2770   :  { %v22334_v62 = vpop.f32.mrf.mxu0 }
0x2771   :  { %v22335_v25 = vadd.f32 %v22334_v62, %v22252_v61 }
0x2772   :  { %v33599_v1 = vpop.f32.mrf.mxu0 }
0x2773   :  { %v22410_v29 = vadd.f32 %v22409_v19, %v22335_v25 }
0x2775   :  { %34438 = vtanh.f32 %v22410_v29  ;;  %v23003_v29 = vsel %vm29_vm0, %v29286_v23, 0 }
0x2782   :  { %v34439_v53 = vpop.eup %34438 }
0x2783   :  { %v37266_v31 = vadd.f32 %v34439_v53, %v29283_v43 }
0x2785   :  { %v22458_v56 = vand.u32 4294901760, %v37266_v31 }
0x2787   :  { %33611 = vmatprep.subr.mxu0 %v22458_v56  ;;  %v22565_v60 = vsub.f32 %v37266_v31, %v22458_v56 }
0x2788   :  { %33612 = vmatpush3.msra.mxu0 %v22458_v56 }
0x2789   :  { %33614 = vmatmul.mubr.f32.vlgmr.msra.gmra.mxu0 %v22507_v57  ;;  %33627 = vmatprep.subr.mxu0 %v22565_v60  ;;  %v22566_v40 = vand.u32 4294901760, %v22565_v60 }
0x278a   :  { %33628 = vmatpush3.msra.mxu0 %v22565_v60  ;;  %33616 = vmatprep.mubr.f32.mxu0 %v22517_v59 }
0x278b   :  { %33643 = vmatprep.subr.mxu0 %v22566_v40  ;;  %v22567_v2 = vsub.f32 %v22565_v60, %v22566_v40 }
0x278d   :  { %33617 = vmatmul.mubr.f32.gmra.mxu0 %v22527_v41  ;;  %v22568_v55 = vand.u32 4294901760, %v22567_v2 }
0x278e   :  { %33629 = vmatprep.mubr.f32.mxu0 %v37243_v63 }
0x278f   :  { %33619 = vmatprep.subr.mxu1 %v22568_v55 }
0x2790   :  { %33620 = vmatpush3.msra.mxu1 %v22568_v55 }
0x2791   :  { %33622 = vmatmul.mubr.f32.vlgmr.msra.gmra.mxu1 %v22503_v32  ;;  %33630 = vmatmul.mubr.f32.vlgmr.msra.gmra.mxu0 %v22504_v38 }
0x2792   :  { %33635 = vmatprep.subr.mxu1 %v22458_v56  ;;  %33644 = vmatpush3.msra.mxu0 %v22566_v40 }
0x2793   :  { %33636 = vmatpush3.msra.mxu1 %v22458_v56  ;;  %33624 = vmatprep.mubr.f32.mxu1 %v22513_v33 }
0x2794   :  { %33651 = vmatprep.subr.mxu1 %v22458_v56  ;;  %33632 = vmatprep.mubr.f32.mxu0 %v22514_v24 }
0x2795   :  { %33625 = vmatmul.mubr.f32.gmra.mxu1 %v22523_v39  ;;  %33633 = vmatmul.mubr.f32.gmra.mxu0 %v22524_v37 }
0x2796   :  { %33637 = vmatprep.mubr.f32.mxu1 %v22495_v49  ;;  %33645 = vmatprep.mubr.f32.mxu0 %v37240_v35 }
0x2797   :  { %33659 = vmatprep.subr.mxu0 %v34480_v3 }
0x2799   :  { %33638 = vmatmul.mubr.f32.vlgmr.msra.gmra.mxu1 %v22505_v36  ;;  %33646 = vmatmul.mubr.f32.vlgmr.msra.gmra.mxu0 %v22503_v32 }
0x279a   :  { %33652 = vmatpush3.msra.mxu1 %v22458_v56  ;;  %33640 = vmatprep.mubr.f32.mxu1 %v22515_v42 }
0x279b   :  { %33648 = vmatprep.mubr.f32.mxu0 %v22513_v33  ;;  %33670 = vmatprep.subr.mxu1 %v34480_v3 }
0x279d   :  { %33641 = vmatmul.mubr.f32.gmra.mxu1 %v22525_v48  ;;  %33649 = vmatmul.mubr.f32.gmra.mxu0 %v22523_v39 }
0x279e   :  { %33653 = vmatprep.mubr.f32.mxu1 %v37240_v35  ;;  %33667 = vmatprep.mubr.msk.f32.mxu0 %vm34481_vm1, %v34480_v3 }
0x27a1   :  { %33654 = vmatmul.mubr.f32.vlgmr.msra.gmra.mxu1 %v22503_v32 }
0x27a2   :  { %33656 = vmatprep.mubr.f32.mxu1 %v22513_v33 }
0x27a5   :  { %33657 = vmatmul.mubr.f32.gmra.mxu1 %v22523_v39  ;;  %v37285_v39 = vand.u32 4294901760, %v23003_v29 }
0x27a6   :  { %33678 = vmatprep.mubr.msk.f32.mxu1 %vm34481_vm1, %v34480_v3 }
0x27a7   :  { %v37288_v54 = vsub.f32 %v23003_v29, %v37285_v39 }
0x2849   :  { %v33615_v63 = vpop.f32.mrf.mxu0 }
0x284b   :  { %v22499_v49 = vpop.f32.mrf.mxu0 }
0x284d   :  { %v33618_v45 = vpop.f32.mrf.mxu0 }
0x284f   :  { %v22519_v46 = vpop.f32.mrf.mxu0 }
0x2851   :  { %v33623_v18 = vpop.f32.mrf.mxu1  ;;  %v33631_v58 = vpop.f32.mrf.mxu0 }
0x2852   :  { %v22612_v35 = vadd.f32 %v33623_v18, %v33615_v63  ;;  %v23076_v63 = vand.u32 4294901760, %v37288_v54 }
0x2853   :  { %v22605_v19 = vpop.f32.mrf.mxu1  ;;  %v22697_v50 = vpop.f32.mrf.mxu0 }
0x2854   :  { %v22606_v62 = vadd.f32 %v22605_v19, %v22499_v49  ;;  %v22705_v1 = vadd.f32 %v33631_v58, %v22612_v35 }
0x2855   :  { %v33626_v51 = vpop.f32.mrf.mxu1  ;;  %v33634_v52 = vpop.f32.mrf.mxu0 }
0x2856   :  { %v22624_v7 = vadd.f32 %v33626_v51, %v33618_v45  ;;  %v22698_v32 = vadd.f32 %v22697_v50, %v22606_v62  ;;  %v23077_v51 = vsub.f32 %v37288_v54, %v23076_v63 }
0x2857   :  { %v22617_v44 = vpop.f32.mrf.mxu1  ;;  %v22711_v61 = vpop.f32.mrf.mxu0 }
0x2858   :  { %v22618_v33 = vadd.f32 %v22617_v44, %v22519_v46  ;;  %v22719_v24 = vadd.f32 %v33634_v52, %v22624_v7 }
0x2859   :  { %v33639_v0 = vpop.f32.mrf.mxu1  ;;  %v33647_v25 = vpop.f32.mrf.mxu0 }
0x285a   :  { %v22801_v20 = vadd.f32 %v33639_v0, %v22705_v1  ;;  %v22712_v43 = vadd.f32 %v22711_v61, %v22618_v33  ;;  %v23078_v0 = vand.u32 4294901760, %v23077_v51 }
0x285b   :  { %v22792_v30 = vpop.f32.mrf.mxu1  ;;  %v22890_v8 = vpop.f32.mrf.mxu0 }
0x285c   :  { %v22793_v36 = vadd.f32 %v22792_v30, %v22698_v32  ;;  %v22897_v47 = vadd.f32 %v33647_v25, %v22801_v20 }
0x285d   :  { %v33642_v38 = vpop.f32.mrf.mxu1  ;;  %v33650_v42 = vpop.f32.mrf.mxu0 }
0x285e   :  { %v22817_v48 = vadd.f32 %v33642_v38, %v22719_v24  ;;  %v22891_v56 = vadd.f32 %v22890_v8, %v22793_v36 }
0x285f   :  { %v22808_v37 = vpop.f32.mrf.mxu1  ;;  %v22902_v59 = vpop.f32.mrf.mxu0 }
0x2860   :  { %v22809_v57 = vadd.f32 %v22808_v37, %v22712_v43  ;;  %v22909_v40 = vadd.f32 %v33650_v42, %v22817_v48 }
0x2861   :  { %v33655_v53 = vpop.f32.mrf.mxu1 }
0x2862   :  { %v22987_v34 = vadd.f32 %v33655_v53, %v22897_v47  ;;  %v22903_v49 = vadd.f32 %v22902_v59, %v22809_v57 }
0x2863   :  { %v22980_v60 = vpop.f32.mrf.mxu1 }
0x2864   :  { %v37290_v41 = vand.u32 4294901760, %v22987_v34  ;;  %v22981_v2 = vadd.f32 %v22980_v60, %v22891_v56 }
0x2865   :  { %v33658_v55 = vpop.f32.mrf.mxu1 }
0x2866   :  { %v37293_v45 = vand.u32 4294901760, %v22981_v2  ;;  %v22999_v46 = vadd.f32 %v33658_v55, %v22909_v40  ;;  %v23124_v58 = vsub.f32 %v22987_v34, %v37290_v41 }
0x2867   :  { %v22992_v18 = vpop.f32.mrf.mxu1 }
0x2868   :  { %v37296_v19 = vand.u32 4294901760, %v22999_v46  ;;  %v22993_v50 = vadd.f32 %v22992_v18, %v22903_v49  ;;  %v23131_v52 = vsub.f32 %v22981_v2, %v37293_v45  ;;  %v23125_v61 = vand.u32 4294901760, %v23124_v58  ;;  %v29292_v18 = vld [vmem:[%s38040_s2 + $0x1a0] sm:$0xff] }
0x286a   :  { %v23110_v35 = vsub.f32 %v22999_v46, %v37296_v19  ;;  %v37303_v44 = vand.u32 4294901760, %v22993_v50  ;;  %33660 = vmatpush3.msra.mxu0 %v37296_v19  ;;  %v23132_v25 = vand.u32 4294901760, %v23131_v52  ;;  %v23126_v29 = vsub.f32 %v23124_v58, %v23125_v61 }
0x286b   :  { %33661 = vmatprep.subr.mxu0 %v34480_v3 }
0x286c   :  { %v23111_v23 = vand.u32 4294901760, %v23110_v35  ;;  %v23117_v62 = vsub.f32 %v22993_v50, %v37303_v44  ;;  %33662 = vmatpush3.msra.mxu0 %v37303_v44  ;;  %v23133_v32 = vsub.f32 %v23131_v52, %v23132_v25  ;;  %v23127_v20 = vand.u32 4294901760, %v23126_v29 }
0x286d   :  { %33663 = vmatprep.subr.mxu0 %v34480_v3 }
0x286e   :  { %v23112_v1 = vsub.f32 %v23110_v35, %v23111_v23  ;;  %v23118_v7 = vand.u32 4294901760, %v23117_v62  ;;  %33664 = vmatpush3.msra.mxu0 %v37290_v41  ;;  %v23134_v38 = vand.u32 4294901760, %v23133_v32 }
0x286f   :  { %33665 = vmatprep.subr.mxu0 %v34480_v3 }
0x2870   :  { %v23119_v30 = vsub.f32 %v23117_v62, %v23118_v7  ;;  %33666 = vmatpush3.msra.mxu0 %v37293_v45  ;;  %v23113_v8 = vand.u32 4294901760, %v23112_v1 }
0x2871   :  { %33681 = vmatprep.subr.mxu0 %v34480_v3  ;;  %33668 = vmatmul.mubr.f32.vlgmr.msra.gmra.mxu0 %v23078_v0 }
0x2872   :  { %33671 = vmatpush3.msra.mxu1 %v23113_v8  ;;  %33682 = vmatpush3.msra.mxu0 %v23110_v35  ;;  %v23120_v33 = vand.u32 4294901760, %v23119_v30 }
0x2873   :  { %33672 = vmatprep.subr.mxu1 %v34480_v3  ;;  %33683 = vmatprep.subr.mxu0 %v34480_v3 }
0x2874   :  { %33673 = vmatpush3.msra.mxu1 %v23120_v33  ;;  %33684 = vmatpush3.msra.mxu0 %v23117_v62 }
0x2875   :  { %33674 = vmatprep.subr.mxu1 %v34480_v3  ;;  %33685 = vmatprep.subr.mxu0 %v34480_v3 }
0x2876   :  { %33675 = vmatpush3.msra.mxu1 %v23127_v20  ;;  %33686 = vmatpush3.msra.mxu0 %v23124_v58  ;;  %v23982_v58 = vsel %vm551_vm2, %v29292_v18, 0 }
0x2877   :  { %33676 = vmatprep.subr.mxu1 %v34480_v3  ;;  %33687 = vmatprep.subr.mxu0 %v34480_v3 }
0x2878   :  { %33677 = vmatpush3.msra.mxu1 %v23134_v38  ;;  %33688 = vmatpush3.msra.mxu0 %v23131_v52  ;;  %v29293_v38 = vld [vmem:[%s38040_s2 + $0x1a8] sm:$0xff] }
0x2879   :  { %33679 = vmatmul.mubr.f32.vlgmr.msra.gmra.mxu1 %v37285_v39  ;;  %33689 = vmatprep.mubr.msk.f32.mxu0 %vm34481_vm1, %v34480_v3 }
0x287a   :  { %33692 = vmatprep.subr.mxu1 %v34480_v3  ;;  %33703 = vmatprep.subr.mxu0 %v34480_v3 }
0x287b   :  { %33690 = vmatmul.mubr.f32.vlgmr.msra.gmra.mxu0 %v37288_v54  ;;  %33693 = vmatpush3.msra.mxu1 %v37296_v19 }
0x287c   :  { %33704 = vmatpush3.msra.mxu0 %v23111_v23  ;;  %33694 = vmatprep.subr.mxu1 %v34480_v3 }
0x287d   :  { %33705 = vmatprep.subr.mxu0 %v34480_v3  ;;  %33695 = vmatpush3.msra.mxu1 %v37303_v44 }
0x287e   :  { %33706 = vmatpush3.msra.mxu0 %v23118_v7  ;;  %33696 = vmatprep.subr.mxu1 %v34480_v3 }
0x287f   :  { %33707 = vmatprep.subr.mxu0 %v34480_v3  ;;  %33697 = vmatpush3.msra.mxu1 %v37290_v41 }
0x2880   :  { %33708 = vmatpush3.msra.mxu0 %v23125_v61  ;;  %33698 = vmatprep.subr.mxu1 %v34480_v3 }
0x2881   :  { %33709 = vmatprep.subr.mxu0 %v34480_v3  ;;  %33699 = vmatpush3.msra.mxu1 %v37293_v45 }
0x2882   :  { %33700 = vmatprep.mubr.msk.f32.mxu1 %vm34481_vm1, %v34480_v3  ;;  %33710 = vmatpush3.msra.mxu0 %v23132_v25 }
0x2883   :  { %33701 = vmatmul.mubr.f32.vlgmr.msra.gmra.mxu1 %v23076_v63  ;;  %33714 = vmatprep.subr.mxu1 %v34480_v3 }
0x2884   :  { %33711 = vmatprep.mubr.msk.f32.mxu0 %vm34481_vm1, %v34480_v3  ;;  %33715 = vmatpush3.msra.mxu1 %v37296_v19  ;;  %v37420_v19 = vand.u32 4294901760, %v23982_v58 }
0x2885   :  { %33712 = vmatmul.mubr.f32.vlgmr.msra.gmra.mxu0 %v37285_v39  ;;  %33716 = vmatprep.subr.mxu1 %v34480_v3 }
0x2886   :  { %33717 = vmatpush3.msra.mxu1 %v37303_v44  ;;  %33722 = vmatprep.mubr.msk.f32.mxu1 %vm34481_vm1, %v34480_v3  ;;  %v37423_v50 = vsub.f32 %v23982_v58, %v37420_v19 }
0x2887   :  { %33718 = vmatprep.subr.mxu1 %v34480_v3  ;;  %33725 = vmatprep.subr.mxu0 %v34480_v3 }
0x2888   :  { %33719 = vmatpush3.msra.mxu1 %v37290_v41  ;;  %33726 = vmatpush3.msra.mxu0 %v34531_v4  ;;  %v24061_v51 = vand.u32 4294901760, %v37423_v50 }
0x2889   :  { %33720 = vmatprep.subr.mxu1 %v34480_v3  ;;  %33727 = vmatprep.subr.mxu0 %v34480_v3 }
0x288a   :  { %33721 = vmatpush3.msra.mxu1 %v37293_v45  ;;  %33728 = vmatpush3.msra.mxu0 %v34533_v5  ;;  %v24062_v52 = vsub.f32 %v37423_v50, %v24061_v51 }
0x288b   :  { %33723 = vmatmul.mubr.f32.vlgmr.msra.gmra.mxu1 %v37285_v39  ;;  %33736 = vmatprep.subr.mxu1 %v34480_v3 }
0x288c   :  { %33737 = vmatpush3.msra.mxu1 %v34586_v21  ;;  %33744 = vmatprep.mubr.msk.f32.mxu1 %vm34481_vm1, %v34480_v3  ;;  %v24063_v35 = vand.u32 4294901760, %v24062_v52 }
0x288d   :  { %33738 = vmatprep.subr.mxu1 %v34480_v3  ;;  %33729 = vmatprep.subr.mxu0 %v34480_v3 }
0x288e   :  { %33739 = vmatpush3.msra.mxu1 %v34588_v22  ;;  %33730 = vmatpush3.msra.mxu0 %v34535_v6 }
0x288f   :  { %33740 = vmatprep.subr.mxu1 %v34480_v3  ;;  %33731 = vmatprep.subr.mxu0 %v34480_v3 }
0x2890   :  { %33741 = vmatpush3.msra.mxu1 %v34596_v26  ;;  %33732 = vmatpush3.msra.mxu0 %v34543_v9 }
0x2891   :  { %33742 = vmatprep.subr.mxu1 %v34480_v3  ;;  %33733 = vmatprep.mubr.msk.f32.mxu0 %vm34481_vm1, %v34480_v3 }
0x2892   :  { %33743 = vmatpush3.msra.mxu1 %v34600_v28  ;;  %33747 = vmatprep.subr.mxu0 %v34480_v3 }
0x2893   :  { %33758 = vmatprep.subr.mxu1 %v34480_v3 }
0x2931   :  { %v23080_v39 = vpop.f32.mrf.mxu0 }
0x2933   :  { %v33669_v24 = vpop.f32.mrf.mxu0 }
0x2934   :  { %v29294_v24 = vld [vmem:[%s38040_s2 + $0x1b0] sm:$0xff] }
0x2939   :  { %v23171_v36 = vpop.f32.mrf.mxu1 }
0x293a   :  { %v23172_v47 = vadd.f32 %v23171_v36, %v23080_v39 }
0x293b   :  { %v33680_v37 = vpop.f32.mrf.mxu1  ;;  %v23251_v42 = vpop.f32.mrf.mxu0 }
0x293c   :  { %v23252_v53 = vadd.f32 %v23251_v42, %v23172_v47  ;;  %v29295_v47 = vld [vmem:[%s38040_s2 + $0x1b8] sm:$0xff] }
0x293d   :  { %v33691_v43 = vpop.f32.mrf.mxu0 }
0x293e   :  { %v23988_v43 = vsel %vm551_vm2, %v29294_v24, 0 }
0x2943   :  { %v23328_v48 = vpop.f32.mrf.mxu1 }
0x2944   :  { %v23329_v57 = vadd.f32 %v23328_v48, %v23252_v53  ;;  %v24079_v53 = vand.u32 4294901760, %v23988_v43 }
0x2945   :  { %v33702_v54 = vpop.f32.mrf.mxu1  ;;  %v23411_v56 = vpop.f32.mrf.mxu0 }
0x2946   :  { %v23412_v59 = vadd.f32 %v23411_v56, %v23329_v57  ;;  %v23991_v54 = vsel %vm551_vm2, %v29295_v47, 0 }
0x2947   :  { %v33713_v34 = vpop.f32.mrf.mxu0  ;;  %v24089_v57 = vand.u32 4294901760, %v23991_v54 }
0x2948   :  { %v24080_v34 = vsub.f32 %v23988_v43, %v24079_v53 }
0x294b   :  { %v23486_v60 = vpop.f32.mrf.mxu1 }
0x294c   :  { %v23487_v40 = vadd.f32 %v23486_v60, %v23412_v59  ;;  %v24090_v60 = vsub.f32 %v23991_v54, %v24089_v57 }
0x294d   :  { %v33724_v41 = vpop.f32.mrf.mxu1 }
0x294e   :  { %v23490_v2 = vsub.f32 %v37266_v31, %v23487_v40  ;;  %v24081_v40 = vand.u32 4294901760, %v24080_v34  ;;  %v29284_v41 = vld [vmem:[%s38038_s0 + $0x98] sm:$0xff] }
0x2950   :  { %v23492_v55 = vsel %vm29_vm0, %v23490_v2, 0 }
0x2951   :  { %v23563_v63 = vand.u32 4294901760, %v23492_v55 }
0x2953   :  { %v23564_v49 = vsub.f32 %v23492_v55, %v23563_v63  ;;  %33745 = vmatmul.mubr.f32.vlgmr.msra.gmra.mxu1 %v23563_v63  ;;  %v24091_v55 = vand.u32 4294901760, %v24090_v60 }
0x2954   :  { %33759 = vmatpush3.msra.mxu1 %v34531_v4  ;;  %33766 = vmatprep.mubr.msk.f32.mxu1 %vm34481_vm1, %v34480_v3 }
0x2955   :  { %v23565_v45 = vand.u32 4294901760, %v23564_v49  ;;  %33760 = vmatprep.subr.mxu1 %v34480_v3  ;;  %v24092_v18 = vsub.f32 %v24090_v60, %v24091_v55 }
0x2956   :  { %33761 = vmatpush3.msra.mxu1 %v34533_v5 }
0x2957   :  { %v23566_v46 = vsub.f32 %v23564_v49, %v23565_v45  ;;  %33762 = vmatprep.subr.mxu1 %v34480_v3 }
0x2958   :  { %33763 = vmatpush3.msra.mxu1 %v34535_v6 }
0x2959   :  { %v23567_v31 = vand.u32 4294901760, %v23566_v46  ;;  %33764 = vmatprep.subr.mxu1 %v34480_v3 }
0x295a   :  { %33765 = vmatpush3.msra.mxu1 %v34543_v9 }
0x295b   :  { %33767 = vmatmul.mubr.f32.vlgmr.msra.gmra.mxu1 %v23565_v45  ;;  %33780 = vmatprep.subr.mxu1 %v34480_v3 }
0x295c   :  { %33734 = vmatmul.mubr.f32.vlgmr.msra.gmra.mxu0 %v23567_v31  ;;  %33781 = vmatpush3.msra.mxu1 %v34531_v4 }
0x295d   :  { %33748 = vmatpush3.msra.mxu0 %v34552_v10  ;;  %33782 = vmatprep.subr.mxu1 %v34480_v3 }
0x295e   :  { %33749 = vmatprep.subr.mxu0 %v34480_v3  ;;  %33783 = vmatpush3.msra.mxu1 %v34533_v5 }
0x295f   :  { %33750 = vmatpush3.msra.mxu0 %v34555_v11  ;;  %33784 = vmatprep.subr.mxu1 %v34480_v3 }
0x2960   :  { %33751 = vmatprep.subr.mxu0 %v34480_v3  ;;  %33785 = vmatpush3.msra.mxu1 %v34535_v6 }
0x2961   :  { %33752 = vmatpush3.msra.mxu0 %v34558_v12  ;;  %33786 = vmatprep.subr.mxu1 %v34480_v3 }
0x2962   :  { %33753 = vmatprep.subr.mxu0 %v34480_v3  ;;  %33755 = vmatprep.mubr.msk.f32.mxu0 %vm34481_vm1, %v34480_v3 }
0x2963   :  { %33754 = vmatpush3.msra.mxu0 %v34562_v13  ;;  %33787 = vmatpush3.msra.mxu1 %v34543_v9 }
0x2964   :  { %33788 = vmatprep.mubr.msk.f32.mxu1 %vm34481_vm1, %v34480_v3  ;;  %33756 = vmatmul.mubr.f32.vlgmr.msra.gmra.mxu0 %v23564_v49  ;;  %v24082_v49 = vsub.f32 %v24080_v34, %v24081_v40 }
0x2965   :  { %33769 = vmatprep.subr.mxu0 %v34480_v3  ;;  %33789 = vmatmul.mubr.f32.vlgmr.msra.gmra.mxu1 %v23563_v63 }
0x2966   :  { %33770 = vmatpush3.msra.mxu0 %v34565_v14  ;;  %33777 = vmatprep.mubr.msk.f32.mxu0 %vm34481_vm1, %v34480_v3  ;;  %v24083_v58 = vand.u32 4294901760, %v24082_v49 }
0x2967   :  { %33771 = vmatprep.subr.mxu0 %v34480_v3  ;;  %33801 = vmatprep.mubr.f32.mxu1 %v37420_v19 }
0x2968   :  { %33772 = vmatpush3.msra.mxu0 %v34569_v15 }
0x2969   :  { %33773 = vmatprep.subr.mxu0 %v34480_v3 }
0x296a   :  { %33774 = vmatpush3.msra.mxu0 %v34572_v16 }
0x296b   :  { %33775 = vmatprep.subr.mxu0 %v34480_v3 }
0x296c   :  { %33776 = vmatpush3.msra.mxu0 %v34576_v17 }
0x296d   :  { %33778 = vmatmul.mubr.f32.vlgmr.msra.gmra.mxu0 %v23563_v63 }
0x296e   :  { %33793 = vmatprep.mubr.f32.mxu0 %v24063_v35 }
0x2a13   :  { %v23660_v44 = vpop.f32.mrf.mxu1 }
0x2a15   :  { %v33746_v61 = vpop.f32.mrf.mxu1 }
0x2a1b   :  { %v23817_v23 = vpop.f32.mrf.mxu1 }
0x2a1c   :  { %v23569_v62 = vpop.f32.mrf.mxu0 }
0x2a1d   :  { %v33768_v0 = vpop.f32.mrf.mxu1  ;;  %v23570_v1 = vadd.f32 %v37190_v27, %v23569_v62  ;;  %v23985_v27 = vsel %vm551_vm2, %v29293_v38, 0 }
0x2a1e   :  { %v33735_v25 = vpop.f32.mrf.mxu0  ;;  %v24069_v48 = vand.u32 4294901760, %v23985_v27 }
0x2a1f   :  { %v23661_v30 = vadd.f32 %v23660_v44, %v23570_v1  ;;  %v24093_v44 = vand.u32 4294901760, %v24092_v18 }
0x2a20   :  { %v24070_v56 = vsub.f32 %v23985_v27, %v24069_v48 }
0x2a22   :  { %v24071_v59 = vand.u32 4294901760, %v24070_v56 }
0x2a24   :  { %v23740_v7 = vpop.f32.mrf.mxu0  ;;  %v24072_v2 = vsub.f32 %v24070_v56, %v24071_v59 }
0x2a25   :  { %v23975_v29 = vpop.f32.mrf.mxu1  ;;  %v23741_v33 = vadd.f32 %v23740_v7, %v23661_v30 }
0x2a26   :  { %v33757_v8 = vpop.f32.mrf.mxu0  ;;  %v24073_v31 = vand.u32 4294901760, %v24072_v2 }
0x2a27   :  { %v33790_v32 = vpop.f32.mrf.mxu1  ;;  %v23818_v20 = vadd.f32 %v23817_v23, %v23741_v33 }
0x2a2d   :  { %v23900_v39 = vpop.f32.mrf.mxu0 }
0x2a2e   :  { %v23901_v36 = vadd.f32 %v23900_v39, %v23818_v20  ;;  %v29287_v20 = vld [vmem:[%s38039_s1 + $0x68] sm:$0xff] }
0x2a2f   :  { %v33779_v37 = vpop.f32.mrf.mxu0  ;;  %v24569_v27 = vsel %vm29_vm0, %v29287_v20, 0 }
0x2a30   :  { %v23976_v42 = vadd.f32 %v23975_v29, %v23901_v36 }
0x2a32   :  { %34440 = vtanh.f32 %v23976_v42 }
0x2a3f   :  { %v34441_v63 = vpop.eup %34440 }
0x2a40   :  { %v37446_v45 = vadd.f32 %v34441_v63, %v29284_v41 }
0x2a42   :  { %v24024_v46 = vand.u32 4294901760, %v37446_v45 }
0x2a44   :  { %33791 = vmatprep.subr.mxu0 %v24024_v46  ;;  %v24131_v52 = vsub.f32 %v37446_v45, %v24024_v46 }
0x2a45   :  { %33792 = vmatpush3.msra.mxu0 %v24024_v46 }
0x2a46   :  { %33794 = vmatmul.mubr.f32.vlgmr.msra.gmra.mxu0 %v24073_v31  ;;  %33807 = vmatprep.subr.mxu0 %v24131_v52  ;;  %v24132_v35 = vand.u32 4294901760, %v24131_v52 }
0x2a47   :  { %33808 = vmatpush3.msra.mxu0 %v24131_v52  ;;  %33796 = vmatprep.mubr.f32.mxu0 %v24083_v58 }
0x2a48   :  { %33823 = vmatprep.subr.mxu0 %v24132_v35  ;;  %v24133_v61 = vsub.f32 %v24131_v52, %v24132_v35 }
0x2a4a   :  { %33797 = vmatmul.mubr.f32.gmra.mxu0 %v24093_v44  ;;  %v24134_v23 = vand.u32 4294901760, %v24133_v61 }
0x2a4b   :  { %33809 = vmatprep.mubr.f32.mxu0 %v37423_v50 }
0x2a4c   :  { %33799 = vmatprep.subr.mxu1 %v24134_v23 }
0x2a4d   :  { %33800 = vmatpush3.msra.mxu1 %v24134_v23 }
0x2a4e   :  { %33802 = vmatmul.mubr.f32.vlgmr.msra.gmra.mxu1 %v24069_v48  ;;  %33810 = vmatmul.mubr.f32.vlgmr.msra.gmra.mxu0 %v24070_v56  ;;  %v37465_v56 = vand.u32 4294901760, %v24569_v27 }
0x2a4f   :  { %33815 = vmatprep.subr.mxu1 %v24024_v46  ;;  %33824 = vmatpush3.msra.mxu0 %v24132_v35 }
0x2a50   :  { %33816 = vmatpush3.msra.mxu1 %v24024_v46  ;;  %33804 = vmatprep.mubr.f32.mxu1 %v24079_v53  ;;  %v37468_v63 = vsub.f32 %v24569_v27, %v37465_v56 }
0x2a51   :  { %33831 = vmatprep.subr.mxu1 %v24024_v46  ;;  %33812 = vmatprep.mubr.f32.mxu0 %v24080_v34 }
0x2a52   :  { %33805 = vmatmul.mubr.f32.gmra.mxu1 %v24089_v57  ;;  %33813 = vmatmul.mubr.f32.gmra.mxu0 %v24090_v60  ;;  %v24642_v23 = vand.u32 4294901760, %v37468_v63 }
0x2a53   :  { %33817 = vmatprep.mubr.f32.mxu1 %v24061_v51  ;;  %33825 = vmatprep.mubr.f32.mxu0 %v37420_v19 }
0x2a54   :  { %33839 = vmatprep.subr.mxu0 %v34480_v3 }
0x2a56   :  { %33818 = vmatmul.mubr.f32.vlgmr.msra.gmra.mxu1 %v24071_v59  ;;  %33826 = vmatmul.mubr.f32.vlgmr.msra.gmra.mxu0 %v24069_v48 }
0x2a57   :  { %33832 = vmatpush3.msra.mxu1 %v24024_v46  ;;  %33820 = vmatprep.mubr.f32.mxu1 %v24081_v40 }
0x2a58   :  { %33828 = vmatprep.mubr.f32.mxu0 %v24079_v53  ;;  %33850 = vmatprep.subr.mxu1 %v34480_v3 }
0x2a5a   :  { %33821 = vmatmul.mubr.f32.gmra.mxu1 %v24091_v55  ;;  %33829 = vmatmul.mubr.f32.gmra.mxu0 %v24089_v57 }
0x2a5b   :  { %33833 = vmatprep.mubr.f32.mxu1 %v37420_v19  ;;  %33847 = vmatprep.mubr.msk.f32.mxu0 %vm34481_vm1, %v34480_v3 }
0x2a5e   :  { %33834 = vmatmul.mubr.f32.vlgmr.msra.gmra.mxu1 %v24069_v48 }
0x2a5f   :  { %33836 = vmatprep.mubr.f32.mxu1 %v24079_v53 }
0x2a62   :  { %33837 = vmatmul.mubr.f32.gmra.mxu1 %v24089_v57 }
0x2a63   :  { %33858 = vmatprep.mubr.msk.f32.mxu1 %vm34481_vm1, %v34480_v3 }
0x2b06   :  { %v33795_v50 = vpop.f32.mrf.mxu0 }
0x2b08   :  { %v24065_v51 = vpop.f32.mrf.mxu0 }
0x2b0a   :  { %v33798_v62 = vpop.f32.mrf.mxu0 }
0x2b0c   :  { %v24085_v0 = vpop.f32.mrf.mxu0 }
0x2b0e   :  { %v33803_v25 = vpop.f32.mrf.mxu1  ;;  %v33811_v1 = vpop.f32.mrf.mxu0 }
0x2b0f   :  { %v24178_v19 = vadd.f32 %v33803_v25, %v33795_v50 }
0x2b10   :  { %v24171_v7 = vpop.f32.mrf.mxu1  ;;  %v24263_v29 = vpop.f32.mrf.mxu0 }
0x2b11   :  { %v24172_v38 = vadd.f32 %v24171_v7, %v24065_v51  ;;  %v24271_v36 = vadd.f32 %v33811_v1, %v24178_v19 }
0x2b12   :  { %v33806_v30 = vpop.f32.mrf.mxu1  ;;  %v33814_v8 = vpop.f32.mrf.mxu0 }
0x2b13   :  { %v24190_v37 = vadd.f32 %v33806_v30, %v33798_v62  ;;  %v24264_v47 = vadd.f32 %v24263_v29, %v24172_v38  ;;  %v24643_v29 = vsub.f32 %v37468_v63, %v24642_v23 }
0x2b14   :  { %v24183_v32 = vpop.f32.mrf.mxu1  ;;  %v24277_v33 = vpop.f32.mrf.mxu0 }
0x2b15   :  { %v24184_v48 = vadd.f32 %v24183_v32, %v24085_v0  ;;  %v24285_v57 = vadd.f32 %v33814_v8, %v24190_v37  ;;  %v24644_v38 = vand.u32 4294901760, %v24643_v29 }
0x2b16   :  { %v33819_v39 = vpop.f32.mrf.mxu1  ;;  %v33827_v24 = vpop.f32.mrf.mxu0 }
0x2b17   :  { %v24367_v53 = vadd.f32 %v33819_v39, %v24271_v36  ;;  %v24278_v40 = vadd.f32 %v24277_v33, %v24184_v48 }
0x2b18   :  { %v24358_v42 = vpop.f32.mrf.mxu1  ;;  %v24456_v43 = vpop.f32.mrf.mxu0 }
0x2b19   :  { %v24359_v34 = vadd.f32 %v24358_v42, %v24264_v47  ;;  %v24463_v41 = vadd.f32 %v33827_v24, %v24367_v53 }
0x2b1a   :  { %v33822_v54 = vpop.f32.mrf.mxu1  ;;  %v33830_v60 = vpop.f32.mrf.mxu0 }
0x2b1b   :  { %v24383_v2 = vadd.f32 %v33822_v54, %v24285_v57  ;;  %v24457_v49 = vadd.f32 %v24456_v43, %v24359_v34 }
0x2b1c   :  { %v24374_v59 = vpop.f32.mrf.mxu1  ;;  %v24468_v18 = vpop.f32.mrf.mxu0 }
0x2b1d   :  { %v24375_v46 = vadd.f32 %v24374_v59, %v24278_v40  ;;  %v24475_v52 = vadd.f32 %v33830_v60, %v24383_v2 }
0x2b1e   :  { %v33835_v55 = vpop.f32.mrf.mxu1 }
0x2b1f   :  { %v24553_v31 = vadd.f32 %v33835_v55, %v24463_v41  ;;  %v24469_v50 = vadd.f32 %v24468_v18, %v24375_v46 }
0x2b20   :  { %v24546_v58 = vpop.f32.mrf.mxu1 }
0x2b21   :  { %v37470_v35 = vand.u32 4294901760, %v24553_v31  ;;  %v24547_v44 = vadd.f32 %v24546_v58, %v24457_v49 }
0x2b22   :  { %v33838_v61 = vpop.f32.mrf.mxu1 }
0x2b23   :  { %v37473_v51 = vand.u32 4294901760, %v24547_v44  ;;  %v24565_v62 = vadd.f32 %v33838_v61, %v24475_v52  ;;  %v24690_v25 = vsub.f32 %v24553_v31, %v37470_v35 }
0x2b24   :  { %v24558_v0 = vpop.f32.mrf.mxu1 }
0x2b25   :  { %v37476_v1 = vand.u32 4294901760, %v24565_v62  ;;  %v24559_v7 = vadd.f32 %v24558_v0, %v24469_v50  ;;  %v24697_v30 = vsub.f32 %v24547_v44, %v37473_v51  ;;  %v24691_v32 = vand.u32 4294901760, %v24690_v25 }
0x2b27   :  { %v24676_v8 = vsub.f32 %v24565_v62, %v37476_v1  ;;  %v37483_v19 = vand.u32 4294901760, %v24559_v7  ;;  %33840 = vmatpush3.msra.mxu0 %v37476_v1  ;;  %v24698_v39 = vand.u32 4294901760, %v24697_v30  ;;  %v24692_v37 = vsub.f32 %v24690_v25, %v24691_v32 }
0x2b28   :  { %33841 = vmatprep.subr.mxu0 %v34480_v3 }
0x2b29   :  { %v24677_v33 = vand.u32 4294901760, %v24676_v8  ;;  %v24683_v20 = vsub.f32 %v24559_v7, %v37483_v19  ;;  %33842 = vmatpush3.msra.mxu0 %v37483_v19  ;;  %v24699_v43 = vsub.f32 %v24697_v30, %v24698_v39  ;;  %v24693_v48 = vand.u32 4294901760, %v24692_v37 }
0x2b2a   :  { %33843 = vmatprep.subr.mxu0 %v34480_v3 }
0x2b2b   :  { %v24678_v24 = vsub.f32 %v24676_v8, %v24677_v33  ;;  %v24684_v36 = vand.u32 4294901760, %v24683_v20  ;;  %33844 = vmatpush3.msra.mxu0 %v37470_v35  ;;  %v24700_v53 = vand.u32 4294901760, %v24699_v43  ;;  %v29285_v43 = vld [vmem:[%s38038_s0 + $0xa0] sm:$0xff] }
0x2b2c   :  { %33845 = vmatprep.subr.mxu0 %v34480_v3 }
0x2b2d   :  { %v24685_v27 = vsub.f32 %v24683_v20, %v24684_v36  ;;  %33846 = vmatpush3.msra.mxu0 %v37473_v51  ;;  %v24679_v42 = vand.u32 4294901760, %v24678_v24 }
0x2b2e   :  { %33861 = vmatprep.subr.mxu0 %v34480_v3  ;;  %33848 = vmatmul.mubr.f32.vlgmr.msra.gmra.mxu0 %v24644_v38 }
0x2b2f   :  { %33851 = vmatpush3.msra.mxu1 %v24679_v42  ;;  %33862 = vmatpush3.msra.mxu0 %v24676_v8  ;;  %v24686_v47 = vand.u32 4294901760, %v24685_v27 }
0x2b30   :  { %33852 = vmatprep.subr.mxu1 %v34480_v3  ;;  %33863 = vmatprep.subr.mxu0 %v34480_v3 }
0x2b31   :  { %33853 = vmatpush3.msra.mxu1 %v24686_v47  ;;  %33864 = vmatpush3.msra.mxu0 %v24683_v20 }
0x2b32   :  { %33854 = vmatprep.subr.mxu1 %v34480_v3  ;;  %33865 = vmatprep.subr.mxu0 %v34480_v3 }
0x2b33   :  { %33855 = vmatpush3.msra.mxu1 %v24693_v48  ;;  %33866 = vmatpush3.msra.mxu0 %v24690_v25 }
0x2b34   :  { %33856 = vmatprep.subr.mxu1 %v34480_v3  ;;  %33867 = vmatprep.subr.mxu0 %v34480_v3 }
0x2b35   :  { %33857 = vmatpush3.msra.mxu1 %v24700_v53  ;;  %33868 = vmatpush3.msra.mxu0 %v24697_v30  ;;  %v37621_v30 = vld [vmem:[%s38043_s5] ss:$0 sm:$0xff] }
0x2b36   :  { %33859 = vmatmul.mubr.f32.vlgmr.msra.gmra.mxu1 %v37465_v56  ;;  %33869 = vmatprep.mubr.msk.f32.mxu0 %vm34481_vm1, %v34480_v3 }
0x2b37   :  { %33872 = vmatprep.subr.mxu1 %v34480_v3  ;;  %33883 = vmatprep.subr.mxu0 %v34480_v3 }
0x2b38   :  { %33870 = vmatmul.mubr.f32.vlgmr.msra.gmra.mxu0 %v37468_v63  ;;  %33873 = vmatpush3.msra.mxu1 %v37476_v1 }
0x2b39   :  { %33884 = vmatpush3.msra.mxu0 %v24677_v33  ;;  %33874 = vmatprep.subr.mxu1 %v34480_v3 }
0x2b3a   :  { %33885 = vmatprep.subr.mxu0 %v34480_v3  ;;  %33875 = vmatpush3.msra.mxu1 %v37483_v19 }
0x2b3b   :  { %33886 = vmatpush3.msra.mxu0 %v24684_v36  ;;  %33876 = vmatprep.subr.mxu1 %v34480_v3 }
0x2b3c   :  { %33887 = vmatprep.subr.mxu0 %v34480_v3  ;;  %33877 = vmatpush3.msra.mxu1 %v37470_v35 }
0x2b3d   :  { %33888 = vmatpush3.msra.mxu0 %v24691_v32  ;;  %33878 = vmatprep.subr.mxu1 %v34480_v3 }
0x2b3e   :  { %33889 = vmatprep.subr.mxu0 %v34480_v3  ;;  %33879 = vmatpush3.msra.mxu1 %v37473_v51 }
0x2b3f   :  { %33880 = vmatprep.mubr.msk.f32.mxu1 %vm34481_vm1, %v34480_v3  ;;  %33890 = vmatpush3.msra.mxu0 %v24698_v39 }
0x2b40   :  { %33881 = vmatmul.mubr.f32.vlgmr.msra.gmra.mxu1 %v24642_v23  ;;  %33894 = vmatprep.subr.mxu1 %v34480_v3 }
0x2b41   :  { %33891 = vmatprep.mubr.msk.f32.mxu0 %vm34481_vm1, %v34480_v3  ;;  %33895 = vmatpush3.msra.mxu1 %v37476_v1 }
0x2b42   :  { %33892 = vmatmul.mubr.f32.vlgmr.msra.gmra.mxu0 %v37465_v56  ;;  %33896 = vmatprep.subr.mxu1 %v34480_v3 }
0x2b43   :  { %33897 = vmatpush3.msra.mxu1 %v37483_v19  ;;  %33902 = vmatprep.mubr.msk.f32.mxu1 %vm34481_vm1, %v34480_v3 }
0x2b44   :  { %33898 = vmatprep.subr.mxu1 %v34480_v3  ;;  %33905 = vmatprep.subr.mxu0 %v34480_v3 }
0x2b45   :  { %33899 = vmatpush3.msra.mxu1 %v37470_v35  ;;  %33906 = vmatpush3.msra.mxu0 %v34531_v4 }
0x2b46   :  { %33900 = vmatprep.subr.mxu1 %v34480_v3  ;;  %33907 = vmatprep.subr.mxu0 %v34480_v3 }
0x2b47   :  { %33901 = vmatpush3.msra.mxu1 %v37473_v51  ;;  %33908 = vmatpush3.msra.mxu0 %v34533_v5 }
0x2b48   :  { %33903 = vmatmul.mubr.f32.vlgmr.msra.gmra.mxu1 %v37465_v56  ;;  %33916 = vmatprep.subr.mxu1 %v34480_v3 }
0x2b49   :  { %33917 = vmatpush3.msra.mxu1 %v34586_v21  ;;  %33924 = vmatprep.mubr.msk.f32.mxu1 %vm34481_vm1, %v34480_v3 }
0x2b4a   :  { %33918 = vmatprep.subr.mxu1 %v34480_v3  ;;  %33909 = vmatprep.subr.mxu0 %v34480_v3 }
0x2b4b   :  { %33919 = vmatpush3.msra.mxu1 %v34588_v22  ;;  %33910 = vmatpush3.msra.mxu0 %v34535_v6 }
0x2b4c   :  { %33920 = vmatprep.subr.mxu1 %v34480_v3  ;;  %33911 = vmatprep.subr.mxu0 %v34480_v3 }
0x2b4d   :  { %33921 = vmatpush3.msra.mxu1 %v34596_v26  ;;  %33912 = vmatpush3.msra.mxu0 %v34543_v9 }
0x2b4e   :  { %33922 = vmatprep.subr.mxu1 %v34480_v3  ;;  %33913 = vmatprep.mubr.msk.f32.mxu0 %vm34481_vm1, %v34480_v3 }
0x2b4f   :  { %33923 = vmatpush3.msra.mxu1 %v34600_v28  ;;  %33927 = vmatprep.subr.mxu0 %v34480_v3 }
0x2b50   :  { %33938 = vmatprep.subr.mxu1 %v34480_v3 }
0x2bee   :  { %v24646_v54 = vpop.f32.mrf.mxu0 }
0x2bf0   :  { %v33849_v56 = vpop.f32.mrf.mxu0 }
0x2bf6   :  { %v24737_v57 = vpop.f32.mrf.mxu1 }
0x2bf7   :  { %v24738_v40 = vadd.f32 %v24737_v57, %v24646_v54 }
0x2bf8   :  { %v33860_v34 = vpop.f32.mrf.mxu1  ;;  %v24817_v59 = vpop.f32.mrf.mxu0 }
0x2bf9   :  { %v24818_v2 = vadd.f32 %v24817_v59, %v24738_v40 }
0x2bfa   :  { %v33871_v60 = vpop.f32.mrf.mxu0 }
0x2bfb   :  { %v29301_v60 = vld [vmem:[%s38040_s2 + $0x1c0] sm:$0xff] }
0x2bfc   :  { %v26060_v40 = vsel %vm551_vm2, %v29301_v60, 0 }
0x2c00   :  { %v24894_v41 = vpop.f32.mrf.mxu1 }
0x2c01   :  { %v24895_v49 = vadd.f32 %v24894_v41, %v24818_v2  ;;  %v37671_v41 = vand.u32 4294901760, %v26060_v40 }
0x2c02   :  { %v33882_v55 = vpop.f32.mrf.mxu1  ;;  %v24977_v63 = vpop.f32.mrf.mxu0 }
0x2c03   :  { %v24978_v31 = vadd.f32 %v24977_v63, %v24895_v49  ;;  %v37674_v2 = vsub.f32 %v26060_v40, %v37671_v41 }
0x2c04   :  { %v33893_v46 = vpop.f32.mrf.mxu0 }
0x2c05   :  { %v26139_v55 = vand.u32 4294901760, %v37674_v2 }
0x2c07   :  { %v26140_v63 = vsub.f32 %v37674_v2, %v26139_v55 }
0x2c08   :  { %v25052_v18 = vpop.f32.mrf.mxu1 }
0x2c09   :  { %v25053_v58 = vadd.f32 %v25052_v18, %v24978_v31  ;;  %v26141_v49 = vand.u32 4294901760, %v26140_v63 }
0x2c0a   :  { %v33904_v52 = vpop.f32.mrf.mxu1 }
0x2c0b   :  { %v25056_v35 = vsub.f32 %v37446_v45, %v25053_v58 }
0x2c0d   :  { %v25058_v44 = vsel %vm29_vm0, %v25056_v35, 0 }
0x2c0e   :  { %v25129_v61 = vand.u32 4294901760, %v25058_v44 }
0x2c10   :  { %v25130_v23 = vsub.f32 %v25058_v44, %v25129_v61  ;;  %33925 = vmatmul.mubr.f32.vlgmr.msra.gmra.mxu1 %v25129_v61 }
0x2c11   :  { %33939 = vmatpush3.msra.mxu1 %v34531_v4  ;;  %33946 = vmatprep.mubr.msk.f32.mxu1 %vm34481_vm1, %v34480_v3 }
0x2c12   :  { %v25131_v50 = vand.u32 4294901760, %v25130_v23  ;;  %33940 = vmatprep.subr.mxu1 %v34480_v3 }
0x2c13   :  { %33941 = vmatpush3.msra.mxu1 %v34533_v5 }
0x2c14   :  { %v25132_v51 = vsub.f32 %v25130_v23, %v25131_v50  ;;  %33942 = vmatprep.subr.mxu1 %v34480_v3 }
0x2c15   :  { %33943 = vmatpush3.msra.mxu1 %v34535_v6 }
0x2c16   :  { %v25133_v45 = vand.u32 4294901760, %v25132_v51  ;;  %33944 = vmatprep.subr.mxu1 %v34480_v3 }
0x2c17   :  { %33945 = vmatpush3.msra.mxu1 %v34543_v9 }
0x2c18   :  { %33947 = vmatmul.mubr.f32.vlgmr.msra.gmra.mxu1 %v25131_v50  ;;  %33960 = vmatprep.subr.mxu1 %v34480_v3 }
0x2c19   :  { %33914 = vmatmul.mubr.f32.vlgmr.msra.gmra.mxu0 %v25133_v45  ;;  %33961 = vmatpush3.msra.mxu1 %v34531_v4 }
0x2c1a   :  { %33928 = vmatpush3.msra.mxu0 %v34552_v10  ;;  %33962 = vmatprep.subr.mxu1 %v34480_v3 }
0x2c1b   :  { %33929 = vmatprep.subr.mxu0 %v34480_v3  ;;  %33963 = vmatpush3.msra.mxu1 %v34533_v5 }
0x2c1c   :  { %33930 = vmatpush3.msra.mxu0 %v34555_v11  ;;  %33964 = vmatprep.subr.mxu1 %v34480_v3 }
0x2c1d   :  { %33931 = vmatprep.subr.mxu0 %v34480_v3  ;;  %33965 = vmatpush3.msra.mxu1 %v34535_v6 }
0x2c1e   :  { %33932 = vmatpush3.msra.mxu0 %v34558_v12  ;;  %33966 = vmatprep.subr.mxu1 %v34480_v3 }
0x2c1f   :  { %33933 = vmatprep.subr.mxu0 %v34480_v3  ;;  %33935 = vmatprep.mubr.msk.f32.mxu0 %vm34481_vm1, %v34480_v3 }
0x2c20   :  { %33934 = vmatpush3.msra.mxu0 %v34562_v13  ;;  %33967 = vmatpush3.msra.mxu1 %v34543_v9 }
0x2c21   :  { %33968 = vmatprep.mubr.msk.f32.mxu1 %vm34481_vm1, %v34480_v3  ;;  %33936 = vmatmul.mubr.f32.vlgmr.msra.gmra.mxu0 %v25130_v23 }
0x2c22   :  { %33949 = vmatprep.subr.mxu0 %v34480_v3  ;;  %33969 = vmatmul.mubr.f32.vlgmr.msra.gmra.mxu1 %v25129_v61 }
0x2c23   :  { %33950 = vmatpush3.msra.mxu0 %v34565_v14  ;;  %33957 = vmatprep.mubr.msk.f32.mxu0 %vm34481_vm1, %v34480_v3 }
0x2c24   :  { %33951 = vmatprep.subr.mxu0 %v34480_v3  ;;  %33982 = vmatprep.subr.mxu1 %v34480_v3 }
0x2c25   :  { %33952 = vmatpush3.msra.mxu0 %v34569_v15  ;;  %33983 = vmatpush3.msra.mxu1 %v34586_v21 }
0x2c26   :  { %33953 = vmatprep.subr.mxu0 %v34480_v3  ;;  %33984 = vmatprep.subr.mxu1 %v34480_v3 }
0x2c27   :  { %33954 = vmatpush3.msra.mxu0 %v34572_v16  ;;  %33985 = vmatpush3.msra.mxu1 %v34588_v22 }
0x2c28   :  { %33955 = vmatprep.subr.mxu0 %v34480_v3  ;;  %33986 = vmatprep.subr.mxu1 %v34480_v3 }
0x2c29   :  { %33956 = vmatpush3.msra.mxu0 %v34576_v17  ;;  %33987 = vmatpush3.msra.mxu1 %v34596_v26 }
0x2c2a   :  { %33958 = vmatmul.mubr.f32.vlgmr.msra.gmra.mxu0 %v25129_v61  ;;  %33988 = vmatprep.subr.mxu1 %v34480_v3 }
0x2c2b   :  { %33989 = vmatpush3.msra.mxu1 %v34600_v28  ;;  %33971 = vmatprep.subr.mxu0 %v34480_v3 }
0x2c2c   :  { %33990 = vmatprep.mubr.msk.f32.mxu1 %vm34481_vm1, %v34480_v3  ;;  %34004 = vmatprep.subr.mxu1 %v34480_v3 }
0x2c2d   :  { %33972 = vmatpush3.msra.mxu0 %v34531_v4  ;;  %33979 = vmatprep.mubr.msk.f32.mxu0 %vm34481_vm1, %v34480_v3 }
0x2c2e   :  { %33973 = vmatprep.subr.mxu0 %v34480_v3 }
0x2c2f   :  { %33974 = vmatpush3.msra.mxu0 %v34533_v5 }
0x2c30   :  { %33975 = vmatprep.subr.mxu0 %v34480_v3 }
0x2c31   :  { %33976 = vmatpush3.msra.mxu0 %v34535_v6 }
0x2c32   :  { %33977 = vmatprep.subr.mxu0 %v34480_v3 }
0x2c33   :  { %33978 = vmatpush3.msra.mxu0 %v34543_v9 }
0x2c34   :  { %33993 = vmatprep.subr.mxu0 %v34480_v3 }
0x2cd0   :  { %v25226_v62 = vpop.f32.mrf.mxu1 }
0x2cd2   :  { %v33926_v0 = vpop.f32.mrf.mxu1 }
0x2cd8   :  { %v25383_v25 = vpop.f32.mrf.mxu1 }
0x2cd9   :  { %v25135_v1 = vpop.f32.mrf.mxu0 }
0x2cda   :  { %v33948_v7 = vpop.f32.mrf.mxu1  ;;  %v25136_v8 = vadd.f32 %v37621_v30, %v25135_v1 }
0x2cdb   :  { %v33915_v29 = vpop.f32.mrf.mxu0  ;;  %v29303_v7 = vld [vmem:[%s38040_s2 + $0x1d0] sm:$0xff] }
0x2cdc   :  { %v25227_v33 = vadd.f32 %v25226_v62, %v25136_v8 }
0x2ce1   :  { %v25306_v19 = vpop.f32.mrf.mxu0 }
0x2ce2   :  { %v25541_v32 = vpop.f32.mrf.mxu1  ;;  %v25307_v39 = vadd.f32 %v25306_v19, %v25227_v33  ;;  %v26066_v33 = vsel %vm551_vm2, %v29303_v7, 0 }
0x2ce3   :  { %v33937_v20 = vpop.f32.mrf.mxu0 }
0x2ce4   :  { %v33970_v38 = vpop.f32.mrf.mxu1  ;;  %v25384_v24 = vadd.f32 %v25383_v25, %v25307_v39  ;;  %v29302_v25 = vld [vmem:[%s38040_s2 + $0x1c8] sm:$0xff]  ;;  %v29304_v20 = vld [vmem:[%s38040_s2 + $0x1d8] sm:$0xff]  ;;  %v26157_v39 = vand.u32 4294901760, %v26066_v33 }
0x2ce5   :  { %v26063_v19 = vsel %vm551_vm2, %v29302_v25, 0  ;;  %v29299_v25 = vld [vmem:[%s38039_s1 + $0x70] sm:$0xff] }
0x2ce6   :  { %v26147_v38 = vand.u32 4294901760, %v26063_v19 }
0x2cea   :  { %v25466_v36 = vpop.f32.mrf.mxu0 }
0x2ceb   :  { %v25467_v37 = vadd.f32 %v25466_v36, %v25384_v24  ;;  %v26069_v24 = vsel %vm551_vm2, %v29304_v20, 0  ;;  %v26148_v36 = vsub.f32 %v26063_v19, %v26147_v38 }
0x2cec   :  { %v33959_v27 = vpop.f32.mrf.mxu0 }
0x2ced   :  { %v25542_v42 = vadd.f32 %v25541_v32, %v25467_v37  ;;  %v26167_v37 = vand.u32 4294901760, %v26069_v24  ;;  %v26158_v27 = vsub.f32 %v26066_v33, %v26157_v39 }
0x2cef   :  { %34442 = vtanh.f32 %v25542_v42  ;;  %v26149_v42 = vand.u32 4294901760, %v26148_v36 }
0x2cfc   :  { %v34443_v47 = vpop.eup %34442 }
0x2cfd   :  { %v25546_v48 = vadd.f32 %v34443_v47, %v29285_v43  ;;  %v26168_v43 = vsub.f32 %v26069_v24, %v26167_v37  ;;  %v26159_v47 = vand.u32 4294901760, %v26158_v27 }
0x2cff   :  { %25548 = vst.msk [vmem:[#allocation3 + $0x30] sm:$0xff] %vm29_vm0, %v25546_v48  ;;  %v25570_v53 = vsel %vm29_vm0, %v25546_v48, 0  ;;  %v29296_v48 = vld [vmem:[%s38038_s0 + $0xa8] sm:$0xff] }
0x2d00   :  { %v25641_v54 = vand.u32 4294901760, %v25570_v53 }
0x2d02   :  { %v25642_v56 = vsub.f32 %v25570_v53, %v25641_v54  ;;  %33991 = vmatmul.mubr.f32.vlgmr.msra.gmra.mxu1 %v25641_v54  ;;  %v26150_v53 = vsub.f32 %v26148_v36, %v26149_v42 }
0x2d03   :  { %34005 = vmatpush3.msra.mxu1 %v34531_v4  ;;  %34012 = vmatprep.mubr.msk.f32.mxu1 %vm34481_vm1, %v34480_v3 }
0x2d04   :  { %34006 = vmatprep.subr.mxu1 %v34480_v3  ;;  %v25643_v57 = vand.u32 4294901760, %v25642_v56  ;;  %v26151_v60 = vand.u32 4294901760, %v26150_v53 }
0x2d05   :  { %34007 = vmatpush3.msra.mxu1 %v34533_v5 }
0x2d06   :  { %34008 = vmatprep.subr.mxu1 %v34480_v3  ;;  %v25644_v34 = vsub.f32 %v25642_v56, %v25643_v57 }
0x2d07   :  { %34009 = vmatpush3.msra.mxu1 %v34535_v6 }
0x2d08   :  { %34010 = vmatprep.subr.mxu1 %v34480_v3  ;;  %v25645_v59 = vand.u32 4294901760, %v25644_v34 }
0x2d09   :  { %34011 = vmatpush3.msra.mxu1 %v34543_v9 }
0x2d0a   :  { %34013 = vmatmul.mubr.f32.vlgmr.msra.gmra.mxu1 %v25643_v57  ;;  %34026 = vmatprep.subr.mxu1 %v34480_v3  ;;  %v26160_v57 = vsub.f32 %v26158_v27, %v26159_v47 }
0x2d0b   :  { %33980 = vmatmul.mubr.f32.vlgmr.msra.gmra.mxu0 %v25645_v59  ;;  %34027 = vmatpush3.msra.mxu1 %v34531_v4 }
0x2d0c   :  { %33994 = vmatpush3.msra.mxu0 %v34552_v10  ;;  %34028 = vmatprep.subr.mxu1 %v34480_v3  ;;  %v26161_v63 = vand.u32 4294901760, %v26160_v57 }
0x2d0d   :  { %33995 = vmatprep.subr.mxu0 %v34480_v3  ;;  %34029 = vmatpush3.msra.mxu1 %v34533_v5 }
0x2d0e   :  { %33996 = vmatpush3.msra.mxu0 %v34555_v11  ;;  %34030 = vmatprep.subr.mxu1 %v34480_v3 }
0x2d0f   :  { %33997 = vmatprep.subr.mxu0 %v34480_v3  ;;  %34031 = vmatpush3.msra.mxu1 %v34535_v6 }
0x2d10   :  { %33998 = vmatpush3.msra.mxu0 %v34558_v12  ;;  %34032 = vmatprep.subr.mxu1 %v34480_v3 }
0x2d11   :  { %33999 = vmatprep.subr.mxu0 %v34480_v3  ;;  %34001 = vmatprep.mubr.msk.f32.mxu0 %vm34481_vm1, %v34480_v3 }
0x2d12   :  { %34000 = vmatpush3.msra.mxu0 %v34562_v13  ;;  %34033 = vmatpush3.msra.mxu1 %v34543_v9 }
0x2d13   :  { %34034 = vmatprep.mubr.msk.f32.mxu1 %vm34481_vm1, %v34480_v3  ;;  %34002 = vmatmul.mubr.f32.vlgmr.msra.gmra.mxu0 %v25642_v56 }
0x2d14   :  { %34015 = vmatprep.subr.mxu0 %v34480_v3  ;;  %34035 = vmatmul.mubr.f32.vlgmr.msra.gmra.mxu1 %v25641_v54 }
0x2d15   :  { %34016 = vmatpush3.msra.mxu0 %v34565_v14  ;;  %34023 = vmatprep.mubr.msk.f32.mxu0 %vm34481_vm1, %v34480_v3 }
0x2d16   :  { %34017 = vmatprep.subr.mxu0 %v34480_v3  ;;  %34047 = vmatprep.mubr.f32.mxu1 %v37671_v41 }
0x2d17   :  { %34018 = vmatpush3.msra.mxu0 %v34569_v15 }
0x2d18   :  { %34019 = vmatprep.subr.mxu0 %v34480_v3 }
0x2d19   :  { %34020 = vmatpush3.msra.mxu0 %v34572_v16 }
0x2d1a   :  { %34021 = vmatprep.subr.mxu0 %v34480_v3 }
0x2d1b   :  { %34022 = vmatpush3.msra.mxu0 %v34576_v17 }
0x2d1c   :  { %34024 = vmatmul.mubr.f32.vlgmr.msra.gmra.mxu0 %v25641_v54  ;;  %v26169_v54 = vand.u32 4294901760, %v26168_v43 }
0x2d1d   :  { %34039 = vmatprep.mubr.f32.mxu0 %v26141_v49 }
0x2d1e   :  { %v26170_v40 = vsub.f32 %v26168_v43, %v26169_v54 }
0x2dc2   :  { %v25738_v46 = vpop.f32.mrf.mxu1 }
0x2dc4   :  { %v33992_v31 = vpop.f32.mrf.mxu1 }
0x2dc5   :  { %v26171_v31 = vand.u32 4294901760, %v26170_v40 }
0x2dca   :  { %v25895_v18 = vpop.f32.mrf.mxu1 }
0x2dcb   :  { %v25647_v58 = vpop.f32.mrf.mxu0 }
0x2dcc   :  { %v34014_v52 = vpop.f32.mrf.mxu1  ;;  %v25648_v44 = vadd.f32 %v37621_v30, %v25647_v58 }
0x2dcd   :  { %v33981_v35 = vpop.f32.mrf.mxu0 }
0x2dce   :  { %v25739_v50 = vadd.f32 %v25738_v46, %v25648_v44 }
0x2dd3   :  { %v25818_v61 = vpop.f32.mrf.mxu0 }
0x2dd4   :  { %v26053_v23 = vpop.f32.mrf.mxu1  ;;  %v25819_v62 = vadd.f32 %v25818_v61, %v25739_v50 }
0x2dd5   :  { %v34003_v51 = vpop.f32.mrf.mxu0 }
0x2dd6   :  { %v34036_v45 = vpop.f32.mrf.mxu1  ;;  %v25896_v0 = vadd.f32 %v25895_v18, %v25819_v62 }
0x2ddc   :  { %v25978_v1 = vpop.f32.mrf.mxu0 }
0x2ddd   :  { %v25979_v29 = vadd.f32 %v25978_v1, %v25896_v0 }
0x2dde   :  { %v34025_v8 = vpop.f32.mrf.mxu0 }
0x2ddf   :  { %v26054_v32 = vadd.f32 %v26053_v23, %v25979_v29 }
0x2de1   :  { %34444 = vtanh.f32 %v26054_v32  ;;  %v26647_v32 = vsel %vm29_vm0, %v29299_v25, 0 }
0x2dee   :  { %v34445_v56 = vpop.eup %34444 }
0x2def   :  { %v37697_v34 = vadd.f32 %v34445_v56, %v29296_v48 }
0x2df1   :  { %v26102_v59 = vand.u32 4294901760, %v37697_v34 }
0x2df3   :  { %34037 = vmatprep.subr.mxu0 %v26102_v59  ;;  %v26209_v49 = vsub.f32 %v37697_v34, %v26102_v59 }
0x2df4   :  { %34038 = vmatpush3.msra.mxu0 %v26102_v59 }
0x2df5   :  { %34040 = vmatmul.mubr.f32.vlgmr.msra.gmra.mxu0 %v26151_v60  ;;  %34053 = vmatprep.subr.mxu0 %v26209_v49  ;;  %v26210_v46 = vand.u32 4294901760, %v26209_v49 }
0x2df6   :  { %34054 = vmatpush3.msra.mxu0 %v26209_v49  ;;  %34042 = vmatprep.mubr.f32.mxu0 %v26161_v63 }
0x2df7   :  { %34069 = vmatprep.subr.mxu0 %v26210_v46  ;;  %v26211_v18 = vsub.f32 %v26209_v49, %v26210_v46 }
0x2df9   :  { %34043 = vmatmul.mubr.f32.gmra.mxu0 %v26171_v31  ;;  %v26212_v58 = vand.u32 4294901760, %v26211_v18 }
0x2dfa   :  { %34055 = vmatprep.mubr.f32.mxu0 %v37674_v2 }
0x2dfb   :  { %34045 = vmatprep.subr.mxu1 %v26212_v58 }
0x2dfc   :  { %34046 = vmatpush3.msra.mxu1 %v26212_v58 }
0x2dfd   :  { %34048 = vmatmul.mubr.f32.vlgmr.msra.gmra.mxu1 %v26147_v38  ;;  %34056 = vmatmul.mubr.f32.vlgmr.msra.gmra.mxu0 %v26148_v36 }
0x2dfe   :  { %34061 = vmatprep.subr.mxu1 %v26102_v59  ;;  %34070 = vmatpush3.msra.mxu0 %v26210_v46 }
0x2dff   :  { %34062 = vmatpush3.msra.mxu1 %v26102_v59  ;;  %34050 = vmatprep.mubr.f32.mxu1 %v26157_v39 }
0x2e00   :  { %34077 = vmatprep.subr.mxu1 %v26102_v59  ;;  %34058 = vmatprep.mubr.f32.mxu0 %v26158_v27 }
0x2e01   :  { %34051 = vmatmul.mubr.f32.gmra.mxu1 %v26167_v37  ;;  %34059 = vmatmul.mubr.f32.gmra.mxu0 %v26168_v43 }
0x2e02   :  { %34063 = vmatprep.mubr.f32.mxu1 %v26139_v55  ;;  %34071 = vmatprep.mubr.f32.mxu0 %v37671_v41 }
0x2e03   :  { %34085 = vmatprep.subr.mxu0 %v34480_v3 }
0x2e05   :  { %34064 = vmatmul.mubr.f32.vlgmr.msra.gmra.mxu1 %v26149_v42  ;;  %34072 = vmatmul.mubr.f32.vlgmr.msra.gmra.mxu0 %v26147_v38 }
0x2e06   :  { %34078 = vmatpush3.msra.mxu1 %v26102_v59  ;;  %34066 = vmatprep.mubr.f32.mxu1 %v26159_v47 }
0x2e07   :  { %34074 = vmatprep.mubr.f32.mxu0 %v26157_v39  ;;  %34096 = vmatprep.subr.mxu1 %v34480_v3 }
0x2e09   :  { %34067 = vmatmul.mubr.f32.gmra.mxu1 %v26169_v54  ;;  %34075 = vmatmul.mubr.f32.gmra.mxu0 %v26167_v37 }
0x2e0a   :  { %34079 = vmatprep.mubr.f32.mxu1 %v37671_v41  ;;  %34093 = vmatprep.mubr.msk.f32.mxu0 %vm34481_vm1, %v34480_v3 }
0x2e0d   :  { %34080 = vmatmul.mubr.f32.vlgmr.msra.gmra.mxu1 %v26147_v38 }
0x2e0e   :  { %34082 = vmatprep.mubr.f32.mxu1 %v26157_v39 }
0x2e11   :  { %34083 = vmatmul.mubr.f32.gmra.mxu1 %v26167_v37  ;;  %v37716_v37 = vand.u32 4294901760, %v26647_v32 }
0x2e12   :  { %34104 = vmatprep.mubr.msk.f32.mxu1 %vm34481_vm1, %v34480_v3 }
0x2e13   :  { %v37719_v57 = vsub.f32 %v26647_v32, %v37716_v37 }
0x2eb5   :  { %v34041_v2 = vpop.f32.mrf.mxu0 }
0x2eb7   :  { %v26143_v55 = vpop.f32.mrf.mxu0 }
0x2eb9   :  { %v34044_v52 = vpop.f32.mrf.mxu0 }
0x2ebb   :  { %v26163_v35 = vpop.f32.mrf.mxu0 }
0x2ebd   :  { %v34049_v44 = vpop.f32.mrf.mxu1  ;;  %v34057_v61 = vpop.f32.mrf.mxu0 }
0x2ebe   :  { %v26256_v41 = vadd.f32 %v34049_v44, %v34041_v2  ;;  %v26720_v2 = vand.u32 4294901760, %v37719_v57 }
0x2ebf   :  { %v26249_v23 = vpop.f32.mrf.mxu1  ;;  %v26341_v50 = vpop.f32.mrf.mxu0 }
0x2ec0   :  { %v26250_v1 = vadd.f32 %v26249_v23, %v26143_v55  ;;  %v26349_v8 = vadd.f32 %v34057_v61, %v26256_v41 }
0x2ec1   :  { %v34052_v51 = vpop.f32.mrf.mxu1  ;;  %v34060_v45 = vpop.f32.mrf.mxu0 }
0x2ec2   :  { %v26268_v19 = vadd.f32 %v34052_v51, %v34044_v52  ;;  %v26342_v38 = vadd.f32 %v26341_v50, %v26250_v1  ;;  %v26721_v51 = vsub.f32 %v37719_v57, %v26720_v2 }
0x2ec3   :  { %v26261_v62 = vpop.f32.mrf.mxu1  ;;  %v26355_v0 = vpop.f32.mrf.mxu0 }
0x2ec4   :  { %v26262_v39 = vadd.f32 %v26261_v62, %v26163_v35  ;;  %v26363_v27 = vadd.f32 %v34060_v45, %v26268_v19 }
0x2ec5   :  { %v34065_v7 = vpop.f32.mrf.mxu1  ;;  %v34073_v29 = vpop.f32.mrf.mxu0 }
0x2ec6   :  { %v26445_v24 = vadd.f32 %v34065_v7, %v26349_v8  ;;  %v26356_v48 = vadd.f32 %v26355_v0, %v26262_v39  ;;  %v26722_v7 = vand.u32 4294901760, %v26721_v51 }
0x2ec7   :  { %v26436_v33 = vpop.f32.mrf.mxu1  ;;  %v26534_v20 = vpop.f32.mrf.mxu0 }
0x2ec8   :  { %v26437_v42 = vadd.f32 %v26436_v33, %v26342_v38  ;;  %v26541_v53 = vadd.f32 %v34073_v29, %v26445_v24 }
0x2ec9   :  { %v34068_v36 = vpop.f32.mrf.mxu1  ;;  %v34076_v47 = vpop.f32.mrf.mxu0 }
0x2eca   :  { %v26461_v54 = vadd.f32 %v34068_v36, %v26363_v27  ;;  %v26535_v59 = vadd.f32 %v26534_v20, %v26437_v42 }
0x2ecb   :  { %v26452_v43 = vpop.f32.mrf.mxu1  ;;  %v26546_v63 = vpop.f32.mrf.mxu0 }
0x2ecc   :  { %v26453_v60 = vadd.f32 %v26452_v43, %v26356_v48  ;;  %v26553_v46 = vadd.f32 %v34076_v47, %v26461_v54 }
0x2ecd   :  { %v34081_v56 = vpop.f32.mrf.mxu1 }
0x2ece   :  { %v26631_v40 = vadd.f32 %v34081_v56, %v26541_v53  ;;  %v26547_v55 = vadd.f32 %v26546_v63, %v26453_v60 }
0x2ecf   :  { %v26624_v49 = vpop.f32.mrf.mxu1 }
0x2ed0   :  { %v37721_v31 = vand.u32 4294901760, %v26631_v40  ;;  %v26625_v18 = vadd.f32 %v26624_v49, %v26535_v59 }
0x2ed1   :  { %v34084_v58 = vpop.f32.mrf.mxu1 }
0x2ed2   :  { %v37724_v52 = vand.u32 4294901760, %v26625_v18  ;;  %v26643_v35 = vadd.f32 %v34084_v58, %v26553_v46  ;;  %v26768_v61 = vsub.f32 %v26631_v40, %v37721_v31 }
0x2ed3   :  { %v26636_v44 = vpop.f32.mrf.mxu1 }
0x2ed4   :  { %v37727_v23 = vand.u32 4294901760, %v26643_v35  ;;  %v26637_v50 = vadd.f32 %v26636_v44, %v26547_v55  ;;  %v26775_v45 = vsub.f32 %v26625_v18, %v37724_v52  ;;  %v26769_v0 = vand.u32 4294901760, %v26768_v61  ;;  %v29305_v44 = vld [vmem:[%s38040_s2 + $0x1e0] sm:$0xff] }
0x2ed6   :  { %v26754_v41 = vsub.f32 %v26643_v35, %v37727_v23  ;;  %v37734_v62 = vand.u32 4294901760, %v26637_v50  ;;  %34086 = vmatpush3.msra.mxu0 %v37727_v23  ;;  %v26776_v29 = vand.u32 4294901760, %v26775_v45  ;;  %v26770_v32 = vsub.f32 %v26768_v61, %v26769_v0 }
0x2ed7   :  { %34087 = vmatprep.subr.mxu0 %v34480_v3 }
0x2ed8   :  { %v26755_v25 = vand.u32 4294901760, %v26754_v41  ;;  %v26761_v1 = vsub.f32 %v26637_v50, %v37734_v62  ;;  %34088 = vmatpush3.msra.mxu0 %v37734_v62  ;;  %v26777_v38 = vsub.f32 %v26775_v45, %v26776_v29  ;;  %v26771_v24 = vand.u32 4294901760, %v26770_v32 }
0x2ed9   :  { %34089 = vmatprep.subr.mxu0 %v34480_v3 }
0x2eda   :  { %v26756_v8 = vsub.f32 %v26754_v41, %v26755_v25  ;;  %v26762_v19 = vand.u32 4294901760, %v26761_v1  ;;  %34090 = vmatpush3.msra.mxu0 %v37721_v31  ;;  %v26778_v36 = vand.u32 4294901760, %v26777_v38 }
0x2edb   :  { %34091 = vmatprep.subr.mxu0 %v34480_v3 }
0x2edc   :  { %v26763_v33 = vsub.f32 %v26761_v1, %v26762_v19  ;;  %34092 = vmatpush3.msra.mxu0 %v37724_v52  ;;  %v26757_v20 = vand.u32 4294901760, %v26756_v8 }
0x2edd   :  { %34107 = vmatprep.subr.mxu0 %v34480_v3  ;;  %34094 = vmatmul.mubr.f32.vlgmr.msra.gmra.mxu0 %v26722_v7 }
0x2ede   :  { %34097 = vmatpush3.msra.mxu1 %v26757_v20  ;;  %34108 = vmatpush3.msra.mxu0 %v26754_v41  ;;  %v26764_v39 = vand.u32 4294901760, %v26763_v33 }
0x2edf   :  { %34098 = vmatprep.subr.mxu1 %v34480_v3  ;;  %34109 = vmatprep.subr.mxu0 %v34480_v3 }
0x2ee0   :  { %34099 = vmatpush3.msra.mxu1 %v26764_v39  ;;  %34110 = vmatpush3.msra.mxu0 %v26761_v1 }
0x2ee1   :  { %34100 = vmatprep.subr.mxu1 %v34480_v3  ;;  %34111 = vmatprep.subr.mxu0 %v34480_v3 }
0x2ee2   :  { %34101 = vmatpush3.msra.mxu1 %v26771_v24  ;;  %34112 = vmatpush3.msra.mxu0 %v26768_v61  ;;  %v27626_v61 = vsel %vm551_vm2, %v29305_v44, 0 }
0x2ee3   :  { %34102 = vmatprep.subr.mxu1 %v34480_v3  ;;  %34113 = vmatprep.subr.mxu0 %v34480_v3 }
0x2ee4   :  { %34103 = vmatpush3.msra.mxu1 %v26778_v36  ;;  %34114 = vmatpush3.msra.mxu0 %v26775_v45  ;;  %v29306_v36 = vld [vmem:[%s38040_s2 + $0x1e8] sm:$0xff] }
0x2ee5   :  { %34105 = vmatmul.mubr.f32.vlgmr.msra.gmra.mxu1 %v37716_v37  ;;  %34115 = vmatprep.mubr.msk.f32.mxu0 %vm34481_vm1, %v34480_v3 }
0x2ee6   :  { %34118 = vmatprep.subr.mxu1 %v34480_v3  ;;  %34129 = vmatprep.subr.mxu0 %v34480_v3 }
0x2ee7   :  { %34116 = vmatmul.mubr.f32.vlgmr.msra.gmra.mxu0 %v37719_v57  ;;  %34119 = vmatpush3.msra.mxu1 %v37727_v23 }
0x2ee8   :  { %34130 = vmatpush3.msra.mxu0 %v26755_v25  ;;  %34120 = vmatprep.subr.mxu1 %v34480_v3 }
0x2ee9   :  { %34131 = vmatprep.subr.mxu0 %v34480_v3  ;;  %34121 = vmatpush3.msra.mxu1 %v37734_v62 }
0x2eea   :  { %34132 = vmatpush3.msra.mxu0 %v26762_v19  ;;  %34122 = vmatprep.subr.mxu1 %v34480_v3 }
0x2eeb   :  { %34133 = vmatprep.subr.mxu0 %v34480_v3  ;;  %34123 = vmatpush3.msra.mxu1 %v37721_v31 }
0x2eec   :  { %34134 = vmatpush3.msra.mxu0 %v26769_v0  ;;  %34124 = vmatprep.subr.mxu1 %v34480_v3 }
0x2eed   :  { %34135 = vmatprep.subr.mxu0 %v34480_v3  ;;  %34125 = vmatpush3.msra.mxu1 %v37724_v52 }
0x2eee   :  { %34126 = vmatprep.mubr.msk.f32.mxu1 %vm34481_vm1, %v34480_v3  ;;  %34136 = vmatpush3.msra.mxu0 %v26776_v29 }
0x2eef   :  { %34127 = vmatmul.mubr.f32.vlgmr.msra.gmra.mxu1 %v26720_v2  ;;  %34140 = vmatprep.subr.mxu1 %v34480_v3 }
0x2ef0   :  { %34137 = vmatprep.mubr.msk.f32.mxu0 %vm34481_vm1, %v34480_v3  ;;  %34141 = vmatpush3.msra.mxu1 %v37727_v23  ;;  %v37851_v23 = vand.u32 4294901760, %v27626_v61 }
0x2ef1   :  { %34138 = vmatmul.mubr.f32.vlgmr.msra.gmra.mxu0 %v37716_v37  ;;  %34142 = vmatprep.subr.mxu1 %v34480_v3 }
0x2ef2   :  { %34143 = vmatpush3.msra.mxu1 %v37734_v62  ;;  %34148 = vmatprep.mubr.msk.f32.mxu1 %vm34481_vm1, %v34480_v3  ;;  %v37854_v50 = vsub.f32 %v27626_v61, %v37851_v23 }
0x2ef3   :  { %34144 = vmatprep.subr.mxu1 %v34480_v3  ;;  %34151 = vmatprep.subr.mxu0 %v34480_v3 }
0x2ef4   :  { %34145 = vmatpush3.msra.mxu1 %v37721_v31  ;;  %34152 = vmatpush3.msra.mxu0 %v34531_v4  ;;  %v27705_v51 = vand.u32 4294901760, %v37854_v50 }
0x2ef5   :  { %34146 = vmatprep.subr.mxu1 %v34480_v3  ;;  %34153 = vmatprep.subr.mxu0 %v34480_v3 }
0x2ef6   :  { %34147 = vmatpush3.msra.mxu1 %v37724_v52  ;;  %34154 = vmatpush3.msra.mxu0 %v34533_v5  ;;  %v27706_v45 = vsub.f32 %v37854_v50, %v27705_v51 }
0x2ef7   :  { %34149 = vmatmul.mubr.f32.vlgmr.msra.gmra.mxu1 %v37716_v37  ;;  %34162 = vmatprep.subr.mxu1 %v34480_v3 }
0x2ef8   :  { %34163 = vmatpush3.msra.mxu1 %v34586_v21  ;;  %34170 = vmatprep.mubr.msk.f32.mxu1 %vm34481_vm1, %v34480_v3  ;;  %v27707_v41 = vand.u32 4294901760, %v27706_v45 }
0x2ef9   :  { %34164 = vmatprep.subr.mxu1 %v34480_v3  ;;  %34155 = vmatprep.subr.mxu0 %v34480_v3 }
0x2efa   :  { %34165 = vmatpush3.msra.mxu1 %v34588_v22  ;;  %34156 = vmatpush3.msra.mxu0 %v34535_v6 }
0x2efb   :  { %34166 = vmatprep.subr.mxu1 %v34480_v3  ;;  %34157 = vmatprep.subr.mxu0 %v34480_v3 }
0x2efc   :  { %34167 = vmatpush3.msra.mxu1 %v34596_v26  ;;  %34158 = vmatpush3.msra.mxu0 %v34543_v9 }
0x2efd   :  { %34168 = vmatprep.subr.mxu1 %v34480_v3  ;;  %34159 = vmatprep.mubr.msk.f32.mxu0 %vm34481_vm1, %v34480_v3 }
0x2efe   :  { %34169 = vmatpush3.msra.mxu1 %v34600_v28  ;;  %34173 = vmatprep.subr.mxu0 %v34480_v3 }
0x2eff   :  { %34184 = vmatprep.subr.mxu1 %v34480_v3 }
0x2f9d   :  { %v26724_v37 = vpop.f32.mrf.mxu0 }
0x2f9f   :  { %v34095_v27 = vpop.f32.mrf.mxu0 }
0x2fa0   :  { %v29307_v27 = vld [vmem:[%s38040_s2 + $0x1f0] sm:$0xff] }
0x2fa5   :  { %v26815_v42 = vpop.f32.mrf.mxu1 }
0x2fa6   :  { %v26816_v53 = vadd.f32 %v26815_v42, %v26724_v37 }
0x2fa7   :  { %v34106_v43 = vpop.f32.mrf.mxu1  ;;  %v26895_v47 = vpop.f32.mrf.mxu0 }
0x2fa8   :  { %v26896_v56 = vadd.f32 %v26895_v47, %v26816_v53  ;;  %v29308_v53 = vld [vmem:[%s38040_s2 + $0x1f8] sm:$0xff] }
0x2fa9   :  { %v34117_v48 = vpop.f32.mrf.mxu0 }
0x2faa   :  { %v27632_v48 = vsel %vm551_vm2, %v29307_v27, 0 }
0x2faf   :  { %v26972_v54 = vpop.f32.mrf.mxu1 }
0x2fb0   :  { %v26973_v60 = vadd.f32 %v26972_v54, %v26896_v56  ;;  %v27723_v56 = vand.u32 4294901760, %v27632_v48 }
0x2fb1   :  { %v34128_v57 = vpop.f32.mrf.mxu1  ;;  %v27055_v59 = vpop.f32.mrf.mxu0 }
0x2fb2   :  { %v27056_v63 = vadd.f32 %v27055_v59, %v26973_v60  ;;  %v27635_v57 = vsel %vm551_vm2, %v29308_v53, 0 }
0x2fb3   :  { %v34139_v40 = vpop.f32.mrf.mxu0  ;;  %v27733_v60 = vand.u32 4294901760, %v27635_v57 }
0x2fb4   :  { %v27724_v40 = vsub.f32 %v27632_v48, %v27723_v56 }
0x2fb7   :  { %v27130_v49 = vpop.f32.mrf.mxu1 }
0x2fb8   :  { %v27131_v46 = vadd.f32 %v27130_v49, %v27056_v63  ;;  %v27734_v49 = vsub.f32 %v27635_v57, %v27733_v60 }
0x2fb9   :  { %v34150_v31 = vpop.f32.mrf.mxu1 }
0x2fba   :  { %v27134_v18 = vsub.f32 %v37697_v34, %v27131_v46  ;;  %v27725_v46 = vand.u32 4294901760, %v27724_v40  ;;  %v29297_v31 = vld [vmem:[%s38038_s0 + $0xb0] sm:$0xff] }
0x2fbc   :  { %v27136_v58 = vsel %vm29_vm0, %v27134_v18, 0 }
0x2fbd   :  { %v27207_v2 = vand.u32 4294901760, %v27136_v58 }
0x2fbf   :  { %v27208_v55 = vsub.f32 %v27136_v58, %v27207_v2  ;;  %34171 = vmatmul.mubr.f32.vlgmr.msra.gmra.mxu1 %v27207_v2  ;;  %v27735_v58 = vand.u32 4294901760, %v27734_v49 }
0x2fc0   :  { %34185 = vmatpush3.msra.mxu1 %v34531_v4  ;;  %34192 = vmatprep.mubr.msk.f32.mxu1 %vm34481_vm1, %v34480_v3 }
0x2fc1   :  { %v27209_v52 = vand.u32 4294901760, %v27208_v55  ;;  %34186 = vmatprep.subr.mxu1 %v34480_v3  ;;  %v27736_v44 = vsub.f32 %v27734_v49, %v27735_v58 }
0x2fc2   :  { %34187 = vmatpush3.msra.mxu1 %v34533_v5 }
0x2fc3   :  { %v27210_v35 = vsub.f32 %v27208_v55, %v27209_v52  ;;  %34188 = vmatprep.subr.mxu1 %v34480_v3 }
0x2fc4   :  { %34189 = vmatpush3.msra.mxu1 %v34535_v6 }
0x2fc5   :  { %v27211_v34 = vand.u32 4294901760, %v27210_v35  ;;  %34190 = vmatprep.subr.mxu1 %v34480_v3 }
0x2fc6   :  { %34191 = vmatpush3.msra.mxu1 %v34543_v9 }
0x2fc7   :  { %34193 = vmatmul.mubr.f32.vlgmr.msra.gmra.mxu1 %v27209_v52  ;;  %34206 = vmatprep.subr.mxu1 %v34480_v3 }
0x2fc8   :  { %34160 = vmatmul.mubr.f32.vlgmr.msra.gmra.mxu0 %v27211_v34  ;;  %34207 = vmatpush3.msra.mxu1 %v34531_v4 }
0x2fc9   :  { %34174 = vmatpush3.msra.mxu0 %v34552_v10  ;;  %34208 = vmatprep.subr.mxu1 %v34480_v3 }
0x2fca   :  { %34175 = vmatprep.subr.mxu0 %v34480_v3  ;;  %34209 = vmatpush3.msra.mxu1 %v34533_v5 }
0x2fcb   :  { %34176 = vmatpush3.msra.mxu0 %v34555_v11  ;;  %34210 = vmatprep.subr.mxu1 %v34480_v3 }
0x2fcc   :  { %34177 = vmatprep.subr.mxu0 %v34480_v3  ;;  %34211 = vmatpush3.msra.mxu1 %v34535_v6 }
0x2fcd   :  { %34178 = vmatpush3.msra.mxu0 %v34558_v12  ;;  %34212 = vmatprep.subr.mxu1 %v34480_v3 }
0x2fce   :  { %34179 = vmatprep.subr.mxu0 %v34480_v3  ;;  %34181 = vmatprep.mubr.msk.f32.mxu0 %vm34481_vm1, %v34480_v3 }
0x2fcf   :  { %34180 = vmatpush3.msra.mxu0 %v34562_v13  ;;  %34213 = vmatpush3.msra.mxu1 %v34543_v9 }
0x2fd0   :  { %34214 = vmatprep.mubr.msk.f32.mxu1 %vm34481_vm1, %v34480_v3  ;;  %34182 = vmatmul.mubr.f32.vlgmr.msra.gmra.mxu0 %v27208_v55  ;;  %v27726_v55 = vsub.f32 %v27724_v40, %v27725_v46 }
0x2fd1   :  { %34195 = vmatprep.subr.mxu0 %v34480_v3  ;;  %34215 = vmatmul.mubr.f32.vlgmr.msra.gmra.mxu1 %v27207_v2 }
0x2fd2   :  { %34196 = vmatpush3.msra.mxu0 %v34565_v14  ;;  %34203 = vmatprep.mubr.msk.f32.mxu0 %vm34481_vm1, %v34480_v3  ;;  %v27727_v61 = vand.u32 4294901760, %v27726_v55 }
0x2fd3   :  { %34197 = vmatprep.subr.mxu0 %v34480_v3  ;;  %34227 = vmatprep.mubr.f32.mxu1 %v37851_v23 }
0x2fd4   :  { %34198 = vmatpush3.msra.mxu0 %v34569_v15 }
0x2fd5   :  { %34199 = vmatprep.subr.mxu0 %v34480_v3 }
0x2fd6   :  { %34200 = vmatpush3.msra.mxu0 %v34572_v16 }
0x2fd7   :  { %34201 = vmatprep.subr.mxu0 %v34480_v3 }
0x2fd8   :  { %34202 = vmatpush3.msra.mxu0 %v34576_v17 }
0x2fd9   :  { %34204 = vmatmul.mubr.f32.vlgmr.msra.gmra.mxu0 %v27207_v2 }
0x2fda   :  { %34219 = vmatprep.mubr.f32.mxu0 %v27707_v41 }
0x307f   :  { %v27304_v62 = vpop.f32.mrf.mxu1 }
0x3081   :  { %v34172_v0 = vpop.f32.mrf.mxu1 }
0x3087   :  { %v27461_v25 = vpop.f32.mrf.mxu1 }
0x3088   :  { %v27213_v1 = vpop.f32.mrf.mxu0 }
0x3089   :  { %v34194_v7 = vpop.f32.mrf.mxu1  ;;  %v27214_v8 = vadd.f32 %v37621_v30, %v27213_v1  ;;  %v27629_v30 = vsel %vm551_vm2, %v29306_v36, 0 }
0x308a   :  { %v34161_v29 = vpop.f32.mrf.mxu0  ;;  %v27713_v54 = vand.u32 4294901760, %v27629_v30 }
0x308b   :  { %v27305_v33 = vadd.f32 %v27304_v62, %v27214_v8  ;;  %v27737_v62 = vand.u32 4294901760, %v27736_v44 }
0x308c   :  { %v27714_v59 = vsub.f32 %v27629_v30, %v27713_v54 }
0x308e   :  { %v27715_v63 = vand.u32 4294901760, %v27714_v59 }
0x3090   :  { %v27384_v19 = vpop.f32.mrf.mxu0  ;;  %v27716_v18 = vsub.f32 %v27714_v59, %v27715_v63 }
0x3091   :  { %v27619_v32 = vpop.f32.mrf.mxu1  ;;  %v27385_v39 = vadd.f32 %v27384_v19, %v27305_v33 }
0x3092   :  { %v34183_v20 = vpop.f32.mrf.mxu0  ;;  %v27717_v34 = vand.u32 4294901760, %v27716_v18 }
0x3093   :  { %v34216_v38 = vpop.f32.mrf.mxu1  ;;  %v27462_v24 = vadd.f32 %v27461_v25, %v27385_v39 }
0x3099   :  { %v27544_v37 = vpop.f32.mrf.mxu0 }
0x309a   :  { %v27545_v42 = vadd.f32 %v27544_v37, %v27462_v24  ;;  %v29300_v24 = vld [vmem:[%s38039_s1 + $0x78] sm:$0xff] }
0x309b   :  { %v34205_v43 = vpop.f32.mrf.mxu0  ;;  %v28213_v30 = vsel %vm29_vm0, %v29300_v24, 0 }
0x309c   :  { %v27620_v47 = vadd.f32 %v27619_v32, %v27545_v42 }
0x309e   :  { %34446 = vtanh.f32 %v27620_v47 }
0x30ab   :  { %v34447_v2 = vpop.eup %34446 }
0x30ac   :  { %v37877_v52 = vadd.f32 %v34447_v2, %v29297_v31 }
0x30ae   :  { %v27668_v35 = vand.u32 4294901760, %v37877_v52 }
0x30b0   :  { %34217 = vmatprep.subr.mxu0 %v27668_v35  ;;  %v27775_v45 = vsub.f32 %v37877_v52, %v27668_v35 }
0x30b1   :  { %34218 = vmatpush3.msra.mxu0 %v27668_v35 }
0x30b2   :  { %34220 = vmatmul.mubr.f32.vlgmr.msra.gmra.mxu0 %v27717_v34  ;;  %34233 = vmatprep.subr.mxu0 %v27775_v45  ;;  %v27776_v41 = vand.u32 4294901760, %v27775_v45 }
0x30b3   :  { %34234 = vmatpush3.msra.mxu0 %v27775_v45  ;;  %34222 = vmatprep.mubr.f32.mxu0 %v27727_v61 }
0x30b4   :  { %34249 = vmatprep.subr.mxu0 %v27776_v41  ;;  %v27777_v0 = vsub.f32 %v27775_v45, %v27776_v41 }
0x30b6   :  { %34223 = vmatmul.mubr.f32.gmra.mxu0 %v27737_v62  ;;  %v27778_v25 = vand.u32 4294901760, %v27777_v0 }
0x30b7   :  { %34235 = vmatprep.mubr.f32.mxu0 %v37854_v50 }
0x30b8   :  { %34225 = vmatprep.subr.mxu1 %v27778_v25 }
0x30b9   :  { %34226 = vmatpush3.msra.mxu1 %v27778_v25 }
0x30ba   :  { %34228 = vmatmul.mubr.f32.vlgmr.msra.gmra.mxu1 %v27713_v54  ;;  %34236 = vmatmul.mubr.f32.vlgmr.msra.gmra.mxu0 %v27714_v59  ;;  %v37896_v59 = vand.u32 4294901760, %v28213_v30 }
0x30bb   :  { %34241 = vmatprep.subr.mxu1 %v27668_v35  ;;  %34250 = vmatpush3.msra.mxu0 %v27776_v41 }
0x30bc   :  { %34242 = vmatpush3.msra.mxu1 %v27668_v35  ;;  %34230 = vmatprep.mubr.f32.mxu1 %v27723_v56  ;;  %v37899_v2 = vsub.f32 %v28213_v30, %v37896_v59 }
0x30bd   :  { %34257 = vmatprep.subr.mxu1 %v27668_v35  ;;  %34238 = vmatprep.mubr.f32.mxu0 %v27724_v40 }
0x30be   :  { %34231 = vmatmul.mubr.f32.gmra.mxu1 %v27733_v60  ;;  %34239 = vmatmul.mubr.f32.gmra.mxu0 %v27734_v49  ;;  %v28286_v25 = vand.u32 4294901760, %v37899_v2 }
0x30bf   :  { %34243 = vmatprep.mubr.f32.mxu1 %v27705_v51  ;;  %34251 = vmatprep.mubr.f32.mxu0 %v37851_v23 }
0x30c0   :  { %34265 = vmatprep.subr.mxu0 %v34480_v3 }
0x30c2   :  { %34244 = vmatmul.mubr.f32.vlgmr.msra.gmra.mxu1 %v27715_v63  ;;  %34252 = vmatmul.mubr.f32.vlgmr.msra.gmra.mxu0 %v27713_v54 }
0x30c3   :  { %34258 = vmatpush3.msra.mxu1 %v27668_v35  ;;  %34246 = vmatprep.mubr.f32.mxu1 %v27725_v46 }
0x30c4   :  { %34254 = vmatprep.mubr.f32.mxu0 %v27723_v56  ;;  %34276 = vmatprep.subr.mxu1 %v34480_v3 }
0x30c6   :  { %34247 = vmatmul.mubr.f32.gmra.mxu1 %v27735_v58  ;;  %34255 = vmatmul.mubr.f32.gmra.mxu0 %v27733_v60 }
0x30c7   :  { %34259 = vmatprep.mubr.f32.mxu1 %v37851_v23  ;;  %34273 = vmatprep.mubr.msk.f32.mxu0 %vm34481_vm1, %v34480_v3 }
0x30ca   :  { %34260 = vmatmul.mubr.f32.vlgmr.msra.gmra.mxu1 %v27713_v54 }
0x30cb   :  { %34262 = vmatprep.mubr.f32.mxu1 %v27723_v56 }
0x30ce   :  { %34263 = vmatmul.mubr.f32.gmra.mxu1 %v27733_v60 }
0x30cf   :  { %34284 = vmatprep.mubr.msk.f32.mxu1 %vm34481_vm1, %v34480_v3 }
0x3172   :  { %v34221_v50 = vpop.f32.mrf.mxu0 }
0x3174   :  { %v27709_v51 = vpop.f32.mrf.mxu0 }
0x3176   :  { %v34224_v1 = vpop.f32.mrf.mxu0 }
0x3178   :  { %v27729_v7 = vpop.f32.mrf.mxu0 }
0x317a   :  { %v34229_v29 = vpop.f32.mrf.mxu1  ;;  %v34237_v8 = vpop.f32.mrf.mxu0 }
0x317b   :  { %v27822_v23 = vadd.f32 %v34229_v29, %v34221_v50 }
0x317c   :  { %v27815_v19 = vpop.f32.mrf.mxu1  ;;  %v27907_v32 = vpop.f32.mrf.mxu0 }
0x317d   :  { %v27816_v36 = vadd.f32 %v27815_v19, %v27709_v51  ;;  %v27915_v42 = vadd.f32 %v34237_v8, %v27822_v23 }
0x317e   :  { %v34232_v33 = vpop.f32.mrf.mxu1  ;;  %v34240_v20 = vpop.f32.mrf.mxu0 }
0x317f   :  { %v27834_v43 = vadd.f32 %v34232_v33, %v34224_v1  ;;  %v27908_v53 = vadd.f32 %v27907_v32, %v27816_v36  ;;  %v28287_v32 = vsub.f32 %v37899_v2, %v28286_v25 }
0x3180   :  { %v27827_v38 = vpop.f32.mrf.mxu1  ;;  %v27921_v39 = vpop.f32.mrf.mxu0 }
0x3181   :  { %v27828_v54 = vadd.f32 %v27827_v38, %v27729_v7  ;;  %v27929_v60 = vadd.f32 %v34240_v20, %v27834_v43  ;;  %v28288_v36 = vand.u32 4294901760, %v28287_v32 }
0x3182   :  { %v34245_v37 = vpop.f32.mrf.mxu1  ;;  %v34253_v27 = vpop.f32.mrf.mxu0 }
0x3183   :  { %v28011_v56 = vadd.f32 %v34245_v37, %v27915_v42  ;;  %v27922_v46 = vadd.f32 %v27921_v39, %v27828_v54 }
0x3184   :  { %v28002_v47 = vpop.f32.mrf.mxu1  ;;  %v28100_v48 = vpop.f32.mrf.mxu0 }
0x3185   :  { %v28003_v40 = vadd.f32 %v28002_v47, %v27908_v53  ;;  %v28107_v31 = vadd.f32 %v34253_v27, %v28011_v56 }
0x3186   :  { %v34248_v57 = vpop.f32.mrf.mxu1  ;;  %v34256_v49 = vpop.f32.mrf.mxu0 }
0x3187   :  { %v28027_v18 = vadd.f32 %v34248_v57, %v27929_v60  ;;  %v28101_v55 = vadd.f32 %v28100_v48, %v28003_v40 }
0x3188   :  { %v28018_v63 = vpop.f32.mrf.mxu1  ;;  %v28112_v44 = vpop.f32.mrf.mxu0 }
0x3189   :  { %v28019_v35 = vadd.f32 %v28018_v63, %v27922_v46  ;;  %v28119_v45 = vadd.f32 %v34256_v49, %v28027_v18 }
0x318a   :  { %v34261_v58 = vpop.f32.mrf.mxu1 }
0x318b   :  { %v28197_v34 = vadd.f32 %v34261_v58, %v28107_v31  ;;  %v28113_v50 = vadd.f32 %v28112_v44, %v28019_v35 }
0x318c   :  { %v28190_v61 = vpop.f32.mrf.mxu1 }
0x318d   :  { %v37901_v41 = vand.u32 4294901760, %v28197_v34  ;;  %v28191_v62 = vadd.f32 %v28190_v61, %v28101_v55 }
0x318e   :  { %v34264_v0 = vpop.f32.mrf.mxu1 }
0x318f   :  { %v37904_v51 = vand.u32 4294901760, %v28191_v62  ;;  %v28209_v1 = vadd.f32 %v34264_v0, %v28119_v45  ;;  %v28334_v29 = vsub.f32 %v28197_v34, %v37901_v41 }
0x3190   :  { %v28202_v7 = vpop.f32.mrf.mxu1 }
0x3191   :  { %v37907_v8 = vand.u32 4294901760, %v28209_v1  ;;  %v28203_v19 = vadd.f32 %v28202_v7, %v28113_v50  ;;  %v28341_v33 = vsub.f32 %v28191_v62, %v37904_v51  ;;  %v28335_v38 = vand.u32 4294901760, %v28334_v29 }
0x3193   :  { %v28320_v20 = vsub.f32 %v28209_v1, %v37907_v8  ;;  %v37914_v23 = vand.u32 4294901760, %v28203_v19  ;;  %34266 = vmatpush3.msra.mxu0 %v37907_v8  ;;  %v28342_v37 = vand.u32 4294901760, %v28341_v33  ;;  %v28336_v43 = vsub.f32 %v28334_v29, %v28335_v38 }
0x3194   :  { %34267 = vmatprep.subr.mxu0 %v34480_v3 }
0x3195   :  { %v28321_v39 = vand.u32 4294901760, %v28320_v20  ;;  %v28327_v24 = vsub.f32 %v28203_v19, %v37914_v23  ;;  %34268 = vmatpush3.msra.mxu0 %v37914_v23  ;;  %v28343_v48 = vsub.f32 %v28341_v33, %v28342_v37  ;;  %v28337_v54 = vand.u32 4294901760, %v28336_v43 }
0x3196   :  { %34269 = vmatprep.subr.mxu0 %v34480_v3 }
0x3197   :  { %v28322_v27 = vsub.f32 %v28320_v20, %v28321_v39  ;;  %v28328_v42 = vand.u32 4294901760, %v28327_v24  ;;  %34270 = vmatpush3.msra.mxu0 %v37901_v41  ;;  %v28344_v56 = vand.u32 4294901760, %v28343_v48 }
0x3198   :  { %34271 = vmatprep.subr.mxu0 %v34480_v3 }
0x3199   :  { %v28329_v30 = vsub.f32 %v28327_v24, %v28328_v42  ;;  %34272 = vmatpush3.msra.mxu0 %v37904_v51  ;;  %v28323_v47 = vand.u32 4294901760, %v28322_v27 }
0x319a   :  { %34287 = vmatprep.subr.mxu0 %v34480_v3  ;;  %34274 = vmatmul.mubr.f32.vlgmr.msra.gmra.mxu0 %v28288_v36 }
0x319b   :  { %34277 = vmatpush3.msra.mxu1 %v28323_v47  ;;  %34288 = vmatpush3.msra.mxu0 %v28320_v20  ;;  %v28330_v53 = vand.u32 4294901760, %v28329_v30 }
0x319c   :  { %34278 = vmatprep.subr.mxu1 %v34480_v3  ;;  %34289 = vmatprep.subr.mxu0 %v34480_v3 }
0x319d   :  { %34279 = vmatpush3.msra.mxu1 %v28330_v53  ;;  %34290 = vmatpush3.msra.mxu0 %v28327_v24 }
0x319e   :  { %34280 = vmatprep.subr.mxu1 %v34480_v3  ;;  %34291 = vmatprep.subr.mxu0 %v34480_v3 }
0x319f   :  { %34281 = vmatpush3.msra.mxu1 %v28337_v54  ;;  %34292 = vmatpush3.msra.mxu0 %v28334_v29  ;;  %v29298_v29 = vld [vmem:[%s38038_s0 + $0xb8] sm:$0xff] }
0x31a0   :  { %34282 = vmatprep.subr.mxu1 %v34480_v3  ;;  %34293 = vmatprep.subr.mxu0 %v34480_v3 }
0x31a1   :  { %34283 = vmatpush3.msra.mxu1 %v28344_v56  ;;  %34294 = vmatpush3.msra.mxu0 %v28341_v33 }
0x31a2   :  { %34295 = vmatprep.mubr.msk.f32.mxu0 %vm34481_vm1, %v34480_v3  ;;  %34298 = vmatprep.subr.mxu1 %v34480_v3 }
0x31a3   :  { %34309 = vmatprep.subr.mxu0 %v34480_v3  ;;  %34285 = vmatmul.mubr.f32.vlgmr.msra.gmra.mxu1 %v37896_v59 }
0x31a4   :  { %34296 = vmatmul.mubr.f32.vlgmr.msra.gmra.mxu0 %v37899_v2  ;;  %34299 = vmatpush3.msra.mxu1 %v37907_v8 }
0x31a5   :  { %34310 = vmatpush3.msra.mxu0 %v28321_v39  ;;  %34300 = vmatprep.subr.mxu1 %v34480_v3 }
0x31a6   :  { %34311 = vmatprep.subr.mxu0 %v34480_v3  ;;  %34301 = vmatpush3.msra.mxu1 %v37914_v23 }
0x31a7   :  { %34312 = vmatpush3.msra.mxu0 %v28328_v42  ;;  %34302 = vmatprep.subr.mxu1 %v34480_v3 }
0x31a8   :  { %34313 = vmatprep.subr.mxu0 %v34480_v3  ;;  %34303 = vmatpush3.msra.mxu1 %v37901_v41 }
0x31a9   :  { %34314 = vmatpush3.msra.mxu0 %v28335_v38  ;;  %34304 = vmatprep.subr.mxu1 %v34480_v3 }
0x31aa   :  { %34315 = vmatprep.subr.mxu0 %v34480_v3  ;;  %34305 = vmatpush3.msra.mxu1 %v37904_v51 }
0x31ab   :  { %34306 = vmatprep.mubr.msk.f32.mxu1 %vm34481_vm1, %v34480_v3  ;;  %34316 = vmatpush3.msra.mxu0 %v28342_v37 }
0x31ac   :  { %34307 = vmatmul.mubr.f32.vlgmr.msra.gmra.mxu1 %v28286_v25  ;;  %34320 = vmatprep.subr.mxu1 %v34480_v3 }
0x31ad   :  { %34317 = vmatprep.mubr.msk.f32.mxu0 %vm34481_vm1, %v34480_v3  ;;  %34321 = vmatpush3.msra.mxu1 %v37907_v8 }
0x31ae   :  { %34318 = vmatmul.mubr.f32.vlgmr.msra.gmra.mxu0 %v37896_v59  ;;  %34322 = vmatprep.subr.mxu1 %v34480_v3 }
0x31af   :  { %34323 = vmatpush3.msra.mxu1 %v37914_v23  ;;  %34328 = vmatprep.mubr.msk.f32.mxu1 %vm34481_vm1, %v34480_v3 }
0x31b0   :  { %34324 = vmatprep.subr.mxu1 %v34480_v3  ;;  %34331 = vmatprep.subr.mxu0 %v34480_v3 }
0x31b1   :  { %34325 = vmatpush3.msra.mxu1 %v37901_v41  ;;  %34332 = vmatpush3.msra.mxu0 %v34531_v4 }
0x31b2   :  { %34326 = vmatprep.subr.mxu1 %v34480_v3  ;;  %34333 = vmatprep.subr.mxu0 %v34480_v3 }
0x31b3   :  { %34327 = vmatpush3.msra.mxu1 %v37904_v51  ;;  %34334 = vmatpush3.msra.mxu0 %v34533_v5 }
0x31b4   :  { %34329 = vmatmul.mubr.f32.vlgmr.msra.gmra.mxu1 %v37896_v59  ;;  %34342 = vmatprep.subr.mxu1 %v34480_v3 }
0x31b5   :  { %34343 = vmatpush3.msra.mxu1 %v34586_v21  ;;  %34350 = vmatprep.mubr.msk.f32.mxu1 %vm34481_vm1, %v34480_v3 }
0x31b6   :  { %34344 = vmatprep.subr.mxu1 %v34480_v3  ;;  %34335 = vmatprep.subr.mxu0 %v34480_v3 }
0x31b7   :  { %34345 = vmatpush3.msra.mxu1 %v34588_v22  ;;  %34336 = vmatpush3.msra.mxu0 %v34535_v6 }
0x31b8   :  { %34346 = vmatprep.subr.mxu1 %v34480_v3  ;;  %34337 = vmatprep.subr.mxu0 %v34480_v3 }
0x31b9   :  { %34347 = vmatpush3.msra.mxu1 %v34596_v26  ;;  %34338 = vmatpush3.msra.mxu0 %v34543_v9 }
0x31ba   :  { %34348 = vmatprep.subr.mxu1 %v34480_v3  ;;  %34339 = vmatprep.mubr.msk.f32.mxu0 %vm34481_vm1, %v34480_v3 }
0x31bb   :  { %34349 = vmatpush3.msra.mxu1 %v34600_v28  ;;  %34353 = vmatprep.subr.mxu0 %v34480_v3 }
0x31bc   :  { %34364 = vmatprep.subr.mxu1 %v34480_v3 }
0x325a   :  { %v28290_v21 = vpop.f32.mrf.mxu0 }
0x325c   :  { %v34275_v22 = vpop.f32.mrf.mxu0 }
0x3263   :  { %v28381_v57 = vpop.f32.mrf.mxu1 }
0x3264   :  { %v28461_v59 = vpop.f32.mrf.mxu0  ;;  %v28382_v26 = vadd.f32 %v28381_v57, %v28290_v21 }
0x3265   :  { %v34286_v60 = vpop.f32.mrf.mxu1 }
0x3266   :  { %v34297_v40 = vpop.f32.mrf.mxu0  ;;  %v28462_v49 = vadd.f32 %v28461_v59, %v28382_v26 }
0x326c   :  { %v28538_v63 = vpop.f32.mrf.mxu1 }
0x326d   :  { %v28539_v18 = vadd.f32 %v28538_v63, %v28462_v49 }
0x326e   :  { %v28621_v46 = vpop.f32.mrf.mxu0  ;;  %v34308_v31 = vpop.f32.mrf.mxu1 }
0x326f   :  { %v28622_v2 = vadd.f32 %v28621_v46, %v28539_v18 }
0x3270   :  { %v34319_v58 = vpop.f32.mrf.mxu0 }
0x3274   :  { %v28696_v55 = vpop.f32.mrf.mxu1 }
0x3275   :  { %v28697_v28 = vadd.f32 %v28696_v55, %v28622_v2 }
0x3276   :  { %v34330_v35 = vpop.f32.mrf.mxu1 }
0x3277   :  { %v28700_v34 = vsub.f32 %v37877_v52, %v28697_v28 }
0x3279   :  { %v28702_v44 = vsel %vm29_vm0, %v28700_v34, 0 }
0x327a   :  { %v28773_v61 = vand.u32 4294901760, %v28702_v44 }
0x327c   :  { %v28774_v45 = vsub.f32 %v28702_v44, %v28773_v61  ;;  %34351 = vmatmul.mubr.f32.vlgmr.msra.gmra.mxu1 %v28773_v61 }
0x327d   :  { %34365 = vmatpush3.msra.mxu1 %v34531_v4  ;;  %34372 = vmatprep.mubr.msk.f32.mxu1 %vm34481_vm1, %v34480_v3 }
0x327e   :  { %v28775_v41 = vand.u32 4294901760, %v28774_v45  ;;  %34366 = vmatprep.subr.mxu1 %v34480_v3 }
0x327f   :  { %34367 = vmatpush3.msra.mxu1 %v34533_v5 }
0x3280   :  { %v28776_v62 = vsub.f32 %v28774_v45, %v28775_v41  ;;  %34368 = vmatprep.subr.mxu1 %v34480_v3 }
0x3281   :  { %34369 = vmatpush3.msra.mxu1 %v34535_v6 }
0x3282   :  { %v28777_v52 = vand.u32 4294901760, %v28776_v62  ;;  %34370 = vmatprep.subr.mxu1 %v34480_v3 }
0x3283   :  { %34371 = vmatpush3.msra.mxu1 %v34543_v9 }
0x3284   :  { %34373 = vmatmul.mubr.f32.vlgmr.msra.gmra.mxu1 %v28775_v41  ;;  %34386 = vmatprep.subr.mxu1 %v34480_v3 }
0x3285   :  { %34340 = vmatmul.mubr.f32.vlgmr.msra.gmra.mxu0 %v28777_v52  ;;  %34387 = vmatpush3.msra.mxu1 %v34531_v4 }
0x3286   :  { %34354 = vmatpush3.msra.mxu0 %v34552_v10  ;;  %34388 = vmatprep.subr.mxu1 %v34480_v3 }
0x3287   :  { %34355 = vmatprep.subr.mxu0 %v34480_v3  ;;  %34389 = vmatpush3.msra.mxu1 %v34533_v5 }
0x3288   :  { %34356 = vmatpush3.msra.mxu0 %v34555_v11  ;;  %34390 = vmatprep.subr.mxu1 %v34480_v3 }
0x3289   :  { %34357 = vmatprep.subr.mxu0 %v34480_v3  ;;  %34391 = vmatpush3.msra.mxu1 %v34535_v6 }
0x328a   :  { %34358 = vmatpush3.msra.mxu0 %v34558_v12  ;;  %34392 = vmatprep.subr.mxu1 %v34480_v3  ;;  %v34457_v12 = vld [vmem:[%s38043_s5] ss:$0 sm:$0xff]  ;;  %s34458_s5 = scalar_lea.vmem %s29200_s20, 1024 }
0x328b   :  { %34359 = vmatprep.subr.mxu0 %v34480_v3  ;;  %34361 = vmatprep.mubr.msk.f32.mxu0 %vm34481_vm1, %v34480_v3  ;;  %p34459_p0 = scmp.ne.s32.totalorder %s29200_s20, %s34458_s5  ;;  %p34464_p2 = scmp.lt.s32.totalorder %s34458_s5, %s34458_s5 }
0x328c   :  { %34360 = vmatpush3.msra.mxu0 %v34562_v13  ;;  %34393 = vmatpush3.msra.mxu1 %v34543_v9 }
0x328d   :  { %34394 = vmatprep.mubr.msk.f32.mxu1 %vm34481_vm1, %v34480_v3  ;;  %34362 = vmatmul.mubr.f32.vlgmr.msra.gmra.mxu0 %v28774_v45  ;;  %p34465_p3 = por %p34464_p2, %p34463_p1 }
0x328e   :  { %34375 = vmatprep.subr.mxu0 %v34480_v3  ;;  %34395 = vmatmul.mubr.f32.vlgmr.msra.gmra.mxu1 %v28773_v61 }
0x328f   :  { %34376 = vmatpush3.msra.mxu0 %v34565_v14  ;;  %34383 = vmatprep.mubr.msk.f32.mxu0 %vm34481_vm1, %v34480_v3  ;;  %p34466_p4 = pnand %p34465_p3, %p34459_p0 }
0x3290   :  { %34377 = vmatprep.subr.mxu0 %v34480_v3 }
0x3291   :  { %34378 = vmatpush3.msra.mxu0 %v34569_v15 }
0x3292   :  { %34379 = vmatprep.subr.mxu0 %v34480_v3 }
0x3293   :  { %34380 = vmatpush3.msra.mxu0 %v34572_v16 }
0x3294   :  { %34381 = vmatprep.subr.mxu0 %v34480_v3 }
0x3295   :  { %34382 = vmatpush3.msra.mxu0 %v34576_v17 }
0x3296   :  { %34384 = vmatmul.mubr.f32.vlgmr.msra.gmra.mxu0 %v28773_v61 }
0x333c   :  { %v28870_v4 = vpop.f32.mrf.mxu1 }
0x333e   :  { %v34352_v5 = vpop.f32.mrf.mxu1 }
0x3344   :  { %v29027_v6 = vpop.f32.mrf.mxu1 }
0x3345   :  { %v28779_v9 = vpop.f32.mrf.mxu0 }
0x3346   :  { %v34374_v10 = vpop.f32.mrf.mxu1  ;;  %v28780_v13 = vadd.f32 %v34457_v12, %v28779_v9 }
0x3347   :  { %v34341_v11 = vpop.f32.mrf.mxu0 }
0x3348   :  { %v28871_v0 = vadd.f32 %v28870_v4, %v28780_v13 }
0x334d   :  { %v28950_v14 = vpop.f32.mrf.mxu0 }
0x334e   :  { %v29185_v15 = vpop.f32.mrf.mxu1  ;;  %v28951_v3 = vadd.f32 %v28950_v14, %v28871_v0 }
0x334f   :  { %v34363_v16 = vpop.f32.mrf.mxu0 }
0x3350   :  { %v34396_v25 = vpop.f32.mrf.mxu1  ;;  %v29028_v50 = vadd.f32 %v29027_v6, %v28951_v3 }
0x3356   :  { %v29110_v17 = vpop.f32.mrf.mxu0 }
0x3357   :  { %v29111_v51 = vadd.f32 %v29110_v17, %v29028_v50 }
0x3358   :  { %v34385_v1 = vpop.f32.mrf.mxu0 }
0x3359   :  { %v29186_v7 = vadd.f32 %v29185_v15, %v29111_v51 }
0x335b   :  { %34448 = vtanh.f32 %v29186_v7 }
0x3368   :  { %v34449_v8 = vpop.eup %34448 }
0x3369   :  { %v29190_v19 = vadd.f32 %v34449_v8, %v29298_v29 }
0x336b   :  { %29192 = vst.msk [vmem:[#allocation3 + $0x38] sm:$0xff] %vm29_vm0, %v29190_v19  ;;  %29193 = vst.msk [vmem:[#allocation2] sm:$0xff] %vm29_vm0, %v29190_v19 }
0x336c   :  { %34469 = shalt.err (!%p34466_p4)
}
0x336d   :  { %s34483_s23 = smov 128   ;;  %s34484_s24 = smov 8  }
0x336e   :  { %29205 = dma.vmem_to_hbm [thread:$0]  %s29200_s20, 1024, %s38044_s6, [#allocation4], %s34483_s23, %s34483_s23, %s34484_s24  }
0x336f   :  { %34478 = dma.done.wait [#allocation4], 1024  }
0x3370   :  { %34479 = vsyncadd [#allocation4], 4294966272 }
0x3371   :  { %29209 = vsyncpa [#allocation4], 1 }

</bundles_post_ra>
